<compile_context>
chip_gen: v5e
topology: v5e:2x2
jax: 0.10.0
libtpu: 0.0.40
codegen_flags: <defaults>
</compile_context>

<pallas_src>
import functools

import jax
import jax.numpy as jnp
from jax import lax
from jax.experimental import pallas as pl
from jax.experimental.pallas import tpu as pltpu

VMEM = pltpu.MemorySpace.VMEM
BF16 = jnp.bfloat16


# ----------------------------- fused kernel --------------------------------

def fused_cnn_kernel(patch_ref, w1_ref, b1_ref, w2_ref, b2_ref,
                     wf1_ref, bf1_ref, wf2_ref, bf2_ref, out_ref,
                     acc1_scr, p1_scr, o2_scr, hv_scr, *, bb):
    n1 = bb * 144                  # pooled-conv1 rows: row = b*144 + Y*12 + X
    n2 = (bb - 1) * 144 + 92       # conv2-output row span (valid rows inside)
    nh = (bb - 1) * 144 + 79       # pooled-conv2 candidate rows (valid at 24Y+2X)

    # ---- conv1: 4 pooling-phase GEMMs fused with the 2x2 max-pool -----------
    # Host ordered the patch rows as 4 pooling-phase slabs, so pooling is an
    # elementwise max of 4 GEMM outputs; result is row-flat (pitch 12/144).
    acc1_scr[...] = jnp.dot(patch_ref[0:n1, :], w1_ref[...],
                            preferred_element_type=jnp.float32)
    for ph in range(1, 4):
        acc1_scr[...] = jnp.maximum(
            acc1_scr[...],
            jnp.dot(patch_ref[ph * n1:(ph + 1) * n1, :], w1_ref[...],
                    preferred_element_type=jnp.float32))
    # bias + ReLU (max commutes with the per-channel bias); lanes >= 10 stay 0.
    p1_scr[...] = jnp.maximum(acc1_scr[...] + b1_ref[...], 0.0)

    # ---- conv2: 25 shifted-slab GEMMs accumulated in VMEM (no im2col buffer) -
    o2_scr[...] = b2_ref[...] + jnp.dot(
        p1_scr[0:n2, :].astype(BF16), w2_ref[0],
        preferred_element_type=jnp.float32)
    for blk in range(1, 25):
        i, j = divmod(blk, 5)
        sh = i * 12 + j
        o2_scr[...] += jnp.dot(p1_scr[sh:sh + n2, :].astype(BF16), w2_ref[blk],
                               preferred_element_type=jnp.float32)

    # ---- 2x2 max-pool + ReLU on conv2 output: 4 shifted-slab maxes ----------
    pool2 = jnp.maximum(
        jnp.maximum(o2_scr[0:nh, :], o2_scr[1:1 + nh, :]),
        jnp.maximum(o2_scr[12:12 + nh, :], o2_scr[13:13 + nh, :]))
    hv_scr[...] = jnp.maximum(pool2, 0.0)          # valid rows at b*144+24Y+2X

    # ---- fc1: bias-initialized accumulator + 16 per-spatial-tap bf16 GEMMs ---
    acc = jnp.broadcast_to(bf1_ref[...], (bb, 128))
    for s in range(16):
        Y, X = divmod(s, 4)
        dr = 24 * Y + 2 * X
        rows = [hv_scr[b * 144 + dr: b * 144 + dr + 1, :] for b in range(bb)]
        act = rows[0] if bb == 1 else jnp.concatenate(rows, axis=0)   # (bb,128)
        acc = acc + jnp.dot(act.astype(BF16), wf1_ref[s],
                            preferred_element_type=jnp.float32)

    # ---- fc1 ReLU, fc2, masked log_softmax (lanes >= 10 are padding) ---------
    h = jnp.maximum(acc, 0.0)
    logits = jnp.dot(h.astype(BF16), wf2_ref[...],
                     preferred_element_type=jnp.float32) + bf2_ref[...]
    lane = lax.broadcasted_iota(jnp.int32, logits.shape, 1)
    masked = jnp.where(lane < 10, logits, -1e30)
    mx = jnp.max(masked, axis=-1, keepdims=True)
    lse = mx + jnp.log(jnp.sum(jnp.exp(masked - mx), axis=-1, keepdims=True))
    out_ref[...] = logits - lse                    # lane-dense (bb,128) store


def _fused_call(bb, nb):
    n1 = bb * 144
    n2 = (bb - 1) * 144 + 92
    nh = (bb - 1) * 144 + 79
    flops = nb * (4 * 2 * n1 * 32 * 128 + 25 * 2 * n2 * 128 * 128
                  + 16 * 2 * bb * 128 * 128 + 2 * bb * 128 * 128)
    bytes_accessed = (nb * bb * 576 * 32 * 2 + nb * bb * 128 * 4
                      + (32 * 128 + 25 * 128 * 128 + 16 * 128 * 128
                         + 128 * 128) * 2 + 4 * 128 * 4)
    return pl.pallas_call(
        functools.partial(fused_cnn_kernel, bb=bb),
        out_shape=jax.ShapeDtypeStruct((nb * bb, 128), jnp.float32),
        grid=(nb,),
        in_specs=[
            pl.BlockSpec((bb * 576, 32), lambda i: (i, 0)),      # conv1 patches
            pl.BlockSpec((32, 128), lambda i: (0, 0)),           # w1
            pl.BlockSpec((1, 128), lambda i: (0, 0)),            # b1
            pl.BlockSpec((25, 128, 128), lambda i: (0, 0, 0)),   # w2 per tap
            pl.BlockSpec((1, 128), lambda i: (0, 0)),            # b2
            pl.BlockSpec((16, 128, 128), lambda i: (0, 0, 0)),   # fc1 per tap
            pl.BlockSpec((1, 128), lambda i: (0, 0)),            # bf1
            pl.BlockSpec((128, 128), lambda i: (0, 0)),          # fc2
            pl.BlockSpec((1, 128), lambda i: (0, 0)),            # bf2
        ],
        out_specs=pl.BlockSpec((bb, 128), lambda i: (i, 0)),
        scratch_shapes=[
            pltpu.VMEM((n1, 128), jnp.float32),    # conv1 pool accumulator
            pltpu.VMEM((n1, 128), jnp.float32),    # pooled conv1 (row-flat)
            pltpu.VMEM((n2, 128), jnp.float32),    # conv2 accumulator
            pltpu.VMEM((nh, 128), jnp.float32),    # pooled conv2 candidates
        ],
        compiler_params=pltpu.CompilerParams(
            dimension_semantics=("parallel",)),
        cost_estimate=pl.CostEstimate(flops=flops,
                                      transcendentals=nb * bb * 130,
                                      bytes_accessed=bytes_accessed),
    )


# -------------------- host-side glue (tiny, runs once / per step) ----------

def prepare_params(p):
    """One-time repack of PyTorch-layout params into padded bf16 kernel layout."""
    f32 = jnp.float32
    w1p = (jnp.zeros((32, 128), f32)
           .at[:25, :10].set(p['w1'].reshape(10, 25).T).astype(BF16))
    b1p = jnp.zeros((1, 128), f32).at[0, :10].set(p['b1'])

    w2r = jnp.transpose(p['w2'], (2, 3, 1, 0)).reshape(25, 10, 20)  # [tap,c,o]
    w2p = jnp.zeros((25, 128, 128), f32).at[:, :10, :20].set(w2r).astype(BF16)
    b2p = jnp.zeros((1, 128), f32).at[0, :20].set(p['b2'])

    # fc1: PyTorch flattens NCHW (c*16 + s); fold that permutation into 16
    # per-spatial-tap (channel, out) blocks consumed directly by the kernel.
    wf1r = jnp.transpose(p['wf1'].reshape(50, 20, 16), (2, 1, 0))   # [s,c,n]
    wf1p = jnp.zeros((16, 128, 128), f32).at[:, :20, :50].set(wf1r).astype(BF16)
    bf1p = jnp.zeros((1, 128), f32).at[0, :50].set(p['bf1'])

    wf2p = jnp.zeros((128, 128), f32).at[:50, :10].set(p['wf2'].T).astype(BF16)
    bf2p = jnp.zeros((1, 128), f32).at[0, :10].set(p['bf2'])
    return dict(w1p=w1p, b1p=b1p, w2p=w2p, b2p=b2p,
                wf1p=wf1p, bf1p=bf1p, wf2p=wf2p, bf2p=bf2p)


def simple_cnn_forward(x_nchw, kp, block_batch=8):
    """Forward pass; x_nchw is (B, 1, 28, 28), kp = prepare_params(params)."""
    B, Cin, H, W = x_nchw.shape
    assert (Cin, H, W) == (1, 28, 28)
    bb = B if B <= block_batch else block_batch
    Bp = ((B + bb - 1) // bb) * bb
    nb = Bp // bb
    x2d = x_nchw[:, 0]
    if Bp != B:
        x2d = jnp.pad(x2d, ((0, Bp - B), (0, 0), (0, 0)))

    # conv1 im2col (Cin=1, tiny), reordered into 4 pooling-phase slabs per
    # batch block so the in-kernel 2x2 pool is a max of 4 GEMM outputs:
    # row = g*(bb*576) + (2*dy+dx)*(bb*144) + l*144 + Y*12 + X
    cols = [x2d[:, i:i + 24, j:j + 24] for i in range(5) for j in range(5)]
    patches = jnp.stack(cols, axis=-1)                         # (Bp,24,24,25)
    patches = patches.reshape(nb, bb, 12, 2, 12, 2, 25)
    patches = jnp.transpose(patches, (0, 3, 5, 1, 2, 4, 6))    # (g,dy,dx,l,Y,X,t)
    patches = patches.reshape(Bp * 576, 25)
    patches = jnp.pad(patches, ((0, 0), (0, 7))).astype(BF16)  # K 25 -> 32, bf16

    out = _fused_call(bb, nb)(patches, kp['w1p'], kp['b1p'], kp['w2p'],
                              kp['b2p'], kp['wf1p'], kp['bf1p'],
                              kp['wf2p'], kp['bf2p'])
    return out[:B, :10]


# ------------------------- params & reference ------------------------------

def init_params(key):
    ks = jax.random.split(key, 8)

    def u(k, shape, fan_in):
        bound = 1.0 / jnp.sqrt(jnp.float32(fan_in))
        return jax.random.uniform(k, shape, jnp.float32, -bound, bound)

    return dict(
        w1=u(ks[0], (10, 1, 5, 5), 25),   b1=u(ks[1], (10,), 25),
        w2=u(ks[2], (20, 10, 5, 5), 250), b2=u(ks[3], (20,), 250),
        wf1=u(ks[4], (50, 320), 320),     bf1=u(ks[5], (50,), 320),
        wf2=u(ks[6], (10, 50), 50),       bf2=u(ks[7], (10,), 50),
    )


def reference_forward(x, p):
    """Pure-JAX reference mirroring the PyTorch forward."""
    def conv(x, w, b):
        y = lax.conv_general_dilated(
            x, w, (1, 1), 'VALID', dimension_numbers=('NCHW', 'OIHW', 'NCHW'))
        return y + b.reshape(1, -1, 1, 1)

    def pool(x):
        return lax.reduce_window(x, -jnp.inf, lax.max,
                                 (1, 1, 2, 2), (1, 1, 2, 2), 'VALID')

    x = jax.nn.relu(pool(conv(x, p['w1'], p['b1'])))
    x = jax.nn.relu(pool(conv(x, p['w2'], p['b2'])))
    x = x.reshape(x.shape[0], -1)
    x = jax.nn.relu(x @ p['wf1'].T + p['bf1'])
    x = x @ p['wf2'].T + p['bf2']
    return jax.nn.log_softmax(x, axis=1)


if __name__ == "__main__":
    key = jax.random.PRNGKey(0)
    pkey, xkey = jax.random.split(key)
    params = init_params(pkey)
    kparams = prepare_params(params)            # one-time weight repack (bf16)
    # MNIST-like input implied by fc1 in_features=320: (B, 1, 28, 28)
    x = jax.random.normal(xkey, (2, 1, 28, 28), jnp.float32)

    out = jax.jit(simple_cnn_forward)(x, kparams)
    out = jax.block_until_ready(out)

    ref = reference_forward(x, params)
    assert out.shape == (2, 10), out.shape
    err = float(jnp.max(jnp.abs(out - ref)))
    assert jnp.allclose(out, ref, atol=2e-2, rtol=2e-2), (
        f"mismatch vs pure-JAX reference (max abs err {err})")
    print("KERNEL_OK")
</pallas_src>

<mosaic_0001>
module attributes {stable_mosaic.version = 11 : i64} {
  func.func @fused_cnn_kernel(%arg0: i32, %arg1: memref<1152x32xbf16, #tpu.memory_space<vmem>>, %arg2: memref<32x128xbf16, #tpu.memory_space<vmem>>, %arg3: memref<1x128xf32, #tpu.memory_space<vmem>>, %arg4: memref<25x128x128xbf16, #tpu.memory_space<vmem>>, %arg5: memref<1x128xf32, #tpu.memory_space<vmem>>, %arg6: memref<16x128x128xbf16, #tpu.memory_space<vmem>>, %arg7: memref<1x128xf32, #tpu.memory_space<vmem>>, %arg8: memref<128x128xbf16, #tpu.memory_space<vmem>>, %arg9: memref<1x128xf32, #tpu.memory_space<vmem>>, %arg10: memref<2x128xf32, #tpu.memory_space<vmem>>, %arg11: memref<288x128xf32, #tpu.memory_space<vmem>>, %arg12: memref<288x128xf32, #tpu.memory_space<vmem>>, %arg13: memref<236x128xf32, #tpu.memory_space<vmem>>, %arg14: memref<223x128xf32, #tpu.memory_space<vmem>>) attributes {dimension_semantics = [#tpu.dimension_semantics<parallel>], iteration_bounds = array<i64: 1>, scalar_prefetch = 0 : i64, scratch_operands = 4 : i64, tpu.core_type = #tpu.core_type<tc>, window_params = [{transform_indices = @transform_0, window_bounds = array<i64: 1152, 32>}, {pipeline_mode = #tpu.pipeline_mode<synchronous>, transform_indices = @transform_1, window_bounds = array<i64: 32, 128>}, {pipeline_mode = #tpu.pipeline_mode<synchronous>, transform_indices = @transform_2, window_bounds = array<i64: 1, 128>}, {pipeline_mode = #tpu.pipeline_mode<synchronous>, transform_indices = @transform_3, window_bounds = array<i64: 25, 128, 128>}, {pipeline_mode = #tpu.pipeline_mode<synchronous>, transform_indices = @transform_4, window_bounds = array<i64: 1, 128>}, {pipeline_mode = #tpu.pipeline_mode<synchronous>, transform_indices = @transform_5, window_bounds = array<i64: 16, 128, 128>}, {pipeline_mode = #tpu.pipeline_mode<synchronous>, transform_indices = @transform_6, window_bounds = array<i64: 1, 128>}, {pipeline_mode = #tpu.pipeline_mode<synchronous>, transform_indices = @transform_7, window_bounds = array<i64: 128, 128>}, {pipeline_mode = #tpu.pipeline_mode<synchronous>, transform_indices = @transform_8, window_bounds = array<i64: 1, 128>}, {transform_indices = @transform_9, window_bounds = array<i64: 2, 128>}]} {
    %c0 = arith.constant 0 : index
    %c0_0 = arith.constant 0 : index
    %0 = vector.load %arg1[%c0, %c0_0] : memref<1152x32xbf16, #tpu.memory_space<vmem>>, vector<288x32xbf16>
    %c0_1 = arith.constant 0 : index
    %c0_2 = arith.constant 0 : index
    %1 = vector.load %arg2[%c0_1, %c0_2] : memref<32x128xbf16, #tpu.memory_space<vmem>>, vector<32x128xbf16>
    %cst = arith.constant dense<0.000000e+00> : vector<288x128xf32>
    %2 = tpu.matmul %0, %1, %cst {dimension_numbers = #tpu.dot_dimension_numbers<[1], [0], [0], [1], [0, 0, 1, 1], [], []>} : vector<288x32xbf16>, vector<32x128xbf16>, vector<288x128xf32> -> vector<288x128xf32>
    %c0_3 = arith.constant 0 : index
    %c0_4 = arith.constant 0 : index
    %3 = vector.load %arg11[%c0_3, %c0_4] : memref<288x128xf32, #tpu.memory_space<vmem>>, vector<288x128xf32>
    tpu.vector_store %arg11[%c0_3, %c0_4], %2 {strides = array<i32>} : memref<288x128xf32, #tpu.memory_space<vmem>>, vector<288x128xf32>,
    %c0_5 = arith.constant 0 : index
    %c0_6 = arith.constant 0 : index
    %4 = vector.load %arg11[%c0_5, %c0_6] : memref<288x128xf32, #tpu.memory_space<vmem>>, vector<288x128xf32>
    %c288 = arith.constant 288 : index
    %c0_7 = arith.constant 0 : index
    %5 = vector.load %arg1[%c288, %c0_7] : memref<1152x32xbf16, #tpu.memory_space<vmem>>, vector<288x32xbf16>
    %c0_8 = arith.constant 0 : index
    %c0_9 = arith.constant 0 : index
    %6 = vector.load %arg2[%c0_8, %c0_9] : memref<32x128xbf16, #tpu.memory_space<vmem>>, vector<32x128xbf16>
    %cst_10 = arith.constant dense<0.000000e+00> : vector<288x128xf32>
    %7 = tpu.matmul %5, %6, %cst_10 {dimension_numbers = #tpu.dot_dimension_numbers<[1], [0], [0], [1], [0, 0, 1, 1], [], []>} : vector<288x32xbf16>, vector<32x128xbf16>, vector<288x128xf32> -> vector<288x128xf32>
    %8 = arith.maximumf %4, %7 : vector<288x128xf32>
    %c0_11 = arith.constant 0 : index
    %c0_12 = arith.constant 0 : index
    %9 = vector.load %arg11[%c0_11, %c0_12] : memref<288x128xf32, #tpu.memory_space<vmem>>, vector<288x128xf32>
    tpu.vector_store %arg11[%c0_11, %c0_12], %8 {strides = array<i32>} : memref<288x128xf32, #tpu.memory_space<vmem>>, vector<288x128xf32>,
    %c0_13 = arith.constant 0 : index
    %c0_14 = arith.constant 0 : index
    %10 = vector.load %arg11[%c0_13, %c0_14] : memref<288x128xf32, #tpu.memory_space<vmem>>, vector<288x128xf32>
    %c576 = arith.constant 576 : index
    %c0_15 = arith.constant 0 : index
    %11 = vector.load %arg1[%c576, %c0_15] : memref<1152x32xbf16, #tpu.memory_space<vmem>>, vector<288x32xbf16>
    %c0_16 = arith.constant 0 : index
    %c0_17 = arith.constant 0 : index
    %12 = vector.load %arg2[%c0_16, %c0_17] : memref<32x128xbf16, #tpu.memory_space<vmem>>, vector<32x128xbf16>
    %cst_18 = arith.constant dense<0.000000e+00> : vector<288x128xf32>
    %13 = tpu.matmul %11, %12, %cst_18 {dimension_numbers = #tpu.dot_dimension_numbers<[1], [0], [0], [1], [0, 0, 1, 1], [], []>} : vector<288x32xbf16>, vector<32x128xbf16>, vector<288x128xf32> -> vector<288x128xf32>
    %14 = arith.maximumf %10, %13 : vector<288x128xf32>
    %c0_19 = arith.constant 0 : index
    %c0_20 = arith.constant 0 : index
    %15 = vector.load %arg11[%c0_19, %c0_20] : memref<288x128xf32, #tpu.memory_space<vmem>>, vector<288x128xf32>
    tpu.vector_store %arg11[%c0_19, %c0_20], %14 {strides = array<i32>} : memref<288x128xf32, #tpu.memory_space<vmem>>, vector<288x128xf32>,
    %c0_21 = arith.constant 0 : index
    %c0_22 = arith.constant 0 : index
    %16 = vector.load %arg11[%c0_21, %c0_22] : memref<288x128xf32, #tpu.memory_space<vmem>>, vector<288x128xf32>
    %c864 = arith.constant 864 : index
    %c0_23 = arith.constant 0 : index
    %17 = vector.load %arg1[%c864, %c0_23] : memref<1152x32xbf16, #tpu.memory_space<vmem>>, vector<288x32xbf16>
    %c0_24 = arith.constant 0 : index
    %c0_25 = arith.constant 0 : index
    %18 = vector.load %arg2[%c0_24, %c0_25] : memref<32x128xbf16, #tpu.memory_space<vmem>>, vector<32x128xbf16>
    %cst_26 = arith.constant dense<0.000000e+00> : vector<288x128xf32>
    %19 = tpu.matmul %17, %18, %cst_26 {dimension_numbers = #tpu.dot_dimension_numbers<[1], [0], [0], [1], [0, 0, 1, 1], [], []>} : vector<288x32xbf16>, vector<32x128xbf16>, vector<288x128xf32> -> vector<288x128xf32>
    %20 = arith.maximumf %16, %19 : vector<288x128xf32>
    %c0_27 = arith.constant 0 : index
    %c0_28 = arith.constant 0 : index
    %21 = vector.load %arg11[%c0_27, %c0_28] : memref<288x128xf32, #tpu.memory_space<vmem>>, vector<288x128xf32>
    tpu.vector_store %arg11[%c0_27, %c0_28], %20 {strides = array<i32>} : memref<288x128xf32, #tpu.memory_space<vmem>>, vector<288x128xf32>,
    %c0_29 = arith.constant 0 : index
    %c0_30 = arith.constant 0 : index
    %22 = vector.load %arg11[%c0_29, %c0_30] : memref<288x128xf32, #tpu.memory_space<vmem>>, vector<288x128xf32>
    %c0_31 = arith.constant 0 : index
    %c0_32 = arith.constant 0 : index
    %23 = vector.load %arg3[%c0_31, %c0_32] : memref<1x128xf32, #tpu.memory_space<vmem>>, vector<1x128xf32>
    %24 = vector.broadcast %23 : vector<1x128xf32> to vector<288x128xf32>
    %25 = arith.addf %22, %24 : vector<288x128xf32>
    %cst_33 = arith.constant 0.000000e+00 : f32
    %26 = vector.broadcast %cst_33 : f32 to vector<288x128xf32>
    %27 = arith.maximumf %25, %26 : vector<288x128xf32>
    %c0_34 = arith.constant 0 : index
    %c0_35 = arith.constant 0 : index
    %28 = vector.load %arg12[%c0_34, %c0_35] : memref<288x128xf32, #tpu.memory_space<vmem>>, vector<288x128xf32>
    tpu.vector_store %arg12[%c0_34, %c0_35], %27 {strides = array<i32>} : memref<288x128xf32, #tpu.memory_space<vmem>>, vector<288x128xf32>,
    %c0_36 = arith.constant 0 : index
    %c0_37 = arith.constant 0 : index
    %29 = vector.load %arg5[%c0_36, %c0_37] : memref<1x128xf32, #tpu.memory_space<vmem>>, vector<1x128xf32>
    %c0_38 = arith.constant 0 : index
    %c0_39 = arith.constant 0 : index
    %30 = vector.load %arg12[%c0_38, %c0_39] : memref<288x128xf32, #tpu.memory_space<vmem>>, vector<236x128xf32>
    %31 = arith.truncf %30 : vector<236x128xf32> to vector<236x128xbf16>
    %c0_40 = arith.constant 0 : index
    %c0_41 = arith.constant 0 : index
    %c0_42 = arith.constant 0 : index
    %32 = vector.load %arg4[%c0_40, %c0_41, %c0_42] : memref<25x128x128xbf16, #tpu.memory_space<vmem>>, vector<1x128x128xbf16>
    %33 = vector.shape_cast %32 : vector<1x128x128xbf16> to vector<128x128xbf16>
    %cst_43 = arith.constant dense<0.000000e+00> : vector<236x128xf32>
    %34 = tpu.matmul %31, %33, %cst_43 {dimension_numbers = #tpu.dot_dimension_numbers<[1], [0], [0], [1], [0, 0, 1, 1], [], []>} : vector<236x128xbf16>, vector<128x128xbf16>, vector<236x128xf32> -> vector<236x128xf32>
    %35 = vector.broadcast %29 : vector<1x128xf32> to vector<236x128xf32>
    %36 = arith.addf %35, %34 : vector<236x128xf32>
    %c0_44 = arith.constant 0 : index
    %c0_45 = arith.constant 0 : index
    %37 = vector.load %arg13[%c0_44, %c0_45] : memref<236x128xf32, #tpu.memory_space<vmem>>, vector<236x128xf32>
    tpu.vector_store %arg13[%c0_44, %c0_45], %36 {strides = array<i32>} : memref<236x128xf32, #tpu.memory_space<vmem>>, vector<236x128xf32>,
    %c0_46 = arith.constant 0 : index
    %c0_47 = arith.constant 0 : index
    %38 = vector.load %arg13[%c0_46, %c0_47] : memref<236x128xf32, #tpu.memory_space<vmem>>, vector<236x128xf32>
    %c1 = arith.constant 1 : index
    %c0_48 = arith.constant 0 : index
    %39 = vector.load %arg12[%c1, %c0_48] : memref<288x128xf32, #tpu.memory_space<vmem>>, vector<236x128xf32>
    %40 = arith.truncf %39 : vector<236x128xf32> to vector<236x128xbf16>
    %c1_49 = arith.constant 1 : index
    %c0_50 = arith.constant 0 : index
    %c0_51 = arith.constant 0 : index
    %41 = vector.load %arg4[%c1_49, %c0_50, %c0_51] : memref<25x128x128xbf16, #tpu.memory_space<vmem>>, vector<1x128x128xbf16>
    %42 = vector.shape_cast %41 : vector<1x128x128xbf16> to vector<128x128xbf16>
    %cst_52 = arith.constant dense<0.000000e+00> : vector<236x128xf32>
    %43 = tpu.matmul %40, %42, %cst_52 {dimension_numbers = #tpu.dot_dimension_numbers<[1], [0], [0], [1], [0, 0, 1, 1], [], []>} : vector<236x128xbf16>, vector<128x128xbf16>, vector<236x128xf32> -> vector<236x128xf32>
    %44 = arith.addf %38, %43 : vector<236x128xf32>
    %c0_53 = arith.constant 0 : index
    %c0_54 = arith.constant 0 : index
    %45 = vector.load %arg13[%c0_53, %c0_54] : memref<236x128xf32, #tpu.memory_space<vmem>>, vector<236x128xf32>
    tpu.vector_store %arg13[%c0_53, %c0_54], %44 {strides = array<i32>} : memref<236x128xf32, #tpu.memory_space<vmem>>, vector<236x128xf32>,
    %c0_55 = arith.constant 0 : index
    %c0_56 = arith.constant 0 : index
    %46 = vector.load %arg13[%c0_55, %c0_56] : memref<236x128xf32, #tpu.memory_space<vmem>>, vector<236x128xf32>
    %c2 = arith.constant 2 : index
    %c0_57 = arith.constant 0 : index
    %47 = vector.load %arg12[%c2, %c0_57] : memref<288x128xf32, #tpu.memory_space<vmem>>, vector<236x128xf32>
    %48 = arith.truncf %47 : vector<236x128xf32> to vector<236x128xbf16>
    %c2_58 = arith.constant 2 : index
    %c0_59 = arith.constant 0 : index
    %c0_60 = arith.constant 0 : index
    %49 = vector.load %arg4[%c2_58, %c0_59, %c0_60] : memref<25x128x128xbf16, #tpu.memory_space<vmem>>, vector<1x128x128xbf16>
    %50 = vector.shape_cast %49 : vector<1x128x128xbf16> to vector<128x128xbf16>
    %cst_61 = arith.constant dense<0.000000e+00> : vector<236x128xf32>
    %51 = tpu.matmul %48, %50, %cst_61 {dimension_numbers = #tpu.dot_dimension_numbers<[1], [0], [0], [1], [0, 0, 1, 1], [], []>} : vector<236x128xbf16>, vector<128x128xbf16>, vector<236x128xf32> -> vector<236x128xf32>
    %52 = arith.addf %46, %51 : vector<236x128xf32>
    %c0_62 = arith.constant 0 : index
    %c0_63 = arith.constant 0 : index
    %53 = vector.load %arg13[%c0_62, %c0_63] : memref<236x128xf32, #tpu.memory_space<vmem>>, vector<236x128xf32>
    tpu.vector_store %arg13[%c0_62, %c0_63], %52 {strides = array<i32>} : memref<236x128xf32, #tpu.memory_space<vmem>>, vector<236x128xf32>,
    %c0_64 = arith.constant 0 : index
    %c0_65 = arith.constant 0 : index
    %54 = vector.load %arg13[%c0_64, %c0_65] : memref<236x128xf32, #tpu.memory_space<vmem>>, vector<236x128xf32>
    %c3 = arith.constant 3 : index
    %c0_66 = arith.constant 0 : index
    %55 = vector.load %arg12[%c3, %c0_66] : memref<288x128xf32, #tpu.memory_space<vmem>>, vector<236x128xf32>
    %56 = arith.truncf %55 : vector<236x128xf32> to vector<236x128xbf16>
    %c3_67 = arith.constant 3 : index
    %c0_68 = arith.constant 0 : index
    %c0_69 = arith.constant 0 : index
    %57 = vector.load %arg4[%c3_67, %c0_68, %c0_69] : memref<25x128x128xbf16, #tpu.memory_space<vmem>>, vector<1x128x128xbf16>
    %58 = vector.shape_cast %57 : vector<1x128x128xbf16> to vector<128x128xbf16>
    %cst_70 = arith.constant dense<0.000000e+00> : vector<236x128xf32>
    %59 = tpu.matmul %56, %58, %cst_70 {dimension_numbers = #tpu.dot_dimension_numbers<[1], [0], [0], [1], [0, 0, 1, 1], [], []>} : vector<236x128xbf16>, vector<128x128xbf16>, vector<236x128xf32> -> vector<236x128xf32>
    %60 = arith.addf %54, %59 : vector<236x128xf32>
    %c0_71 = arith.constant 0 : index
    %c0_72 = arith.constant 0 : index
    %61 = vector.load %arg13[%c0_71, %c0_72] : memref<236x128xf32, #tpu.memory_space<vmem>>, vector<236x128xf32>
    tpu.vector_store %arg13[%c0_71, %c0_72], %60 {strides = array<i32>} : memref<236x128xf32, #tpu.memory_space<vmem>>, vector<236x128xf32>,
    %c0_73 = arith.constant 0 : index
    %c0_74 = arith.constant 0 : index
    %62 = vector.load %arg13[%c0_73, %c0_74] : memref<236x128xf32, #tpu.memory_space<vmem>>, vector<236x128xf32>
    %c4 = arith.constant 4 : index
    %c0_75 = arith.constant 0 : index
    %63 = vector.load %arg12[%c4, %c0_75] : memref<288x128xf32, #tpu.memory_space<vmem>>, vector<236x128xf32>
    %64 = arith.truncf %63 : vector<236x128xf32> to vector<236x128xbf16>
    %c4_76 = arith.constant 4 : index
    %c0_77 = arith.constant 0 : index
    %c0_78 = arith.constant 0 : index
    %65 = vector.load %arg4[%c4_76, %c0_77, %c0_78] : memref<25x128x128xbf16, #tpu.memory_space<vmem>>, vector<1x128x128xbf16>
    %66 = vector.shape_cast %65 : vector<1x128x128xbf16> to vector<128x128xbf16>
    %cst_79 = arith.constant dense<0.000000e+00> : vector<236x128xf32>
    %67 = tpu.matmul %64, %66, %cst_79 {dimension_numbers = #tpu.dot_dimension_numbers<[1], [0], [0], [1], [0, 0, 1, 1], [], []>} : vector<236x128xbf16>, vector<128x128xbf16>, vector<236x128xf32> -> vector<236x128xf32>
    %68 = arith.addf %62, %67 : vector<236x128xf32>
    %c0_80 = arith.constant 0 : index
    %c0_81 = arith.constant 0 : index
    %69 = vector.load %arg13[%c0_80, %c0_81] : memref<236x128xf32, #tpu.memory_space<vmem>>, vector<236x128xf32>
    tpu.vector_store %arg13[%c0_80, %c0_81], %68 {strides = array<i32>} : memref<236x128xf32, #tpu.memory_space<vmem>>, vector<236x128xf32>,
    %c0_82 = arith.constant 0 : index
    %c0_83 = arith.constant 0 : index
    %70 = vector.load %arg13[%c0_82, %c0_83] : memref<236x128xf32, #tpu.memory_space<vmem>>, vector<236x128xf32>
    %c12 = arith.constant 12 : index
    %c0_84 = arith.constant 0 : index
    %71 = vector.load %arg12[%c12, %c0_84] : memref<288x128xf32, #tpu.memory_space<vmem>>, vector<236x128xf32>
    %72 = arith.truncf %71 : vector<236x128xf32> to vector<236x128xbf16>
    %c5 = arith.constant 5 : index
    %c0_85 = arith.constant 0 : index
    %c0_86 = arith.constant 0 : index
    %73 = vector.load %arg4[%c5, %c0_85, %c0_86] : memref<25x128x128xbf16, #tpu.memory_space<vmem>>, vector<1x128x128xbf16>
    %74 = vector.shape_cast %73 : vector<1x128x128xbf16> to vector<128x128xbf16>
    %cst_87 = arith.constant dense<0.000000e+00> : vector<236x128xf32>
    %75 = tpu.matmul %72, %74, %cst_87 {dimension_numbers = #tpu.dot_dimension_numbers<[1], [0], [0], [1], [0, 0, 1, 1], [], []>} : vector<236x128xbf16>, vector<128x128xbf16>, vector<236x128xf32> -> vector<236x128xf32>
    %76 = arith.addf %70, %75 : vector<236x128xf32>
    %c0_88 = arith.constant 0 : index
    %c0_89 = arith.constant 0 : index
    %77 = vector.load %arg13[%c0_88, %c0_89] : memref<236x128xf32, #tpu.memory_space<vmem>>, vector<236x128xf32>
    tpu.vector_store %arg13[%c0_88, %c0_89], %76 {strides = array<i32>} : memref<236x128xf32, #tpu.memory_space<vmem>>, vector<236x128xf32>,
    %c0_90 = arith.constant 0 : index
    %c0_91 = arith.constant 0 : index
    %78 = vector.load %arg13[%c0_90, %c0_91] : memref<236x128xf32, #tpu.memory_space<vmem>>, vector<236x128xf32>
    %c13 = arith.constant 13 : index
    %c0_92 = arith.constant 0 : index
    %79 = vector.load %arg12[%c13, %c0_92] : memref<288x128xf32, #tpu.memory_space<vmem>>, vector<236x128xf32>
    %80 = arith.truncf %79 : vector<236x128xf32> to vector<236x128xbf16>
    %c6 = arith.constant 6 : index
    %c0_93 = arith.constant 0 : index
    %c0_94 = arith.constant 0 : index
    %81 = vector.load %arg4[%c6, %c0_93, %c0_94] : memref<25x128x128xbf16, #tpu.memory_space<vmem>>, vector<1x128x128xbf16>
    %82 = vector.shape_cast %81 : vector<1x128x128xbf16> to vector<128x128xbf16>
    %cst_95 = arith.constant dense<0.000000e+00> : vector<236x128xf32>
    %83 = tpu.matmul %80, %82, %cst_95 {dimension_numbers = #tpu.dot_dimension_numbers<[1], [0], [0], [1], [0, 0, 1, 1], [], []>} : vector<236x128xbf16>, vector<128x128xbf16>, vector<236x128xf32> -> vector<236x128xf32>
    %84 = arith.addf %78, %83 : vector<236x128xf32>
    %c0_96 = arith.constant 0 : index
    %c0_97 = arith.constant 0 : index
    %85 = vector.load %arg13[%c0_96, %c0_97] : memref<236x128xf32, #tpu.memory_space<vmem>>, vector<236x128xf32>
    tpu.vector_store %arg13[%c0_96, %c0_97], %84 {strides = array<i32>} : memref<236x128xf32, #tpu.memory_space<vmem>>, vector<236x128xf32>,
    %c0_98 = arith.constant 0 : index
    %c0_99 = arith.constant 0 : index
    %86 = vector.load %arg13[%c0_98, %c0_99] : memref<236x128xf32, #tpu.memory_space<vmem>>, vector<236x128xf32>
    %c14 = arith.constant 14 : index
    %c0_100 = arith.constant 0 : index
    %87 = vector.load %arg12[%c14, %c0_100] : memref<288x128xf32, #tpu.memory_space<vmem>>, vector<236x128xf32>
    %88 = arith.truncf %87 : vector<236x128xf32> to vector<236x128xbf16>
    %c7 = arith.constant 7 : index
    %c0_101 = arith.constant 0 : index
    %c0_102 = arith.constant 0 : index
    %89 = vector.load %arg4[%c7, %c0_101, %c0_102] : memref<25x128x128xbf16, #tpu.memory_space<vmem>>, vector<1x128x128xbf16>
    %90 = vector.shape_cast %89 : vector<1x128x128xbf16> to vector<128x128xbf16>
    %cst_103 = arith.constant dense<0.000000e+00> : vector<236x128xf32>
    %91 = tpu.matmul %88, %90, %cst_103 {dimension_numbers = #tpu.dot_dimension_numbers<[1], [0], [0], [1], [0, 0, 1, 1], [], []>} : vector<236x128xbf16>, vector<128x128xbf16>, vector<236x128xf32> -> vector<236x128xf32>
    %92 = arith.addf %86, %91 : vector<236x128xf32>
    %c0_104 = arith.constant 0 : index
    %c0_105 = arith.constant 0 : index
    %93 = vector.load %arg13[%c0_104, %c0_105] : memref<236x128xf32, #tpu.memory_space<vmem>>, vector<236x128xf32>
    tpu.vector_store %arg13[%c0_104, %c0_105], %92 {strides = array<i32>} : memref<236x128xf32, #tpu.memory_space<vmem>>, vector<236x128xf32>,
    %c0_106 = arith.constant 0 : index
    %c0_107 = arith.constant 0 : index
    %94 = vector.load %arg13[%c0_106, %c0_107] : memref<236x128xf32, #tpu.memory_space<vmem>>, vector<236x128xf32>
    %c15 = arith.constant 15 : index
    %c0_108 = arith.constant 0 : index
    %95 = vector.load %arg12[%c15, %c0_108] : memref<288x128xf32, #tpu.memory_space<vmem>>, vector<236x128xf32>
    %96 = arith.truncf %95 : vector<236x128xf32> to vector<236x128xbf16>
    %c8 = arith.constant 8 : index
    %c0_109 = arith.constant 0 : index
    %c0_110 = arith.constant 0 : index
    %97 = vector.load %arg4[%c8, %c0_109, %c0_110] : memref<25x128x128xbf16, #tpu.memory_space<vmem>>, vector<1x128x128xbf16>
    %98 = vector.shape_cast %97 : vector<1x128x128xbf16> to vector<128x128xbf16>
    %cst_111 = arith.constant dense<0.000000e+00> : vector<236x128xf32>
    %99 = tpu.matmul %96, %98, %cst_111 {dimension_numbers = #tpu.dot_dimension_numbers<[1], [0], [0], [1], [0, 0, 1, 1], [], []>} : vector<236x128xbf16>, vector<128x128xbf16>, vector<236x128xf32> -> vector<236x128xf32>
    %100 = arith.addf %94, %99 : vector<236x128xf32>
    %c0_112 = arith.constant 0 : index
    %c0_113 = arith.constant 0 : index
    %101 = vector.load %arg13[%c0_112, %c0_113] : memref<236x128xf32, #tpu.memory_space<vmem>>, vector<236x128xf32>
    tpu.vector_store %arg13[%c0_112, %c0_113], %100 {strides = array<i32>} : memref<236x128xf32, #tpu.memory_space<vmem>>, vector<236x128xf32>,
    %c0_114 = arith.constant 0 : index
    %c0_115 = arith.constant 0 : index
    %102 = vector.load %arg13[%c0_114, %c0_115] : memref<236x128xf32, #tpu.memory_space<vmem>>, vector<236x128xf32>
    %c16 = arith.constant 16 : index
    %c0_116 = arith.constant 0 : index
    %103 = vector.load %arg12[%c16, %c0_116] : memref<288x128xf32, #tpu.memory_space<vmem>>, vector<236x128xf32>
    %104 = arith.truncf %103 : vector<236x128xf32> to vector<236x128xbf16>
    %c9 = arith.constant 9 : index
    %c0_117 = arith.constant 0 : index
    %c0_118 = arith.constant 0 : index
    %105 = vector.load %arg4[%c9, %c0_117, %c0_118] : memref<25x128x128xbf16, #tpu.memory_space<vmem>>, vector<1x128x128xbf16>
    %106 = vector.shape_cast %105 : vector<1x128x128xbf16> to vector<128x128xbf16>
    %cst_119 = arith.constant dense<0.000000e+00> : vector<236x128xf32>
    %107 = tpu.matmul %104, %106, %cst_119 {dimension_numbers = #tpu.dot_dimension_numbers<[1], [0], [0], [1], [0, 0, 1, 1], [], []>} : vector<236x128xbf16>, vector<128x128xbf16>, vector<236x128xf32> -> vector<236x128xf32>
    %108 = arith.addf %102, %107 : vector<236x128xf32>
    %c0_120 = arith.constant 0 : index
    %c0_121 = arith.constant 0 : index
    %109 = vector.load %arg13[%c0_120, %c0_121] : memref<236x128xf32, #tpu.memory_space<vmem>>, vector<236x128xf32>
    tpu.vector_store %arg13[%c0_120, %c0_121], %108 {strides = array<i32>} : memref<236x128xf32, #tpu.memory_space<vmem>>, vector<236x128xf32>,
    %c0_122 = arith.constant 0 : index
    %c0_123 = arith.constant 0 : index
    %110 = vector.load %arg13[%c0_122, %c0_123] : memref<236x128xf32, #tpu.memory_space<vmem>>, vector<236x128xf32>
    %c24 = arith.constant 24 : index
    %c0_124 = arith.constant 0 : index
    %111 = vector.load %arg12[%c24, %c0_124] : memref<288x128xf32, #tpu.memory_space<vmem>>, vector<236x128xf32>
    %112 = arith.truncf %111 : vector<236x128xf32> to vector<236x128xbf16>
    %c10 = arith.constant 10 : index
    %c0_125 = arith.constant 0 : index
    %c0_126 = arith.constant 0 : index
    %113 = vector.load %arg4[%c10, %c0_125, %c0_126] : memref<25x128x128xbf16, #tpu.memory_space<vmem>>, vector<1x128x128xbf16>
    %114 = vector.shape_cast %113 : vector<1x128x128xbf16> to vector<128x128xbf16>
    %cst_127 = arith.constant dense<0.000000e+00> : vector<236x128xf32>
    %115 = tpu.matmul %112, %114, %cst_127 {dimension_numbers = #tpu.dot_dimension_numbers<[1], [0], [0], [1], [0, 0, 1, 1], [], []>} : vector<236x128xbf16>, vector<128x128xbf16>, vector<236x128xf32> -> vector<236x128xf32>
    %116 = arith.addf %110, %115 : vector<236x128xf32>
    %c0_128 = arith.constant 0 : index
    %c0_129 = arith.constant 0 : index
    %117 = vector.load %arg13[%c0_128, %c0_129] : memref<236x128xf32, #tpu.memory_space<vmem>>, vector<236x128xf32>
    tpu.vector_store %arg13[%c0_128, %c0_129], %116 {strides = array<i32>} : memref<236x128xf32, #tpu.memory_space<vmem>>, vector<236x128xf32>,
    %c0_130 = arith.constant 0 : index
    %c0_131 = arith.constant 0 : index
    %118 = vector.load %arg13[%c0_130, %c0_131] : memref<236x128xf32, #tpu.memory_space<vmem>>, vector<236x128xf32>
    %c25 = arith.constant 25 : index
    %c0_132 = arith.constant 0 : index
    %119 = vector.load %arg12[%c25, %c0_132] : memref<288x128xf32, #tpu.memory_space<vmem>>, vector<236x128xf32>
    %120 = arith.truncf %119 : vector<236x128xf32> to vector<236x128xbf16>
    %c11 = arith.constant 11 : index
    %c0_133 = arith.constant 0 : index
    %c0_134 = arith.constant 0 : index
    %121 = vector.load %arg4[%c11, %c0_133, %c0_134] : memref<25x128x128xbf16, #tpu.memory_space<vmem>>, vector<1x128x128xbf16>
    %122 = vector.shape_cast %121 : vector<1x128x128xbf16> to vector<128x128xbf16>
    %cst_135 = arith.constant dense<0.000000e+00> : vector<236x128xf32>
    %123 = tpu.matmul %120, %122, %cst_135 {dimension_numbers = #tpu.dot_dimension_numbers<[1], [0], [0], [1], [0, 0, 1, 1], [], []>} : vector<236x128xbf16>, vector<128x128xbf16>, vector<236x128xf32> -> vector<236x128xf32>
    %124 = arith.addf %118, %123 : vector<236x128xf32>
    %c0_136 = arith.constant 0 : index
    %c0_137 = arith.constant 0 : index
    %125 = vector.load %arg13[%c0_136, %c0_137] : memref<236x128xf32, #tpu.memory_space<vmem>>, vector<236x128xf32>
    tpu.vector_store %arg13[%c0_136, %c0_137], %124 {strides = array<i32>} : memref<236x128xf32, #tpu.memory_space<vmem>>, vector<236x128xf32>,
    %c0_138 = arith.constant 0 : index
    %c0_139 = arith.constant 0 : index
    %126 = vector.load %arg13[%c0_138, %c0_139] : memref<236x128xf32, #tpu.memory_space<vmem>>, vector<236x128xf32>
    %c26 = arith.constant 26 : index
    %c0_140 = arith.constant 0 : index
    %127 = vector.load %arg12[%c26, %c0_140] : memref<288x128xf32, #tpu.memory_space<vmem>>, vector<236x128xf32>
    %128 = arith.truncf %127 : vector<236x128xf32> to vector<236x128xbf16>
    %c12_141 = arith.constant 12 : index
    %c0_142 = arith.constant 0 : index
    %c0_143 = arith.constant 0 : index
    %129 = vector.load %arg4[%c12_141, %c0_142, %c0_143] : memref<25x128x128xbf16, #tpu.memory_space<vmem>>, vector<1x128x128xbf16>
    %130 = vector.shape_cast %129 : vector<1x128x128xbf16> to vector<128x128xbf16>
    %cst_144 = arith.constant dense<0.000000e+00> : vector<236x128xf32>
    %131 = tpu.matmul %128, %130, %cst_144 {dimension_numbers = #tpu.dot_dimension_numbers<[1], [0], [0], [1], [0, 0, 1, 1], [], []>} : vector<236x128xbf16>, vector<128x128xbf16>, vector<236x128xf32> -> vector<236x128xf32>
    %132 = arith.addf %126, %131 : vector<236x128xf32>
    %c0_145 = arith.constant 0 : index
    %c0_146 = arith.constant 0 : index
    %133 = vector.load %arg13[%c0_145, %c0_146] : memref<236x128xf32, #tpu.memory_space<vmem>>, vector<236x128xf32>
    tpu.vector_store %arg13[%c0_145, %c0_146], %132 {strides = array<i32>} : memref<236x128xf32, #tpu.memory_space<vmem>>, vector<236x128xf32>,
    %c0_147 = arith.constant 0 : index
    %c0_148 = arith.constant 0 : index
    %134 = vector.load %arg13[%c0_147, %c0_148] : memref<236x128xf32, #tpu.memory_space<vmem>>, vector<236x128xf32>
    %c27 = arith.constant 27 : index
    %c0_149 = arith.constant 0 : index
    %135 = vector.load %arg12[%c27, %c0_149] : memref<288x128xf32, #tpu.memory_space<vmem>>, vector<236x128xf32>
    %136 = arith.truncf %135 : vector<236x128xf32> to vector<236x128xbf16>
    %c13_150 = arith.constant 13 : index
    %c0_151 = arith.constant 0 : index
    %c0_152 = arith.constant 0 : index
    %137 = vector.load %arg4[%c13_150, %c0_151, %c0_152] : memref<25x128x128xbf16, #tpu.memory_space<vmem>>, vector<1x128x128xbf16>
    %138 = vector.shape_cast %137 : vector<1x128x128xbf16> to vector<128x128xbf16>
    %cst_153 = arith.constant dense<0.000000e+00> : vector<236x128xf32>
    %139 = tpu.matmul %136, %138, %cst_153 {dimension_numbers = #tpu.dot_dimension_numbers<[1], [0], [0], [1], [0, 0, 1, 1], [], []>} : vector<236x128xbf16>, vector<128x128xbf16>, vector<236x128xf32> -> vector<236x128xf32>
    %140 = arith.addf %134, %139 : vector<236x128xf32>
    %c0_154 = arith.constant 0 : index
    %c0_155 = arith.constant 0 : index
    %141 = vector.load %arg13[%c0_154, %c0_155] : memref<236x128xf32, #tpu.memory_space<vmem>>, vector<236x128xf32>
    tpu.vector_store %arg13[%c0_154, %c0_155], %140 {strides = array<i32>} : memref<236x128xf32, #tpu.memory_space<vmem>>, vector<236x128xf32>,
    %c0_156 = arith.constant 0 : index
    %c0_157 = arith.constant 0 : index
    %142 = vector.load %arg13[%c0_156, %c0_157] : memref<236x128xf32, #tpu.memory_space<vmem>>, vector<236x128xf32>
    %c28 = arith.constant 28 : index
    %c0_158 = arith.constant 0 : index
    %143 = vector.load %arg12[%c28, %c0_158] : memref<288x128xf32, #tpu.memory_space<vmem>>, vector<236x128xf32>
    %144 = arith.truncf %143 : vector<236x128xf32> to vector<236x128xbf16>
    %c14_159 = arith.constant 14 : index
    %c0_160 = arith.constant 0 : index
    %c0_161 = arith.constant 0 : index
    %145 = vector.load %arg4[%c14_159, %c0_160, %c0_161] : memref<25x128x128xbf16, #tpu.memory_space<vmem>>, vector<1x128x128xbf16>
    %146 = vector.shape_cast %145 : vector<1x128x128xbf16> to vector<128x128xbf16>
    %cst_162 = arith.constant dense<0.000000e+00> : vector<236x128xf32>
    %147 = tpu.matmul %144, %146, %cst_162 {dimension_numbers = #tpu.dot_dimension_numbers<[1], [0], [0], [1], [0, 0, 1, 1], [], []>} : vector<236x128xbf16>, vector<128x128xbf16>, vector<236x128xf32> -> vector<236x128xf32>
    %148 = arith.addf %142, %147 : vector<236x128xf32>
    %c0_163 = arith.constant 0 : index
    %c0_164 = arith.constant 0 : index
    %149 = vector.load %arg13[%c0_163, %c0_164] : memref<236x128xf32, #tpu.memory_space<vmem>>, vector<236x128xf32>
    tpu.vector_store %arg13[%c0_163, %c0_164], %148 {strides = array<i32>} : memref<236x128xf32, #tpu.memory_space<vmem>>, vector<236x128xf32>,
    %c0_165 = arith.constant 0 : index
    %c0_166 = arith.constant 0 : index
    %150 = vector.load %arg13[%c0_165, %c0_166] : memref<236x128xf32, #tpu.memory_space<vmem>>, vector<236x128xf32>
    %c36 = arith.constant 36 : index
    %c0_167 = arith.constant 0 : index
    %151 = vector.load %arg12[%c36, %c0_167] : memref<288x128xf32, #tpu.memory_space<vmem>>, vector<236x128xf32>
    %152 = arith.truncf %151 : vector<236x128xf32> to vector<236x128xbf16>
    %c15_168 = arith.constant 15 : index
    %c0_169 = arith.constant 0 : index
    %c0_170 = arith.constant 0 : index
    %153 = vector.load %arg4[%c15_168, %c0_169, %c0_170] : memref<25x128x128xbf16, #tpu.memory_space<vmem>>, vector<1x128x128xbf16>
    %154 = vector.shape_cast %153 : vector<1x128x128xbf16> to vector<128x128xbf16>
    %cst_171 = arith.constant dense<0.000000e+00> : vector<236x128xf32>
    %155 = tpu.matmul %152, %154, %cst_171 {dimension_numbers = #tpu.dot_dimension_numbers<[1], [0], [0], [1], [0, 0, 1, 1], [], []>} : vector<236x128xbf16>, vector<128x128xbf16>, vector<236x128xf32> -> vector<236x128xf32>
    %156 = arith.addf %150, %155 : vector<236x128xf32>
    %c0_172 = arith.constant 0 : index
    %c0_173 = arith.constant 0 : index
    %157 = vector.load %arg13[%c0_172, %c0_173] : memref<236x128xf32, #tpu.memory_space<vmem>>, vector<236x128xf32>
    tpu.vector_store %arg13[%c0_172, %c0_173], %156 {strides = array<i32>} : memref<236x128xf32, #tpu.memory_space<vmem>>, vector<236x128xf32>,
    %c0_174 = arith.constant 0 : index
    %c0_175 = arith.constant 0 : index
    %158 = vector.load %arg13[%c0_174, %c0_175] : memref<236x128xf32, #tpu.memory_space<vmem>>, vector<236x128xf32>
    %c37 = arith.constant 37 : index
    %c0_176 = arith.constant 0 : index
    %159 = vector.load %arg12[%c37, %c0_176] : memref<288x128xf32, #tpu.memory_space<vmem>>, vector<236x128xf32>
    %160 = arith.truncf %159 : vector<236x128xf32> to vector<236x128xbf16>
    %c16_177 = arith.constant 16 : index
    %c0_178 = arith.constant 0 : index
    %c0_179 = arith.constant 0 : index
    %161 = vector.load %arg4[%c16_177, %c0_178, %c0_179] : memref<25x128x128xbf16, #tpu.memory_space<vmem>>, vector<1x128x128xbf16>
    %162 = vector.shape_cast %161 : vector<1x128x128xbf16> to vector<128x128xbf16>
    %cst_180 = arith.constant dense<0.000000e+00> : vector<236x128xf32>
    %163 = tpu.matmul %160, %162, %cst_180 {dimension_numbers = #tpu.dot_dimension_numbers<[1], [0], [0], [1], [0, 0, 1, 1], [], []>} : vector<236x128xbf16>, vector<128x128xbf16>, vector<236x128xf32> -> vector<236x128xf32>
    %164 = arith.addf %158, %163 : vector<236x128xf32>
    %c0_181 = arith.constant 0 : index
    %c0_182 = arith.constant 0 : index
    %165 = vector.load %arg13[%c0_181, %c0_182] : memref<236x128xf32, #tpu.memory_space<vmem>>, vector<236x128xf32>
    tpu.vector_store %arg13[%c0_181, %c0_182], %164 {strides = array<i32>} : memref<236x128xf32, #tpu.memory_space<vmem>>, vector<236x128xf32>,
    %c0_183 = arith.constant 0 : index
    %c0_184 = arith.constant 0 : index
    %166 = vector.load %arg13[%c0_183, %c0_184] : memref<236x128xf32, #tpu.memory_space<vmem>>, vector<236x128xf32>
    %c38 = arith.constant 38 : index
    %c0_185 = arith.constant 0 : index
    %167 = vector.load %arg12[%c38, %c0_185] : memref<288x128xf32, #tpu.memory_space<vmem>>, vector<236x128xf32>
    %168 = arith.truncf %167 : vector<236x128xf32> to vector<236x128xbf16>
    %c17 = arith.constant 17 : index
    %c0_186 = arith.constant 0 : index
    %c0_187 = arith.constant 0 : index
    %169 = vector.load %arg4[%c17, %c0_186, %c0_187] : memref<25x128x128xbf16, #tpu.memory_space<vmem>>, vector<1x128x128xbf16>
    %170 = vector.shape_cast %169 : vector<1x128x128xbf16> to vector<128x128xbf16>
    %cst_188 = arith.constant dense<0.000000e+00> : vector<236x128xf32>
    %171 = tpu.matmul %168, %170, %cst_188 {dimension_numbers = #tpu.dot_dimension_numbers<[1], [0], [0], [1], [0, 0, 1, 1], [], []>} : vector<236x128xbf16>, vector<128x128xbf16>, vector<236x128xf32> -> vector<236x128xf32>
    %172 = arith.addf %166, %171 : vector<236x128xf32>
    %c0_189 = arith.constant 0 : index
    %c0_190 = arith.constant 0 : index
    %173 = vector.load %arg13[%c0_189, %c0_190] : memref<236x128xf32, #tpu.memory_space<vmem>>, vector<236x128xf32>
    tpu.vector_store %arg13[%c0_189, %c0_190], %172 {strides = array<i32>} : memref<236x128xf32, #tpu.memory_space<vmem>>, vector<236x128xf32>,
    %c0_191 = arith.constant 0 : index
    %c0_192 = arith.constant 0 : index
    %174 = vector.load %arg13[%c0_191, %c0_192] : memref<236x128xf32, #tpu.memory_space<vmem>>, vector<236x128xf32>
    %c39 = arith.constant 39 : index
    %c0_193 = arith.constant 0 : index
    %175 = vector.load %arg12[%c39, %c0_193] : memref<288x128xf32, #tpu.memory_space<vmem>>, vector<236x128xf32>
    %176 = arith.truncf %175 : vector<236x128xf32> to vector<236x128xbf16>
    %c18 = arith.constant 18 : index
    %c0_194 = arith.constant 0 : index
    %c0_195 = arith.constant 0 : index
    %177 = vector.load %arg4[%c18, %c0_194, %c0_195] : memref<25x128x128xbf16, #tpu.memory_space<vmem>>, vector<1x128x128xbf16>
    %178 = vector.shape_cast %177 : vector<1x128x128xbf16> to vector<128x128xbf16>
    %cst_196 = arith.constant dense<0.000000e+00> : vector<236x128xf32>
    %179 = tpu.matmul %176, %178, %cst_196 {dimension_numbers = #tpu.dot_dimension_numbers<[1], [0], [0], [1], [0, 0, 1, 1], [], []>} : vector<236x128xbf16>, vector<128x128xbf16>, vector<236x128xf32> -> vector<236x128xf32>
    %180 = arith.addf %174, %179 : vector<236x128xf32>
    %c0_197 = arith.constant 0 : index
    %c0_198 = arith.constant 0 : index
    %181 = vector.load %arg13[%c0_197, %c0_198] : memref<236x128xf32, #tpu.memory_space<vmem>>, vector<236x128xf32>
    tpu.vector_store %arg13[%c0_197, %c0_198], %180 {strides = array<i32>} : memref<236x128xf32, #tpu.memory_space<vmem>>, vector<236x128xf32>,
    %c0_199 = arith.constant 0 : index
    %c0_200 = arith.constant 0 : index
    %182 = vector.load %arg13[%c0_199, %c0_200] : memref<236x128xf32, #tpu.memory_space<vmem>>, vector<236x128xf32>
    %c40 = arith.constant 40 : index
    %c0_201 = arith.constant 0 : index
    %183 = vector.load %arg12[%c40, %c0_201] : memref<288x128xf32, #tpu.memory_space<vmem>>, vector<236x128xf32>
    %184 = arith.truncf %183 : vector<236x128xf32> to vector<236x128xbf16>
    %c19 = arith.constant 19 : index
    %c0_202 = arith.constant 0 : index
    %c0_203 = arith.constant 0 : index
    %185 = vector.load %arg4[%c19, %c0_202, %c0_203] : memref<25x128x128xbf16, #tpu.memory_space<vmem>>, vector<1x128x128xbf16>
    %186 = vector.shape_cast %185 : vector<1x128x128xbf16> to vector<128x128xbf16>
    %cst_204 = arith.constant dense<0.000000e+00> : vector<236x128xf32>
    %187 = tpu.matmul %184, %186, %cst_204 {dimension_numbers = #tpu.dot_dimension_numbers<[1], [0], [0], [1], [0, 0, 1, 1], [], []>} : vector<236x128xbf16>, vector<128x128xbf16>, vector<236x128xf32> -> vector<236x128xf32>
    %188 = arith.addf %182, %187 : vector<236x128xf32>
    %c0_205 = arith.constant 0 : index
    %c0_206 = arith.constant 0 : index
    %189 = vector.load %arg13[%c0_205, %c0_206] : memref<236x128xf32, #tpu.memory_space<vmem>>, vector<236x128xf32>
    tpu.vector_store %arg13[%c0_205, %c0_206], %188 {strides = array<i32>} : memref<236x128xf32, #tpu.memory_space<vmem>>, vector<236x128xf32>,
    %c0_207 = arith.constant 0 : index
    %c0_208 = arith.constant 0 : index
    %190 = vector.load %arg13[%c0_207, %c0_208] : memref<236x128xf32, #tpu.memory_space<vmem>>, vector<236x128xf32>
    %c48 = arith.constant 48 : index
    %c0_209 = arith.constant 0 : index
    %191 = vector.load %arg12[%c48, %c0_209] : memref<288x128xf32, #tpu.memory_space<vmem>>, vector<236x128xf32>
    %192 = arith.truncf %191 : vector<236x128xf32> to vector<236x128xbf16>
    %c20 = arith.constant 20 : index
    %c0_210 = arith.constant 0 : index
    %c0_211 = arith.constant 0 : index
    %193 = vector.load %arg4[%c20, %c0_210, %c0_211] : memref<25x128x128xbf16, #tpu.memory_space<vmem>>, vector<1x128x128xbf16>
    %194 = vector.shape_cast %193 : vector<1x128x128xbf16> to vector<128x128xbf16>
    %cst_212 = arith.constant dense<0.000000e+00> : vector<236x128xf32>
    %195 = tpu.matmul %192, %194, %cst_212 {dimension_numbers = #tpu.dot_dimension_numbers<[1], [0], [0], [1], [0, 0, 1, 1], [], []>} : vector<236x128xbf16>, vector<128x128xbf16>, vector<236x128xf32> -> vector<236x128xf32>
    %196 = arith.addf %190, %195 : vector<236x128xf32>
    %c0_213 = arith.constant 0 : index
    %c0_214 = arith.constant 0 : index
    %197 = vector.load %arg13[%c0_213, %c0_214] : memref<236x128xf32, #tpu.memory_space<vmem>>, vector<236x128xf32>
    tpu.vector_store %arg13[%c0_213, %c0_214], %196 {strides = array<i32>} : memref<236x128xf32, #tpu.memory_space<vmem>>, vector<236x128xf32>,
    %c0_215 = arith.constant 0 : index
    %c0_216 = arith.constant 0 : index
    %198 = vector.load %arg13[%c0_215, %c0_216] : memref<236x128xf32, #tpu.memory_space<vmem>>, vector<236x128xf32>
    %c49 = arith.constant 49 : index
    %c0_217 = arith.constant 0 : index
    %199 = vector.load %arg12[%c49, %c0_217] : memref<288x128xf32, #tpu.memory_space<vmem>>, vector<236x128xf32>
    %200 = arith.truncf %199 : vector<236x128xf32> to vector<236x128xbf16>
    %c21 = arith.constant 21 : index
    %c0_218 = arith.constant 0 : index
    %c0_219 = arith.constant 0 : index
    %201 = vector.load %arg4[%c21, %c0_218, %c0_219] : memref<25x128x128xbf16, #tpu.memory_space<vmem>>, vector<1x128x128xbf16>
    %202 = vector.shape_cast %201 : vector<1x128x128xbf16> to vector<128x128xbf16>
    %cst_220 = arith.constant dense<0.000000e+00> : vector<236x128xf32>
    %203 = tpu.matmul %200, %202, %cst_220 {dimension_numbers = #tpu.dot_dimension_numbers<[1], [0], [0], [1], [0, 0, 1, 1], [], []>} : vector<236x128xbf16>, vector<128x128xbf16>, vector<236x128xf32> -> vector<236x128xf32>
    %204 = arith.addf %198, %203 : vector<236x128xf32>
    %c0_221 = arith.constant 0 : index
    %c0_222 = arith.constant 0 : index
    %205 = vector.load %arg13[%c0_221, %c0_222] : memref<236x128xf32, #tpu.memory_space<vmem>>, vector<236x128xf32>
    tpu.vector_store %arg13[%c0_221, %c0_222], %204 {strides = array<i32>} : memref<236x128xf32, #tpu.memory_space<vmem>>, vector<236x128xf32>,
    %c0_223 = arith.constant 0 : index
    %c0_224 = arith.constant 0 : index
    %206 = vector.load %arg13[%c0_223, %c0_224] : memref<236x128xf32, #tpu.memory_space<vmem>>, vector<236x128xf32>
    %c50 = arith.constant 50 : index
    %c0_225 = arith.constant 0 : index
    %207 = vector.load %arg12[%c50, %c0_225] : memref<288x128xf32, #tpu.memory_space<vmem>>, vector<236x128xf32>
    %208 = arith.truncf %207 : vector<236x128xf32> to vector<236x128xbf16>
    %c22 = arith.constant 22 : index
    %c0_226 = arith.constant 0 : index
    %c0_227 = arith.constant 0 : index
    %209 = vector.load %arg4[%c22, %c0_226, %c0_227] : memref<25x128x128xbf16, #tpu.memory_space<vmem>>, vector<1x128x128xbf16>
    %210 = vector.shape_cast %209 : vector<1x128x128xbf16> to vector<128x128xbf16>
    %cst_228 = arith.constant dense<0.000000e+00> : vector<236x128xf32>
    %211 = tpu.matmul %208, %210, %cst_228 {dimension_numbers = #tpu.dot_dimension_numbers<[1], [0], [0], [1], [0, 0, 1, 1], [], []>} : vector<236x128xbf16>, vector<128x128xbf16>, vector<236x128xf32> -> vector<236x128xf32>
    %212 = arith.addf %206, %211 : vector<236x128xf32>
    %c0_229 = arith.constant 0 : index
    %c0_230 = arith.constant 0 : index
    %213 = vector.load %arg13[%c0_229, %c0_230] : memref<236x128xf32, #tpu.memory_space<vmem>>, vector<236x128xf32>
    tpu.vector_store %arg13[%c0_229, %c0_230], %212 {strides = array<i32>} : memref<236x128xf32, #tpu.memory_space<vmem>>, vector<236x128xf32>,
    %c0_231 = arith.constant 0 : index
    %c0_232 = arith.constant 0 : index
    %214 = vector.load %arg13[%c0_231, %c0_232] : memref<236x128xf32, #tpu.memory_space<vmem>>, vector<236x128xf32>
    %c51 = arith.constant 51 : index
    %c0_233 = arith.constant 0 : index
    %215 = vector.load %arg12[%c51, %c0_233] : memref<288x128xf32, #tpu.memory_space<vmem>>, vector<236x128xf32>
    %216 = arith.truncf %215 : vector<236x128xf32> to vector<236x128xbf16>
    %c23 = arith.constant 23 : index
    %c0_234 = arith.constant 0 : index
    %c0_235 = arith.constant 0 : index
    %217 = vector.load %arg4[%c23, %c0_234, %c0_235] : memref<25x128x128xbf16, #tpu.memory_space<vmem>>, vector<1x128x128xbf16>
    %218 = vector.shape_cast %217 : vector<1x128x128xbf16> to vector<128x128xbf16>
    %cst_236 = arith.constant dense<0.000000e+00> : vector<236x128xf32>
    %219 = tpu.matmul %216, %218, %cst_236 {dimension_numbers = #tpu.dot_dimension_numbers<[1], [0], [0], [1], [0, 0, 1, 1], [], []>} : vector<236x128xbf16>, vector<128x128xbf16>, vector<236x128xf32> -> vector<236x128xf32>
    %220 = arith.addf %214, %219 : vector<236x128xf32>
    %c0_237 = arith.constant 0 : index
    %c0_238 = arith.constant 0 : index
    %221 = vector.load %arg13[%c0_237, %c0_238] : memref<236x128xf32, #tpu.memory_space<vmem>>, vector<236x128xf32>
    tpu.vector_store %arg13[%c0_237, %c0_238], %220 {strides = array<i32>} : memref<236x128xf32, #tpu.memory_space<vmem>>, vector<236x128xf32>,
    %c0_239 = arith.constant 0 : index
    %c0_240 = arith.constant 0 : index
    %222 = vector.load %arg13[%c0_239, %c0_240] : memref<236x128xf32, #tpu.memory_space<vmem>>, vector<236x128xf32>
    %c52 = arith.constant 52 : index
    %c0_241 = arith.constant 0 : index
    %223 = vector.load %arg12[%c52, %c0_241] : memref<288x128xf32, #tpu.memory_space<vmem>>, vector<236x128xf32>
    %224 = arith.truncf %223 : vector<236x128xf32> to vector<236x128xbf16>
    %c24_242 = arith.constant 24 : index
    %c0_243 = arith.constant 0 : index
    %c0_244 = arith.constant 0 : index
    %225 = vector.load %arg4[%c24_242, %c0_243, %c0_244] : memref<25x128x128xbf16, #tpu.memory_space<vmem>>, vector<1x128x128xbf16>
    %226 = vector.shape_cast %225 : vector<1x128x128xbf16> to vector<128x128xbf16>
    %cst_245 = arith.constant dense<0.000000e+00> : vector<236x128xf32>
    %227 = tpu.matmul %224, %226, %cst_245 {dimension_numbers = #tpu.dot_dimension_numbers<[1], [0], [0], [1], [0, 0, 1, 1], [], []>} : vector<236x128xbf16>, vector<128x128xbf16>, vector<236x128xf32> -> vector<236x128xf32>
    %228 = arith.addf %222, %227 : vector<236x128xf32>
    %c0_246 = arith.constant 0 : index
    %c0_247 = arith.constant 0 : index
    %229 = vector.load %arg13[%c0_246, %c0_247] : memref<236x128xf32, #tpu.memory_space<vmem>>, vector<236x128xf32>
    tpu.vector_store %arg13[%c0_246, %c0_247], %228 {strides = array<i32>} : memref<236x128xf32, #tpu.memory_space<vmem>>, vector<236x128xf32>,
    %c0_248 = arith.constant 0 : index
    %c0_249 = arith.constant 0 : index
    %230 = vector.load %arg13[%c0_248, %c0_249] : memref<236x128xf32, #tpu.memory_space<vmem>>, vector<223x128xf32>
    %c1_250 = arith.constant 1 : index
    %c0_251 = arith.constant 0 : index
    %231 = vector.load %arg13[%c1_250, %c0_251] : memref<236x128xf32, #tpu.memory_space<vmem>>, vector<223x128xf32>
    %232 = arith.maximumf %230, %231 : vector<223x128xf32>
    %c12_252 = arith.constant 12 : index
    %c0_253 = arith.constant 0 : index
    %233 = vector.load %arg13[%c12_252, %c0_253] : memref<236x128xf32, #tpu.memory_space<vmem>>, vector<223x128xf32>
    %c13_254 = arith.constant 13 : index
    %c0_255 = arith.constant 0 : index
    %234 = vector.load %arg13[%c13_254, %c0_255] : memref<236x128xf32, #tpu.memory_space<vmem>>, vector<223x128xf32>
    %235 = arith.maximumf %233, %234 : vector<223x128xf32>
    %236 = arith.maximumf %232, %235 : vector<223x128xf32>
    %cst_256 = arith.constant 0.000000e+00 : f32
    %237 = vector.broadcast %cst_256 : f32 to vector<223x128xf32>
    %238 = arith.maximumf %236, %237 : vector<223x128xf32>
    %c0_257 = arith.constant 0 : index
    %c0_258 = arith.constant 0 : index
    %239 = vector.load %arg14[%c0_257, %c0_258] : memref<223x128xf32, #tpu.memory_space<vmem>>, vector<223x128xf32>
    tpu.vector_store %arg14[%c0_257, %c0_258], %238 {strides = array<i32>} : memref<223x128xf32, #tpu.memory_space<vmem>>, vector<223x128xf32>,
    %c0_259 = arith.constant 0 : index
    %c0_260 = arith.constant 0 : index
    %240 = vector.load %arg7[%c0_259, %c0_260] : memref<1x128xf32, #tpu.memory_space<vmem>>, vector<1x128xf32>
    %241 = vector.shape_cast %240 : vector<1x128xf32> to vector<1x128xf32>
    %242 = vector.broadcast %241 : vector<1x128xf32> to vector<2x128xf32>
    %c0_261 = arith.constant 0 : index
    %c0_262 = arith.constant 0 : index
    %243 = vector.load %arg14[%c0_261, %c0_262] : memref<223x128xf32, #tpu.memory_space<vmem>>, vector<1x128xf32>
    %c144 = arith.constant 144 : index
    %c0_263 = arith.constant 0 : index
    %244 = vector.load %arg14[%c144, %c0_263] : memref<223x128xf32, #tpu.memory_space<vmem>>, vector<1x128xf32>
    %245 = tpu.concatenate %243, %244 in 0 : vector<1x128xf32>, vector<1x128xf32> -> vector<2x128xf32>
    %246 = arith.truncf %245 : vector<2x128xf32> to vector<2x128xbf16>
    %c0_264 = arith.constant 0 : index
    %c0_265 = arith.constant 0 : index
    %c0_266 = arith.constant 0 : index
    %247 = vector.load %arg6[%c0_264, %c0_265, %c0_266] : memref<16x128x128xbf16, #tpu.memory_space<vmem>>, vector<1x128x128xbf16>
    %248 = vector.shape_cast %247 : vector<1x128x128xbf16> to vector<128x128xbf16>
    %cst_267 = arith.constant dense<0.000000e+00> : vector<2x128xf32>
    %249 = tpu.matmul %246, %248, %cst_267 {dimension_numbers = #tpu.dot_dimension_numbers<[1], [0], [0], [1], [0, 0, 1, 1], [], []>} : vector<2x128xbf16>, vector<128x128xbf16>, vector<2x128xf32> -> vector<2x128xf32>
    %250 = arith.addf %242, %249 : vector<2x128xf32>
    %c2_268 = arith.constant 2 : index
    %c0_269 = arith.constant 0 : index
    %251 = vector.load %arg14[%c2_268, %c0_269] : memref<223x128xf32, #tpu.memory_space<vmem>>, vector<1x128xf32>
    %c146 = arith.constant 146 : index
    %c0_270 = arith.constant 0 : index
    %252 = vector.load %arg14[%c146, %c0_270] : memref<223x128xf32, #tpu.memory_space<vmem>>, vector<1x128xf32>
    %253 = tpu.concatenate %251, %252 in 0 : vector<1x128xf32>, vector<1x128xf32> -> vector<2x128xf32>
    %254 = arith.truncf %253 : vector<2x128xf32> to vector<2x128xbf16>
    %c1_271 = arith.constant 1 : index
    %c0_272 = arith.constant 0 : index
    %c0_273 = arith.constant 0 : index
    %255 = vector.load %arg6[%c1_271, %c0_272, %c0_273] : memref<16x128x128xbf16, #tpu.memory_space<vmem>>, vector<1x128x128xbf16>
    %256 = vector.shape_cast %255 : vector<1x128x128xbf16> to vector<128x128xbf16>
    %cst_274 = arith.constant dense<0.000000e+00> : vector<2x128xf32>
    %257 = tpu.matmul %254, %256, %cst_274 {dimension_numbers = #tpu.dot_dimension_numbers<[1], [0], [0], [1], [0, 0, 1, 1], [], []>} : vector<2x128xbf16>, vector<128x128xbf16>, vector<2x128xf32> -> vector<2x128xf32>
    %258 = arith.addf %250, %257 : vector<2x128xf32>
    %c4_275 = arith.constant 4 : index
    %c0_276 = arith.constant 0 : index
    %259 = vector.load %arg14[%c4_275, %c0_276] : memref<223x128xf32, #tpu.memory_space<vmem>>, vector<1x128xf32>
    %c148 = arith.constant 148 : index
    %c0_277 = arith.constant 0 : index
    %260 = vector.load %arg14[%c148, %c0_277] : memref<223x128xf32, #tpu.memory_space<vmem>>, vector<1x128xf32>
    %261 = tpu.concatenate %259, %260 in 0 : vector<1x128xf32>, vector<1x128xf32> -> vector<2x128xf32>
    %262 = arith.truncf %261 : vector<2x128xf32> to vector<2x128xbf16>
    %c2_278 = arith.constant 2 : index
    %c0_279 = arith.constant 0 : index
    %c0_280 = arith.constant 0 : index
    %263 = vector.load %arg6[%c2_278, %c0_279, %c0_280] : memref<16x128x128xbf16, #tpu.memory_space<vmem>>, vector<1x128x128xbf16>
    %264 = vector.shape_cast %263 : vector<1x128x128xbf16> to vector<128x128xbf16>
    %cst_281 = arith.constant dense<0.000000e+00> : vector<2x128xf32>
    %265 = tpu.matmul %262, %264, %cst_281 {dimension_numbers = #tpu.dot_dimension_numbers<[1], [0], [0], [1], [0, 0, 1, 1], [], []>} : vector<2x128xbf16>, vector<128x128xbf16>, vector<2x128xf32> -> vector<2x128xf32>
    %266 = arith.addf %258, %265 : vector<2x128xf32>
    %c6_282 = arith.constant 6 : index
    %c0_283 = arith.constant 0 : index
    %267 = vector.load %arg14[%c6_282, %c0_283] : memref<223x128xf32, #tpu.memory_space<vmem>>, vector<1x128xf32>
    %c150 = arith.constant 150 : index
    %c0_284 = arith.constant 0 : index
    %268 = vector.load %arg14[%c150, %c0_284] : memref<223x128xf32, #tpu.memory_space<vmem>>, vector<1x128xf32>
    %269 = tpu.concatenate %267, %268 in 0 : vector<1x128xf32>, vector<1x128xf32> -> vector<2x128xf32>
    %270 = arith.truncf %269 : vector<2x128xf32> to vector<2x128xbf16>
    %c3_285 = arith.constant 3 : index
    %c0_286 = arith.constant 0 : index
    %c0_287 = arith.constant 0 : index
    %271 = vector.load %arg6[%c3_285, %c0_286, %c0_287] : memref<16x128x128xbf16, #tpu.memory_space<vmem>>, vector<1x128x128xbf16>
    %272 = vector.shape_cast %271 : vector<1x128x128xbf16> to vector<128x128xbf16>
    %cst_288 = arith.constant dense<0.000000e+00> : vector<2x128xf32>
    %273 = tpu.matmul %270, %272, %cst_288 {dimension_numbers = #tpu.dot_dimension_numbers<[1], [0], [0], [1], [0, 0, 1, 1], [], []>} : vector<2x128xbf16>, vector<128x128xbf16>, vector<2x128xf32> -> vector<2x128xf32>
    %274 = arith.addf %266, %273 : vector<2x128xf32>
    %c24_289 = arith.constant 24 : index
    %c0_290 = arith.constant 0 : index
    %275 = vector.load %arg14[%c24_289, %c0_290] : memref<223x128xf32, #tpu.memory_space<vmem>>, vector<1x128xf32>
    %c168 = arith.constant 168 : index
    %c0_291 = arith.constant 0 : index
    %276 = vector.load %arg14[%c168, %c0_291] : memref<223x128xf32, #tpu.memory_space<vmem>>, vector<1x128xf32>
    %277 = tpu.concatenate %275, %276 in 0 : vector<1x128xf32>, vector<1x128xf32> -> vector<2x128xf32>
    %278 = arith.truncf %277 : vector<2x128xf32> to vector<2x128xbf16>
    %c4_292 = arith.constant 4 : index
    %c0_293 = arith.constant 0 : index
    %c0_294 = arith.constant 0 : index
    %279 = vector.load %arg6[%c4_292, %c0_293, %c0_294] : memref<16x128x128xbf16, #tpu.memory_space<vmem>>, vector<1x128x128xbf16>
    %280 = vector.shape_cast %279 : vector<1x128x128xbf16> to vector<128x128xbf16>
    %cst_295 = arith.constant dense<0.000000e+00> : vector<2x128xf32>
    %281 = tpu.matmul %278, %280, %cst_295 {dimension_numbers = #tpu.dot_dimension_numbers<[1], [0], [0], [1], [0, 0, 1, 1], [], []>} : vector<2x128xbf16>, vector<128x128xbf16>, vector<2x128xf32> -> vector<2x128xf32>
    %282 = arith.addf %274, %281 : vector<2x128xf32>
    %c26_296 = arith.constant 26 : index
    %c0_297 = arith.constant 0 : index
    %283 = vector.load %arg14[%c26_296, %c0_297] : memref<223x128xf32, #tpu.memory_space<vmem>>, vector<1x128xf32>
    %c170 = arith.constant 170 : index
    %c0_298 = arith.constant 0 : index
    %284 = vector.load %arg14[%c170, %c0_298] : memref<223x128xf32, #tpu.memory_space<vmem>>, vector<1x128xf32>
    %285 = tpu.concatenate %283, %284 in 0 : vector<1x128xf32>, vector<1x128xf32> -> vector<2x128xf32>
    %286 = arith.truncf %285 : vector<2x128xf32> to vector<2x128xbf16>
    %c5_299 = arith.constant 5 : index
    %c0_300 = arith.constant 0 : index
    %c0_301 = arith.constant 0 : index
    %287 = vector.load %arg6[%c5_299, %c0_300, %c0_301] : memref<16x128x128xbf16, #tpu.memory_space<vmem>>, vector<1x128x128xbf16>
    %288 = vector.shape_cast %287 : vector<1x128x128xbf16> to vector<128x128xbf16>
    %cst_302 = arith.constant dense<0.000000e+00> : vector<2x128xf32>
    %289 = tpu.matmul %286, %288, %cst_302 {dimension_numbers = #tpu.dot_dimension_numbers<[1], [0], [0], [1], [0, 0, 1, 1], [], []>} : vector<2x128xbf16>, vector<128x128xbf16>, vector<2x128xf32> -> vector<2x128xf32>
    %290 = arith.addf %282, %289 : vector<2x128xf32>
    %c28_303 = arith.constant 28 : index
    %c0_304 = arith.constant 0 : index
    %291 = vector.load %arg14[%c28_303, %c0_304] : memref<223x128xf32, #tpu.memory_space<vmem>>, vector<1x128xf32>
    %c172 = arith.constant 172 : index
    %c0_305 = arith.constant 0 : index
    %292 = vector.load %arg14[%c172, %c0_305] : memref<223x128xf32, #tpu.memory_space<vmem>>, vector<1x128xf32>
    %293 = tpu.concatenate %291, %292 in 0 : vector<1x128xf32>, vector<1x128xf32> -> vector<2x128xf32>
    %294 = arith.truncf %293 : vector<2x128xf32> to vector<2x128xbf16>
    %c6_306 = arith.constant 6 : index
    %c0_307 = arith.constant 0 : index
    %c0_308 = arith.constant 0 : index
    %295 = vector.load %arg6[%c6_306, %c0_307, %c0_308] : memref<16x128x128xbf16, #tpu.memory_space<vmem>>, vector<1x128x128xbf16>
    %296 = vector.shape_cast %295 : vector<1x128x128xbf16> to vector<128x128xbf16>
    %cst_309 = arith.constant dense<0.000000e+00> : vector<2x128xf32>
    %297 = tpu.matmul %294, %296, %cst_309 {dimension_numbers = #tpu.dot_dimension_numbers<[1], [0], [0], [1], [0, 0, 1, 1], [], []>} : vector<2x128xbf16>, vector<128x128xbf16>, vector<2x128xf32> -> vector<2x128xf32>
    %298 = arith.addf %290, %297 : vector<2x128xf32>
    %c30 = arith.constant 30 : index
    %c0_310 = arith.constant 0 : index
    %299 = vector.load %arg14[%c30, %c0_310] : memref<223x128xf32, #tpu.memory_space<vmem>>, vector<1x128xf32>
    %c174 = arith.constant 174 : index
    %c0_311 = arith.constant 0 : index
    %300 = vector.load %arg14[%c174, %c0_311] : memref<223x128xf32, #tpu.memory_space<vmem>>, vector<1x128xf32>
    %301 = tpu.concatenate %299, %300 in 0 : vector<1x128xf32>, vector<1x128xf32> -> vector<2x128xf32>
    %302 = arith.truncf %301 : vector<2x128xf32> to vector<2x128xbf16>
    %c7_312 = arith.constant 7 : index
    %c0_313 = arith.constant 0 : index
    %c0_314 = arith.constant 0 : index
    %303 = vector.load %arg6[%c7_312, %c0_313, %c0_314] : memref<16x128x128xbf16, #tpu.memory_space<vmem>>, vector<1x128x128xbf16>
    %304 = vector.shape_cast %303 : vector<1x128x128xbf16> to vector<128x128xbf16>
    %cst_315 = arith.constant dense<0.000000e+00> : vector<2x128xf32>
    %305 = tpu.matmul %302, %304, %cst_315 {dimension_numbers = #tpu.dot_dimension_numbers<[1], [0], [0], [1], [0, 0, 1, 1], [], []>} : vector<2x128xbf16>, vector<128x128xbf16>, vector<2x128xf32> -> vector<2x128xf32>
    %306 = arith.addf %298, %305 : vector<2x128xf32>
    %c48_316 = arith.constant 48 : index
    %c0_317 = arith.constant 0 : index
    %307 = vector.load %arg14[%c48_316, %c0_317] : memref<223x128xf32, #tpu.memory_space<vmem>>, vector<1x128xf32>
    %c192 = arith.constant 192 : index
    %c0_318 = arith.constant 0 : index
    %308 = vector.load %arg14[%c192, %c0_318] : memref<223x128xf32, #tpu.memory_space<vmem>>, vector<1x128xf32>
    %309 = tpu.concatenate %307, %308 in 0 : vector<1x128xf32>, vector<1x128xf32> -> vector<2x128xf32>
    %310 = arith.truncf %309 : vector<2x128xf32> to vector<2x128xbf16>
    %c8_319 = arith.constant 8 : index
    %c0_320 = arith.constant 0 : index
    %c0_321 = arith.constant 0 : index
    %311 = vector.load %arg6[%c8_319, %c0_320, %c0_321] : memref<16x128x128xbf16, #tpu.memory_space<vmem>>, vector<1x128x128xbf16>
    %312 = vector.shape_cast %311 : vector<1x128x128xbf16> to vector<128x128xbf16>
    %cst_322 = arith.constant dense<0.000000e+00> : vector<2x128xf32>
    %313 = tpu.matmul %310, %312, %cst_322 {dimension_numbers = #tpu.dot_dimension_numbers<[1], [0], [0], [1], [0, 0, 1, 1], [], []>} : vector<2x128xbf16>, vector<128x128xbf16>, vector<2x128xf32> -> vector<2x128xf32>
    %314 = arith.addf %306, %313 : vector<2x128xf32>
    %c50_323 = arith.constant 50 : index
    %c0_324 = arith.constant 0 : index
    %315 = vector.load %arg14[%c50_323, %c0_324] : memref<223x128xf32, #tpu.memory_space<vmem>>, vector<1x128xf32>
    %c194 = arith.constant 194 : index
    %c0_325 = arith.constant 0 : index
    %316 = vector.load %arg14[%c194, %c0_325] : memref<223x128xf32, #tpu.memory_space<vmem>>, vector<1x128xf32>
    %317 = tpu.concatenate %315, %316 in 0 : vector<1x128xf32>, vector<1x128xf32> -> vector<2x128xf32>
    %318 = arith.truncf %317 : vector<2x128xf32> to vector<2x128xbf16>
    %c9_326 = arith.constant 9 : index
    %c0_327 = arith.constant 0 : index
    %c0_328 = arith.constant 0 : index
    %319 = vector.load %arg6[%c9_326, %c0_327, %c0_328] : memref<16x128x128xbf16, #tpu.memory_space<vmem>>, vector<1x128x128xbf16>
    %320 = vector.shape_cast %319 : vector<1x128x128xbf16> to vector<128x128xbf16>
    %cst_329 = arith.constant dense<0.000000e+00> : vector<2x128xf32>
    %321 = tpu.matmul %318, %320, %cst_329 {dimension_numbers = #tpu.dot_dimension_numbers<[1], [0], [0], [1], [0, 0, 1, 1], [], []>} : vector<2x128xbf16>, vector<128x128xbf16>, vector<2x128xf32> -> vector<2x128xf32>
    %322 = arith.addf %314, %321 : vector<2x128xf32>
    %c52_330 = arith.constant 52 : index
    %c0_331 = arith.constant 0 : index
    %323 = vector.load %arg14[%c52_330, %c0_331] : memref<223x128xf32, #tpu.memory_space<vmem>>, vector<1x128xf32>
    %c196 = arith.constant 196 : index
    %c0_332 = arith.constant 0 : index
    %324 = vector.load %arg14[%c196, %c0_332] : memref<223x128xf32, #tpu.memory_space<vmem>>, vector<1x128xf32>
    %325 = tpu.concatenate %323, %324 in 0 : vector<1x128xf32>, vector<1x128xf32> -> vector<2x128xf32>
    %326 = arith.truncf %325 : vector<2x128xf32> to vector<2x128xbf16>
    %c10_333 = arith.constant 10 : index
    %c0_334 = arith.constant 0 : index
    %c0_335 = arith.constant 0 : index
    %327 = vector.load %arg6[%c10_333, %c0_334, %c0_335] : memref<16x128x128xbf16, #tpu.memory_space<vmem>>, vector<1x128x128xbf16>
    %328 = vector.shape_cast %327 : vector<1x128x128xbf16> to vector<128x128xbf16>
    %cst_336 = arith.constant dense<0.000000e+00> : vector<2x128xf32>
    %329 = tpu.matmul %326, %328, %cst_336 {dimension_numbers = #tpu.dot_dimension_numbers<[1], [0], [0], [1], [0, 0, 1, 1], [], []>} : vector<2x128xbf16>, vector<128x128xbf16>, vector<2x128xf32> -> vector<2x128xf32>
    %330 = arith.addf %322, %329 : vector<2x128xf32>
    %c54 = arith.constant 54 : index
    %c0_337 = arith.constant 0 : index
    %331 = vector.load %arg14[%c54, %c0_337] : memref<223x128xf32, #tpu.memory_space<vmem>>, vector<1x128xf32>
    %c198 = arith.constant 198 : index
    %c0_338 = arith.constant 0 : index
    %332 = vector.load %arg14[%c198, %c0_338] : memref<223x128xf32, #tpu.memory_space<vmem>>, vector<1x128xf32>
    %333 = tpu.concatenate %331, %332 in 0 : vector<1x128xf32>, vector<1x128xf32> -> vector<2x128xf32>
    %334 = arith.truncf %333 : vector<2x128xf32> to vector<2x128xbf16>
    %c11_339 = arith.constant 11 : index
    %c0_340 = arith.constant 0 : index
    %c0_341 = arith.constant 0 : index
    %335 = vector.load %arg6[%c11_339, %c0_340, %c0_341] : memref<16x128x128xbf16, #tpu.memory_space<vmem>>, vector<1x128x128xbf16>
    %336 = vector.shape_cast %335 : vector<1x128x128xbf16> to vector<128x128xbf16>
    %cst_342 = arith.constant dense<0.000000e+00> : vector<2x128xf32>
    %337 = tpu.matmul %334, %336, %cst_342 {dimension_numbers = #tpu.dot_dimension_numbers<[1], [0], [0], [1], [0, 0, 1, 1], [], []>} : vector<2x128xbf16>, vector<128x128xbf16>, vector<2x128xf32> -> vector<2x128xf32>
    %338 = arith.addf %330, %337 : vector<2x128xf32>
    %c72 = arith.constant 72 : index
    %c0_343 = arith.constant 0 : index
    %339 = vector.load %arg14[%c72, %c0_343] : memref<223x128xf32, #tpu.memory_space<vmem>>, vector<1x128xf32>
    %c216 = arith.constant 216 : index
    %c0_344 = arith.constant 0 : index
    %340 = vector.load %arg14[%c216, %c0_344] : memref<223x128xf32, #tpu.memory_space<vmem>>, vector<1x128xf32>
    %341 = tpu.concatenate %339, %340 in 0 : vector<1x128xf32>, vector<1x128xf32> -> vector<2x128xf32>
    %342 = arith.truncf %341 : vector<2x128xf32> to vector<2x128xbf16>
    %c12_345 = arith.constant 12 : index
    %c0_346 = arith.constant 0 : index
    %c0_347 = arith.constant 0 : index
    %343 = vector.load %arg6[%c12_345, %c0_346, %c0_347] : memref<16x128x128xbf16, #tpu.memory_space<vmem>>, vector<1x128x128xbf16>
    %344 = vector.shape_cast %343 : vector<1x128x128xbf16> to vector<128x128xbf16>
    %cst_348 = arith.constant dense<0.000000e+00> : vector<2x128xf32>
    %345 = tpu.matmul %342, %344, %cst_348 {dimension_numbers = #tpu.dot_dimension_numbers<[1], [0], [0], [1], [0, 0, 1, 1], [], []>} : vector<2x128xbf16>, vector<128x128xbf16>, vector<2x128xf32> -> vector<2x128xf32>
    %346 = arith.addf %338, %345 : vector<2x128xf32>
    %c74 = arith.constant 74 : index
    %c0_349 = arith.constant 0 : index
    %347 = vector.load %arg14[%c74, %c0_349] : memref<223x128xf32, #tpu.memory_space<vmem>>, vector<1x128xf32>
    %c218 = arith.constant 218 : index
    %c0_350 = arith.constant 0 : index
    %348 = vector.load %arg14[%c218, %c0_350] : memref<223x128xf32, #tpu.memory_space<vmem>>, vector<1x128xf32>
    %349 = tpu.concatenate %347, %348 in 0 : vector<1x128xf32>, vector<1x128xf32> -> vector<2x128xf32>
    %350 = arith.truncf %349 : vector<2x128xf32> to vector<2x128xbf16>
    %c13_351 = arith.constant 13 : index
    %c0_352 = arith.constant 0 : index
    %c0_353 = arith.constant 0 : index
    %351 = vector.load %arg6[%c13_351, %c0_352, %c0_353] : memref<16x128x128xbf16, #tpu.memory_space<vmem>>, vector<1x128x128xbf16>
    %352 = vector.shape_cast %351 : vector<1x128x128xbf16> to vector<128x128xbf16>
    %cst_354 = arith.constant dense<0.000000e+00> : vector<2x128xf32>
    %353 = tpu.matmul %350, %352, %cst_354 {dimension_numbers = #tpu.dot_dimension_numbers<[1], [0], [0], [1], [0, 0, 1, 1], [], []>} : vector<2x128xbf16>, vector<128x128xbf16>, vector<2x128xf32> -> vector<2x128xf32>
    %354 = arith.addf %346, %353 : vector<2x128xf32>
    %c76 = arith.constant 76 : index
    %c0_355 = arith.constant 0 : index
    %355 = vector.load %arg14[%c76, %c0_355] : memref<223x128xf32, #tpu.memory_space<vmem>>, vector<1x128xf32>
    %c220 = arith.constant 220 : index
    %c0_356 = arith.constant 0 : index
    %356 = vector.load %arg14[%c220, %c0_356] : memref<223x128xf32, #tpu.memory_space<vmem>>, vector<1x128xf32>
    %357 = tpu.concatenate %355, %356 in 0 : vector<1x128xf32>, vector<1x128xf32> -> vector<2x128xf32>
    %358 = arith.truncf %357 : vector<2x128xf32> to vector<2x128xbf16>
    %c14_357 = arith.constant 14 : index
    %c0_358 = arith.constant 0 : index
    %c0_359 = arith.constant 0 : index
    %359 = vector.load %arg6[%c14_357, %c0_358, %c0_359] : memref<16x128x128xbf16, #tpu.memory_space<vmem>>, vector<1x128x128xbf16>
    %360 = vector.shape_cast %359 : vector<1x128x128xbf16> to vector<128x128xbf16>
    %cst_360 = arith.constant dense<0.000000e+00> : vector<2x128xf32>
    %361 = tpu.matmul %358, %360, %cst_360 {dimension_numbers = #tpu.dot_dimension_numbers<[1], [0], [0], [1], [0, 0, 1, 1], [], []>} : vector<2x128xbf16>, vector<128x128xbf16>, vector<2x128xf32> -> vector<2x128xf32>
    %362 = arith.addf %354, %361 : vector<2x128xf32>
    %c78 = arith.constant 78 : index
    %c0_361 = arith.constant 0 : index
    %363 = vector.load %arg14[%c78, %c0_361] : memref<223x128xf32, #tpu.memory_space<vmem>>, vector<1x128xf32>
    %c222 = arith.constant 222 : index
    %c0_362 = arith.constant 0 : index
    %364 = vector.load %arg14[%c222, %c0_362] : memref<223x128xf32, #tpu.memory_space<vmem>>, vector<1x128xf32>
    %365 = tpu.concatenate %363, %364 in 0 : vector<1x128xf32>, vector<1x128xf32> -> vector<2x128xf32>
    %366 = arith.truncf %365 : vector<2x128xf32> to vector<2x128xbf16>
    %c15_363 = arith.constant 15 : index
    %c0_364 = arith.constant 0 : index
    %c0_365 = arith.constant 0 : index
    %367 = vector.load %arg6[%c15_363, %c0_364, %c0_365] : memref<16x128x128xbf16, #tpu.memory_space<vmem>>, vector<1x128x128xbf16>
    %368 = vector.shape_cast %367 : vector<1x128x128xbf16> to vector<128x128xbf16>
    %cst_366 = arith.constant dense<0.000000e+00> : vector<2x128xf32>
    %369 = tpu.matmul %366, %368, %cst_366 {dimension_numbers = #tpu.dot_dimension_numbers<[1], [0], [0], [1], [0, 0, 1, 1], [], []>} : vector<2x128xbf16>, vector<128x128xbf16>, vector<2x128xf32> -> vector<2x128xf32>
    %370 = arith.addf %362, %369 : vector<2x128xf32>
    %cst_367 = arith.constant 0.000000e+00 : f32
    %371 = vector.broadcast %cst_367 : f32 to vector<2x128xf32>
    %372 = arith.maximumf %370, %371 : vector<2x128xf32>
    %373 = arith.truncf %372 : vector<2x128xf32> to vector<2x128xbf16>
    %c0_368 = arith.constant 0 : index
    %c0_369 = arith.constant 0 : index
    %374 = vector.load %arg8[%c0_368, %c0_369] : memref<128x128xbf16, #tpu.memory_space<vmem>>, vector<128x128xbf16>
    %cst_370 = arith.constant dense<0.000000e+00> : vector<2x128xf32>
    %375 = tpu.matmul %373, %374, %cst_370 {dimension_numbers = #tpu.dot_dimension_numbers<[1], [0], [0], [1], [0, 0, 1, 1], [], []>} : vector<2x128xbf16>, vector<128x128xbf16>, vector<2x128xf32> -> vector<2x128xf32>
    %c0_371 = arith.constant 0 : index
    %c0_372 = arith.constant 0 : index
    %376 = vector.load %arg9[%c0_371, %c0_372] : memref<1x128xf32, #tpu.memory_space<vmem>>, vector<1x128xf32>
    %377 = vector.broadcast %376 : vector<1x128xf32> to vector<2x128xf32>
    %378 = arith.addf %375, %377 : vector<2x128xf32>
    %379 = tpu.iota {dimensions = array<i32: 1>} : vector<2x128xi32>
    %c10_i32 = arith.constant 10 : i32
    %380 = vector.broadcast %c10_i32 : i32 to vector<2x128xi32>
    %381 = arith.cmpi slt, %379, %380 : vector<2x128xi32>
    %cst_373 = arith.constant -1.000000e+30 : f32
    %382 = vector.broadcast %cst_373 : f32 to vector<2x128xf32>
    %383 = arith.select %381, %378, %382 : vector<2x128xi1>, vector<2x128xf32>
    %cst_374 = arith.constant dense<0xFF800000> : vector<2xf32>
    %384 = vector.multi_reduction <maximumf>, %383, %cst_374 [1] : vector<2x128xf32> to vector<2xf32>
    %385 = vector.shape_cast %384 : vector<2xf32> to vector<2x1xf32>
    %386 = vector.broadcast %385 : vector<2x1xf32> to vector<2x128xf32>
    %387 = arith.subf %383, %386 : vector<2x128xf32>
    %388 = math.exp %387 : vector<2x128xf32>
    %cst_375 = arith.constant dense<0.000000e+00> : vector<2xf32>
    %389 = vector.multi_reduction <add>, %388, %cst_375 [1] : vector<2x128xf32> to vector<2xf32>
    %390 = vector.shape_cast %389 : vector<2xf32> to vector<2x1xf32>
    %391 = math.log %390 : vector<2x1xf32>
    %392 = arith.addf %385, %391 : vector<2x1xf32>
    %393 = vector.broadcast %392 : vector<2x1xf32> to vector<2x128xf32>
    %394 = arith.subf %378, %393 : vector<2x128xf32>
    %c0_376 = arith.constant 0 : index
    %c0_377 = arith.constant 0 : index
    %395 = vector.load %arg10[%c0_376, %c0_377] : memref<2x128xf32, #tpu.memory_space<vmem>>, vector<2x128xf32>
    tpu.vector_store %arg10[%c0_376, %c0_377], %394 {strides = array<i32>} : memref<2x128xf32, #tpu.memory_space<vmem>>, vector<2x128xf32>,
    return
  }
  func.func @transform_0(%arg0: i32) -> (i32, i32) {
    %c0_i32 = arith.constant 0 : i32
    %c0_i32_0 = arith.constant 0 : i32
    return %arg0, %c0_i32 : i32, i32
  }
  func.func @transform_1(%arg0: i32) -> (i32, i32) {
    %c0_i32 = arith.constant 0 : i32
    %c0_i32_0 = arith.constant 0 : i32
    %c0_i32_1 = arith.constant 0 : i32
    return %c0_i32, %c0_i32_0 : i32, i32
  }
  func.func @transform_2(%arg0: i32) -> (i32, i32) {
    %c0_i32 = arith.constant 0 : i32
    %c0_i32_0 = arith.constant 0 : i32
    %c0_i32_1 = arith.constant 0 : i32
    return %c0_i32, %c0_i32_0 : i32, i32
  }
  func.func @transform_3(%arg0: i32) -> (i32, i32, i32) {
    %c0_i32 = arith.constant 0 : i32
    %c0_i32_0 = arith.constant 0 : i32
    %c0_i32_1 = arith.constant 0 : i32
    %c0_i32_2 = arith.constant 0 : i32
    return %c0_i32, %c0_i32_0, %c0_i32_1 : i32, i32, i32
  }
  func.func @transform_4(%arg0: i32) -> (i32, i32) {
    %c0_i32 = arith.constant 0 : i32
    %c0_i32_0 = arith.constant 0 : i32
    %c0_i32_1 = arith.constant 0 : i32
    return %c0_i32, %c0_i32_0 : i32, i32
  }
  func.func @transform_5(%arg0: i32) -> (i32, i32, i32) {
    %c0_i32 = arith.constant 0 : i32
    %c0_i32_0 = arith.constant 0 : i32
    %c0_i32_1 = arith.constant 0 : i32
    %c0_i32_2 = arith.constant 0 : i32
    return %c0_i32, %c0_i32_0, %c0_i32_1 : i32, i32, i32
  }
  func.func @transform_6(%arg0: i32) -> (i32, i32) {
    %c0_i32 = arith.constant 0 : i32
    %c0_i32_0 = arith.constant 0 : i32
    %c0_i32_1 = arith.constant 0 : i32
    return %c0_i32, %c0_i32_0 : i32, i32
  }
  func.func @transform_7(%arg0: i32) -> (i32, i32) {
    %c0_i32 = arith.constant 0 : i32
    %c0_i32_0 = arith.constant 0 : i32
    %c0_i32_1 = arith.constant 0 : i32
    return %c0_i32, %c0_i32_0 : i32, i32
  }
  func.func @transform_8(%arg0: i32) -> (i32, i32) {
    %c0_i32 = arith.constant 0 : i32
    %c0_i32_0 = arith.constant 0 : i32
    %c0_i32_1 = arith.constant 0 : i32
    return %c0_i32, %c0_i32_0 : i32, i32
  }
  func.func @transform_9(%arg0: i32) -> (i32, i32) {
    %c0_i32 = arith.constant 0 : i32
    %c0_i32_0 = arith.constant 0 : i32
    return %arg0, %c0_i32 : i32, i32
  }
}

</mosaic_0001>

<bundles_post_ra>
// kernel: simple_cnn_forward.1
= control target key start
LH: loop header
LB: loop body
LE: loop exit
PB: predicated region body
PF: predicated region fallthrough
CT: control target
= control target key end

     0   :  { %vm176_vm0 = vcmask 261120   ;;  %s17268_s0 = inlined_call_operand.vmem [shape: bf16[1152,32], index: 0, kind: input, shape index: {}]   ;;  %s17269_s1 = inlined_call_operand.vmem [shape: bf16[32,128], index: 1, kind: input, shape index: {}]   ;;  %s17270_s2 = inlined_call_operand.vmem [shape: f32[1,128], index: 2, kind: input, shape index: {}]   ;;  %s17271_s3 = inlined_call_operand.vmem [shape: bf16[25,128,128], index: 3, kind: input, shape index: {}]   ;;  %s17272_s4 = inlined_call_operand.vmem [shape: f32[1,128], index: 4, kind: input, shape index: {}]   ;;  %s17273_s5 = inlined_call_operand.vmem [shape: bf16[16,128,128], index: 5, kind: input, shape index: {}]   ;;  %s17274_s6 = inlined_call_operand.vmem [shape: f32[1,128], index: 6, kind: input, shape index: {}]   ;;  %s17275_s7 = inlined_call_operand.vmem [shape: bf16[128,128], index: 7, kind: input, shape index: {}]   ;;  %s17276_s8 = inlined_call_operand.vmem [shape: f32[1,128], index: 8, kind: input, shape index: {}]   ;;  %s17277_s9 = inlined_call_operand.hbm [shape: f32[2,128], index: 9, kind: output, shape index: {}]  }
   0x1   :  { %v12925_v0 = vld [vmem:[%s17269_s1 + $0x8] sm:$0xff]  ;;  %v12924_v3 = vld [vmem:[%s17269_s1] sm:$0xff]  ;;  %v12921_v7 = vld [vmem:[%s17268_s0 + $0x78] sm:$0xff] }
   0x2   :  { %v12945_v1 = vld [vmem:[%s17269_s1 + $0x8] sm:$0xff]  ;;  %237 = vmatpush.bf16.msra.mxu0 %v12925_v0  ;;  %13322 = vmatpush.bf16.msra.mxu3 %v12925_v0  ;;  %v12944_v4 = vld [vmem:[%s17269_s1] sm:$0xff]  ;;  %v12926_v8 = vld [vmem:[%s17268_s0 + $0x90] sm:$0xff] }
   0x3   :  { %v12965_v2 = vld [vmem:[%s17269_s1 + $0x8] sm:$0xff]  ;;  %604 = vmatpush.bf16.msra.mxu1 %v12945_v1  ;;  %v12964_v5 = vld [vmem:[%s17269_s1] sm:$0xff]  ;;  %v12993_v9 = vld [vmem:[%s17271_s3 + $0x38] sm:$0xff] }
   0x4   :  { %1007 = vmatpush.bf16.msra.mxu2 %v12965_v2  ;;  %v12906_v6 = vld [vmem:[%s17268_s0] sm:$0xff] }
   0x5   :  { %v12946_v10 = vld [vmem:[%s17268_s0 + $0x120] sm:$0xff] }
   0x6   :  { %238 = vmatpush.bf16.msra.mxu0 %v12924_v3  ;;  %13323 = vmatpush.bf16.msra.mxu3 %v12924_v3 }
   0x7   :  { %14 = vsyncpa [#allocation7], 0  ;;  %605 = vmatpush.bf16.msra.mxu1 %v12944_v4  ;;  %v12985_v11 = vld [vmem:[%s17269_s1 + $0x8] sm:$0xff]  ;;  %v12984_v12 = vld [vmem:[%s17269_s1] sm:$0xff]  ;;  %vm9057_vm1 = vcmask 1040384   ;;  %vm10515_vm3 = vcmask 1041408  }
   0x8   :  { %1008 = vmatpush.bf16.msra.mxu2 %v12964_v5  ;;  %v12907_v13 = vld [vmem:[%s17268_s0 + $0x8] sm:$0xff]  ;;  %v12922_v14 = vld [vmem:[%s17268_s0 + $0x80] sm:$0xff]  ;;  %v12927_v15 = vld [vmem:[%s17268_s0 + $0x98] sm:$0xff]  ;;  %s10537_s24 = sshll.u32 %s17277_s9, 4  ;;  %s10538_s24 = int_to_ptr.hbm [resolvable:$true] %s10537_s24 }
   0x9   :  { %10626 = vmatmul.msk.bf16.vlgmr.msra.gmra.mxu0 %vm176_vm0, %v12906_v6  ;;  %10641 = vmatmul.msk.bf16.vlgmr.msra.gmra.mxu3 %vm176_vm0, %v12921_v7  ;;  %v12947_v16 = vld [vmem:[%s17268_s0 + $0x128] sm:$0xff]  ;;  %v12992_v17 = vld [vmem:[%s17271_s3 + $0x30] sm:$0xff]  ;;  %v12928_v20 = vld [vmem:[%s17268_s0 + $0xa0] sm:$0xff] }
   0xa   :  { %1833 = vmatpush.bf16.msrb.mxu0 %v12993_v9  ;;  %10724 = vmatmul.msk.bf16.vlgmr.msra.gmra.mxu1 %vm176_vm0, %v12926_v8  ;;  %v12908_v18 = vld [vmem:[%s17268_s0 + $0x10] sm:$0xff]  ;;  %v12923_v19 = vld [vmem:[%s17268_s0 + $0x88] sm:$0xff]  ;;  %v12909_v22 = vld [vmem:[%s17268_s0 + $0x18] sm:$0xff] }
   0xb   :  { %10822 = vmatmul.msk.bf16.vlgmr.msra.gmra.mxu2 %vm176_vm0, %v12946_v10  ;;  %1410 = vmatpush.bf16.msrb.mxu3 %v12985_v11  ;;  %v12948_v21 = vld [vmem:[%s17268_s0 + $0x130] sm:$0xff]  ;;  %v12929_v24 = vld [vmem:[%s17268_s0 + $0xa8] sm:$0xff]  ;;  %v12949_v25 = vld [vmem:[%s17268_s0 + $0x138] sm:$0xff] }
   0xc   :  { %v12966_v23 = vld [vmem:[%s17268_s0 + $0x1b0] sm:$0xff]  ;;  %v12991_v26 = vld [vmem:[%s17271_s3 + $0x28] sm:$0xff]  ;;  %v12910_v27 = vld [vmem:[%s17268_s0 + $0x20] sm:$0xff] }
   0xd   :  { %v12967_v28 = vld [vmem:[%s17268_s0 + $0x1b8] sm:$0xff]  ;;  %v12930_v29 = vld [vmem:[%s17268_s0 + $0xb0] sm:$0xff]  ;;  %v12950_v30 = vld [vmem:[%s17268_s0 + $0x140] sm:$0xff] }
   0xe   :  { %1834 = vmatpush.bf16.msrb.mxu0 %v12992_v17  ;;  %v12911_v31 = vld [vmem:[%s17268_s0 + $0x28] sm:$0xff]  ;;  %v12968_v32 = vld [vmem:[%s17268_s0 + $0x1c0] sm:$0xff]  ;;  %v12931_v33 = vld [vmem:[%s17268_s0 + $0xb8] sm:$0xff] }
   0xf   :  { %1411 = vmatpush.bf16.msrb.mxu3 %v12984_v12  ;;  %v12951_v34 = vld [vmem:[%s17268_s0 + $0x148] sm:$0xff]  ;;  %v12990_v35 = vld [vmem:[%s17271_s3 + $0x20] sm:$0xff]  ;;  %v12912_v36 = vld [vmem:[%s17268_s0 + $0x30] sm:$0xff] }
  0x10   :  { %v12969_v37 = vld [vmem:[%s17268_s0 + $0x1c8] sm:$0xff]  ;;  %v12932_v38 = vld [vmem:[%s17268_s0 + $0xc0] sm:$0xff]  ;;  %v12952_v39 = vld [vmem:[%s17268_s0 + $0x150] sm:$0xff] }
  0x11   :  { %v12913_v40 = vld [vmem:[%s17268_s0 + $0x38] sm:$0xff]  ;;  %v12970_v41 = vld [vmem:[%s17268_s0 + $0x1d0] sm:$0xff]  ;;  %v12933_v42 = vld [vmem:[%s17268_s0 + $0xc8] sm:$0xff] }
  0x12   :  { %1835 = vmatpush.bf16.msrb.mxu0 %v12991_v26  ;;  %v12953_v43 = vld [vmem:[%s17268_s0 + $0x158] sm:$0xff]  ;;  %v12914_v45 = vld [vmem:[%s17268_s0 + $0x40] sm:$0xff]  ;;  %v12934_v48 = vld [vmem:[%s17268_s0 + $0xd0] sm:$0xff] }
  0x13   :  { %v12989_v44 = vld [vmem:[%s17271_s3 + $0x18] sm:$0xff]  ;;  %v12954_v49 = vld [vmem:[%s17268_s0 + $0x160] sm:$0xff]  ;;  %v12915_v57 = vld [vmem:[%s17268_s0 + $0x48] sm:$0xff] }
  0x14   :  { %v12971_v46 = vld [vmem:[%s17268_s0 + $0x1d8] sm:$0xff]  ;;  %v12972_v58 = vld [vmem:[%s17268_s0 + $0x1e0] sm:$0xff]  ;;  %v12955_v61 = vld [vmem:[%s17268_s0 + $0x168] sm:$0xff] }
  0x15   :  { %v12935_v60 = vld [vmem:[%s17268_s0 + $0xd8] sm:$0xff]  ;;  %v12988_v3 = vld [vmem:[%s17271_s3 + $0x10] sm:$0xff]  ;;  %v12973_v7 = vld [vmem:[%s17268_s0 + $0x1e8] sm:$0xff] }
  0x16   :  { %1836 = vmatpush.bf16.msrb.mxu0 %v12990_v35  ;;  %v12916_v6 = vld [vmem:[%s17268_s0 + $0x50] sm:$0xff]  ;;  %v12936_v9 = vld [vmem:[%s17268_s0 + $0xe0] sm:$0xff]  ;;  %v13001_v12 = vld [vmem:[%s17271_s3 + $0x78] sm:$0xff] }
  0x17   :  { %v12956_v10 = vld [vmem:[%s17268_s0 + $0x170] sm:$0xff]  ;;  %2120 = vmatpush.bf16.msrb.mxu1 %v13001_v12  ;;  %v13009_v17 = vld [vmem:[%s17271_s3 + $0xb8] sm:$0xff] }
  0x18   :  { %2404 = vmatpush.bf16.msrb.mxu2 %v13009_v17  ;;  %v12939_v17 = vld [vmem:[%s17268_s0 + $0xf8] sm:$0xff] }
  0x19   :  { %10627 = vmatmul.msk.bf16.gmra.mxu0 %vm176_vm0, %v12907_v13  ;;  %10642 = vmatmul.msk.bf16.gmra.mxu3 %vm176_vm0, %v12922_v14 }
  0x1a   :  { %10725 = vmatmul.msk.bf16.gmra.mxu1 %vm176_vm0, %v12927_v15  ;;  %1837 = vmatpush.bf16.msrb.mxu0 %v12989_v44  ;;  %v12975_v44 = vld [vmem:[%s17268_s0 + $0x1f8] sm:$0xff] }
  0x1b   :  { %10823 = vmatmul.msk.bf16.gmra.mxu2 %vm176_vm0, %v12947_v16 }
  0x1e   :  { %1838 = vmatpush.bf16.msrb.mxu0 %v12988_v3  ;;  %v13000_v3 = vld [vmem:[%s17271_s3 + $0x70] sm:$0xff] }
  0x1f   :  { %2121 = vmatpush.bf16.msrb.mxu1 %v13000_v3 }
  0x29   :  { %10628 = vmatmul.msk.bf16.gmra.mxu0 %vm176_vm0, %v12908_v18  ;;  %10643 = vmatmul.msk.bf16.gmra.mxu3 %vm176_vm0, %v12923_v19 }
  0x2a   :  { %10726 = vmatmul.msk.bf16.gmra.mxu1 %vm176_vm0, %v12928_v20  ;;  %v12917_v20 = vld [vmem:[%s17268_s0 + $0x58] sm:$0xff] }
  0x2b   :  { %10824 = vmatmul.msk.bf16.gmra.mxu2 %vm176_vm0, %v12948_v21  ;;  %v12974_v21 = vld [vmem:[%s17268_s0 + $0x1f0] sm:$0xff] }
  0x39   :  { %10629 = vmatmul.msk.bf16.gmra.mxu0 %vm176_vm0, %v12909_v22  ;;  %10920 = vmatmul.msk.bf16.vlgmr.msrb.gmra.mxu3 %vm176_vm0, %v12966_v23  ;;  %v12937_v23 = vld [vmem:[%s17268_s0 + $0xe8] sm:$0xff] }
  0x3a   :  { %10727 = vmatmul.msk.bf16.gmra.mxu1 %vm176_vm0, %v12929_v24  ;;  %v12957_v24 = vld [vmem:[%s17268_s0 + $0x178] sm:$0xff] }
  0x3b   :  { %10825 = vmatmul.msk.bf16.gmra.mxu2 %vm176_vm0, %v12949_v25 }
  0x49   :  { %10630 = vmatmul.msk.bf16.gmra.mxu0 %vm176_vm0, %v12910_v27  ;;  %10921 = vmatmul.msk.bf16.gmra.mxu3 %vm176_vm0, %v12967_v28  ;;  %v13716_v28 = vld [vmem:[%s17270_s2] ss:$0 sm:$0xff] }
  0x4a   :  { %10728 = vmatmul.msk.bf16.gmra.mxu1 %vm176_vm0, %v12930_v29  ;;  %v13017_v29 = vld [vmem:[%s17271_s3 + $0xf8] sm:$0xff] }
  0x4b   :  { %10826 = vmatmul.msk.bf16.gmra.mxu2 %vm176_vm0, %v12950_v30  ;;  %v12987_v30 = vld [vmem:[%s17271_s3 + $0x8] sm:$0xff]  ;;  %2688 = vmatpush.bf16.msra.mxu3 %v13017_v29  ;;  %v13016_v29 = vld [vmem:[%s17271_s3 + $0xf0] sm:$0xff] }
  0x4c   :  { %1839 = vmatpush.bf16.msrb.mxu0 %v12987_v30 }
  0x4f   :  { %2689 = vmatpush.bf16.msra.mxu3 %v13016_v29  ;;  %v12941_v29 = vld [vmem:[%s17268_s0 + $0x108] sm:$0xff] }
  0x59   :  { %10631 = vmatmul.msk.bf16.gmra.mxu0 %vm176_vm0, %v12911_v31  ;;  %10922 = vmatmul.msk.bf16.gmra.mxu3 %vm176_vm0, %v12968_v32 }
  0x5a   :  { %10729 = vmatmul.msk.bf16.gmra.mxu1 %vm176_vm0, %v12931_v33 }
  0x5b   :  { %10827 = vmatmul.msk.bf16.gmra.mxu2 %vm176_vm0, %v12951_v34 }
  0x69   :  { %10632 = vmatmul.msk.bf16.gmra.mxu0 %vm176_vm0, %v12912_v36  ;;  %10923 = vmatmul.msk.bf16.gmra.mxu3 %vm176_vm0, %v12969_v37 }
  0x6a   :  { %10730 = vmatmul.msk.bf16.gmra.mxu1 %vm176_vm0, %v12932_v38 }
  0x6b   :  { %10828 = vmatmul.msk.bf16.gmra.mxu2 %vm176_vm0, %v12952_v39 }
  0x79   :  { %10633 = vmatmul.msk.bf16.gmra.mxu0 %vm176_vm0, %v12913_v40  ;;  %10924 = vmatmul.msk.bf16.gmra.mxu3 %vm176_vm0, %v12970_v41 }
  0x7a   :  { %10731 = vmatmul.msk.bf16.gmra.mxu1 %vm176_vm0, %v12933_v42 }
  0x7b   :  { %10829 = vmatmul.msk.bf16.gmra.mxu2 %vm176_vm0, %v12953_v43  ;;  %v12918_v43 = vld [vmem:[%s17268_s0 + $0x60] sm:$0xff] }
  0x86   :  { %v13597_v47 = vpop.f32.mrf.mxu0 }
  0x87   :  { %v607_v50 = vpop.f32.mrf.mxu1 }
  0x88   :  { %v697_v26 = vmax.f32 %v13597_v47, %v607_v50  ;;  %v12958_v47 = vld [vmem:[%s17268_s0 + $0x180] sm:$0xff] }
  0x89   :  { %10634 = vmatmul.msk.bf16.gmra.mxu0 %vm176_vm0, %v12914_v45  ;;  %10925 = vmatmul.msk.bf16.gmra.mxu3 %vm176_vm0, %v12971_v46  ;;  %v12938_v46 = vld [vmem:[%s17268_s0 + $0xf0] sm:$0xff] }
  0x8a   :  { %10732 = vmatmul.msk.bf16.gmra.mxu1 %vm176_vm0, %v12934_v48 }
  0x8b   :  { %10830 = vmatmul.msk.bf16.gmra.mxu2 %vm176_vm0, %v12954_v49 }
  0x8c   :  { %v13609_v51 = vpop.f32.mrf.mxu3 }
  0x8e   :  { %v1010_v52 = vpop.f32.mrf.mxu2  ;;  %v13611_v53 = vpop.f32.mrf.mxu0 }
  0x8f   :  { %v13613_v54 = vpop.f32.mrf.mxu1  ;;  %v1100_v27 = vmax.f32 %v697_v26, %v1010_v52 }
  0x90   :  { %v698_v37 = vmax.f32 %v13611_v53, %v13613_v54 }
  0x94   :  { %v13615_v55 = vpop.f32.mrf.mxu3 }
  0x96   :  { %v13617_v56 = vpop.f32.mrf.mxu2  ;;  %v13625_v59 = vpop.f32.mrf.mxu0 }
  0x97   :  { %v13633_v62 = vpop.f32.mrf.mxu1  ;;  %v1101_v39 = vmax.f32 %v698_v37, %v13617_v56 }
  0x98   :  { %v699_v50 = vmax.f32 %v13625_v59, %v13633_v62 }
  0x99   :  { %10635 = vmatmul.msk.bf16.gmra.mxu0 %vm176_vm0, %v12915_v57  ;;  %10926 = vmatmul.msk.bf16.gmra.mxu3 %vm176_vm0, %v12972_v58 }
  0x9a   :  { %10733 = vmatmul.msk.bf16.gmra.mxu1 %vm176_vm0, %v12935_v60 }
  0x9b   :  { %10831 = vmatmul.msk.bf16.gmra.mxu2 %vm176_vm0, %v12955_v61 }
  0x9c   :  { %v13639_v63 = vpop.f32.mrf.mxu3 }
  0x9e   :  { %v13641_v0 = vpop.f32.mrf.mxu2  ;;  %v13643_v1 = vpop.f32.mrf.mxu0 }
  0x9f   :  { %v13645_v2 = vpop.f32.mrf.mxu1  ;;  %v1102_v53 = vmax.f32 %v699_v50, %v13641_v0 }
  0xa0   :  { %v700_v61 = vmax.f32 %v13643_v1, %v13645_v2  ;;  %v12919_v1 = vld [vmem:[%s17268_s0 + $0x68] sm:$0xff]  ;;  %v12976_v2 = vld [vmem:[%s17268_s0 + $0x200] sm:$0xff] }
  0xa4   :  { %v13650_v4 = vpop.f32.mrf.mxu3 }
  0xa6   :  { %v13652_v5 = vpop.f32.mrf.mxu2  ;;  %v13660_v8 = vpop.f32.mrf.mxu0 }
  0xa7   :  { %v13668_v11 = vpop.f32.mrf.mxu1  ;;  %v1103_v0 = vmax.f32 %v700_v61, %v13652_v5  ;;  %v12986_v5 = vld [vmem:[%s17271_s3] sm:$0xff] }
  0xa8   :  { %1840 = vmatpush.bf16.msrb.mxu0 %v12986_v5 }
  0xa9   :  { %10636 = vmatmul.msk.bf16.gmra.mxu0 %vm176_vm0, %v12916_v6  ;;  %10927 = vmatmul.msk.bf16.gmra.mxu3 %vm176_vm0, %v12973_v7  ;;  %v13008_v6 = vld [vmem:[%s17271_s3 + $0xb0] sm:$0xff] }
  0xaa   :  { %10734 = vmatmul.msk.bf16.gmra.mxu1 %vm176_vm0, %v12936_v9  ;;  %2405 = vmatpush.bf16.msrb.mxu2 %v13008_v6 }
  0xab   :  { %10832 = vmatmul.msk.bf16.gmra.mxu2 %vm176_vm0, %v12956_v10 }
  0xac   :  { %v13677_v13 = vpop.f32.mrf.mxu3 }
  0xae   :  { %v13679_v14 = vpop.f32.mrf.mxu2  ;;  %v13681_v15 = vpop.f32.mrf.mxu0 }
  0xaf   :  { %v13683_v16 = vpop.f32.mrf.mxu1 }
  0xb4   :  { %v13688_v18 = vpop.f32.mrf.mxu3 }
  0xb6   :  { %v13690_v19 = vpop.f32.mrf.mxu2  ;;  %v13698_v22 = vpop.f32.mrf.mxu0 }
  0xb7   :  { %v13706_v25 = vpop.f32.mrf.mxu1 }
  0xb9   :  { %10637 = vmatmul.msk.bf16.gmra.mxu0 %vm176_vm0, %v12917_v20  ;;  %10928 = vmatmul.msk.bf16.gmra.mxu3 %vm176_vm0, %v12974_v21  ;;  %v12959_v20 = vld [vmem:[%s17268_s0 + $0x188] sm:$0xff] }
  0xba   :  { %10735 = vmatmul.msk.bf16.gmra.mxu1 %vm176_vm0, %v12937_v23 }
  0xbb   :  { %10833 = vmatmul.msk.bf16.gmra.mxu2 %vm176_vm0, %v12957_v24  ;;  %v701_v24 = vmax.f32 %v13660_v8, %v13668_v11 }
  0xbc   :  { %v1413_v31 = vpop.f32.mrf.mxu3 }
  0xbd   :  { %v1503_v33 = vmax.f32 %v1100_v27, %v1413_v31  ;;  %v1104_v27 = vmax.f32 %v701_v24, %v13679_v14  ;;  %v702_v14 = vmax.f32 %v13681_v15, %v13683_v16  ;;  %v12940_v16 = vld [vmem:[%s17268_s0 + $0x100] sm:$0xff] }
  0xbe   :  { %v13724_v32 = vpop.f32.mrf.mxu2  ;;  %v13726_v34 = vpop.f32.mrf.mxu0  ;;  %v12998_v24 = vld [vmem:[%s17271_s3 + $0x60] sm:$0xff] }
  0xbf   :  { %v13729_v35 = vadd.f32 %v13716_v28, %v1503_v33  ;;  %v13731_v36 = vpop.f32.mrf.mxu1 }
  0xc1   :  { %v1651_v38 = vmax.f32 %v13729_v35, 0.0  ;;  %v13005_v35 = vld [vmem:[%s17271_s3 + $0x98] sm:$0xff] }
  0xc3   :  { %1687 = vst [vmem:[#allocation3] sm:$0xff] %v1651_v38 }
  0xc4   :  { %v1415_v40 = vpop.f32.mrf.mxu3 }
  0xc5   :  { %v1504_v42 = vmax.f32 %v1101_v39, %v1415_v40  ;;  %v1105_v40 = vmax.f32 %v702_v14, %v13690_v19  ;;  %v12960_v19 = vld [vmem:[%s17268_s0 + $0x190] sm:$0xff] }
  0xc6   :  { %v13739_v41 = vpop.f32.mrf.mxu2  ;;  %v13747_v45 = vpop.f32.mrf.mxu0 }
  0xc7   :  { %v13756_v48 = vadd.f32 %v13716_v28, %v1504_v42  ;;  %v13758_v49 = vpop.f32.mrf.mxu1 }
  0xc9   :  { %v1652_v52 = vmax.f32 %v13756_v48, 0.0  ;;  %10638 = vmatmul.msk.bf16.gmra.mxu0 %vm176_vm0, %v12918_v43  ;;  %10929 = vmatmul.msk.bf16.gmra.mxu3 %vm176_vm0, %v12975_v44 }
  0xca   :  { %10736 = vmatmul.msk.bf16.gmra.mxu1 %vm176_vm0, %v12938_v46  ;;  %v12920_v46 = vld [vmem:[%s17268_s0 + $0x70] sm:$0xff] }
  0xcb   :  { %10834 = vmatmul.msk.bf16.gmra.mxu2 %vm176_vm0, %v12958_v47  ;;  %1688 = vst [vmem:[#allocation3 + $0x8] sm:$0xff] %v1652_v52  ;;  %v12977_v47 = vld [vmem:[%s17268_s0 + $0x208] sm:$0xff] }
  0xcc   :  { %v1418_v54 = vpop.f32.mrf.mxu3 }
  0xcd   :  { %v1505_v57 = vmax.f32 %v1102_v53, %v1418_v54  ;;  %v703_v54 = vmax.f32 %v13698_v22, %v13706_v25 }
  0xce   :  { %v13770_v56 = vpop.f32.mrf.mxu2  ;;  %v13772_v58 = vpop.f32.mrf.mxu0 }
  0xcf   :  { %v13775_v59 = vadd.f32 %v13716_v28, %v1505_v57  ;;  %v13777_v60 = vpop.f32.mrf.mxu1  ;;  %v1106_v61 = vmax.f32 %v703_v54, %v13724_v32  ;;  %v12999_v32 = vld [vmem:[%s17271_s3 + $0x68] sm:$0xff] }
  0xd0   :  { %2122 = vmatpush.bf16.msrb.mxu1 %v12999_v32 }
  0xd1   :  { %v1653_v62 = vmax.f32 %v13775_v59, 0.0 }
  0xd3   :  { %1689 = vst [vmem:[#allocation3 + $0x10] sm:$0xff] %v1653_v62 }
  0xd4   :  { %v1420_v7 = vpop.f32.mrf.mxu3  ;;  %2123 = vmatpush.bf16.msrb.mxu1 %v12998_v24  ;;  %v12942_v24 = vld [vmem:[%s17268_s0 + $0x110] sm:$0xff] }
  0xd5   :  { %v1506_v10 = vmax.f32 %v1103_v0, %v1420_v7 }
  0xd6   :  { %v13791_v9 = vpop.f32.mrf.mxu2  ;;  %v13802_v12 = vpop.f32.mrf.mxu0 }
  0xd7   :  { %v13811_v21 = vadd.f32 %v13716_v28, %v1506_v10  ;;  %v13813_v23 = vpop.f32.mrf.mxu1  ;;  %v704_v10 = vmax.f32 %v13726_v34, %v13731_v36  ;;  %v12978_v36 = vld [vmem:[%s17268_s0 + $0x210] sm:$0xff] }
  0xd9   :  { %v1654_v26 = vmax.f32 %v13811_v21, 0.0  ;;  %10639 = vmatmul.msk.bf16.gmra.mxu0 %vm176_vm0, %v12919_v1  ;;  %10930 = vmatmul.msk.bf16.gmra.mxu3 %vm176_vm0, %v12976_v2  ;;  %v13007_v2 = vld [vmem:[%s17271_s3 + $0xa8] sm:$0xff]  ;;  %v1107_v5 = vmax.f32 %v704_v10, %v13739_v41  ;;  %v13006_v41 = vld [vmem:[%s17271_s3 + $0xa0] sm:$0xff] }
  0xda   :  { %10737 = vmatmul.msk.bf16.gmra.mxu1 %vm176_vm0, %v12939_v17  ;;  %2406 = vmatpush.bf16.msrb.mxu2 %v13007_v2  ;;  %v13003_v10 = vld [vmem:[%s17271_s3 + $0x88] sm:$0xff] }
  0xdb   :  { %10835 = vmatmul.msk.bf16.gmra.mxu2 %vm176_vm0, %v12959_v20  ;;  %1690 = vst [vmem:[#allocation3 + $0x18] sm:$0xff] %v1654_v26  ;;  %v13015_v2 = vld [vmem:[%s17271_s3 + $0xe8] sm:$0xff] }
  0xdc   :  { %v1423_v8 = vpop.f32.mrf.mxu3  ;;  %2690 = vmatpush.bf16.msra.mxu3 %v13015_v2 }
  0xdd   :  { %v1507_v30 = vmax.f32 %v1104_v27, %v1423_v8  ;;  %v12961_v8 = vld [vmem:[%s17268_s0 + $0x198] sm:$0xff] }
  0xde   :  { %v13828_v11 = vpop.f32.mrf.mxu2  ;;  %v13830_v31 = vpop.f32.mrf.mxu0  ;;  %2407 = vmatpush.bf16.msrb.mxu2 %v13006_v41  ;;  %v12962_v41 = vld [vmem:[%s17268_s0 + $0x1a0] sm:$0xff] }
  0xdf   :  { %v13833_v33 = vadd.f32 %v13716_v28, %v1507_v30  ;;  %v13835_v37 = vpop.f32.mrf.mxu1 }
  0xe1   :  { %v1655_v39 = vmax.f32 %v13833_v33, 0.0 }
  0xe2   :  { %2408 = vmatpush.bf16.msrb.mxu2 %v13005_v35  ;;  %v707_v35 = vmax.f32 %v13802_v12, %v13813_v23 }
  0xe3   :  { %1691 = vst [vmem:[#allocation3 + $0x20] sm:$0xff] %v1655_v39 }
  0xe4   :  { %v1425_v42 = vpop.f32.mrf.mxu3 }
  0xe5   :  { %v1508_v44 = vmax.f32 %v1105_v40, %v1425_v42  ;;  %v1754_v40 = vpack.c.bf16 %v1652_v52, %v1651_v38  ;;  %v705_v42 = vmax.f32 %v13747_v45, %v13758_v49  ;;  %v13025_v45 = vld [vmem:[%s17271_s3 + $0x138] sm:$0xff] }
  0xe6   :  { %v13843_v43 = vpop.f32.mrf.mxu2  ;;  %v13851_v15 = vpop.f32.mrf.mxu0  ;;  %2972 = vmatpush.bf16.msra.mxu0 %v13025_v45 }
  0xe7   :  { %v13860_v50 = vadd.f32 %v13716_v28, %v1508_v44  ;;  %v13862_v53 = vpop.f32.mrf.mxu1  ;;  %v1108_v38 = vmax.f32 %v705_v42, %v13770_v56  ;;  %v13004_v56 = vld [vmem:[%s17271_s3 + $0x90] sm:$0xff] }
  0xe8   :  { %2409 = vmatpush.bf16.msrb.mxu2 %v13004_v56 }
  0xe9   :  { %v1656_v57 = vmax.f32 %v13860_v50, 0.0  ;;  %10640 = vmatmul.msk.bf16.gmra.mxu0 %vm176_vm0, %v12920_v46  ;;  %10931 = vmatmul.msk.bf16.gmra.mxu3 %vm176_vm0, %v12977_v47  ;;  %v12997_v46 = vld [vmem:[%s17271_s3 + $0x58] sm:$0xff]  ;;  %v12996_v47 = vld [vmem:[%s17271_s3 + $0x50] sm:$0xff] }
  0xea   :  { %10738 = vmatmul.msk.bf16.gmra.mxu1 %vm176_vm0, %v12940_v16 }
  0xeb   :  { %10836 = vmatmul.msk.bf16.gmra.mxu2 %vm176_vm0, %v12960_v19  ;;  %1692 = vst [vmem:[#allocation3 + $0x28] sm:$0xff] %v1656_v57  ;;  %2124 = vmatpush.bf16.msrb.mxu1 %v12997_v46 }
  0xec   :  { %v1428_v0 = vpop.f32.mrf.mxu3  ;;  %2410 = vmatpush.bf16.msrb.mxu2 %v13003_v10  ;;  %v12980_v10 = vld [vmem:[%s17268_s0 + $0x220] sm:$0xff] }
  0xed   :  { %v1509_v6 = vmax.f32 %v1106_v61, %v1428_v0  ;;  %v706_v61 = vmax.f32 %v13772_v58, %v13777_v60 }
  0xee   :  { %v13874_v3 = vpop.f32.mrf.mxu2  ;;  %v13876_v22 = vpop.f32.mrf.mxu0 }
  0xef   :  { %v13879_v25 = vadd.f32 %v13716_v28, %v1509_v6  ;;  %v13881_v7 = vpop.f32.mrf.mxu1  ;;  %2125 = vmatpush.bf16.msrb.mxu1 %v12996_v47  ;;  %v12995_v6 = vld [vmem:[%s17271_s3 + $0x48] sm:$0xff]  ;;  %v1109_v32 = vmax.f32 %v706_v61, %v13791_v9  ;;  %v12994_v9 = vld [vmem:[%s17271_s3 + $0x40] sm:$0xff] }
  0xf1   :  { %v1657_v1 = vmax.f32 %v13879_v25, 0.0  ;;  %v13013_v25 = vld [vmem:[%s17271_s3 + $0xd8] sm:$0xff] }
  0xf3   :  { %1693 = vst [vmem:[#allocation3 + $0x30] sm:$0xff] %v1657_v1  ;;  %2126 = vmatpush.bf16.msrb.mxu1 %v12995_v6 }
  0xf4   :  { %v1430_v17 = vpop.f32.mrf.mxu3 }
  0xf5   :  { %v1510_v34 = vmax.f32 %v1107_v5, %v1430_v17  ;;  %v12979_v17 = vld [vmem:[%s17268_s0 + $0x218] sm:$0xff] }
  0xf6   :  { %v13895_v20 = vpop.f32.mrf.mxu2  ;;  %v13906_v27 = vpop.f32.mrf.mxu0 }
  0xf7   :  { %v13915_v30 = vadd.f32 %v13716_v28, %v1510_v34  ;;  %v13917_v14 = vpop.f32.mrf.mxu1  ;;  %v13002_v34 = vld [vmem:[%s17271_s3 + $0x80] sm:$0xff]  ;;  %2127 = vmatpush.bf16.msrb.mxu1 %v12994_v9 }
  0xf8   :  { %2411 = vmatpush.bf16.msrb.mxu2 %v13002_v34  ;;  %v709_v34 = vmax.f32 %v13851_v15, %v13862_v53 }
  0xf9   :  { %v1658_v44 = vmax.f32 %v13915_v30, 0.0  ;;  %10932 = vmatmul.msk.bf16.gmra.mxu3 %vm176_vm0, %v12978_v36  ;;  %1841 = vmatmul.bf16.vlgmr.msrb.gmra.mxu0 %v1754_v40  ;;  %v1755_v40 = vpack.c.bf16 %v1654_v26, %v1653_v62  ;;  %v1110_v62 = vmax.f32 %v707_v35, %v13828_v11 }
  0xfa   :  { %10739 = vmatmul.msk.bf16.gmra.mxu1 %vm176_vm0, %v12941_v29  ;;  %v13999_v42 = vld [vmem:[#allocation3 + $0x30] sm:$0xff]  ;;  %v1112_v33 = vmax.f32 %v709_v34, %v13874_v3  ;;  %v710_v3 = vmax.f32 %v13876_v22, %v13881_v7 }
  0xfb   :  { %10837 = vmatmul.msk.bf16.gmra.mxu2 %vm176_vm0, %v12961_v8  ;;  %1694 = vst [vmem:[#allocation3 + $0x38] sm:$0xff] %v1658_v44  ;;  %v2011_v22 = vld [vmem:[#allocation3 + $0x9] sm:$0xff] }
  0xfc   :  { %v1433_v48 = vpop.f32.mrf.mxu3  ;;  %v2295_v7 = vld [vmem:[#allocation3 + $0xa] sm:$0xff] }
  0xfd   :  { %v1511_v52 = vmax.f32 %v1108_v38, %v1433_v48 }
  0xfe   :  { %v13941_v49 = vpop.f32.mrf.mxu2  ;;  %v13949_v16 = vpop.f32.mrf.mxu0 }
  0xff   :  { %v13952_v19 = vadd.f32 %v13716_v28, %v1511_v52  ;;  %v13954_v54 = vpop.f32.mrf.mxu1  ;;  %v708_v52 = vmax.f32 %v13830_v31, %v13835_v37  ;;  %v12943_v31 = vld [vmem:[%s17268_s0 + $0x118] sm:$0xff]  ;;  %v12963_v37 = vld [vmem:[%s17268_s0 + $0x1a8] sm:$0xff] }
 0x101   :  { %v1659_v0 = vmax.f32 %v13952_v19, 0.0  ;;  %v1111_v11 = vmax.f32 %v708_v52, %v13843_v43 }
 0x102   :  { %v14001_v46 = vld [vmem:[#allocation3 + $0x38] sm:$0xff] }
 0x103   :  { %1695 = vst [vmem:[#allocation3 + $0x40] sm:$0xff] %v1659_v0 }
 0x104   :  { %v1435_v58 = vpop.f32.mrf.mxu3 }
 0x105   :  { %v1512_v5 = vmax.f32 %v1109_v32, %v1435_v58  ;;  %v1756_v58 = vpack.c.bf16 %v1656_v57, %v1655_v39  ;;  %v13024_v39 = vld [vmem:[%s17271_s3 + $0x130] sm:$0xff] }
 0x106   :  { %v13971_v60 = vpop.f32.mrf.mxu2  ;;  %v13982_v36 = vpop.f32.mrf.mxu0  ;;  %2973 = vmatpush.bf16.msra.mxu0 %v13024_v39 }
 0x107   :  { %v13991_v29 = vadd.f32 %v13716_v28, %v1512_v5  ;;  %v13993_v8 = vpop.f32.mrf.mxu1 }
 0x109   :  { %v1660_v38 = vmax.f32 %v13991_v29, 0.0  ;;  %10933 = vmatmul.msk.bf16.gmra.mxu3 %vm176_vm0, %v12979_v17  ;;  %1846 = vmatmul.bf16.gmra.mxu0 %v1755_v40 }
 0x10a   :  { %10740 = vmatmul.msk.bf16.gmra.mxu1 %vm176_vm0, %v12942_v24  ;;  %v14051_v5 = vld [vmem:[#allocation3 + $0x40] sm:$0xff] }
 0x10b   :  { %10838 = vmatmul.msk.bf16.gmra.mxu2 %vm176_vm0, %v12962_v41  ;;  %1696 = vst [vmem:[#allocation3 + $0x48] sm:$0xff] %v1660_v38 }
 0x10c   :  { %v1438_v21 = vpop.f32.mrf.mxu3  ;;  %17288 = vst [vmem:[#allocation9_spill] sm:$0xff] %v14051_v5 }
 0x10d   :  { %v1513_v12 = vmax.f32 %v1110_v62, %v1438_v21  ;;  %v1113_v62 = vmax.f32 %v710_v3, %v13895_v20  ;;  %v13014_v21 = vld [vmem:[%s17271_s3 + $0xe0] sm:$0xff]  ;;  %v711_v3 = vmax.f32 %v13906_v27, %v13917_v14  ;;  %v13012_v14 = vld [vmem:[%s17271_s3 + $0xd0] sm:$0xff] }
 0x10e   :  { %v14014_v26 = vpop.f32.mrf.mxu2  ;;  %v14016_v23 = vpop.f32.mrf.mxu0  ;;  %2691 = vmatpush.bf16.msra.mxu3 %v13014_v21  ;;  %v2010_v20 = vld [vmem:[#allocation3 + $0x1] sm:$0xff] }
 0x10f   :  { %v14019_v45 = vadd.f32 %v13716_v28, %v1513_v12  ;;  %v14021_v48 = vpop.f32.mrf.mxu1  ;;  %v2040_v39 = vpack.c.bf16 %v2011_v22, %v2010_v20  ;;  %v13011_v22 = vld [vmem:[%s17271_s3 + $0xc8] sm:$0xff] }
 0x110   :  { %v13023_v20 = vld [vmem:[%s17271_s3 + $0x128] sm:$0xff] }
 0x111   :  { %v1661_v47 = vmax.f32 %v14019_v45, 0.0  ;;  %2974 = vmatpush.bf16.msra.mxu0 %v13023_v20 }
 0x112   :  { %v14053_v17 = vld [vmem:[#allocation3 + $0x48] sm:$0xff]  ;;  %2692 = vmatpush.bf16.msra.mxu3 %v13013_v25 }
 0x113   :  { %1697 = vst [vmem:[#allocation3 + $0x50] sm:$0xff] %v1661_v47 }
 0x114   :  { %v1440_v56 = vpop.f32.mrf.mxu3  ;;  %17289 = vst [vmem:[#allocation10_spill] sm:$0xff] %v14053_v17 }
 0x115   :  { %v1514_v6 = vmax.f32 %v1111_v11, %v1440_v56  ;;  %v12981_v56 = vld [vmem:[%s17268_s0 + $0x228] sm:$0xff] }
 0x116   :  { %v14029_v61 = vpop.f32.mrf.mxu2  ;;  %v14034_v32 = vpop.f32.mrf.mxu0  ;;  %2693 = vmatpush.bf16.msra.mxu3 %v13012_v14  ;;  %v2296_v14 = vld [vmem:[#allocation3 + $0x12] sm:$0xff] }
 0x117   :  { %v14043_v43 = vadd.f32 %v13716_v28, %v1514_v6  ;;  %v14045_v2 = vpop.f32.mrf.mxu1 }
 0x119   :  { %v1662_v24 = vmax.f32 %v14043_v43, 0.0  ;;  %10934 = vmatmul.msk.bf16.gmra.mxu3 %vm176_vm0, %v12980_v10  ;;  %1851 = vmatmul.bf16.gmra.mxu0 %v1756_v58  ;;  %v2294_v58 = vld [vmem:[#allocation3 + $0x2] sm:$0xff] }
 0x11a   :  { %10741 = vmatmul.msk.bf16.gmra.mxu1 %vm176_vm0, %v12943_v31  ;;  %v14103_v34 = vld [vmem:[#allocation3 + $0x50] sm:$0xff]  ;;  %2694 = vmatpush.bf16.msra.mxu3 %v13011_v22 }
 0x11b   :  { %10839 = vmatmul.msk.bf16.gmra.mxu2 %vm176_vm0, %v12963_v37  ;;  %1698 = vst [vmem:[#allocation3 + $0x58] sm:$0xff] %v1662_v24  ;;  %v1757_v37 = vpack.c.bf16 %v1658_v44, %v1657_v1  ;;  %v1114_v1 = vmax.f32 %v711_v3, %v13941_v49  ;;  %v712_v49 = vmax.f32 %v13949_v16, %v13954_v54  ;;  %v12982_v54 = vld [vmem:[%s17268_s0 + $0x230] sm:$0xff] }
 0x11c   :  { %v1443_v50 = vpop.f32.mrf.mxu3  ;;  %17290 = vst [vmem:[#allocation11_spill] sm:$0xff] %v14103_v34 }
 0x11d   :  { %v1515_v53 = vmax.f32 %v1112_v33, %v1443_v50  ;;  %v2324_v50 = vpack.c.bf16 %v2295_v7, %v2294_v58  ;;  %v1115_v7 = vmax.f32 %v712_v49, %v13971_v60  ;;  %v2013_v58 = vld [vmem:[#allocation3 + $0x19] sm:$0xff] }
 0x11e   :  { %v14069_v15 = vpop.f32.mrf.mxu2  ;;  %v14071_v57 = vpop.f32.mrf.mxu0  ;;  %v13010_v60 = vld [vmem:[%s17271_s3 + $0xc0] sm:$0xff] }
 0x11f   :  { %v14074_v41 = vadd.f32 %v13716_v28, %v1515_v53  ;;  %v14076_v40 = vpop.f32.mrf.mxu1  ;;  %2695 = vmatpush.bf16.msra.mxu3 %v13010_v60 }
 0x121   :  { %v1663_v35 = vmax.f32 %v14074_v41, 0.0 }
 0x122   :  { %v14105_v33 = vld [vmem:[#allocation3 + $0x58] sm:$0xff] }
 0x123   :  { %1699 = vst [vmem:[#allocation3 + $0x60] sm:$0xff] %v1663_v35 }
 0x124   :  { %v1445_v12 = vpop.f32.mrf.mxu3  ;;  %17291 = vst [vmem:[#allocation12_spill] sm:$0xff] %v14105_v33 }
 0x125   :  { %v1516_v11 = vmax.f32 %v1113_v62, %v1445_v12 }
 0x126   :  { %v14087_v52 = vpop.f32.mrf.mxu2  ;;  %v14092_v6 = vpop.f32.mrf.mxu0 }
 0x127   :  { %v14095_v10 = vadd.f32 %v13716_v28, %v1516_v11  ;;  %v14097_v31 = vpop.f32.mrf.mxu1 }
 0x129   :  { %v1664_v62 = vmax.f32 %v14095_v10, 0.0  ;;  %10935 = vmatmul.msk.bf16.gmra.mxu3 %vm176_vm0, %v12981_v56  ;;  %1856 = vmatmul.bf16.gmra.mxu0 %v1757_v37 }
 0x12a   :  { %2128 = vmatmul.bf16.vlgmr.msrb.gmra.mxu1 %v2040_v39 }
 0x12b   :  { %2412 = vmatmul.bf16.vlgmr.msrb.gmra.mxu2 %v2324_v50  ;;  %1700 = vst [vmem:[#allocation3 + $0x68] sm:$0xff] %v1664_v62  ;;  %v2297_v50 = vld [vmem:[#allocation3 + $0x1a] sm:$0xff] }
 0x12c   :  { %v1448_v30 = vpop.f32.mrf.mxu3  ;;  %v2325_v22 = vpack.c.bf16 %v2297_v50, %v2296_v14  ;;  %v2299_v14 = vld [vmem:[#allocation3 + $0x2a] sm:$0xff] }
 0x12d   :  { %v1517_v27 = vmax.f32 %v1114_v1, %v1448_v30  ;;  %v1758_v30 = vpack.c.bf16 %v1660_v38, %v1659_v0 }
 0x12e   :  { %v14119_v44 = vpop.f32.mrf.mxu2  ;;  %v14124_v21 = vpop.f32.mrf.mxu0 }
 0x12f   :  { %v14127_v12 = vadd.f32 %v13716_v28, %v1517_v27  ;;  %v14129_v11 = vpop.f32.mrf.mxu1  ;;  %v2012_v27 = vld [vmem:[#allocation3 + $0x11] sm:$0xff] }
 0x130   :  { %v2041_v49 = vpack.c.bf16 %v2013_v58, %v2012_v27  ;;  %v714_v58 = vmax.f32 %v14016_v23, %v14021_v48  ;;  %v2015_v27 = vld [vmem:[#allocation3 + $0x29] sm:$0xff] }
 0x131   :  { %v1665_v56 = vmax.f32 %v14127_v12, 0.0 }
 0x133   :  { %1701 = vst [vmem:[#allocation3 + $0x70] sm:$0xff] %v1665_v56 }
 0x134   :  { %v1450_v37 = vpop.f32.mrf.mxu3 }
 0x135   :  { %v1518_v16 = vmax.f32 %v1115_v7, %v1450_v37  ;;  %v713_v7 = vmax.f32 %v13982_v36, %v13993_v8 }
 0x136   :  { %v14143_v39 = vpop.f32.mrf.mxu2  ;;  %v14151_v3 = vpop.f32.mrf.mxu0 }
 0x137   :  { %v14154_v25 = vadd.f32 %v13716_v28, %v1518_v16  ;;  %v14156_v1 = vpop.f32.mrf.mxu1  ;;  %v1116_v19 = vmax.f32 %v713_v7, %v14014_v26  ;;  %v1117_v26 = vmax.f32 %v714_v58, %v14029_v61  ;;  %v1759_v61 = vpack.c.bf16 %v1662_v24, %v1661_v47  ;;  %v2298_v7 = vld [vmem:[#allocation3 + $0x22] sm:$0xff] }
 0x139   :  { %v1666_v20 = vmax.f32 %v14154_v25, 0.0  ;;  %10936 = vmatmul.msk.bf16.gmra.mxu3 %vm176_vm0, %v12982_v54  ;;  %1861 = vmatmul.bf16.gmra.mxu0 %v1758_v30  ;;  %v12983_v30 = vld [vmem:[%s17268_s0 + $0x238] sm:$0xff] }
 0x13a   :  { %2133 = vmatmul.bf16.gmra.mxu1 %v2041_v49 }
 0x13b   :  { %2417 = vmatmul.bf16.gmra.mxu2 %v2325_v22  ;;  %1702 = vst [vmem:[#allocation3 + $0x78] sm:$0xff] %v1666_v20  ;;  %v2014_v22 = vld [vmem:[#allocation3 + $0x21] sm:$0xff] }
 0x13c   :  { %v1453_v0 = vpop.f32.mrf.mxu3 }
 0x13d   :  { %v1519_v38 = vmax.f32 %v1116_v19, %v1453_v0  ;;  %v2042_v19 = vpack.c.bf16 %v2015_v27, %v2014_v22  ;;  %v2326_v0 = vpack.c.bf16 %v2299_v14, %v2298_v7  ;;  %v2579_v14 = vld [vmem:[#allocation3 + $0xb] sm:$0xff]  ;;  %v2017_v7 = vld [vmem:[#allocation3 + $0x39] sm:$0xff] }
 0x13e   :  { %v14169_v29 = vpop.f32.mrf.mxu2  ;;  %v14171_v37 = vpop.f32.mrf.mxu0 }
 0x13f   :  { %v14174_v36 = vadd.f32 %v13716_v28, %v1519_v38  ;;  %v14176_v8 = vpop.f32.mrf.mxu1  ;;  %v715_v38 = vmax.f32 %v14034_v32, %v14045_v2 }
 0x141   :  { %v1667_v16 = vmax.f32 %v14174_v36, 0.0 }
 0x143   :  { %1703 = vst [vmem:[#allocation3 + $0x80] sm:$0xff] %v1667_v16 }
 0x144   :  { %v1455_v54 = vpop.f32.mrf.mxu3 }
 0x145   :  { %v1520_v60 = vmax.f32 %v1117_v26, %v1455_v54  ;;  %v1118_v26 = vmax.f32 %v715_v38, %v14069_v15  ;;  %v716_v54 = vmax.f32 %v14071_v57, %v14076_v40  ;;  %v2578_v40 = vld [vmem:[#allocation3 + $0x3] sm:$0xff]  ;;  %v1760_v38 = vpack.c.bf16 %v1664_v62, %v1663_v35 }
 0x146   :  { %v14184_v50 = vpop.f32.mrf.mxu2  ;;  %v14189_v49 = vpop.f32.mrf.mxu0 }
 0x147   :  { %v14192_v23 = vadd.f32 %v13716_v28, %v1520_v60  ;;  %v14194_v48 = vpop.f32.mrf.mxu1  ;;  %v1119_v15 = vmax.f32 %v716_v54, %v14087_v52 }
 0x149   :  { %v1668_v58 = vmax.f32 %v14192_v23, 0.0  ;;  %10937 = vmatmul.msk.bf16.gmra.mxu3 %vm176_vm0, %v12983_v30  ;;  %1866 = vmatmul.bf16.gmra.mxu0 %v1759_v61  ;;  %v13022_v30 = vld [vmem:[%s17271_s3 + $0x120] sm:$0xff] }
 0x14a   :  { %2138 = vmatmul.bf16.gmra.mxu1 %v2042_v19  ;;  %v2301_v19 = vld [vmem:[#allocation3 + $0x3a] sm:$0xff]  ;;  %2975 = vmatpush.bf16.msra.mxu0 %v13022_v30  ;;  %v717_v30 = vmax.f32 %v14092_v6, %v14097_v31  ;;  %v718_v31 = vmax.f32 %v14124_v21, %v14129_v11  ;;  %v1761_v11 = vpack.c.bf16 %v1666_v20, %v1665_v56 }
 0x14b   :  { %2422 = vmatmul.bf16.gmra.mxu2 %v2326_v0  ;;  %1704 = vst [vmem:[#allocation3 + $0x88] sm:$0xff] %v1668_v58 }
 0x14c   :  { %v1458_v45 = vpop.f32.mrf.mxu3 }
 0x14d   :  { %v1521_v43 = vmax.f32 %v1118_v26, %v1458_v45  ;;  %v2016_v26 = vld [vmem:[#allocation3 + $0x31] sm:$0xff] }
 0x14e   :  { %v14207_v47 = vpop.f32.mrf.mxu2  ;;  %v14209_v24 = vpop.f32.mrf.mxu0  ;;  %v2300_v45 = vld [vmem:[#allocation3 + $0x32] sm:$0xff]  ;;  %v2043_v54 = vpack.c.bf16 %v2017_v7, %v2016_v26 }
 0x14f   :  { %v14212_v32 = vadd.f32 %v13716_v28, %v1521_v43  ;;  %v14214_v2 = vpop.f32.mrf.mxu1  ;;  %v2608_v43 = vpack.c.bf16 %v2579_v14, %v2578_v40  ;;  %v2581_v40 = vld [vmem:[#allocation3 + $0x1b] sm:$0xff] }
 0x151   :  { %v1669_v60 = vmax.f32 %v14212_v32, 0.0 }
 0x153   :  { %1705 = vst [vmem:[#allocation3 + $0x90] sm:$0xff] %v1669_v60 }
 0x154   :  { %v1460_v27 = vpop.f32.mrf.mxu3 }
 0x155   :  { %v1522_v22 = vmax.f32 %v1119_v15, %v1460_v27  ;;  %v2327_v15 = vpack.c.bf16 %v2301_v19, %v2300_v45  ;;  %v2019_v45 = vld [vmem:[#allocation3 + $0x49] sm:$0xff] }
 0x156   :  { %v14225_v61 = vpop.f32.mrf.mxu2  ;;  %v14227_v57 = vpop.f32.mrf.mxu0 }
 0x157   :  { %v14230_v52 = vadd.f32 %v13716_v28, %v1522_v22  ;;  %v14232_v0 = vpop.f32.mrf.mxu1  ;;  %v1120_v22 = vmax.f32 %v717_v30, %v14119_v44  ;;  %v1121_v44 = vmax.f32 %v718_v31, %v14143_v39  ;;  %v2018_v39 = vld [vmem:[#allocation3 + $0x41] sm:$0xff] }
 0x159   :  { %v1670_v27 = vmax.f32 %v14230_v52, 0.0  ;;  %1871 = vmatmul.bf16.gmra.mxu0 %v1760_v38  ;;  %2696 = vmatmul.bf16.vlgmr.msra.gmra.mxu3 %v2608_v43  ;;  %v2303_v43 = vld [vmem:[#allocation3 + $0x4a] sm:$0xff] }
 0x15a   :  { %2143 = vmatmul.bf16.gmra.mxu1 %v2043_v54 }
 0x15b   :  { %2427 = vmatmul.bf16.gmra.mxu2 %v2327_v15  ;;  %1706 = vst [vmem:[#allocation3 + $0x98] sm:$0xff] %v1670_v27  ;;  %v2580_v15 = vld [vmem:[#allocation3 + $0x13] sm:$0xff] }
 0x15c   :  { %v1463_v41 = vpop.f32.mrf.mxu3 }
 0x15d   :  { %v1523_v10 = vmax.f32 %v1120_v22, %v1463_v41  ;;  %v2302_v22 = vld [vmem:[#allocation3 + $0x42] sm:$0xff]  ;;  %v2609_v41 = vpack.c.bf16 %v2581_v40, %v2580_v15 }
 0x15e   :  { %v14244_v35 = vpop.f32.mrf.mxu2  ;;  %v14246_v62 = vpop.f32.mrf.mxu0  ;;  %v2328_v31 = vpack.c.bf16 %v2303_v43, %v2302_v22  ;;  %v13021_v43 = vld [vmem:[%s17271_s3 + $0x118] sm:$0xff] }
 0x15f   :  { %v14249_v14 = vadd.f32 %v13716_v28, %v1523_v10  ;;  %v14251_v6 = vpop.f32.mrf.mxu1  ;;  %v2044_v10 = vpack.c.bf16 %v2019_v45, %v2018_v39  ;;  %2976 = vmatpush.bf16.msra.mxu0 %v13021_v43  ;;  %v721_v43 = vmax.f32 %v14189_v49, %v14194_v48  ;;  %v722_v48 = vmax.f32 %v14209_v24, %v14214_v2 }
 0x160   :  { %v1763_v2 = vpack.c.bf16 %v1670_v27, %v1669_v60 }
 0x161   :  { %v1671_v7 = vmax.f32 %v14249_v14, 0.0 }
 0x163   :  { %1707 = vst [vmem:[#allocation3 + $0xa0] sm:$0xff] %v1671_v7 }
 0x164   :  { %v1465_v19 = vpop.f32.mrf.mxu3 }
 0x165   :  { %v1524_v26 = vmax.f32 %v1121_v44, %v1465_v19  ;;  %v719_v44 = vmax.f32 %v14151_v3, %v14156_v1  ;;  %v720_v1 = vmax.f32 %v14171_v37, %v14176_v8  ;;  %v2582_v8 = vld [vmem:[#allocation3 + $0x23] sm:$0xff] }
 0x166   :  { %v14259_v38 = vpop.f32.mrf.mxu2  ;;  %v14261_v54 = vpop.f32.mrf.mxu0 }
 0x167   :  { %v14264_v30 = vadd.f32 %v13716_v28, %v1524_v26  ;;  %v14266_v21 = vpop.f32.mrf.mxu1  ;;  %v1122_v26 = vmax.f32 %v719_v44, %v14169_v29  ;;  %v1123_v29 = vmax.f32 %v720_v1, %v14184_v50  ;;  %v1762_v44 = vpack.c.bf16 %v1668_v58, %v1667_v16 }
 0x169   :  { %v1672_v19 = vmax.f32 %v14264_v30, 0.0  ;;  %1876 = vmatmul.bf16.gmra.mxu0 %v1761_v11  ;;  %2701 = vmatmul.bf16.gmra.mxu3 %v2609_v41  ;;  %v2583_v11 = vld [vmem:[#allocation3 + $0x2b] sm:$0xff]  ;;  %v2021_v41 = vld [vmem:[#allocation3 + $0x59] sm:$0xff] }
 0x16a   :  { %2148 = vmatmul.bf16.gmra.mxu1 %v2044_v10  ;;  %v2305_v10 = vld [vmem:[#allocation3 + $0x5a] sm:$0xff] }
 0x16b   :  { %2432 = vmatmul.bf16.gmra.mxu2 %v2328_v31  ;;  %1708 = vst [vmem:[#allocation3 + $0xa8] sm:$0xff] %v1672_v19 }
 0x16c   :  { %v1468_v12 = vpop.f32.mrf.mxu3 }
 0x16d   :  { %v1525_v25 = vmax.f32 %v1122_v26, %v1468_v12  ;;  %v2020_v26 = vld [vmem:[#allocation3 + $0x51] sm:$0xff] }
 0x16e   :  { %v14278_v56 = vpop.f32.mrf.mxu2  ;;  %v14280_v20 = vpop.f32.mrf.mxu0  ;;  %v2304_v12 = vld [vmem:[#allocation3 + $0x52] sm:$0xff]  ;;  %v2045_v1 = vpack.c.bf16 %v2021_v41, %v2020_v26 }
 0x16f   :  { %v14283_v40 = vadd.f32 %v13716_v28, %v1525_v25  ;;  %v14285_v3 = vpop.f32.mrf.mxu1  ;;  %v2610_v25 = vpack.c.bf16 %v2583_v11, %v2582_v8  ;;  %v2585_v8 = vld [vmem:[#allocation3 + $0x3b] sm:$0xff] }
 0x171   :  { %v1673_v45 = vmax.f32 %v14283_v40, 0.0  ;;  %v13019_v40 = vld [vmem:[%s17271_s3 + $0x108] sm:$0xff] }
 0x173   :  { %1709 = vst [vmem:[#allocation3 + $0xb0] sm:$0xff] %v1673_v45 }
 0x174   :  { %v1470_v15 = vpop.f32.mrf.mxu3 }
 0x175   :  { %v1526_v22 = vmax.f32 %v1123_v29, %v1470_v15  ;;  %v2329_v29 = vpack.c.bf16 %v2305_v10, %v2304_v12  ;;  %v2023_v12 = vld [vmem:[#allocation3 + $0x69] sm:$0xff] }
 0x176   :  { %v14296_v39 = vpop.f32.mrf.mxu2  ;;  %v14298_v37 = vpop.f32.mrf.mxu0 }
 0x177   :  { %v14301_v50 = vadd.f32 %v13716_v28, %v1526_v22  ;;  %v14303_v31 = vpop.f32.mrf.mxu1  ;;  %v1124_v22 = vmax.f32 %v721_v43, %v14207_v47  ;;  %v1125_v47 = vmax.f32 %v722_v48, %v14225_v61  ;;  %v2022_v61 = vld [vmem:[#allocation3 + $0x61] sm:$0xff] }
 0x178   :  { %v727_v53 = vmax.f32 %v13609_v51, %v14303_v31 }
 0x179   :  { %v1674_v15 = vmax.f32 %v14301_v50, 0.0  ;;  %1881 = vmatmul.bf16.gmra.mxu0 %v1762_v44  ;;  %2706 = vmatmul.bf16.gmra.mxu3 %v2610_v25  ;;  %v2307_v25 = vld [vmem:[#allocation3 + $0x6a] sm:$0xff] }
 0x17a   :  { %2153 = vmatmul.bf16.gmra.mxu1 %v2045_v1 }
 0x17b   :  { %2437 = vmatmul.bf16.gmra.mxu2 %v2329_v29  ;;  %1710 = vst [vmem:[#allocation3 + $0xb8] sm:$0xff] %v1674_v15  ;;  %v2584_v29 = vld [vmem:[#allocation3 + $0x33] sm:$0xff] }
 0x17c   :  { %v1473_v36 = vpop.f32.mrf.mxu3 }
 0x17d   :  { %v1527_v23 = vmax.f32 %v1124_v22, %v1473_v36  ;;  %v2306_v22 = vld [vmem:[#allocation3 + $0x62] sm:$0xff]  ;;  %v2611_v36 = vpack.c.bf16 %v2585_v8, %v2584_v29 }
 0x17e   :  { %v14315_v16 = vpop.f32.mrf.mxu2  ;;  %v14317_v58 = vpop.f32.mrf.mxu0  ;;  %v2330_v48 = vpack.c.bf16 %v2307_v25, %v2306_v22  ;;  %v13020_v25 = vld [vmem:[%s17271_s3 + $0x110] sm:$0xff] }
 0x17f   :  { %v14320_v11 = vadd.f32 %v13716_v28, %v1527_v23  ;;  %v14322_v49 = vpop.f32.mrf.mxu1  ;;  %v2046_v23 = vpack.c.bf16 %v2023_v12, %v2022_v61  ;;  %2977 = vmatpush.bf16.msra.mxu0 %v13020_v25  ;;  %v725_v25 = vmax.f32 %v14261_v54, %v14266_v21  ;;  %v726_v21 = vmax.f32 %v14280_v20, %v14285_v3 }
 0x181   :  { %v1675_v41 = vmax.f32 %v14320_v11, 0.0 }
 0x183   :  { %1711 = vst [vmem:[#allocation3 + $0xc0] sm:$0xff] %v1675_v41  ;;  %2978 = vmatpush.bf16.msra.mxu0 %v13019_v40 }
 0x184   :  { %v1475_v10 = vpop.f32.mrf.mxu3 }
 0x185   :  { %v1528_v26 = vmax.f32 %v1125_v47, %v1475_v10  ;;  %v723_v47 = vmax.f32 %v14227_v57, %v14232_v0  ;;  %v724_v0 = vmax.f32 %v14246_v62, %v14251_v6  ;;  %v2586_v6 = vld [vmem:[#allocation3 + $0x43] sm:$0xff] }
 0x186   :  { %v14330_v44 = vpop.f32.mrf.mxu2  ;;  %v14332_v1 = vpop.f32.mrf.mxu0 }
 0x187   :  { %v14335_v43 = vadd.f32 %v13716_v28, %v1528_v26  ;;  %v14337_v24 = vpop.f32.mrf.mxu1  ;;  %v1126_v26 = vmax.f32 %v723_v47, %v14244_v35  ;;  %v1127_v35 = vmax.f32 %v724_v0, %v14259_v38  ;;  %v1764_v47 = vpack.c.bf16 %v1672_v19, %v1671_v7 }
 0x189   :  { %v1676_v10 = vmax.f32 %v14335_v43, 0.0  ;;  %1886 = vmatmul.bf16.gmra.mxu0 %v1763_v2  ;;  %2711 = vmatmul.bf16.gmra.mxu3 %v2611_v36  ;;  %v2587_v2 = vld [vmem:[#allocation3 + $0x4b] sm:$0xff]  ;;  %v2025_v36 = vld [vmem:[#allocation3 + $0x79] sm:$0xff] }
 0x18a   :  { %2158 = vmatmul.bf16.gmra.mxu1 %v2046_v23  ;;  %v2309_v23 = vld [vmem:[#allocation3 + $0x7a] sm:$0xff] }
 0x18b   :  { %2442 = vmatmul.bf16.gmra.mxu2 %v2330_v48  ;;  %1712 = vst [vmem:[#allocation3 + $0xc8] sm:$0xff] %v1676_v10 }
 0x18c   :  { %v1478_v32 = vpop.f32.mrf.mxu3 }
 0x18d   :  { %v1529_v52 = vmax.f32 %v1126_v26, %v1478_v32  ;;  %v2024_v26 = vld [vmem:[#allocation3 + $0x71] sm:$0xff] }
 0x18e   :  { %v14349_v60 = vpop.f32.mrf.mxu2  ;;  %v14351_v27 = vpop.f32.mrf.mxu0  ;;  %v2308_v32 = vld [vmem:[#allocation3 + $0x72] sm:$0xff]  ;;  %v2047_v0 = vpack.c.bf16 %v2025_v36, %v2024_v26 }
 0x18f   :  { %v14354_v8 = vadd.f32 %v13716_v28, %v1529_v52  ;;  %v14356_v57 = vpop.f32.mrf.mxu1  ;;  %v2612_v52 = vpack.c.bf16 %v2587_v2, %v2586_v6 }
 0x191   :  { %v1677_v12 = vmax.f32 %v14354_v8, 0.0  ;;  %v13033_v8 = vld [vmem:[%s17271_s3 + $0x178] sm:$0xff] }
 0x192   :  { %3256 = vmatpush.bf16.msra.mxu1 %v13033_v8 }
 0x193   :  { %1713 = vst [vmem:[#allocation3 + $0xd0] sm:$0xff] %v1677_v12 }
 0x194   :  { %v1480_v29 = vpop.f32.mrf.mxu3 }
 0x195   :  { %v1530_v22 = vmax.f32 %v1127_v35, %v1480_v29  ;;  %v2331_v35 = vpack.c.bf16 %v2309_v23, %v2308_v32  ;;  %v1129_v23 = vmax.f32 %v726_v21, %v14296_v39  ;;  %v2027_v32 = vld [vmem:[#allocation3 + $0x89] sm:$0xff]  ;;  %v14415_v39 = vld [vmem:[%s17270_s2] ss:$0 sm:$0xff] }
 0x196   :  { %v14367_v61 = vpop.f32.mrf.mxu2  ;;  %v14369_v62 = vpop.f32.mrf.mxu0 }
 0x197   :  { %v14372_v38 = vadd.f32 %v13716_v28, %v1530_v22  ;;  %v14374_v48 = vpop.f32.mrf.mxu1  ;;  %v1128_v22 = vmax.f32 %v725_v25, %v14278_v56  ;;  %v14401_v56 = vld [vmem:[%s17272_s4] ss:$0 sm:$0xff] }
 0x198   :  { %v1920_v20 = vadd.f32 %v14401_v56, %v14298_v37 }
 0x199   :  { %v1678_v29 = vmax.f32 %v14372_v38, 0.0  ;;  %1891 = vmatmul.bf16.gmra.mxu0 %v1764_v47  ;;  %2716 = vmatmul.bf16.gmra.mxu3 %v2612_v52  ;;  %v2311_v52 = vld [vmem:[#allocation3 + $0x8a] sm:$0xff] }
 0x19a   :  { %2163 = vmatmul.bf16.gmra.mxu1 %v2047_v0  ;;  %v2588_v0 = vld [vmem:[#allocation3 + $0x53] sm:$0xff] }
 0x19b   :  { %2447 = vmatmul.bf16.gmra.mxu2 %v2331_v35  ;;  %1714 = vst [vmem:[#allocation3 + $0xd8] sm:$0xff] %v1678_v29 }
 0x19c   :  { %v1483_v14 = vpop.f32.mrf.mxu3 }
 0x19d   :  { %v1531_v30 = vmax.f32 %v1128_v22, %v1483_v14  ;;  %v1765_v22 = vpack.c.bf16 %v1674_v15, %v1673_v45  ;;  %v2026_v14 = vld [vmem:[#allocation3 + $0x81] sm:$0xff] }
 0x19e   :  { %v14386_v7 = vpop.f32.mrf.mxu2  ;;  %v14388_v19 = vpop.f32.mrf.mxu0 }
 0x19f   :  { %v14391_v2 = vadd.f32 %v13716_v28, %v1531_v30  ;;  %v14393_v54 = vpop.f32.mrf.mxu1  ;;  %v2589_v28 = vld [vmem:[#allocation3 + $0x5b] sm:$0xff] }
 0x1a0   :  { %v2310_v30 = vld [vmem:[#allocation3 + $0x82] sm:$0xff]  ;;  %v2613_v21 = vpack.c.bf16 %v2589_v28, %v2588_v0 }
 0x1a1   :  { %v1679_v36 = vmax.f32 %v14391_v2, 0.0 }
 0x1a3   :  { %1715 = vst [vmem:[#allocation3 + $0xe0] sm:$0xff] %v1679_v36 }
 0x1a4   :  { %v1485_v6 = vpop.f32.mrf.mxu3 }
 0x1a5   :  { %v1532_v26 = vmax.f32 %v1129_v23, %v1485_v6  ;;  %v2048_v23 = vpack.c.bf16 %v2027_v32, %v2026_v14  ;;  %v2332_v6 = vpack.c.bf16 %v2311_v52, %v2310_v30  ;;  %v1922_v14 = vadd.f32 %v14401_v56, %v14332_v1 }
 0x1a6   :  { %v14406_v47 = vpop.f32.mrf.mxu2  ;;  %v14410_v3 = vpop.f32.mrf.mxu0 }
 0x1a7   :  { %v1644_v35 = vadd.f32 %v14415_v39, %v1532_v26  ;;  %v2129_v25 = vpop.f32.mrf.mxu1  ;;  %v1130_v26 = vmax.f32 %v727_v53, %v14315_v16  ;;  %v728_v53 = vmax.f32 %v13615_v55, %v14322_v49  ;;  %v1766_v49 = vpack.c.bf16 %v1676_v10, %v1675_v41 }
 0x1a8   :  { %v2204_v37 = vadd.f32 %v2129_v25, %v1920_v20  ;;  %v2591_v20 = vld [vmem:[#allocation3 + $0x6b] sm:$0xff]  ;;  %v2029_v25 = vld [vmem:[#allocation3 + $0x99] sm:$0xff] }
 0x1a9   :  { %v1680_v9 = vmax.f32 %v1644_v35, 0.0  ;;  %1896 = vmatmul.bf16.gmra.mxu0 %v1765_v22  ;;  %2721 = vmatmul.bf16.gmra.mxu3 %v2613_v21  ;;  %v1131_v16 = vmax.f32 %v728_v53, %v14330_v44  ;;  %v2313_v22 = vld [vmem:[#allocation3 + $0x9a] sm:$0xff]  ;;  %v2590_v21 = vld [vmem:[#allocation3 + $0x63] sm:$0xff]  ;;  %v2028_v44 = vld [vmem:[#allocation3 + $0x91] sm:$0xff] }
 0x1aa   :  { %2168 = vmatmul.bf16.gmra.mxu1 %v2048_v23  ;;  %v2312_v23 = vld [vmem:[#allocation3 + $0x92] sm:$0xff]  ;;  %v2049_v40 = vpack.c.bf16 %v2029_v25, %v2028_v44  ;;  %v1924_v44 = vadd.f32 %v14401_v56, %v14369_v62 }
 0x1ab   :  { %2452 = vmatmul.bf16.gmra.mxu2 %v2332_v6  ;;  %1716 = vst [vmem:[#allocation3 + $0xe8] sm:$0xff] %v1680_v9  ;;  %v2614_v6 = vpack.c.bf16 %v2591_v20, %v2590_v21 }
 0x1ac   :  { %v1488_v45 = vpop.f32.mrf.mxu3 }
 0x1ad   :  { %v1533_v50 = vmax.f32 %v1130_v26, %v1488_v45  ;;  %v2333_v45 = vpack.c.bf16 %v2313_v22, %v2312_v23 }
 0x1ae   :  { %v2413_v15 = vpop.f32.mrf.mxu2  ;;  %v14430_v32 = vpop.f32.mrf.mxu0 }
 0x1af   :  { %v14428_v28 = vadd.f32 %v2413_v15, %v2204_v37  ;;  %v1645_v51 = vadd.f32 %v14415_v39, %v1533_v50  ;;  %v14433_v31 = vpop.f32.mrf.mxu1  ;;  %v14449_v50 = vld [vmem:[#allocation3 + $0xe0] sm:$0xff]  ;;  %v729_v15 = vmax.f32 %v13639_v63, %v14337_v24 }
 0x1b0   :  { %17292 = vst [vmem:[#allocation13_spill] sm:$0xff] %v14449_v50 }
 0x1b1   :  { %v1681_v9 = vmax.f32 %v1645_v51, 0.0  ;;  %v1132_v41 = vmax.f32 %v729_v15, %v14349_v60  ;;  %v2030_v15 = vld [vmem:[#allocation3 + $0xa1] sm:$0xff] }
 0x1b2   :  { %v14451_v1 = vld [vmem:[#allocation3 + $0xe8] sm:$0xff] }
 0x1b3   :  { %1717 = vst [vmem:[#allocation3 + $0xf0] sm:$0xff] %v1681_v9  ;;  %v1923_v9 = vadd.f32 %v14401_v56, %v14351_v27  ;;  %v2031_v27 = vld [vmem:[#allocation3 + $0xa9] sm:$0xff] }
 0x1b4   :  { %v1490_v52 = vpop.f32.mrf.mxu3  ;;  %17293 = vst [vmem:[#allocation14_spill] sm:$0xff] %v14451_v1 }
 0x1b5   :  { %v1534_v0 = vmax.f32 %v1131_v16, %v1490_v52 }
 0x1b6   :  { %v14438_v35 = vpop.f32.mrf.mxu2  ;;  %v14442_v30 = vpop.f32.mrf.mxu0 }
 0x1b7   :  { %v1646_v37 = vadd.f32 %v14415_v39, %v1534_v0  ;;  %v2134_v55 = vpop.f32.mrf.mxu1  ;;  %v730_v0 = vmax.f32 %v13650_v4, %v14356_v57  ;;  %v2592_v57 = vld [vmem:[#allocation3 + $0x73] sm:$0xff] }
 0x1b8   :  { %v2206_v26 = vadd.f32 %v2134_v55, %v1922_v14  ;;  %v2593_v14 = vld [vmem:[#allocation3 + $0x7b] sm:$0xff]  ;;  %v2315_v55 = vld [vmem:[#allocation3 + $0xaa] sm:$0xff] }
 0x1b9   :  { %v1682_v51 = vmax.f32 %v1646_v37, 0.0  ;;  %1901 = vmatmul.bf16.gmra.mxu0 %v1766_v49  ;;  %2726 = vmatmul.bf16.gmra.mxu3 %v2614_v6  ;;  %v1133_v60 = vmax.f32 %v730_v0, %v14367_v61  ;;  %v13018_v49 = vld [vmem:[%s17271_s3 + $0x100] sm:$0xff]  ;;  %v2615_v62 = vpack.c.bf16 %v2593_v14, %v2592_v57  ;;  %v13041_v0 = vld [vmem:[%s17271_s3 + $0x1b8] sm:$0xff] }
 0x1ba   :  { %2173 = vmatmul.bf16.gmra.mxu1 %v2049_v40  ;;  %v14477_v61 = vld [vmem:[#allocation3 + $0xf0] sm:$0xff]  ;;  %2979 = vmatpush.bf16.msra.mxu0 %v13018_v49 }
 0x1bb   :  { %2457 = vmatmul.bf16.gmra.mxu2 %v2333_v45  ;;  %1718 = vst [vmem:[#allocation3 + $0xf8] sm:$0xff] %v1682_v51  ;;  %v1767_v45 = vpack.c.bf16 %v1678_v29, %v1677_v12  ;;  %v2314_v51 = vld [vmem:[#allocation3 + $0xa2] sm:$0xff]  ;;  %v2595_v49 = vld [vmem:[#allocation3 + $0x8b] sm:$0xff] }
 0x1bc   :  { %v1493_v43 = vpop.f32.mrf.mxu3  ;;  %17294 = vst [vmem:[#allocation15_spill] sm:$0xff] %v14477_v61  ;;  %3540 = vmatpush.bf16.msra.mxu2 %v13041_v0 }
 0x1bd   :  { %v1535_v10 = vmax.f32 %v1132_v41, %v1493_v43 }
 0x1be   :  { %v2418_v53 = vpop.f32.mrf.mxu2  ;;  %v14462_v63 = vpop.f32.mrf.mxu0 }
 0x1bf   :  { %v14460_v16 = vadd.f32 %v2418_v53, %v2206_v26  ;;  %v1647_v24 = vadd.f32 %v14415_v39, %v1535_v10  ;;  %v2136_v52 = vpop.f32.mrf.mxu1  ;;  %v2050_v10 = vpack.c.bf16 %v2031_v27, %v2030_v15  ;;  %v2334_v53 = vpack.c.bf16 %v2315_v55, %v2314_v51  ;;  %v1753_v55 = vld [vmem:[#allocation3 + $0xe8] sm:$0xf] }
 0x1c0   :  { %v2207_v20 = vadd.f32 %v2136_v52, %v1923_v9  ;;  %v731_v9 = vmax.f32 %v13677_v13, %v14374_v48  ;;  %v2594_v15 = vld [vmem:[#allocation3 + $0x83] sm:$0xff] }
 0x1c1   :  { %v1683_v25 = vmax.f32 %v1647_v24, 0.0 }
 0x1c2   :  { %v14479_v6 = vld [vmem:[#allocation3 + $0xf8] sm:$0xff]  ;;  %v1134_v12 = vmax.f32 %v731_v9, %v14386_v7  ;;  %v2616_v9 = vpack.c.bf16 %v2595_v49, %v2594_v15  ;;  %v14550_v49 = vld [vmem:[#allocation3 + $0xc] sm:$0xff] }
 0x1c3   :  { %1719 = vst [vmem:[#allocation3 + $0x100] sm:$0xff] %v1683_v25 }
 0x1c4   :  { %v1495_v22 = vpop.f32.mrf.mxu3  ;;  %17295 = vst [vmem:[#allocation16_spill] sm:$0xff] %v14479_v6 }
 0x1c5   :  { %v1536_v21 = vmax.f32 %v1133_v60, %v1495_v22  ;;  %v732_v22 = vmax.f32 %v13688_v18, %v14393_v54  ;;  %v1926_v18 = vadd.f32 %v14401_v56, %v14410_v3  ;;  %v13049_v3 = vld [vmem:[%s17271_s3 + $0x1f8] sm:$0xff] }
 0x1c6   :  { %v2420_v37 = vpop.f32.mrf.mxu2  ;;  %v14475_v4 = vpop.f32.mrf.mxu0  ;;  %3824 = vmatpush.bf16.msrb.mxu3 %v13049_v3 }
 0x1c7   :  { %v14473_v23 = vadd.f32 %v2420_v37, %v2207_v20  ;;  %v1648_v26 = vadd.f32 %v14415_v39, %v1536_v21  ;;  %v2139_v40 = vpop.f32.mrf.mxu1  ;;  %v1925_v20 = vadd.f32 %v14401_v56, %v14388_v19  ;;  %v1135_v21 = vmax.f32 %v732_v22, %v14406_v47  ;;  %v13031_v22 = vld [vmem:[%s17271_s3 + $0x168] sm:$0xff] }
 0x1c8   :  { %v2208_v43 = vadd.f32 %v2139_v40, %v1924_v44  ;;  %v2033_v40 = vld [vmem:[#allocation3 + $0xb9] sm:$0xff] }
 0x1c9   :  { %v1684_v24 = vmax.f32 %v1648_v26, 0.0  ;;  %1906 = vmatmul.bf16.gmra.mxu0 %v1767_v45  ;;  %2731 = vmatmul.bf16.gmra.mxu3 %v2615_v62  ;;  %v2317_v45 = vld [vmem:[#allocation3 + $0xba] sm:$0xff] }
 0x1ca   :  { %2178 = vmatmul.bf16.gmra.mxu1 %v2050_v10  ;;  %v14507_v19 = vld [vmem:[#allocation3 + $0x100] sm:$0xff]  ;;  %v2032_v10 = vld [vmem:[#allocation3 + $0xb1] sm:$0xff] }
 0x1cb   :  { %2462 = vmatmul.bf16.gmra.mxu2 %v2334_v53  ;;  %1720 = vst [vmem:[#allocation3 + $0x108] sm:$0xff] %v1684_v24  ;;  %v2316_v53 = vld [vmem:[#allocation3 + $0xb2] sm:$0xff]  ;;  %v2051_v8 = vpack.c.bf16 %v2033_v40, %v2032_v10  ;;  %v2319_v40 = vld [vmem:[#allocation3 + $0xca] sm:$0xff]  ;;  %v2034_v10 = vld [vmem:[#allocation3 + $0xc1] sm:$0xff] }
 0x1cc   :  { %v1498_v38 = vpop.f32.mrf.mxu3  ;;  %17296 = vst [vmem:[#allocation17_spill] sm:$0xff] %v14507_v19 }
 0x1cd   :  { %v1537_v29 = vmax.f32 %v1134_v12, %v1498_v38  ;;  %v2335_v12 = vpack.c.bf16 %v2317_v45, %v2316_v53  ;;  %v13030_v45 = vld [vmem:[%s17271_s3 + $0x160] sm:$0xff] }
 0x1ce   :  { %v2423_v52 = vpop.f32.mrf.mxu2  ;;  %v14498_v48 = vpop.f32.mrf.mxu0  ;;  %v2318_v53 = vld [vmem:[#allocation3 + $0xc2] sm:$0xff] }
 0x1cf   :  { %v14496_v13 = vadd.f32 %v2423_v52, %v2208_v43  ;;  %v1649_v25 = vadd.f32 %v14415_v39, %v1537_v29  ;;  %v2141_v60 = vpop.f32.mrf.mxu1  ;;  %v1768_v43 = vpack.c.bf16 %v1753_v55, %v1679_v36  ;;  %v13032_v29 = vld [vmem:[%s17271_s3 + $0x170] sm:$0xff]  ;;  %v2597_v55 = vld [vmem:[#allocation3 + $0x9b] sm:$0xff]  ;;  %v2336_v3 = vpack.c.bf16 %v2319_v40, %v2318_v53 }
 0x1d0   :  { %v2209_v7 = vadd.f32 %v2141_v60, %v1925_v20  ;;  %v13040_v52 = vld [vmem:[%s17271_s3 + $0x1b0] sm:$0xff]  ;;  %v1927_v20 = vadd.f32 %v14401_v56, %v14430_v32  ;;  %v1921_v60 = vadd.f32 %v14401_v56, %v14317_v58  ;;  %3257 = vmatpush.bf16.msra.mxu1 %v13032_v29  ;;  %v2321_v40 = vld [vmem:[#allocation3 + $0xda] sm:$0xff] }
 0x1d1   :  { %v1685_v14 = vmax.f32 %v1649_v25, 0.0  ;;  %3541 = vmatpush.bf16.msra.mxu2 %v13040_v52  ;;  %v2035_v58 = vld [vmem:[#allocation3 + $0xc9] sm:$0xff] }
 0x1d2   :  { %v14509_v37 = vld [vmem:[#allocation3 + $0x108] sm:$0xff]  ;;  %v2205_v32 = vadd.f32 %v14433_v31, %v1921_v60  ;;  %v13038_v31 = vld [vmem:[%s17271_s3 + $0x1a0] sm:$0xff]  ;;  %v13036_v60 = vld [vmem:[%s17271_s3 + $0x190] sm:$0xff] }
 0x1d3   :  { %1721 = vst [vmem:[#allocation3 + $0x110] sm:$0xff] %v1685_v14  ;;  %v13039_v14 = vld [vmem:[%s17271_s3 + $0x1a8] sm:$0xff] }
 0x1d4   :  { %17297 = vst [vmem:[#allocation18_spill] sm:$0xff] %v14509_v37  ;;  %v1500_v27 = vpop.f32.mrf.mxu3  ;;  %3258 = vmatpush.bf16.msra.mxu1 %v13031_v22 }
 0x1d5   :  { %v1538_v57 = vmax.f32 %v1135_v21, %v1500_v27  ;;  %v2489_v21 = vadd.f32 %v14438_v35, %v2205_v32  ;;  %3542 = vmatpush.bf16.msra.mxu2 %v13039_v14  ;;  %v1928_v35 = vadd.f32 %v14401_v56, %v14442_v30  ;;  %v13057_v30 = vld [vmem:[%s17271_s3 + $0x238] sm:$0xff] }
 0x1d6   :  { %v2425_v26 = vpop.f32.mrf.mxu2  ;;  %v14517_v47 = vpop.f32.mrf.mxu0  ;;  %4108 = vmatpush.bf16.msrb.mxu0 %v13057_v30 }
 0x1d7   :  { %v14515_v54 = vadd.f32 %v2425_v26, %v2209_v7  ;;  %v1650_v51 = vadd.f32 %v14415_v39, %v1538_v57  ;;  %v2144_v62 = vpop.f32.mrf.mxu1 }
 0x1d8   :  { %v2210_v24 = vadd.f32 %v2144_v62, %v1926_v18  ;;  %v2862_v62 = vld [vmem:[#allocation3 + $0x4] sm:$0xff]  ;;  %3259 = vmatpush.bf16.msra.mxu1 %v13030_v45 }
 0x1d9   :  { %v1686_v38 = vmax.f32 %v1650_v51, 0.0  ;;  %1911 = vmatmul.bf16.gmra.mxu0 %v1768_v43  ;;  %2736 = vmatmul.bf16.gmra.mxu3 %v2616_v9  ;;  %v2596_v51 = vld [vmem:[#allocation3 + $0x93] sm:$0xff]  ;;  %v13026_v45 = vld [vmem:[%s17271_s3 + $0x140] sm:$0xff] }
 0x1da   :  { %2183 = vmatmul.bf16.gmra.mxu1 %v2051_v8  ;;  %v2617_v9 = vpack.c.bf16 %v2597_v55, %v2596_v51  ;;  %3543 = vmatpush.bf16.msra.mxu2 %v13038_v31  ;;  %v14595_v55 = vld [vmem:[#allocation3 + $0x1c] sm:$0xff] }
 0x1db   :  { %2467 = vmatmul.bf16.gmra.mxu2 %v2335_v12  ;;  %1722 = vst [vmem:[#allocation3 + $0x118] sm:$0xff] %v1686_v38  ;;  %v2052_v12 = vpack.c.bf16 %v2035_v58, %v2034_v10  ;;  %v13029_v38 = vld [vmem:[%s17271_s3 + $0x158] sm:$0xff]  ;;  %v13034_v31 = vld [vmem:[%s17271_s3 + $0x180] sm:$0xff] }
 0x1dc   :  { %v2697_v39 = vpop.f32.mrf.mxu3  ;;  %3260 = vmatpush.bf16.msra.mxu1 %v13029_v38  ;;  %v2037_v58 = vld [vmem:[#allocation3 + $0xd9] sm:$0xff] }
 0x1dd   :  { %v14526_v36 = vadd.f32 %v2697_v39, %v14428_v28  ;;  %v13037_v39 = vld [vmem:[%s17271_s3 + $0x198] sm:$0xff] }
 0x1de   :  { %v2428_v2 = vpop.f32.mrf.mxu2  ;;  %v14538_v25 = vpop.f32.mrf.mxu0  ;;  %3544 = vmatpush.bf16.msra.mxu2 %v13037_v39  ;;  %v14612_v10 = vld [vmem:[#allocation3 + $0x14] sm:$0xff] }
 0x1df   :  { %v14536_v0 = vadd.f32 %v2428_v2, %v2210_v24  ;;  %v2146_v28 = vpop.f32.mrf.mxu1  ;;  %v2892_v24 = vpack.c.bf16 %v14550_v49, %v2862_v62 }
 0x1e0   :  { %v2211_v7 = vadd.f32 %v2146_v28, %v1927_v20  ;;  %v13028_v20 = vld [vmem:[%s17271_s3 + $0x150] sm:$0xff]  ;;  %v1929_v28 = vadd.f32 %v14401_v56, %v14462_v63 }
 0x1e1   :  { %3261 = vmatpush.bf16.msra.mxu1 %v13028_v20  ;;  %v2599_v63 = vld [vmem:[#allocation3 + $0xab] sm:$0xff] }
 0x1e2   :  { %3545 = vmatpush.bf16.msra.mxu2 %v13036_v60 }
 0x1e4   :  { %v2699_v27 = vpop.f32.mrf.mxu3 }
 0x1e5   :  { %v2773_v26 = vadd.f32 %v2699_v27, %v2489_v21  ;;  %v13035_v21 = vld [vmem:[%s17271_s3 + $0x188] sm:$0xff] }
 0x1e6   :  { %v2430_v57 = vpop.f32.mrf.mxu2  ;;  %v14562_v15 = vpop.f32.mrf.mxu0  ;;  %3546 = vmatpush.bf16.msra.mxu2 %v13035_v21  ;;  %v2601_v21 = vld [vmem:[#allocation3 + $0xbb] sm:$0xff] }
 0x1e7   :  { %v14560_v18 = vadd.f32 %v2430_v57, %v2211_v7  ;;  %2803 = vst [vmem:[#allocation4 + $0x8] sm:$0xff] %v2773_v26  ;;  %v2149_v43 = vpop.f32.mrf.mxu1 }
 0x1e8   :  { %v2212_v8 = vadd.f32 %v2149_v43, %v1928_v35  ;;  %v1930_v35 = vadd.f32 %v14401_v56, %v14475_v4  ;;  %v2598_v43 = vld [vmem:[#allocation3 + $0xa3] sm:$0xff] }
 0x1e9   :  { %2741 = vmatmul.bf16.gmra.mxu3 %v2617_v9  ;;  %2980 = vmatmul.bf16.vlgmr.msra.gmra.mxu0 %v2892_v24  ;;  %v2036_v9 = vld [vmem:[#allocation3 + $0xd1] sm:$0xff] }
 0x1ea   :  { %2188 = vmatmul.bf16.gmra.mxu1 %v2052_v12  ;;  %v2320_v24 = vld [vmem:[#allocation3 + $0xd2] sm:$0xff]  ;;  %v2893_v12 = vpack.c.bf16 %v14595_v55, %v14612_v10  ;;  %3547 = vmatpush.bf16.msra.mxu2 %v13034_v31 }
 0x1eb   :  { %2472 = vmatmul.bf16.gmra.mxu2 %v2336_v3  ;;  %v2053_v3 = vpack.c.bf16 %v2037_v58, %v2036_v9  ;;  %v2337_v30 = vpack.c.bf16 %v2321_v40, %v2320_v24  ;;  %v2323_v40 = vld [vmem:[#allocation3 + $0xea] sm:$0xf] }
 0x1ec   :  { %v2702_v2 = vpop.f32.mrf.mxu3 }
 0x1ed   :  { %v14575_v52 = vadd.f32 %v2702_v2, %v14460_v16  ;;  %v13027_v16 = vld [vmem:[%s17271_s3 + $0x148] sm:$0xff] }
 0x1ee   :  { %v2433_v29 = vpop.f32.mrf.mxu2  ;;  %v14587_v22 = vpop.f32.mrf.mxu0  ;;  %3262 = vmatpush.bf16.msra.mxu1 %v13027_v16  ;;  %v2038_v16 = vld [vmem:[#allocation3 + $0xe1] sm:$0xff] }
 0x1ef   :  { %v14585_v7 = vadd.f32 %v2433_v29, %v2212_v8  ;;  %v2151_v14 = vpop.f32.mrf.mxu1  ;;  %v2618_v8 = vpack.c.bf16 %v2599_v63, %v2598_v43  ;;  %v1931_v29 = vadd.f32 %v14401_v56, %v14498_v48  ;;  %v1932_v48 = vadd.f32 %v14401_v56, %v14517_v47  ;;  %v14639_v43 = vld [vmem:[#allocation3 + $0x24] sm:$0xff] }
 0x1f0   :  { %v2213_v32 = vadd.f32 %v2151_v14, %v1929_v28 }
 0x1f2   :  { %3263 = vmatpush.bf16.msra.mxu1 %v13026_v45 }
 0x1f4   :  { %v2704_v27 = vpop.f32.mrf.mxu3 }
 0x1f5   :  { %v14598_v26 = vadd.f32 %v2704_v27, %v14473_v23  ;;  %v13048_v23 = vld [vmem:[%s17271_s3 + $0x1f0] sm:$0xff] }
 0x1f6   :  { %v2435_v57 = vpop.f32.mrf.mxu2  ;;  %v14610_v62 = vpop.f32.mrf.mxu0  ;;  %3825 = vmatpush.bf16.msrb.mxu3 %v13048_v23  ;;  %v14628_v27 = vld [vmem:[#allocation3 + $0x2c] sm:$0xff] }
 0x1f7   :  { %v14608_v51 = vadd.f32 %v2435_v57, %v2213_v32  ;;  %v2154_v53 = vpop.f32.mrf.mxu1  ;;  %v2322_v57 = vld [vmem:[#allocation3 + $0xe2] sm:$0xff]  ;;  %v13056_v23 = vld [vmem:[%s17271_s3 + $0x230] sm:$0xff]  ;;  %v2894_v9 = vpack.c.bf16 %v14628_v27, %v14639_v43 }
 0x1f8   :  { %v2214_v4 = vadd.f32 %v2154_v53, %v1930_v35  ;;  %v2600_v35 = vld [vmem:[#allocation3 + $0xb3] sm:$0xff]  ;;  %4109 = vmatpush.bf16.msrb.mxu0 %v13056_v23 }
 0x1f9   :  { %2746 = vmatmul.bf16.gmra.mxu3 %v2618_v8  ;;  %2985 = vmatmul.bf16.gmra.mxu0 %v2893_v12  ;;  %v2338_v12 = vpack.c.bf16 %v2323_v40, %v2322_v57  ;;  %v1934_v57 = vadd.f32 %v14401_v56, %v14562_v15  ;;  %v14672_v23 = vld [vmem:[#allocation3 + $0x34] sm:$0xff] }
 0x1fa   :  { %2193 = vmatmul.bf16.gmra.mxu1 %v2053_v3  ;;  %v13045_v15 = vld [vmem:[%s17271_s3 + $0x1d8] sm:$0xff] }
 0x1fb   :  { %2477 = vmatmul.bf16.gmra.mxu2 %v2337_v30  ;;  %v1933_v30 = vadd.f32 %v14401_v56, %v14538_v25  ;;  %v3431_v25 = vld [vmem:[#allocation3 + $0x15] sm:$0xff] }
 0x1fc   :  { %v2707_v38 = vpop.f32.mrf.mxu3 }
 0x1fd   :  { %v14620_v2 = vadd.f32 %v2707_v38, %v14496_v13  ;;  %v2039_v13 = vld [vmem:[#allocation3 + $0xe9] sm:$0xf] }
 0x1fe   :  { %v2438_v39 = vpop.f32.mrf.mxu2  ;;  %v14626_v60 = vpop.f32.mrf.mxu0  ;;  %v2054_v8 = vpack.c.bf16 %v2039_v13, %v2038_v16  ;;  %v2603_v16 = vld [vmem:[#allocation3 + $0xcb] sm:$0xff]  ;;  %v13046_v13 = vld [vmem:[%s17271_s3 + $0x1e0] sm:$0xff] }
 0x1ff   :  { %v14624_v20 = vadd.f32 %v2438_v39, %v2214_v4  ;;  %v2156_v28 = vpop.f32.mrf.mxu1 }
 0x200   :  { %v2215_v14 = vadd.f32 %v2156_v28, %v1931_v29 }
 0x204   :  { %v2709_v32 = vpop.f32.mrf.mxu3 }
 0x205   :  { %v14631_v63 = vadd.f32 %v2709_v32, %v14515_v54  ;;  %v2619_v54 = vpack.c.bf16 %v2601_v21, %v2600_v35  ;;  %v14658_v21 = vld [vmem:[#allocation3 + $0x3c] sm:$0xff] }
 0x206   :  { %v2440_v58 = vpop.f32.mrf.mxu2  ;;  %v14637_v31 = vpop.f32.mrf.mxu0  ;;  %v2602_v35 = vld [vmem:[#allocation3 + $0xc3] sm:$0xff] }
 0x207   :  { %v14635_v45 = vadd.f32 %v2440_v58, %v2215_v14  ;;  %v2159_v53 = vpop.f32.mrf.mxu1  ;;  %v13047_v14 = vld [vmem:[%s17271_s3 + $0x1e8] sm:$0xff] }
 0x208   :  { %v2216_v24 = vadd.f32 %v2159_v53, %v1932_v48  ;;  %3826 = vmatpush.bf16.msrb.mxu3 %v13047_v14 }
 0x209   :  { %2751 = vmatmul.bf16.gmra.mxu3 %v2619_v54  ;;  %2990 = vmatmul.bf16.gmra.mxu0 %v2894_v9  ;;  %v2620_v54 = vpack.c.bf16 %v2603_v16, %v2602_v35  ;;  %v3430_v9 = vld [vmem:[#allocation3 + $0xd] sm:$0xff]  ;;  %v3433_v35 = vld [vmem:[#allocation3 + $0x25] sm:$0xff] }
 0x20a   :  { %2198 = vmatmul.bf16.gmra.mxu1 %v2054_v8  ;;  %v3176_v8 = vpack.c.bf16 %v14612_v10, %v14550_v49  ;;  %v13044_v10 = vld [vmem:[%s17271_s3 + $0x1d0] sm:$0xff]  ;;  %v13043_v16 = vld [vmem:[%s17271_s3 + $0x1c8] sm:$0xff] }
 0x20b   :  { %2482 = vmatmul.bf16.gmra.mxu2 %v2338_v12  ;;  %v3460_v12 = vpack.c.bf16 %v3431_v25, %v3430_v9  ;;  %v14699_v25 = vld [vmem:[#allocation3 + $0x4c] sm:$0xff] }
 0x20c   :  { %v2712_v47 = vpop.f32.mrf.mxu3  ;;  %3827 = vmatpush.bf16.msrb.mxu3 %v13046_v13  ;;  %v2604_v9 = vld [vmem:[#allocation3 + $0xd3] sm:$0xff] }
 0x20d   :  { %v14647_v3 = vadd.f32 %v2712_v47, %v14536_v0 }
 0x20e   :  { %v2443_v4 = vpop.f32.mrf.mxu2  ;;  %v14653_v39 = vpop.f32.mrf.mxu0 }
 0x20f   :  { %v14651_v38 = vadd.f32 %v2443_v4, %v2216_v24  ;;  %v2161_v29 = vpop.f32.mrf.mxu1 }
 0x210   :  { %v2217_v28 = vadd.f32 %v2161_v29, %v1933_v30  ;;  %3828 = vmatpush.bf16.msrb.mxu3 %v13045_v15  ;;  %v1935_v29 = vadd.f32 %v14401_v56, %v14587_v22 }
 0x214   :  { %v2714_v32 = vpop.f32.mrf.mxu3  ;;  %3829 = vmatpush.bf16.msrb.mxu3 %v13044_v10 }
 0x215   :  { %v14661_v58 = vadd.f32 %v2714_v32, %v14560_v18  ;;  %v2895_v18 = vpack.c.bf16 %v14658_v21, %v14672_v23 }
 0x216   :  { %v2445_v0 = vpop.f32.mrf.mxu2  ;;  %v14670_v48 = vpop.f32.mrf.mxu0 }
 0x217   :  { %v14668_v40 = vadd.f32 %v2445_v0, %v2217_v28  ;;  %v2164_v53 = vpop.f32.mrf.mxu1  ;;  %v2605_v0 = vld [vmem:[#allocation3 + $0xdb] sm:$0xff] }
 0x218   :  { %v2218_v24 = vadd.f32 %v2164_v53, %v1934_v57  ;;  %3830 = vmatpush.bf16.msrb.mxu3 %v13043_v16  ;;  %v1936_v53 = vadd.f32 %v14401_v56, %v14610_v62  ;;  %v2621_v15 = vpack.c.bf16 %v2605_v0, %v2604_v9  ;;  %v3177_v62 = vpack.c.bf16 %v14639_v43, %v14595_v55 }
 0x219   :  { %2756 = vmatmul.bf16.gmra.mxu3 %v2620_v54  ;;  %2995 = vmatmul.bf16.gmra.mxu0 %v2895_v18  ;;  %v1937_v16 = vadd.f32 %v14401_v56, %v14626_v60 }
 0x21a   :  { %3264 = vmatmul.bf16.vlgmr.msra.gmra.mxu1 %v3176_v8  ;;  %v13042_v8 = vld [vmem:[%s17271_s3 + $0x1c0] sm:$0xff] }
 0x21b   :  { %3548 = vmatmul.bf16.vlgmr.msra.gmra.mxu2 %v3460_v12 }
 0x21c   :  { %v2717_v47 = vpop.f32.mrf.mxu3  ;;  %3831 = vmatpush.bf16.msrb.mxu3 %v13042_v8 }
 0x21d   :  { %v14682_v30 = vadd.f32 %v2717_v47, %v14585_v7  ;;  %v13055_v7 = vld [vmem:[%s17271_s3 + $0x228] sm:$0xff]  ;;  %v3432_v47 = vld [vmem:[#allocation3 + $0x1d] sm:$0xff] }
 0x21e   :  { %v2448_v4 = vpop.f32.mrf.mxu2  ;;  %v14688_v49 = vpop.f32.mrf.mxu0  ;;  %4110 = vmatpush.bf16.msrb.mxu0 %v13055_v7 }
 0x21f   :  { %v14686_v28 = vadd.f32 %v2448_v4, %v2218_v24  ;;  %v2166_v14 = vpop.f32.mrf.mxu1  ;;  %v14710_v24 = vld [vmem:[#allocation3 + $0x44] sm:$0xff] }
 0x220   :  { %v2219_v32 = vadd.f32 %v2166_v14, %v1935_v29  ;;  %v3461_v29 = vpack.c.bf16 %v3433_v35, %v3432_v47  ;;  %v2607_v35 = vld [vmem:[#allocation3 + $0xeb] sm:$0xf] }
 0x224   :  { %v2719_v22 = vpop.f32.mrf.mxu3 }
 0x225   :  { %v14702_v57 = vadd.f32 %v2719_v22, %v14608_v51  ;;  %v2896_v51 = vpack.c.bf16 %v14699_v25, %v14710_v24 }
 0x226   :  { %v2450_v13 = vpop.f32.mrf.mxu2  ;;  %v14708_v18 = vpop.f32.mrf.mxu0 }
 0x227   :  { %v14706_v54 = vadd.f32 %v2450_v13, %v2219_v32  ;;  %v2169_v12 = vpop.f32.mrf.mxu1  ;;  %v2606_v13 = vld [vmem:[#allocation3 + $0xe3] sm:$0xff] }
 0x228   :  { %v2220_v4 = vadd.f32 %v2169_v12, %v1936_v53  ;;  %v14728_v53 = vld [vmem:[#allocation3 + $0x5c] sm:$0xff]  ;;  %v1938_v12 = vadd.f32 %v14401_v56, %v14637_v31 }
 0x229   :  { %2761 = vmatmul.bf16.gmra.mxu3 %v2621_v15  ;;  %3000 = vmatmul.bf16.gmra.mxu0 %v2896_v51  ;;  %v14739_v51 = vld [vmem:[#allocation3 + $0x54] sm:$0xff] }
 0x22a   :  { %3269 = vmatmul.bf16.gmra.mxu1 %v3177_v62  ;;  %v2897_v62 = vpack.c.bf16 %v14728_v53, %v14739_v51 }
 0x22b   :  { %3553 = vmatmul.bf16.gmra.mxu2 %v3461_v29  ;;  %v3434_v29 = vld [vmem:[#allocation3 + $0x2d] sm:$0xff] }
 0x22c   :  { %v2722_v10 = vpop.f32.mrf.mxu3 }
 0x22d   :  { %v14720_v32 = vadd.f32 %v2722_v10, %v14624_v20  ;;  %v3435_v20 = vld [vmem:[#allocation3 + $0x35] sm:$0xff] }
 0x22e   :  { %v2453_v14 = vpop.f32.mrf.mxu2  ;;  %v14726_v22 = vpop.f32.mrf.mxu0 }
 0x22f   :  { %v14724_v7 = vadd.f32 %v2453_v14, %v2220_v4  ;;  %v2171_v0 = vpop.f32.mrf.mxu1  ;;  %v2622_v4 = vpack.c.bf16 %v2607_v35, %v2606_v13  ;;  %v3462_v14 = vpack.c.bf16 %v3435_v20, %v3434_v29  ;;  %v3715_v20 = vld [vmem:[#allocation3 + $0x16] sm:$0xff]  ;;  %v14765_v29 = vld [vmem:[#allocation3 + $0x64] sm:$0xff]  ;;  %v1943_v41 = vadd.f32 %v14401_v56, %v14726_v22 }
 0x230   :  { %v2221_v55 = vadd.f32 %v2171_v0, %v1937_v16 }
 0x234   :  { %v2724_v43 = vpop.f32.mrf.mxu3 }
 0x235   :  { %v14731_v8 = vadd.f32 %v2724_v43, %v14635_v45  ;;  %v3178_v45 = vpack.c.bf16 %v14672_v23, %v14628_v27  ;;  %v14754_v23 = vld [vmem:[#allocation3 + $0x6c] sm:$0xff] }
 0x236   :  { %v2455_v9 = vpop.f32.mrf.mxu2  ;;  %v14737_v15 = vpop.f32.mrf.mxu0 }
 0x237   :  { %v14735_v60 = vadd.f32 %v2455_v9, %v2221_v55  ;;  %v2174_v47 = vpop.f32.mrf.mxu1  ;;  %v1939_v55 = vadd.f32 %v14401_v56, %v14653_v39 }
 0x238   :  { %v2222_v10 = vadd.f32 %v2174_v47, %v1938_v12 }
 0x239   :  { %2766 = vmatmul.bf16.gmra.mxu3 %v2622_v4  ;;  %3005 = vmatmul.bf16.gmra.mxu0 %v2897_v62  ;;  %v3437_v4 = vld [vmem:[#allocation3 + $0x45] sm:$0xff] }
 0x23a   :  { %3274 = vmatmul.bf16.gmra.mxu1 %v3178_v45 }
 0x23b   :  { %3558 = vmatmul.bf16.gmra.mxu2 %v3462_v14  ;;  %v2898_v14 = vpack.c.bf16 %v14754_v23, %v14765_v29 }
 0x23c   :  { %v2727_v31 = vpop.f32.mrf.mxu3 }
 0x23d   :  { %v14746_v0 = vadd.f32 %v2727_v31, %v14651_v38  ;;  %v1940_v38 = vadd.f32 %v14401_v56, %v14670_v48  ;;  %v3436_v31 = vld [vmem:[#allocation3 + $0x3d] sm:$0xff] }
 0x23e   :  { %v2458_v16 = vpop.f32.mrf.mxu2  ;;  %v14752_v13 = vpop.f32.mrf.mxu0  ;;  %v13054_v48 = vld [vmem:[%s17271_s3 + $0x220] sm:$0xff] }
 0x23f   :  { %v14750_v43 = vadd.f32 %v2458_v16, %v2222_v10  ;;  %v2176_v35 = vpop.f32.mrf.mxu1  ;;  %v3714_v10 = vld [vmem:[#allocation3 + $0xe] sm:$0xff]  ;;  %4111 = vmatpush.bf16.msrb.mxu0 %v13054_v48  ;;  %v3716_v48 = vld [vmem:[#allocation3 + $0x1e] sm:$0xff] }
 0x240   :  { %v2223_v9 = vadd.f32 %v2176_v35, %v1939_v55  ;;  %v3744_v16 = vpack.c.bf16 %v3715_v20, %v3714_v10  ;;  %v3463_v35 = vpack.c.bf16 %v3437_v4, %v3436_v31  ;;  %v1941_v20 = vadd.f32 %v14401_v56, %v14688_v49 }
 0x244   :  { %v2729_v27 = vpop.f32.mrf.mxu3 }
 0x245   :  { %v14757_v47 = vadd.f32 %v2729_v27, %v14668_v40  ;;  %v3179_v40 = vpack.c.bf16 %v14710_v24, %v14658_v21 }
 0x246   :  { %v2460_v12 = vpop.f32.mrf.mxu2  ;;  %v14763_v39 = vpop.f32.mrf.mxu0 }
 0x247   :  { %v14761_v62 = vadd.f32 %v2460_v12, %v2223_v9  ;;  %v2179_v45 = vpop.f32.mrf.mxu1 }
 0x248   :  { %v2224_v55 = vadd.f32 %v2179_v45, %v1940_v38  ;;  %v14783_v45 = vld [vmem:[#allocation3 + $0x7c] sm:$0xff] }
 0x249   :  { %3010 = vmatmul.bf16.gmra.mxu0 %v2898_v14  ;;  %3832 = vmatmul.bf16.vlgmr.msrb.gmra.mxu3 %v3744_v16  ;;  %v3717_v14 = vld [vmem:[#allocation3 + $0x26] sm:$0xff] }
 0x24a   :  { %3279 = vmatmul.bf16.gmra.mxu1 %v3179_v40  ;;  %v3439_v40 = vld [vmem:[#allocation3 + $0x55] sm:$0xff] }
 0x24b   :  { %3563 = vmatmul.bf16.gmra.mxu2 %v3463_v35 }
 0x24c   :  { %v2732_v9 = vpop.f32.mrf.mxu3 }
 0x24d   :  { %v14775_v12 = vadd.f32 %v2732_v9, %v14686_v28  ;;  %v1942_v28 = vadd.f32 %v14401_v56, %v14708_v18 }
 0x24e   :  { %v2463_v27 = vpop.f32.mrf.mxu2  ;;  %v14781_v21 = vpop.f32.mrf.mxu0 }
 0x24f   :  { %v14779_v38 = vadd.f32 %v2463_v27, %v2224_v55  ;;  %v2181_v24 = vpop.f32.mrf.mxu1  ;;  %v14794_v55 = vld [vmem:[#allocation3 + $0x74] sm:$0xff] }
 0x250   :  { %v2225_v4 = vadd.f32 %v2181_v24, %v1941_v20  ;;  %v2899_v27 = vpack.c.bf16 %v14783_v45, %v14794_v55  ;;  %v3438_v20 = vld [vmem:[#allocation3 + $0x4d] sm:$0xff]  ;;  %v3745_v24 = vpack.c.bf16 %v3717_v14, %v3716_v48 }
 0x254   :  { %v2734_v10 = vpop.f32.mrf.mxu3 }
 0x255   :  { %v14786_v16 = vadd.f32 %v2734_v10, %v14706_v54  ;;  %v3180_v54 = vpack.c.bf16 %v14739_v51, %v14699_v25  ;;  %v3464_v10 = vpack.c.bf16 %v3439_v40, %v3438_v20  ;;  %v13053_v51 = vld [vmem:[%s17271_s3 + $0x218] sm:$0xff]  ;;  %v1944_v20 = vadd.f32 %v14401_v56, %v14737_v15 }
 0x256   :  { %v2465_v31 = vpop.f32.mrf.mxu2  ;;  %v14792_v49 = vpop.f32.mrf.mxu0  ;;  %4112 = vmatpush.bf16.msrb.mxu0 %v13053_v51  ;;  %v3181_v51 = vpack.c.bf16 %v14765_v29, %v14728_v53  ;;  %v3721_v53 = vld [vmem:[#allocation3 + $0x46] sm:$0xff] }
 0x257   :  { %v14790_v35 = vadd.f32 %v2465_v31, %v2225_v4  ;;  %v2184_v9 = vpop.f32.mrf.mxu1 }
 0x258   :  { %v2226_v44 = vadd.f32 %v2184_v9, %v1942_v28  ;;  %v14811_v9 = vld [vmem:[#allocation3 + $0x8c] sm:$0xff] }
 0x259   :  { %3015 = vmatmul.bf16.gmra.mxu0 %v2899_v27  ;;  %3837 = vmatmul.bf16.gmra.mxu3 %v3745_v24 }
 0x25a   :  { %3284 = vmatmul.bf16.gmra.mxu1 %v3180_v54  ;;  %v14820_v54 = vld [vmem:[#allocation3 + $0x84] sm:$0xff] }
 0x25b   :  { %3568 = vmatmul.bf16.gmra.mxu2 %v3464_v10  ;;  %v3718_v10 = vld [vmem:[#allocation3 + $0x2e] sm:$0xff] }
 0x25c   :  { %v2737_v18 = vpop.f32.mrf.mxu3 }
 0x25d   :  { %v14801_v31 = vadd.f32 %v2737_v18, %v14724_v7  ;;  %v3719_v7 = vld [vmem:[#allocation3 + $0x36] sm:$0xff] }
 0x25e   :  { %v2468_v4 = vpop.f32.mrf.mxu2  ;;  %v1914_v14 = vpop.f32.mrf.mxu0 }
 0x25f   :  { %v14805_v11 = vadd.f32 %v2468_v4, %v2226_v44  ;;  %v1949_v28 = vadd.f32 %v14401_v56, %v1914_v14  ;;  %v2186_v48 = vpop.f32.mrf.mxu1  ;;  %v3441_v44 = vld [vmem:[#allocation3 + $0x65] sm:$0xff]  ;;  %v2900_v14 = vpack.c.bf16 %v14811_v9, %v14820_v54 }
 0x260   :  { %v2227_v25 = vadd.f32 %v2186_v48, %v1943_v41 }
 0x261   :  { %1979 = vst [vmem:[#allocation4 + $0xe8] sm:$0xf] %v1949_v28  ;;  %v3440_v28 = vld [vmem:[#allocation3 + $0x5d] sm:$0xff] }
 0x262   :  { %v3465_v56 = vpack.c.bf16 %v3441_v44, %v3440_v28 }
 0x264   :  { %v2739_v40 = vpop.f32.mrf.mxu3 }
 0x265   :  { %v14814_v22 = vadd.f32 %v2739_v40, %v14735_v60  ;;  %v3746_v60 = vpack.c.bf16 %v3719_v7, %v3718_v10  ;;  %v3443_v10 = vld [vmem:[#allocation3 + $0x75] sm:$0xff] }
 0x266   :  { %v2470_v27 = vpop.f32.mrf.mxu2  ;;  %v2981_v41 = vpop.f32.mrf.mxu0 }
 0x267   :  { %v14818_v24 = vadd.f32 %v2470_v27, %v2227_v25  ;;  %v2189_v18 = vpop.f32.mrf.mxu1  ;;  %v14823_v4 = vadd.f32 %v2981_v41, %v14526_v36 }
 0x268   :  { %v2228_v48 = vadd.f32 %v2189_v18, %v1944_v20  ;;  %v14838_v20 = vld [vmem:[#allocation3 + $0x9c] sm:$0xff] }
 0x269   :  { %3020 = vmatmul.bf16.gmra.mxu0 %v2900_v14  ;;  %3842 = vmatmul.bf16.gmra.mxu3 %v3746_v60  ;;  %v14845_v14 = vld [vmem:[#allocation3 + $0x94] sm:$0xff] }
 0x26a   :  { %3289 = vmatmul.bf16.gmra.mxu1 %v3181_v51  ;;  %v3442_v51 = vld [vmem:[#allocation3 + $0x6d] sm:$0xff] }
 0x26b   :  { %3573 = vmatmul.bf16.gmra.mxu2 %v3465_v56 }
 0x26c   :  { %v2742_v15 = vpop.f32.mrf.mxu3 }
 0x26d   :  { %v14830_v40 = vadd.f32 %v2742_v15, %v14750_v43  ;;  %v3720_v43 = vld [vmem:[#allocation3 + $0x3e] sm:$0xff]  ;;  %v3182_v15 = vpack.c.bf16 %v14794_v55, %v14754_v23  ;;  %v13052_v23 = vld [vmem:[%s17271_s3 + $0x210] sm:$0xff] }
 0x26e   :  { %v2473_v25 = vpop.f32.mrf.mxu2  ;;  %v14834_v27 = vpop.f32.mrf.mxu0  ;;  %v3747_v56 = vpack.c.bf16 %v3721_v53, %v3720_v43  ;;  %v14869_v53 = vld [vmem:[#allocation3 + $0xac] sm:$0xff]  ;;  %4113 = vmatpush.bf16.msrb.mxu0 %v13052_v23 }
 0x26f   :  { %v14832_v36 = vadd.f32 %v2473_v25, %v2228_v48  ;;  %v14836_v41 = vpop.f32.mrf.mxu1  ;;  %v2901_v48 = vpack.c.bf16 %v14838_v20, %v14845_v14 }
 0x274   :  { %v2744_v7 = vpop.f32.mrf.mxu3 }
 0x275   :  { %v14843_v44 = vadd.f32 %v2744_v7, %v14761_v62  ;;  %v3466_v62 = vpack.c.bf16 %v3443_v10, %v3442_v51  ;;  %v3723_v10 = vld [vmem:[#allocation3 + $0x56] sm:$0xff] }
 0x276   :  { %v14840_v29 = vpop.f32.mrf.mxu2  ;;  %v2986_v18 = vpop.f32.mrf.mxu0 }
 0x277   :  { %v14847_v28 = vpop.f32.mrf.mxu1  ;;  %v14850_v60 = vadd.f32 %v2986_v18, %v14575_v52 }
 0x279   :  { %3025 = vmatmul.bf16.gmra.mxu0 %v2901_v48  ;;  %3847 = vmatmul.bf16.gmra.mxu3 %v3747_v56  ;;  %v14876_v56 = vld [vmem:[#allocation3 + $0xa4] sm:$0xff] }
 0x27a   :  { %3294 = vmatmul.bf16.gmra.mxu1 %v3182_v15 }
 0x27b   :  { %3578 = vmatmul.bf16.gmra.mxu2 %v3466_v62 }
 0x27c   :  { %v2747_v25 = vpop.f32.mrf.mxu3 }
 0x27d   :  { %v14859_v59 = vadd.f32 %v2747_v25, %v14779_v38  ;;  %v3445_v38 = vld [vmem:[#allocation3 + $0x85] sm:$0xff]  ;;  %v2902_v25 = vpack.c.bf16 %v14869_v53, %v14876_v56 }
 0x27e   :  { %v14856_v7 = vpop.f32.mrf.mxu2  ;;  %v2988_v52 = vpop.f32.mrf.mxu0 }
 0x27f   :  { %v14861_v18 = vpop.f32.mrf.mxu1  ;;  %v14864_v19 = vadd.f32 %v2988_v52, %v14598_v26  ;;  %v3722_v26 = vld [vmem:[#allocation3 + $0x4e] sm:$0xff]  ;;  %v3444_v52 = vld [vmem:[#allocation3 + $0x7d] sm:$0xff] }
 0x280   :  { %v3748_v37 = vpack.c.bf16 %v3723_v10, %v3722_v26 }
 0x284   :  { %v2749_v55 = vpop.f32.mrf.mxu3 }
 0x285   :  { %v14874_v48 = vadd.f32 %v2749_v55, %v14790_v35  ;;  %v3183_v35 = vpack.c.bf16 %v14820_v54, %v14783_v45  ;;  %v3467_v55 = vpack.c.bf16 %v3445_v38, %v3444_v52  ;;  %v14895_v54 = vld [vmem:[#allocation3 + $0xbc] sm:$0xff] }
 0x286   :  { %v14871_v43 = vpop.f32.mrf.mxu2  ;;  %v2991_v51 = vpop.f32.mrf.mxu0 }
 0x287   :  { %v14878_v15 = vpop.f32.mrf.mxu1  ;;  %v14881_v62 = vadd.f32 %v2991_v51, %v14620_v2  ;;  %v2009_v51 = vld [vmem:[#allocation4 + $0xe8] sm:$0xf] }
 0x289   :  { %3030 = vmatmul.bf16.gmra.mxu0 %v2902_v25  ;;  %3852 = vmatmul.bf16.gmra.mxu3 %v3748_v37  ;;  %v3725_v37 = vld [vmem:[#allocation3 + $0x66] sm:$0xff]  ;;  %v3447_v25 = vld [vmem:[#allocation3 + $0x95] sm:$0xff] }
 0x28a   :  { %3299 = vmatmul.bf16.gmra.mxu1 %v3183_v35  ;;  %v3724_v35 = vld [vmem:[#allocation3 + $0x5e] sm:$0xff] }
 0x28b   :  { %3583 = vmatmul.bf16.gmra.mxu2 %v3467_v55 }
 0x28c   :  { %v2752_v23 = vpop.f32.mrf.mxu3 }
 0x28d   :  { %v14890_v6 = vadd.f32 %v2752_v23, %v14805_v11  ;;  %v14900_v11 = vld [vmem:[#allocation3 + $0xb4] sm:$0xff] }
 0x28e   :  { %v14887_v61 = vpop.f32.mrf.mxu2  ;;  %v2993_v2 = vpop.f32.mrf.mxu0  ;;  %v3446_v23 = vld [vmem:[#allocation3 + $0x8d] sm:$0xff] }
 0x28f   :  { %v2201_v50 = vpop.f32.mrf.mxu1  ;;  %v14893_v1 = vadd.f32 %v2993_v2, %v14631_v63  ;;  %v3749_v2 = vpack.c.bf16 %v3725_v37, %v3724_v35 }
 0x290   :  { %v2233_v10 = vadd.f32 %v2201_v50, %v2009_v51  ;;  %v2903_v50 = vpack.c.bf16 %v14895_v54, %v14900_v11  ;;  %v3184_v51 = vpack.c.bf16 %v14845_v14, %v14811_v9  ;;  %v13334_v14 = vld [vmem:[%s17272_s4] ss:$0 sm:$0xff] }
 0x291   :  { %v1947_v17 = vadd.f32 %v13334_v14, %v14781_v21  ;;  %v14962_v21 = vld [vmem:[#allocation3 + $0xd4] sm:$0xff] }
 0x292   :  { %2263 = vst [vmem:[#allocation4 + $0xe8] sm:$0xf] %v2233_v10 }
 0x294   :  { %v2754_v45 = vpop.f32.mrf.mxu3 }
 0x295   :  { %v14898_v26 = vadd.f32 %v2754_v45, %v14818_v24  ;;  %v3468_v24 = vpack.c.bf16 %v3447_v25, %v3446_v23 }
 0x296   :  { %v2485_v38 = vpop.f32.mrf.mxu2  ;;  %v2996_v52 = vpop.f32.mrf.mxu0 }
 0x297   :  { %v14903_v55 = vadd.f32 %v2996_v52, %v14647_v3  ;;  %v14905_v63 = vpop.f32.mrf.mxu1  ;;  %v13051_v3 = vld [vmem:[%s17271_s3 + $0x208] sm:$0xff] }
 0x298   :  { %4114 = vmatpush.bf16.msrb.mxu0 %v13051_v3 }
 0x299   :  { %v2293_v10 = vld [vmem:[#allocation4 + $0xe8] sm:$0xf]  ;;  %3035 = vmatmul.bf16.gmra.mxu0 %v2903_v50  ;;  %3857 = vmatmul.bf16.gmra.mxu3 %v3749_v2  ;;  %v14930_v2 = vld [vmem:[#allocation3 + $0xcc] sm:$0xff] }
 0x29a   :  { %v2517_v45 = vadd.f32 %v2485_v38, %v2293_v10  ;;  %3304 = vmatmul.bf16.gmra.mxu1 %v3184_v51  ;;  %v1945_v38 = vadd.f32 %v13334_v14, %v14752_v13  ;;  %v3727_v51 = vld [vmem:[#allocation3 + $0x76] sm:$0xff]  ;;  %v3726_v13 = vld [vmem:[#allocation3 + $0x6e] sm:$0xff] }
 0x29b   :  { %3588 = vmatmul.bf16.gmra.mxu2 %v3468_v24 }
 0x29c   :  { %2547 = vst [vmem:[#allocation4 + $0xe8] sm:$0xf] %v2517_v45  ;;  %v2757_v52 = vpop.f32.mrf.mxu3  ;;  %v2229_v50 = vadd.f32 %v14836_v41, %v1945_v38  ;;  %v3449_v45 = vld [vmem:[#allocation3 + $0xa5] sm:$0xff]  ;;  %v3448_v38 = vld [vmem:[#allocation3 + $0x9d] sm:$0xff] }
 0x29d   :  { %v14915_v34 = vadd.f32 %v2757_v52, %v14832_v36  ;;  %v14934_v52 = vld [vmem:[#allocation3 + $0xc4] sm:$0xff] }
 0x29e   :  { %v14917_v37 = vpop.f32.mrf.mxu2  ;;  %v2998_v9 = vpop.f32.mrf.mxu0  ;;  %v2513_v23 = vadd.f32 %v14840_v29, %v2229_v50  ;;  %v2904_v29 = vpack.c.bf16 %v14930_v2, %v14934_v52  ;;  %v3750_v50 = vpack.c.bf16 %v3727_v51, %v3726_v13  ;;  %v14958_v13 = vld [vmem:[#allocation3 + $0xdc] sm:$0xff] }
 0x29f   :  { %v14924_v25 = vadd.f32 %v2998_v9, %v14661_v58  ;;  %v14926_v35 = vpop.f32.mrf.mxu1  ;;  %v1946_v58 = vadd.f32 %v13334_v14, %v14763_v39 }
 0x2a1   :  { %v2230_v33 = vadd.f32 %v14847_v28, %v1946_v58  ;;  %v2231_v28 = vadd.f32 %v14861_v18, %v1947_v17  ;;  %v1948_v17 = vadd.f32 %v13334_v14, %v14792_v49 }
 0x2a4   :  { %v2759_v36 = vpop.f32.mrf.mxu3 }
 0x2a5   :  { %v2797_v24 = vadd.f32 %v2759_v36, %v2513_v23  ;;  %v3185_v23 = vpack.c.bf16 %v14876_v56, %v14838_v20  ;;  %v3469_v36 = vpack.c.bf16 %v3449_v45, %v3448_v38  ;;  %v2515_v56 = vadd.f32 %v14871_v43, %v2231_v28 }
 0x2a6   :  { %v14932_v10 = vpop.f32.mrf.mxu2  ;;  %v3001_v3 = vpop.f32.mrf.mxu0  ;;  %v2905_v43 = vpack.c.bf16 %v14958_v13, %v14962_v21  ;;  %v2232_v28 = vadd.f32 %v14878_v15, %v1948_v17 }
 0x2a7   :  { %2827 = vst [vmem:[#allocation4 + $0xc8] sm:$0xff] %v2797_v24  ;;  %v14938_v9 = vadd.f32 %v3001_v3, %v14682_v30  ;;  %v14940_v41 = vpop.f32.mrf.mxu1  ;;  %v2514_v30 = vadd.f32 %v14856_v7, %v2230_v33  ;;  %v3729_v33 = vld [vmem:[#allocation3 + $0x86] sm:$0xff] }
 0x2a8   :  { %v2516_v49 = vadd.f32 %v14887_v61, %v2232_v28  ;;  %v3731_v61 = vld [vmem:[#allocation3 + $0x96] sm:$0xff] }
 0x2a9   :  { %3040 = vmatmul.bf16.gmra.mxu0 %v2904_v29  ;;  %3862 = vmatmul.bf16.gmra.mxu3 %v3750_v50  ;;  %v3451_v29 = vld [vmem:[#allocation3 + $0xb5] sm:$0xff]  ;;  %v3728_v50 = vld [vmem:[#allocation3 + $0x7e] sm:$0xff] }
 0x2aa   :  { %3309 = vmatmul.bf16.gmra.mxu1 %v3185_v23  ;;  %v3450_v23 = vld [vmem:[#allocation3 + $0xad] sm:$0xff] }
 0x2ab   :  { %3593 = vmatmul.bf16.gmra.mxu2 %v3469_v36  ;;  %v3751_v36 = vpack.c.bf16 %v3729_v33, %v3728_v50  ;;  %v13073_v33 = vld [vmem:[%s17271_s3 + $0x2b8] sm:$0xff]  ;;  %v14990_v50 = vld [vmem:[#allocation3 + $0xe4] sm:$0xff] }
 0x2ac   :  { %v2762_v39 = vpop.f32.mrf.mxu3  ;;  %4676 = vmatpush.bf16.msrb.mxu2 %v13073_v33  ;;  %v2833_v33 = vld [vmem:[#allocation4 + $0x8] sm:$0xff] }
 0x2ad   :  { %v2798_v24 = vadd.f32 %v2762_v39, %v2514_v30  ;;  %v3186_v39 = vpack.c.bf16 %v14900_v11, %v14869_v53 }
 0x2ae   :  { %v14948_v3 = vpop.f32.mrf.mxu2  ;;  %v3003_v5 = vpop.f32.mrf.mxu0 }
 0x2af   :  { %2828 = vst [vmem:[#allocation4 + $0xd0] sm:$0xff] %v2798_v24  ;;  %v14952_v51 = vadd.f32 %v3003_v5, %v14702_v57  ;;  %v14954_v20 = vpop.f32.mrf.mxu1  ;;  %v13050_v5 = vld [vmem:[%s17271_s3 + $0x200] sm:$0xff]  ;;  %v3470_v24 = vpack.c.bf16 %v3451_v29, %v3450_v23  ;;  %v2577_v29 = vld [vmem:[#allocation4 + $0xe8] sm:$0xf] }
 0x2b0   :  { %4115 = vmatpush.bf16.msrb.mxu0 %v13050_v5  ;;  %v2891_v5 = vld [vmem:[#allocation3 + $0xec] sm:$0xf] }
 0x2b4   :  { %v2764_v45 = vpop.f32.mrf.mxu3 }
 0x2b5   :  { %v2799_v7 = vadd.f32 %v2764_v45, %v2515_v56 }
 0x2b6   :  { %v14960_v58 = vpop.f32.mrf.mxu2  ;;  %v3006_v38 = vpop.f32.mrf.mxu0 }
 0x2b7   :  { %2829 = vst [vmem:[#allocation4 + $0xd8] sm:$0xff] %v2799_v7  ;;  %v14969_v57 = vadd.f32 %v3006_v38, %v14720_v32  ;;  %v3275_v18 = vpop.f32.mrf.mxu1  ;;  %v13065_v32 = vld [vmem:[%s17271_s3 + $0x278] sm:$0xff] }
 0x2b8   :  { %v3344_v30 = vadd.f32 %v3275_v18, %v14881_v62  ;;  %4392 = vmatpush.bf16.msrb.mxu1 %v13065_v32 }
 0x2b9   :  { %3045 = vmatmul.bf16.gmra.mxu0 %v2905_v43  ;;  %3867 = vmatmul.bf16.gmra.mxu3 %v3751_v36  ;;  %v3453_v43 = vld [vmem:[#allocation3 + $0xc5] sm:$0xff]  ;;  %v3730_v36 = vld [vmem:[#allocation3 + $0x8e] sm:$0xff] }
 0x2ba   :  { %3314 = vmatmul.bf16.gmra.mxu1 %v3186_v39  ;;  %v3752_v28 = vpack.c.bf16 %v3731_v61, %v3730_v36 }
 0x2bb   :  { %3598 = vmatmul.bf16.gmra.mxu2 %v3470_v24  ;;  %v3452_v24 = vld [vmem:[#allocation3 + $0xbd] sm:$0xff] }
 0x2bc   :  { %v2767_v14 = vpop.f32.mrf.mxu3 }
 0x2bd   :  { %v2800_v62 = vadd.f32 %v2767_v14, %v2516_v49  ;;  %v3187_v49 = vpack.c.bf16 %v14934_v52, %v14895_v54  ;;  %v3471_v14 = vpack.c.bf16 %v3453_v43, %v3452_v24  ;;  %v3999_v43 = vld [vmem:[#allocation3 + $0x17] sm:$0xff]  ;;  %v3998_v24 = vld [vmem:[#allocation3 + $0xf] sm:$0xff] }
 0x2be   :  { %v3559_v56 = vpop.f32.mrf.mxu2  ;;  %v3008_v53 = vpop.f32.mrf.mxu0 }
 0x2bf   :  { %v14981_v45 = vadd.f32 %v3559_v56, %v3344_v30  ;;  %2830 = vst [vmem:[#allocation4 + $0xe0] sm:$0xff] %v2800_v62  ;;  %v14984_v15 = vadd.f32 %v3008_v53, %v14731_v8  ;;  %v3277_v11 = vpop.f32.mrf.mxu1  ;;  %v13081_v62 = vld [vmem:[%s17271_s3 + $0x2f8] sm:$0xff]  ;;  %v3340_v56 = vadd.f32 %v14905_v63, %v14823_v4  ;;  %v13064_v63 = vld [vmem:[%s17271_s3 + $0x270] sm:$0xff] }
 0x2c0   :  { %v3345_v7 = vadd.f32 %v3277_v11, %v14893_v1  ;;  %v2906_v1 = vpack.c.bf16 %v2891_v5, %v14990_v50  ;;  %4960 = vmatpush.bf16.msra.mxu3 %v13081_v62  ;;  %4393 = vmatpush.bf16.msrb.mxu1 %v13064_v63  ;;  %v13062_v62 = vld [vmem:[%s17271_s3 + $0x260] sm:$0xff]  ;;  %v13060_v63 = vld [vmem:[%s17271_s3 + $0x250] sm:$0xff] }
 0x2c4   :  { %v2769_v38 = vpop.f32.mrf.mxu3 }
 0x2c5   :  { %v2801_v17 = vadd.f32 %v2769_v38, %v2577_v29 }
 0x2c6   :  { %v3561_v18 = vpop.f32.mrf.mxu2  ;;  %v3011_v8 = vpop.f32.mrf.mxu0 }
 0x2c7   :  { %v14992_v23 = vadd.f32 %v3561_v18, %v3345_v7  ;;  %2831 = vst [vmem:[#allocation4 + $0xe8] sm:$0xf] %v2801_v17  ;;  %v14995_v30 = vadd.f32 %v3011_v8, %v14746_v0  ;;  %v3280_v39 = vpop.f32.mrf.mxu1  ;;  %v3624_v0 = vadd.f32 %v14917_v37, %v3340_v56  ;;  %v3057_v7 = vadd.f32 %v14834_v27, %v2833_v33  ;;  %v13072_v37 = vld [vmem:[%s17271_s3 + $0x2b0] sm:$0xff]  ;;  %v13071_v27 = vld [vmem:[%s17271_s3 + $0x2a8] sm:$0xff]  ;;  %v13070_v56 = vld [vmem:[%s17271_s3 + $0x2a0] sm:$0xff] }
 0x2c8   :  { %v3346_v32 = vadd.f32 %v3280_v39, %v14903_v55  ;;  %4677 = vmatpush.bf16.msrb.mxu2 %v13072_v37  ;;  %v3733_v18 = vld [vmem:[#allocation3 + $0xa6] sm:$0xff]  ;;  %v13068_v37 = vld [vmem:[%s17271_s3 + $0x290] sm:$0xff] }
 0x2c9   :  { %3050 = vmatmul.bf16.gmra.mxu0 %v2906_v1  ;;  %3872 = vmatmul.bf16.gmra.mxu3 %v3752_v28  ;;  %v3341_v38 = vadd.f32 %v14926_v35, %v3057_v7  ;;  %v3732_v1 = vld [vmem:[#allocation3 + $0x9e] sm:$0xff] }
 0x2ca   :  { %3319 = vmatmul.bf16.gmra.mxu1 %v3187_v49  ;;  %v3454_v49 = vld [vmem:[#allocation3 + $0xcd] sm:$0xff] }
 0x2cb   :  { %3603 = vmatmul.bf16.gmra.mxu2 %v3471_v14  ;;  %v3625_v5 = vadd.f32 %v14932_v10, %v3341_v38  ;;  %v3753_v10 = vpack.c.bf16 %v3733_v18, %v3732_v1  ;;  %v4028_v14 = vpack.c.bf16 %v3999_v43, %v3998_v24  ;;  %v3343_v38 = vadd.f32 %v14954_v20, %v14864_v19  ;;  %v4001_v18 = vld [vmem:[#allocation3 + $0x27] sm:$0xff]  ;;  %v3456_v24 = vld [vmem:[#allocation3 + $0xdd] sm:$0xff] }
 0x2cc   :  { %v3833_v53 = vpop.f32.mrf.mxu3  ;;  %4678 = vmatpush.bf16.msrb.mxu2 %v13071_v27  ;;  %v13067_v27 = vld [vmem:[%s17271_s3 + $0x288] sm:$0xff] }
 0x2cd   :  { %v3908_v11 = vadd.f32 %v3833_v53, %v3624_v0  ;;  %v3188_v53 = vpack.c.bf16 %v14962_v21, %v14930_v2  ;;  %v13061_v2 = vld [vmem:[%s17271_s3 + $0x258] sm:$0xff]  ;;  %v3734_v20 = vld [vmem:[#allocation3 + $0xae] sm:$0xff] }
 0x2ce   :  { %v3564_v55 = vpop.f32.mrf.mxu2  ;;  %v3013_v52 = vpop.f32.mrf.mxu0 }
 0x2cf   :  { %v15007_v54 = vadd.f32 %v3564_v55, %v3346_v32  ;;  %3938 = vst [vmem:[#allocation4] sm:$0xff] %v3908_v11  ;;  %v15011_v61 = vadd.f32 %v3013_v52, %v14757_v47  ;;  %v3282_v4 = vpop.f32.mrf.mxu1  ;;  %v13063_v47 = vld [vmem:[%s17271_s3 + $0x268] sm:$0xff]  ;;  %v3342_v11 = vadd.f32 %v14940_v41, %v14850_v60 }
 0x2d0   :  { %v3347_v29 = vadd.f32 %v3282_v4, %v14924_v25  ;;  %v3455_v25 = vld [vmem:[#allocation3 + $0xd5] sm:$0xff]  ;;  %4394 = vmatpush.bf16.msrb.mxu1 %v13063_v47  ;;  %4679 = vmatpush.bf16.msrb.mxu2 %v13070_v56  ;;  %v3627_v47 = vadd.f32 %v14960_v58, %v3343_v38  ;;  %v4000_v58 = vld [vmem:[#allocation3 + $0x1f] sm:$0xff] }
 0x2d1   :  { %v3472_v55 = vpack.c.bf16 %v3455_v25, %v3454_v49  ;;  %v3626_v33 = vadd.f32 %v14948_v3, %v3342_v11  ;;  %v13080_v25 = vld [vmem:[%s17271_s3 + $0x2f0] sm:$0xff]  ;;  %v4029_v49 = vpack.c.bf16 %v4001_v18, %v4000_v58  ;;  %v13079_v58 = vld [vmem:[%s17271_s3 + $0x2e8] sm:$0xff] }
 0x2d2   :  { %4961 = vmatpush.bf16.msra.mxu3 %v13080_v25 }
 0x2d4   :  { %v3835_v17 = vpop.f32.mrf.mxu3  ;;  %4395 = vmatpush.bf16.msrb.mxu1 %v13062_v62 }
 0x2d5   :  { %v3909_v36 = vadd.f32 %v3835_v17, %v3625_v5  ;;  %v3735_v17 = vld [vmem:[#allocation3 + $0xb6] sm:$0xff] }
 0x2d6   :  { %v3566_v8 = vpop.f32.mrf.mxu2  ;;  %v3016_v39 = vpop.f32.mrf.mxu0  ;;  %4962 = vmatpush.bf16.msra.mxu3 %v13079_v58  ;;  %v13074_v58 = vld [vmem:[%s17271_s3 + $0x2c0] sm:$0xff] }
 0x2d7   :  { %v15028_v35 = vadd.f32 %v3566_v8, %v3347_v29  ;;  %3939 = vst [vmem:[#allocation4 + $0x8] sm:$0xff] %v3909_v36  ;;  %v15031_v28 = vadd.f32 %v3016_v39, %v14775_v12  ;;  %v3285_v32 = vpop.f32.mrf.mxu1  ;;  %v13089_v12 = vld [vmem:[%s17271_s3 + $0x338] sm:$0xff]  ;;  %v3457_v8 = vld [vmem:[#allocation3 + $0xe5] sm:$0xff] }
 0x2d8   :  { %v3348_v0 = vadd.f32 %v3285_v32, %v14938_v9  ;;  %v13069_v9 = vld [vmem:[%s17271_s3 + $0x298] sm:$0xff]  ;;  %5244 = vmatpush.bf16.msra.mxu0 %v13089_v12  ;;  %4396 = vmatpush.bf16.msrb.mxu1 %v13061_v2  ;;  %v3754_v32 = vpack.c.bf16 %v3735_v17, %v3734_v20  ;;  %v3473_v56 = vpack.c.bf16 %v3457_v8, %v3456_v24  ;;  %v3737_v2 = vld [vmem:[#allocation3 + $0xc6] sm:$0xff] }
 0x2d9   :  { %3877 = vmatmul.bf16.gmra.mxu3 %v3753_v10  ;;  %4116 = vmatmul.bf16.vlgmr.msrb.gmra.mxu0 %v4028_v14  ;;  %v13058_v10 = vld [vmem:[%s17271_s3 + $0x240] sm:$0xff] }
 0x2da   :  { %3324 = vmatmul.bf16.gmra.mxu1 %v3188_v53  ;;  %4680 = vmatpush.bf16.msrb.mxu2 %v13069_v9  ;;  %v13066_v14 = vld [vmem:[%s17271_s3 + $0x280] sm:$0xff]  ;;  %v4003_v9 = vld [vmem:[#allocation3 + $0x37] sm:$0xff] }
 0x2db   :  { %3608 = vmatmul.bf16.gmra.mxu2 %v3472_v55  ;;  %v4005_v24 = vld [vmem:[#allocation3 + $0x47] sm:$0xff] }
 0x2dc   :  { %v3838_v21 = vpop.f32.mrf.mxu3  ;;  %4397 = vmatpush.bf16.msrb.mxu1 %v13060_v63 }
 0x2dd   :  { %v3910_v60 = vadd.f32 %v3838_v21, %v3626_v33 }
 0x2de   :  { %v3569_v52 = vpop.f32.mrf.mxu2  ;;  %v3018_v7 = vpop.f32.mrf.mxu0  ;;  %4681 = vmatpush.bf16.msrb.mxu2 %v13068_v37  ;;  %v3736_v37 = vld [vmem:[#allocation3 + $0xbe] sm:$0xff] }
 0x2df   :  { %v15054_v41 = vadd.f32 %v3569_v52, %v3348_v0  ;;  %3940 = vst [vmem:[#allocation4 + $0x10] sm:$0xff] %v3910_v60  ;;  %v15057_v3 = vadd.f32 %v3018_v7, %v14786_v16  ;;  %v3287_v4 = vpop.f32.mrf.mxu1  ;;  %v13059_v16 = vld [vmem:[%s17271_s3 + $0x248] sm:$0xff]  ;;  %v3175_v7 = vld [vmem:[#allocation3 + $0xf4] sm:$0xf] }
 0x2e0   :  { %v3349_v29 = vadd.f32 %v3287_v4, %v14952_v51  ;;  %4398 = vmatpush.bf16.msrb.mxu1 %v13059_v16  ;;  %v3174_v60 = vld [vmem:[#allocation3 + $0xec] sm:$0xff]  ;;  %v3755_v16 = vpack.c.bf16 %v3737_v2, %v3736_v37 }
 0x2e2   :  { %4682 = vmatpush.bf16.msrb.mxu2 %v13067_v27 }
 0x2e4   :  { %v3840_v5 = vpop.f32.mrf.mxu3  ;;  %4399 = vmatpush.bf16.msrb.mxu1 %v13058_v10  ;;  %v4567_v10 = vld [vmem:[#allocation3 + $0x20] sm:$0xff] }
 0x2e5   :  { %v3911_v51 = vadd.f32 %v3840_v5, %v3627_v47  ;;  %v3458_v47 = vld [vmem:[#allocation3 + $0xed] sm:$0xff]  ;;  %v3190_v5 = vpack.c.bf16 %v3175_v7, %v3174_v60 }
 0x2e6   :  { %v3571_v43 = vpop.f32.mrf.mxu2  ;;  %v3021_v19 = vpop.f32.mrf.mxu0  ;;  %4683 = vmatpush.bf16.msrb.mxu2 %v13066_v14 }
 0x2e7   :  { %v15075_v36 = vadd.f32 %v3571_v43, %v3349_v29  ;;  %3941 = vst [vmem:[#allocation4 + $0x18] sm:$0xff] %v3911_v51  ;;  %v15081_v39 = vadd.f32 %v3021_v19, %v14801_v31  ;;  %v3290_v1 = vpop.f32.mrf.mxu1  ;;  %v3189_v31 = vpack.c.bf16 %v14990_v50, %v14958_v13  ;;  %v4002_v29 = vld [vmem:[#allocation3 + $0x2f] sm:$0xff] }
 0x2e8   :  { %v3350_v62 = vadd.f32 %v3290_v1, %v14969_v57  ;;  %v3739_v1 = vld [vmem:[#allocation3 + $0xd6] sm:$0xff] }
 0x2e9   :  { %3882 = vmatmul.bf16.gmra.mxu3 %v3754_v32  ;;  %4121 = vmatmul.bf16.gmra.mxu0 %v4029_v49  ;;  %v4283_v49 = vld [vmem:[#allocation3 + $0x18] sm:$0xff] }
 0x2ea   :  { %3329 = vmatmul.bf16.gmra.mxu1 %v3189_v31  ;;  %v4004_v31 = vld [vmem:[#allocation3 + $0x3f] sm:$0xff] }
 0x2eb   :  { %3613 = vmatmul.bf16.gmra.mxu2 %v3473_v56 }
 0x2ec   :  { %v3843_v0 = vpop.f32.mrf.mxu3 }
 0x2ed   :  { %v15093_v55 = vadd.f32 %v3843_v0, %v14981_v45  ;;  %v3459_v45 = vld [vmem:[#allocation3 + $0xf5] sm:$0xf] }
 0x2ee   :  { %v3574_v53 = vpop.f32.mrf.mxu2  ;;  %v3023_v11 = vpop.f32.mrf.mxu0  ;;  %v3474_v17 = vpack.c.bf16 %v3459_v45, %v3458_v47 }
 0x2ef   :  { %v15095_v12 = vadd.f32 %v3574_v53, %v3350_v62  ;;  %v15098_v57 = vadd.f32 %v3023_v11, %v14814_v22  ;;  %v3292_v13 = vpop.f32.mrf.mxu1  ;;  %v13088_v22 = vld [vmem:[%s17271_s3 + $0x330] sm:$0xff]  ;;  %v4031_v53 = vpack.c.bf16 %v4005_v24, %v4004_v31 }
 0x2f0   :  { %v3351_v50 = vadd.f32 %v3292_v13, %v14984_v15  ;;  %5245 = vmatpush.bf16.msra.mxu0 %v13088_v22  ;;  %v3738_v62 = vld [vmem:[#allocation3 + $0xce] sm:$0xff]  ;;  %v13078_v13 = vld [vmem:[%s17271_s3 + $0x2e0] sm:$0xff] }
 0x2f1   :  { %v3756_v0 = vpack.c.bf16 %v3739_v1, %v3738_v62  ;;  %v4282_v11 = vld [vmem:[#allocation3 + $0x10] sm:$0xff]  ;;  %4963 = vmatpush.bf16.msra.mxu3 %v13078_v13  ;;  %v3741_v22 = vld [vmem:[#allocation3 + $0xe6] sm:$0xff]  ;;  %v4287_v13 = vld [vmem:[#allocation3 + $0x38] sm:$0xff] }
 0x2f4   :  { %v3845_v33 = vpop.f32.mrf.mxu3 }
 0x2f5   :  { %v15102_v52 = vadd.f32 %v3845_v33, %v14992_v23  ;;  %v4030_v23 = vpack.c.bf16 %v4003_v9, %v4002_v29  ;;  %v4596_v33 = vpack.c.bf16 %v4567_v10, %v4283_v49  ;;  %v13087_v29 = vld [vmem:[%s17271_s3 + $0x328] sm:$0xff] }
 0x2f6   :  { %v3576_v21 = vpop.f32.mrf.mxu2  ;;  %v3026_v63 = vpop.f32.mrf.mxu0  ;;  %5246 = vmatpush.bf16.msra.mxu0 %v13087_v29 }
 0x2f7   :  { %v15104_v4 = vadd.f32 %v3576_v21, %v3351_v50  ;;  %v15110_v15 = vadd.f32 %v3026_v63, %v14830_v40  ;;  %v3295_v38 = vpop.f32.mrf.mxu1  ;;  %v4312_v50 = vpack.c.bf16 %v4283_v49, %v4282_v11  ;;  %v13076_v63 = vld [vmem:[%s17271_s3 + $0x2d0] sm:$0xff] }
 0x2f8   :  { %v3352_v27 = vadd.f32 %v3295_v38, %v14995_v30  ;;  %v4007_v38 = vld [vmem:[#allocation3 + $0x57] sm:$0xff] }
 0x2f9   :  { %3887 = vmatmul.bf16.gmra.mxu3 %v3755_v16  ;;  %4126 = vmatmul.bf16.gmra.mxu0 %v4030_v23  ;;  %v4285_v23 = vld [vmem:[#allocation3 + $0x28] sm:$0xff] }
 0x2fa   :  { %3334 = vmatmul.bf16.gmra.mxu1 %v3190_v5 }
 0x2fb   :  { %3618 = vmatmul.bf16.gmra.mxu2 %v3474_v17  ;;  %v3740_v17 = vld [vmem:[#allocation3 + $0xde] sm:$0xff] }
 0x2fc   :  { %v3848_v18 = vpop.f32.mrf.mxu3 }
 0x2fd   :  { %v15114_v51 = vadd.f32 %v3848_v18, %v15007_v54  ;;  %v4006_v18 = vld [vmem:[#allocation3 + $0x4f] sm:$0xff] }
 0x2fe   :  { %v3579_v43 = vpop.f32.mrf.mxu2  ;;  %v3028_v8 = vpop.f32.mrf.mxu0 }
 0x2ff   :  { %v15116_v40 = vadd.f32 %v3579_v43, %v3352_v27  ;;  %v15119_v19 = vadd.f32 %v3028_v8, %v14843_v44  ;;  %v3297_v20 = vpop.f32.mrf.mxu1  ;;  %v4569_v27 = vld [vmem:[#allocation3 + $0x30] sm:$0xff] }
 0x300   :  { %v3353_v30 = vadd.f32 %v3297_v20, %v15011_v61  ;;  %v3757_v20 = vpack.c.bf16 %v3741_v22, %v3740_v17  ;;  %v4597_v1 = vpack.c.bf16 %v4569_v27, %v4285_v23  ;;  %v4573_v17 = vld [vmem:[#allocation3 + $0x50] sm:$0xff] }
 0x304   :  { %v3850_v25 = vpop.f32.mrf.mxu3 }
 0x305   :  { %v15126_v54 = vadd.f32 %v3850_v25, %v15028_v35  ;;  %v4313_v25 = vpack.c.bf16 %v4285_v23, %v4567_v10 }
 0x306   :  { %v3581_v32 = vpop.f32.mrf.mxu2  ;;  %v3031_v44 = vpop.f32.mrf.mxu0 }
 0x307   :  { %v15128_v14 = vadd.f32 %v3581_v32, %v3353_v30  ;;  %v15131_v61 = vadd.f32 %v3031_v44, %v14859_v59  ;;  %v3300_v56 = vpop.f32.mrf.mxu1  ;;  %v13077_v59 = vld [vmem:[%s17271_s3 + $0x2d8] sm:$0xff]  ;;  %v4032_v30 = vpack.c.bf16 %v4007_v38, %v4006_v18 }
 0x308   :  { %v3354_v35 = vadd.f32 %v3300_v56, %v15031_v28  ;;  %4964 = vmatpush.bf16.msra.mxu3 %v13077_v59  ;;  %v3743_v56 = vld [vmem:[#allocation3 + $0xf6] sm:$0xf]  ;;  %v4008_v59 = vld [vmem:[#allocation3 + $0x5f] sm:$0xff] }
 0x309   :  { %3892 = vmatmul.bf16.gmra.mxu3 %v3756_v0  ;;  %4131 = vmatmul.bf16.gmra.mxu0 %v4031_v53  ;;  %v4009_v0 = vld [vmem:[#allocation3 + $0x67] sm:$0xff] }
 0x30a   :  { %4400 = vmatmul.bf16.vlgmr.msrb.gmra.mxu1 %v4312_v50 }
 0x30b   :  { %4684 = vmatmul.bf16.vlgmr.msrb.gmra.mxu2 %v4596_v33  ;;  %v3742_v33 = vld [vmem:[#allocation3 + $0xee] sm:$0xff] }
 0x30c   :  { %v3853_v2 = vpop.f32.mrf.mxu3  ;;  %4965 = vmatpush.bf16.msra.mxu3 %v13076_v63 }
 0x30d   :  { %v15141_v21 = vadd.f32 %v3853_v2, %v15054_v41  ;;  %v13075_v41 = vld [vmem:[%s17271_s3 + $0x2c8] sm:$0xff] }
 0x30e   :  { %v3584_v9 = vpop.f32.mrf.mxu2  ;;  %v3033_v7 = vpop.f32.mrf.mxu0 }
 0x30f   :  { %v15143_v60 = vadd.f32 %v3584_v9, %v3354_v35  ;;  %v15146_v28 = vadd.f32 %v3033_v7, %v14874_v48  ;;  %v3302_v45 = vpop.f32.mrf.mxu1  ;;  %v4571_v35 = vld [vmem:[#allocation3 + $0x40] sm:$0xff]  ;;  %v3758_v9 = vpack.c.bf16 %v3743_v56, %v3742_v33 }
 0x310   :  { %v3355_v37 = vadd.f32 %v3302_v45, %v15057_v3  ;;  %4966 = vmatpush.bf16.msra.mxu3 %v13075_v41  ;;  %v4314_v45 = vpack.c.bf16 %v4287_v13, %v4569_v27  ;;  %v4598_v63 = vpack.c.bf16 %v4571_v35, %v4287_v13  ;;  %v4575_v33 = vld [vmem:[#allocation3 + $0x60] sm:$0xff] }
 0x314   :  { %v3855_v48 = vpop.f32.mrf.mxu3  ;;  %4967 = vmatpush.bf16.msra.mxu3 %v13074_v58 }
 0x315   :  { %v15159_v16 = vadd.f32 %v3855_v48, %v15075_v36 }
 0x316   :  { %v3586_v47 = vpop.f32.mrf.mxu2  ;;  %v3036_v5 = vpop.f32.mrf.mxu0 }
 0x317   :  { %v15161_v3 = vadd.f32 %v3586_v47, %v3355_v37  ;;  %v15164_v43 = vadd.f32 %v3036_v5, %v14890_v6  ;;  %v3305_v8 = vpop.f32.mrf.mxu1  ;;  %v4851_v47 = vld [vmem:[#allocation3 + $0x21] sm:$0xff] }
 0x318   :  { %v3356_v36 = vadd.f32 %v3305_v8, %v15081_v39  ;;  %v4289_v5 = vld [vmem:[#allocation3 + $0x48] sm:$0xff] }
 0x319   :  { %3897 = vmatmul.bf16.gmra.mxu3 %v3757_v20  ;;  %4136 = vmatmul.bf16.gmra.mxu0 %v4032_v30  ;;  %v4010_v8 = vld [vmem:[#allocation3 + $0x6f] sm:$0xff]  ;;  %v4850_v20 = vld [vmem:[#allocation3 + $0x19] sm:$0xff] }
 0x31a   :  { %4405 = vmatmul.bf16.gmra.mxu1 %v4313_v25  ;;  %v4315_v25 = vpack.c.bf16 %v4289_v5, %v4571_v35 }
 0x31b   :  { %4689 = vmatmul.bf16.gmra.mxu2 %v4597_v1  ;;  %v4599_v1 = vpack.c.bf16 %v4573_v17, %v4289_v5 }
 0x31c   :  { %v3858_v24 = vpop.f32.mrf.mxu3 }
 0x31d   :  { %v15171_v32 = vadd.f32 %v3858_v24, %v15095_v12 }
 0x31e   :  { %v3589_v6 = vpop.f32.mrf.mxu2  ;;  %v3038_v44 = vpop.f32.mrf.mxu0 }
 0x31f   :  { %v15173_v49 = vadd.f32 %v3589_v6, %v3356_v36  ;;  %v15176_v62 = vadd.f32 %v3038_v44, %v14898_v26  ;;  %v3307_v31 = vpop.f32.mrf.mxu1  ;;  %v4880_v36 = vpack.c.bf16 %v4851_v47, %v4850_v20  ;;  %v4855_v20 = vld [vmem:[#allocation3 + $0x41] sm:$0xff] }
 0x320   :  { %v3357_v39 = vadd.f32 %v3307_v31, %v15098_v57  ;;  %v4033_v57 = vpack.c.bf16 %v4009_v0, %v4008_v59  ;;  %v4013_v0 = vld [vmem:[#allocation3 + $0x87] sm:$0xff] }
 0x324   :  { %v3860_v10 = vpop.f32.mrf.mxu3 }
 0x325   :  { %v15180_v11 = vadd.f32 %v3860_v10, %v15104_v4 }
 0x326   :  { %v3591_v53 = vpop.f32.mrf.mxu2  ;;  %v3041_v50 = vpop.f32.mrf.mxu0 }
 0x327   :  { %v15182_v12 = vadd.f32 %v3591_v53, %v3357_v39  ;;  %v15185_v26 = vadd.f32 %v3041_v50, %v14915_v34  ;;  %v3310_v2 = vpop.f32.mrf.mxu1  ;;  %v4853_v53 = vld [vmem:[#allocation3 + $0x31] sm:$0xff] }
 0x328   :  { %v3358_v7 = vadd.f32 %v3310_v2, %v15110_v15  ;;  %v4011_v15 = vld [vmem:[#allocation3 + $0x77] sm:$0xff]  ;;  %v4012_v2 = vld [vmem:[#allocation3 + $0x7f] sm:$0xff] }
 0x329   :  { %3902 = vmatmul.bf16.gmra.mxu3 %v3758_v9  ;;  %4141 = vmatmul.bf16.gmra.mxu0 %v4033_v57  ;;  %v4034_v58 = vpack.c.bf16 %v4011_v15, %v4010_v8  ;;  %v4291_v50 = vld [vmem:[#allocation3 + $0x58] sm:$0xff]  ;;  %v4852_v9 = vld [vmem:[#allocation3 + $0x29] sm:$0xff] }
 0x32a   :  { %4410 = vmatmul.bf16.gmra.mxu1 %v4314_v45  ;;  %v4881_v45 = vpack.c.bf16 %v4853_v53, %v4852_v9  ;;  %v4015_v8 = vld [vmem:[#allocation3 + $0x97] sm:$0xff] }
 0x32b   :  { %4694 = vmatmul.bf16.gmra.mxu2 %v4598_v63  ;;  %v4316_v63 = vpack.c.bf16 %v4291_v50, %v4573_v17 }
 0x32c   :  { %v3863_v4 = vpop.f32.mrf.mxu3 }
 0x32d   :  { %v15189_v29 = vadd.f32 %v3863_v4, %v15116_v40  ;;  %v4600_v4 = vpack.c.bf16 %v4575_v33, %v4291_v50 }
 0x32e   :  { %v3594_v37 = vpop.f32.mrf.mxu2  ;;  %v15193_v34 = vpop.f32.mrf.mxu0 }
 0x32f   :  { %v15191_v41 = vadd.f32 %v3594_v37, %v3358_v7  ;;  %v3312_v48 = vpop.f32.mrf.mxu1  ;;  %v4035_v7 = vpack.c.bf16 %v4013_v0, %v4012_v2 }
 0x330   :  { %v3359_v22 = vadd.f32 %v3312_v48, %v15119_v19 }
 0x334   :  { %v3865_v38 = vpop.f32.mrf.mxu3 }
 0x335   :  { %v15197_v27 = vadd.f32 %v3865_v38, %v15128_v14  ;;  %v13086_v14 = vld [vmem:[%s17271_s3 + $0x320] sm:$0xff] }
 0x336   :  { %v3596_v23 = vpop.f32.mrf.mxu2  ;;  %v15201_v40 = vpop.f32.mrf.mxu0  ;;  %5247 = vmatpush.bf16.msra.mxu0 %v13086_v14 }
 0x337   :  { %v15199_v18 = vadd.f32 %v3596_v23, %v3359_v22  ;;  %v3315_v30 = vpop.f32.mrf.mxu1  ;;  %v2861_v22 = vld [vmem:[#allocation4 + $0xe8] sm:$0xf] }
 0x338   :  { %v3360_v19 = vadd.f32 %v3315_v30, %v15131_v61 }
 0x339   :  { %4146 = vmatmul.bf16.gmra.mxu0 %v4034_v58  ;;  %4968 = vmatmul.bf16.vlgmr.msra.gmra.mxu3 %v4880_v36  ;;  %v4293_v58 = vld [vmem:[#allocation3 + $0x68] sm:$0xff]  ;;  %v4577_v36 = vld [vmem:[#allocation3 + $0x70] sm:$0xff] }
 0x33a   :  { %4415 = vmatmul.bf16.gmra.mxu1 %v4315_v25 }
 0x33b   :  { %4699 = vmatmul.bf16.gmra.mxu2 %v4599_v1  ;;  %v4854_v1 = vld [vmem:[#allocation3 + $0x39] sm:$0xff] }
 0x33c   :  { %v3868_v24 = vpop.f32.mrf.mxu3 }
 0x33d   :  { %v15208_v44 = vadd.f32 %v3868_v24, %v15143_v60 }
 0x33e   :  { %v3599_v6 = vpop.f32.mrf.mxu2  ;;  %v15212_v39 = vpop.f32.mrf.mxu0 }
 0x33f   :  { %v15210_v31 = vadd.f32 %v3599_v6, %v3360_v19  ;;  %v3317_v61 = vpop.f32.mrf.mxu1  ;;  %v4882_v6 = vpack.c.bf16 %v4855_v20, %v4854_v1  ;;  %v4297_v1 = vld [vmem:[#allocation3 + $0x88] sm:$0xff] }
 0x340   :  { %v3361_v10 = vadd.f32 %v3317_v61, %v15146_v28 }
 0x344   :  { %v3870_v56 = vpop.f32.mrf.mxu3 }
 0x345   :  { %v15216_v35 = vadd.f32 %v3870_v56, %v15161_v3  ;;  %v4601_v56 = vpack.c.bf16 %v4577_v36, %v4293_v58 }
 0x346   :  { %v3601_v13 = vpop.f32.mrf.mxu2  ;;  %v15220_v60 = vpop.f32.mrf.mxu0 }
 0x347   :  { %v15218_v59 = vadd.f32 %v3601_v13, %v3361_v10  ;;  %v3320_v57 = vpop.f32.mrf.mxu1  ;;  %v4317_v10 = vpack.c.bf16 %v4293_v58, %v4575_v33  ;;  %v4859_v58 = vld [vmem:[#allocation3 + $0x61] sm:$0xff] }
 0x348   :  { %v3362_v28 = vadd.f32 %v3320_v57, %v15164_v43  ;;  %v13085_v43 = vld [vmem:[%s17271_s3 + $0x318] sm:$0xff]  ;;  %v4017_v57 = vld [vmem:[#allocation3 + $0xa7] sm:$0xff] }
 0x349   :  { %4151 = vmatmul.bf16.gmra.mxu0 %v4035_v7  ;;  %4973 = vmatmul.bf16.gmra.mxu3 %v4881_v45  ;;  %v4295_v45 = vld [vmem:[#allocation3 + $0x78] sm:$0xff] }
 0x34a   :  { %4420 = vmatmul.bf16.gmra.mxu1 %v4316_v63  ;;  %5248 = vmatpush.bf16.msra.mxu0 %v13085_v43 }
 0x34b   :  { %4704 = vmatmul.bf16.gmra.mxu2 %v4600_v4  ;;  %v4856_v4 = vld [vmem:[#allocation3 + $0x49] sm:$0xff] }
 0x34c   :  { %v3873_v3 = vpop.f32.mrf.mxu3 }
 0x34d   :  { %v15224_v48 = vadd.f32 %v3873_v3, %v15173_v49 }
 0x34e   :  { %v3604_v37 = vpop.f32.mrf.mxu2  ;;  %v3053_v15 = vpop.f32.mrf.mxu0 }
 0x34f   :  { %v15226_v38 = vadd.f32 %v3604_v37, %v3362_v28  ;;  %v3085_v47 = vadd.f32 %v3053_v15, %v2861_v22  ;;  %v3322_v23 = vpop.f32.mrf.mxu1  ;;  %v4579_v28 = vld [vmem:[#allocation3 + $0x80] sm:$0xff]  ;;  %v4318_v15 = vpack.c.bf16 %v4295_v45, %v4577_v36 }
 0x350   :  { %v3363_v5 = vadd.f32 %v3322_v23, %v15176_v62  ;;  %v4014_v62 = vld [vmem:[#allocation3 + $0x8f] sm:$0xff] }
 0x351   :  { %3115 = vst [vmem:[#allocation4 + $0xe8] sm:$0xf] %v3085_v47  ;;  %v4036_v24 = vpack.c.bf16 %v4015_v8, %v4014_v62  ;;  %v4602_v47 = vpack.c.bf16 %v4579_v28, %v4295_v45  ;;  %v13084_v8 = vld [vmem:[%s17271_s3 + $0x310] sm:$0xff] }
 0x352   :  { %5249 = vmatpush.bf16.msra.mxu0 %v13084_v8  ;;  %v4299_v8 = vld [vmem:[#allocation3 + $0x98] sm:$0xff] }
 0x354   :  { %v3875_v17 = vpop.f32.mrf.mxu3 }
 0x355   :  { %v15233_v49 = vadd.f32 %v3875_v17, %v15182_v12 }
 0x356   :  { %v3606_v30 = vpop.f32.mrf.mxu2  ;;  %v15237_v25 = vpop.f32.mrf.mxu0 }
 0x357   :  { %v15235_v19 = vadd.f32 %v3606_v30, %v3363_v5  ;;  %v3325_v14 = vpop.f32.mrf.mxu1  ;;  %v4019_v30 = vld [vmem:[#allocation3 + $0xb7] sm:$0xff] }
 0x358   :  { %v3364_v61 = vadd.f32 %v3325_v14, %v15185_v26  ;;  %v4857_v26 = vld [vmem:[#allocation3 + $0x51] sm:$0xff] }
 0x359   :  { %4156 = vmatmul.bf16.gmra.mxu0 %v4036_v24  ;;  %4978 = vmatmul.bf16.gmra.mxu3 %v4882_v6  ;;  %v4883_v22 = vpack.c.bf16 %v4857_v26, %v4856_v4  ;;  %v4581_v14 = vld [vmem:[#allocation3 + $0x90] sm:$0xff]  ;;  %v4858_v6 = vld [vmem:[#allocation3 + $0x59] sm:$0xff] }
 0x35a   :  { %4425 = vmatmul.bf16.gmra.mxu1 %v4317_v10  ;;  %v4018_v24 = vld [vmem:[#allocation3 + $0xaf] sm:$0xff] }
 0x35b   :  { %4709 = vmatmul.bf16.gmra.mxu2 %v4601_v56  ;;  %v4038_v56 = vpack.c.bf16 %v4019_v30, %v4018_v24 }
 0x35c   :  { %v3878_v12 = vpop.f32.mrf.mxu3 }
 0x35d   :  { %v15241_v53 = vadd.f32 %v3878_v12, %v15191_v41  ;;  %v4016_v41 = vld [vmem:[#allocation3 + $0x9f] sm:$0xff]  ;;  %v4884_v12 = vpack.c.bf16 %v4859_v58, %v4858_v6  ;;  %v4860_v58 = vld [vmem:[#allocation3 + $0x69] sm:$0xff]  ;;  %v4320_v6 = vpack.c.bf16 %v4299_v8, %v4581_v14 }
 0x35e   :  { %v3609_v0 = vpop.f32.mrf.mxu2  ;;  %v15245_v50 = vpop.f32.mrf.mxu0  ;;  %v4037_v37 = vpack.c.bf16 %v4017_v57, %v4016_v41  ;;  %v3145_v41 = vld [vmem:[#allocation4 + $0xe8] sm:$0xf] }
 0x35f   :  { %v15243_v13 = vadd.f32 %v3609_v0, %v3364_v61  ;;  %v15247_v2 = vpop.f32.mrf.mxu1  ;;  %v4319_v0 = vpack.c.bf16 %v4297_v1, %v4579_v28 }
 0x364   :  { %v3880_v9 = vpop.f32.mrf.mxu3 }
 0x365   :  { %v15252_v7 = vadd.f32 %v3880_v9, %v15199_v18  ;;  %v4603_v9 = vpack.c.bf16 %v4581_v14, %v4297_v1  ;;  %v2857_v14 = vld [vmem:[#allocation4 + $0xc8] sm:$0xff] }
 0x366   :  { %v15249_v33 = vpop.f32.mrf.mxu2  ;;  %v15254_v63 = vpop.f32.mrf.mxu0 }
 0x367   :  { %v15256_v3 = vpop.f32.mrf.mxu1 }
 0x369   :  { %4161 = vmatmul.bf16.gmra.mxu0 %v4037_v37  ;;  %4983 = vmatmul.bf16.gmra.mxu3 %v4883_v22  ;;  %v4021_v22 = vld [vmem:[#allocation3 + $0xc7] sm:$0xff] }
 0x36a   :  { %4430 = vmatmul.bf16.gmra.mxu1 %v4318_v15  ;;  %v4861_v15 = vld [vmem:[#allocation3 + $0x71] sm:$0xff] }
 0x36b   :  { %4714 = vmatmul.bf16.gmra.mxu2 %v4602_v47  ;;  %v4885_v24 = vpack.c.bf16 %v4861_v15, %v4860_v58  ;;  %v4301_v58 = vld [vmem:[#allocation3 + $0xa8] sm:$0xff] }
 0x36c   :  { %v3883_v23 = vpop.f32.mrf.mxu3 }
 0x36d   :  { %v15261_v18 = vadd.f32 %v3883_v23, %v15210_v31 }
 0x36e   :  { %v15258_v5 = vpop.f32.mrf.mxu2  ;;  %v15263_v43 = vpop.f32.mrf.mxu0 }
 0x36f   :  { %v15265_v17 = vpop.f32.mrf.mxu1 }
 0x374   :  { %v3885_v20 = vpop.f32.mrf.mxu3 }
 0x375   :  { %v15273_v62 = vadd.f32 %v3885_v20, %v15218_v59  ;;  %v4583_v20 = vld [vmem:[#allocation3 + $0xa0] sm:$0xff] }
 0x376   :  { %v15270_v36 = vpop.f32.mrf.mxu2  ;;  %v4127_v31 = vpop.f32.mrf.mxu0 }
 0x377   :  { %v15275_v61 = vpop.f32.mrf.mxu1  ;;  %v15278_v10 = vadd.f32 %v4127_v31, %v15093_v55 }
 0x379   :  { %4166 = vmatmul.bf16.gmra.mxu0 %v4038_v56  ;;  %4988 = vmatmul.bf16.gmra.mxu3 %v4884_v12  ;;  %v4604_v56 = vpack.c.bf16 %v4583_v20, %v4299_v8  ;;  %v4863_v8 = vld [vmem:[#allocation3 + $0x81] sm:$0xff] }
 0x37a   :  { %4435 = vmatmul.bf16.gmra.mxu1 %v4319_v0 }
 0x37b   :  { %4719 = vmatmul.bf16.gmra.mxu2 %v4603_v9 }
 0x37c   :  { %v3888_v59 = vpop.f32.mrf.mxu3 }
 0x37d   :  { %v15283_v26 = vadd.f32 %v3888_v59, %v15226_v38  ;;  %v4020_v38 = vld [vmem:[#allocation3 + $0xbf] sm:$0xff] }
 0x37e   :  { %v15280_v57 = vpop.f32.mrf.mxu2  ;;  %v4129_v45 = vpop.f32.mrf.mxu0 }
 0x37f   :  { %v3337_v4 = vpop.f32.mrf.mxu1  ;;  %v15286_v55 = vadd.f32 %v4129_v45, %v15102_v52  ;;  %v4039_v52 = vpack.c.bf16 %v4021_v22, %v4020_v38 }
 0x380   :  { %v3369_v37 = vadd.f32 %v3337_v4, %v3145_v41  ;;  %v3081_v41 = vadd.f32 %v15193_v34, %v2857_v14  ;;  %v4321_v14 = vpack.c.bf16 %v4301_v58, %v4583_v20 }
 0x382   :  { %3399 = vst [vmem:[#allocation4 + $0xe8] sm:$0xf] %v3369_v37 }
 0x384   :  { %v3890_v28 = vpop.f32.mrf.mxu3 }
 0x385   :  { %v15289_v23 = vadd.f32 %v3890_v28, %v15235_v19  ;;  %v13083_v19 = vld [vmem:[%s17271_s3 + $0x308] sm:$0xff]  ;;  %v3365_v28 = vadd.f32 %v15247_v2, %v3081_v41 }
 0x386   :  { %v3621_v47 = vpop.f32.mrf.mxu2  ;;  %v4132_v30 = vpop.f32.mrf.mxu0  ;;  %5250 = vmatpush.bf16.msra.mxu0 %v13083_v19 }
 0x387   :  { %v15292_v1 = vadd.f32 %v4132_v30, %v15114_v51  ;;  %v15294_v31 = vpop.f32.mrf.mxu1  ;;  %v3649_v22 = vadd.f32 %v15249_v33, %v3365_v28 }
 0x389   :  { %v3429_v12 = vld [vmem:[#allocation4 + $0xe8] sm:$0xf]  ;;  %4171 = vmatmul.bf16.gmra.mxu0 %v4039_v52  ;;  %4993 = vmatmul.bf16.gmra.mxu3 %v4885_v24  ;;  %v4585_v52 = vld [vmem:[#allocation3 + $0xb0] sm:$0xff] }
 0x38a   :  { %v3653_v0 = vadd.f32 %v3621_v47, %v3429_v12  ;;  %4440 = vmatmul.bf16.gmra.mxu1 %v4320_v6  ;;  %v4023_v47 = vld [vmem:[#allocation3 + $0xd7] sm:$0xff]  ;;  %v4022_v6 = vld [vmem:[#allocation3 + $0xcf] sm:$0xff] }
 0x38b   :  { %4724 = vmatmul.bf16.gmra.mxu2 %v4604_v56  ;;  %v2858_v24 = vld [vmem:[#allocation4 + $0xd0] sm:$0xff]  ;;  %v4862_v56 = vld [vmem:[#allocation3 + $0x79] sm:$0xff] }
 0x38c   :  { %3683 = vst [vmem:[#allocation4 + $0xe8] sm:$0xf] %v3653_v0  ;;  %v3893_v9 = vpop.f32.mrf.mxu3  ;;  %v3082_v12 = vadd.f32 %v15201_v40, %v2858_v24  ;;  %v4040_v0 = vpack.c.bf16 %v4023_v47, %v4022_v6  ;;  %v4886_v19 = vpack.c.bf16 %v4863_v8, %v4862_v56  ;;  %v4865_v24 = vld [vmem:[#allocation3 + $0x91] sm:$0xff]  ;;  %v4587_v56 = vld [vmem:[#allocation3 + $0xc0] sm:$0xff] }
 0x38d   :  { %v15300_v51 = vadd.f32 %v3893_v9, %v15243_v13  ;;  %v3970_v13 = vld [vmem:[#allocation4 + $0x10] sm:$0xff]  ;;  %v4303_v6 = vld [vmem:[#allocation3 + $0xb8] sm:$0xff] }
 0x38e   :  { %v15302_v59 = vpop.f32.mrf.mxu2  ;;  %v4134_v45 = vpop.f32.mrf.mxu0  ;;  %v4194_v34 = vadd.f32 %v15254_v63, %v3970_v13  ;;  %v3366_v41 = vadd.f32 %v15256_v3, %v3082_v12  ;;  %v2860_v12 = vld [vmem:[#allocation4 + $0xe0] sm:$0xff] }
 0x38f   :  { %v15306_v4 = vadd.f32 %v4134_v45, %v15126_v54  ;;  %v15308_v37 = vpop.f32.mrf.mxu1  ;;  %v4605_v45 = vpack.c.bf16 %v4585_v52, %v4301_v58  ;;  %v4025_v58 = vld [vmem:[#allocation3 + $0xe7] sm:$0xff] }
 0x390   :  { %v3650_v63 = vadd.f32 %v15258_v5, %v3366_v41  ;;  %v4322_v41 = vpack.c.bf16 %v4303_v6, %v4585_v52 }
 0x394   :  { %v3895_v15 = vpop.f32.mrf.mxu3 }
 0x395   :  { %v3933_v30 = vadd.f32 %v3895_v15, %v3649_v22  ;;  %v2859_v15 = vld [vmem:[#allocation4 + $0xd8] sm:$0xff] }
 0x396   :  { %v15312_v38 = vpop.f32.mrf.mxu2  ;;  %v4137_v54 = vpop.f32.mrf.mxu0  ;;  %v3083_v47 = vadd.f32 %v15212_v39, %v2859_v15 }
 0x397   :  { %3963 = vst [vmem:[#allocation4 + $0xc8] sm:$0xff] %v3933_v30  ;;  %v15317_v2 = vadd.f32 %v4137_v54, %v15141_v21  ;;  %v4406_v33 = vpop.f32.mrf.mxu1 }
 0x398   :  { %v4478_v9 = vadd.f32 %v4406_v33, %v4194_v34  ;;  %v3367_v8 = vadd.f32 %v15265_v17, %v3083_v47  ;;  %v4024_v33 = vld [vmem:[#allocation3 + $0xdf] sm:$0xff] }
 0x399   :  { %4176 = vmatmul.bf16.gmra.mxu0 %v4040_v0  ;;  %4998 = vmatmul.bf16.gmra.mxu3 %v4886_v19  ;;  %v4864_v0 = vld [vmem:[#allocation3 + $0x89] sm:$0xff] }
 0x39a   :  { %4445 = vmatmul.bf16.gmra.mxu1 %v4321_v14  ;;  %v3651_v30 = vadd.f32 %v15270_v36, %v3367_v8  ;;  %v4041_v36 = vpack.c.bf16 %v4025_v58, %v4024_v33  ;;  %v13082_v14 = vld [vmem:[%s17271_s3 + $0x300] sm:$0xff] }
 0x39b   :  { %4729 = vmatmul.bf16.gmra.mxu2 %v4605_v45  ;;  %5251 = vmatpush.bf16.msra.mxu0 %v13082_v14  ;;  %v4867_v58 = vld [vmem:[#allocation3 + $0xa1] sm:$0xff] }
 0x39c   :  { %v3898_v28 = vpop.f32.mrf.mxu3 }
 0x39d   :  { %v3934_v40 = vadd.f32 %v3898_v28, %v3650_v63  ;;  %v4606_v63 = vpack.c.bf16 %v4587_v56, %v4303_v6  ;;  %v4305_v6 = vld [vmem:[#allocation3 + $0xc8] sm:$0xff] }
 0x39e   :  { %v4690_v22 = vpop.f32.mrf.mxu2  ;;  %v4139_v13 = vpop.f32.mrf.mxu0 }
 0x39f   :  { %v15321_v21 = vadd.f32 %v4690_v22, %v4478_v9  ;;  %3964 = vst [vmem:[#allocation4 + $0xd0] sm:$0xff] %v3934_v40  ;;  %v15325_v20 = vadd.f32 %v4139_v13, %v15159_v16  ;;  %v15327_v3 = vpop.f32.mrf.mxu1  ;;  %v3084_v16 = vadd.f32 %v15220_v60, %v2860_v12  ;;  %v4887_v9 = vpack.c.bf16 %v4865_v24, %v4864_v0  ;;  %v15355_v12 = vld [vmem:[#allocation3 + $0xd0] sm:$0xff] }
 0x3a1   :  { %v3368_v28 = vadd.f32 %v15275_v61, %v3084_v16  ;;  %v13105_v61 = vld [vmem:[%s17271_s3 + $0x3b8] sm:$0xff]  ;;  %v4026_v16 = vld [vmem:[#allocation3 + $0xef] sm:$0xff] }
 0x3a2   :  { %5812 = vmatpush.bf16.msra.mxu2 %v13105_v61 }
 0x3a3   :  { %v3652_v60 = vadd.f32 %v15280_v57, %v3368_v28  ;;  %v3713_v57 = vld [vmem:[#allocation4 + $0xe8] sm:$0xf]  ;;  %v13113_v28 = vld [vmem:[%s17271_s3 + $0x3f8] sm:$0xff] }
 0x3a4   :  { %v3900_v5 = vpop.f32.mrf.mxu3  ;;  %6096 = vmatpush.bf16.msrb.mxu3 %v13113_v28 }
 0x3a5   :  { %v3935_v34 = vadd.f32 %v3900_v5, %v3651_v30  ;;  %v4027_v5 = vld [vmem:[#allocation3 + $0xf7] sm:$0xf] }
 0x3a6   :  { %v15331_v54 = vpop.f32.mrf.mxu2  ;;  %v4142_v39 = vpop.f32.mrf.mxu0 }
 0x3a7   :  { %3965 = vst [vmem:[#allocation4 + $0xd8] sm:$0xff] %v3935_v34  ;;  %v15335_v19 = vadd.f32 %v4142_v39, %v15171_v32  ;;  %v4411_v17 = vpop.f32.mrf.mxu1  ;;  %v13097_v32 = vld [vmem:[%s17271_s3 + $0x378] sm:$0xff]  ;;  %v3968_v39 = vld [vmem:[#allocation4] sm:$0xff] }
 0x3a8   :  { %v4480_v45 = vadd.f32 %v4411_v17, %v15278_v10  ;;  %5528 = vmatpush.bf16.msra.mxu1 %v13097_v32  ;;  %v4192_v17 = vadd.f32 %v15237_v25, %v3968_v39 }
 0x3a9   :  { %4181 = vmatmul.bf16.gmra.mxu0 %v4041_v36  ;;  %5003 = vmatmul.bf16.gmra.mxu3 %v4887_v9  ;;  %v4042_v9 = vpack.c.bf16 %v4027_v5, %v4026_v16  ;;  %v5135_v5 = vld [vmem:[#allocation3 + $0x22] sm:$0xff]  ;;  %v5134_v16 = vld [vmem:[#allocation3 + $0x1a] sm:$0xff] }
 0x3aa   :  { %4450 = vmatmul.bf16.gmra.mxu1 %v4322_v41  ;;  %v4323_v41 = vpack.c.bf16 %v4305_v6, %v4587_v56  ;;  %v4476_v32 = vadd.f32 %v15294_v31, %v4192_v17 }
 0x3ab   :  { %4734 = vmatmul.bf16.gmra.mxu2 %v4606_v63  ;;  %v4607_v63 = vpack.c.bf16 %v15355_v12, %v4305_v6  ;;  %v15391_v6 = vld [vmem:[#allocation3 + $0xe0] sm:$0xff] }
 0x3ac   :  { %v3903_v40 = vpop.f32.mrf.mxu3 }
 0x3ad   :  { %v3936_v22 = vadd.f32 %v3903_v40, %v3652_v60 }
 0x3ae   :  { %v4695_v15 = vpop.f32.mrf.mxu2  ;;  %v4144_v52 = vpop.f32.mrf.mxu0 }
 0x3af   :  { %v15346_v10 = vadd.f32 %v4695_v15, %v4480_v45  ;;  %3966 = vst [vmem:[#allocation4 + $0xe0] sm:$0xff] %v3936_v22  ;;  %v15352_v13 = vadd.f32 %v4144_v52, %v15180_v11  ;;  %v4413_v47 = vpop.f32.mrf.mxu1  ;;  %v4866_v11 = vld [vmem:[#allocation3 + $0x99] sm:$0xff] }
 0x3b0   :  { %v4481_v8 = vadd.f32 %v4413_v47, %v15286_v55  ;;  %v4888_v14 = vpack.c.bf16 %v4867_v58, %v4866_v11  ;;  %v13104_v47 = vld [vmem:[%s17271_s3 + $0x3b0] sm:$0xff] }
 0x3b1   :  { %5813 = vmatpush.bf16.msra.mxu2 %v13104_v47 }
 0x3b4   :  { %v3905_v30 = vpop.f32.mrf.mxu3 }
 0x3b5   :  { %v3937_v24 = vadd.f32 %v3905_v30, %v3713_v57  ;;  %v4869_v30 = vld [vmem:[#allocation3 + $0xb1] sm:$0xff] }
 0x3b6   :  { %v4697_v34 = vpop.f32.mrf.mxu2  ;;  %v4147_v0 = vpop.f32.mrf.mxu0 }
 0x3b7   :  { %v15357_v33 = vadd.f32 %v4697_v34, %v4481_v8  ;;  %3967 = vst [vmem:[#allocation4 + $0xe8] sm:$0xf] %v3937_v24  ;;  %v15361_v55 = vadd.f32 %v4147_v0, %v15189_v29  ;;  %v4416_v36 = vpop.f32.mrf.mxu1  ;;  %v4760_v29 = vadd.f32 %v15302_v59, %v4476_v32  ;;  %v13096_v59 = vld [vmem:[%s17271_s3 + $0x370] sm:$0xff]  ;;  %v4307_v34 = vld [vmem:[#allocation3 + $0xd8] sm:$0xff] }
 0x3b8   :  { %v4482_v45 = vadd.f32 %v4416_v36, %v15292_v1  ;;  %v3969_v1 = vld [vmem:[#allocation4 + $0x8] sm:$0xff]  ;;  %5529 = vmatpush.bf16.msra.mxu1 %v13096_v59  ;;  %v5164_v36 = vpack.c.bf16 %v5135_v5, %v5134_v16  ;;  %v4870_v5 = vld [vmem:[#allocation3 + $0xb9] sm:$0xff] }
 0x3b9   :  { %4186 = vmatmul.bf16.gmra.mxu0 %v4042_v9  ;;  %5008 = vmatmul.bf16.gmra.mxu3 %v4888_v14  ;;  %v4193_v15 = vadd.f32 %v15245_v50, %v3969_v1  ;;  %v13103_v50 = vld [vmem:[%s17271_s3 + $0x3a8] sm:$0xff]  ;;  %v4324_v14 = vpack.c.bf16 %v4307_v34, %v15355_v12  ;;  %v13101_v12 = vld [vmem:[%s17271_s3 + $0x398] sm:$0xff] }
 0x3ba   :  { %4455 = vmatmul.bf16.gmra.mxu1 %v4323_v41  ;;  %v4868_v0 = vld [vmem:[#allocation3 + $0xa9] sm:$0xff]  ;;  %5814 = vmatpush.bf16.msra.mxu2 %v13103_v50  ;;  %v13094_v41 = vld [vmem:[%s17271_s3 + $0x360] sm:$0xff] }
 0x3bb   :  { %4739 = vmatmul.bf16.gmra.mxu2 %v4607_v63  ;;  %v4477_v8 = vadd.f32 %v15308_v37, %v4193_v15  ;;  %v4889_v17 = vpack.c.bf16 %v4869_v30, %v4868_v0  ;;  %v13102_v63 = vld [vmem:[%s17271_s3 + $0x3a0] sm:$0xff]  ;;  %v4593_v30 = vld [vmem:[#allocation3 + $0xf0] sm:$0xff] }
 0x3bc   :  { %v4969_v25 = vpop.f32.mrf.mxu3 }
 0x3bd   :  { %v5044_v40 = vadd.f32 %v4969_v25, %v4760_v29  ;;  %v3971_v25 = vld [vmem:[#allocation4 + $0x18] sm:$0xff] }
 0x3be   :  { %v4700_v60 = vpop.f32.mrf.mxu2  ;;  %v4149_v22 = vpop.f32.mrf.mxu0  ;;  %5815 = vmatpush.bf16.msra.mxu2 %v13102_v63  ;;  %v4195_v1 = vadd.f32 %v15263_v43, %v3971_v25 }
 0x3bf   :  { %v15370_v56 = vadd.f32 %v4700_v60, %v4482_v45  ;;  %5074 = vst [vmem:[#allocation4] sm:$0xff] %v5044_v40  ;;  %v15374_v52 = vadd.f32 %v4149_v22, %v15197_v27  ;;  %v4418_v31 = vpop.f32.mrf.mxu1  ;;  %v13095_v27 = vld [vmem:[%s17271_s3 + $0x368] sm:$0xff]  ;;  %v4608_v45 = vpack.c.bf16 %v15391_v6, %v4307_v34 }
 0x3c0   :  { %v4483_v61 = vadd.f32 %v4418_v31, %v15306_v4  ;;  %v4761_v4 = vadd.f32 %v15312_v38, %v4477_v8  ;;  %5530 = vmatpush.bf16.msra.mxu1 %v13095_v27  ;;  %v4479_v59 = vadd.f32 %v15327_v3, %v4195_v1  ;;  %v4871_v8 = vld [vmem:[#allocation3 + $0xc1] sm:$0xff]  ;;  %v5137_v27 = vld [vmem:[#allocation3 + $0x32] sm:$0xff] }
 0x3c1   :  { %v4890_v0 = vpack.c.bf16 %v4871_v8, %v4870_v5  ;;  %v4311_v1 = vld [vmem:[#allocation3 + $0xf8] sm:$0xf] }
 0x3c2   :  { %5816 = vmatpush.bf16.msra.mxu2 %v13101_v12  ;;  %v4763_v43 = vadd.f32 %v15331_v54, %v4479_v59 }
 0x3c4   :  { %v4971_v57 = vpop.f32.mrf.mxu3  ;;  %5531 = vmatpush.bf16.msra.mxu1 %v13094_v41 }
 0x3c5   :  { %v5045_v24 = vadd.f32 %v4971_v57, %v4761_v4  ;;  %v4309_v57 = vld [vmem:[#allocation3 + $0xe8] sm:$0xff] }
 0x3c6   :  { %v4702_v58 = vpop.f32.mrf.mxu2  ;;  %v4152_v39 = vpop.f32.mrf.mxu0 }
 0x3c7   :  { %v15393_v37 = vadd.f32 %v4702_v58, %v4483_v61  ;;  %5075 = vst [vmem:[#allocation4 + $0x8] sm:$0xff] %v5045_v24  ;;  %v15396_v11 = vadd.f32 %v4152_v39, %v15208_v44  ;;  %v4421_v38 = vpop.f32.mrf.mxu1  ;;  %v13121_v44 = vld [vmem:[%s17271_s3 + $0x438] sm:$0xff]  ;;  %v13092_v61 = vld [vmem:[%s17271_s3 + $0x350] sm:$0xff] }
 0x3c8   :  { %v4484_v9 = vadd.f32 %v4421_v38, %v15317_v2  ;;  %v13093_v2 = vld [vmem:[%s17271_s3 + $0x358] sm:$0xff]  ;;  %6380 = vmatpush.bf16.msrb.mxu0 %v13121_v44  ;;  %v5136_v58 = vld [vmem:[#allocation3 + $0x2a] sm:$0xff] }
 0x3c9   :  { %5013 = vmatmul.bf16.gmra.mxu3 %v4889_v17  ;;  %5252 = vmatmul.bf16.vlgmr.msra.gmra.mxu0 %v5164_v36  ;;  %v13112_v24 = vld [vmem:[%s17271_s3 + $0x3f0] sm:$0xff]  ;;  %v5165_v16 = vpack.c.bf16 %v5137_v27, %v5136_v58  ;;  %v4325_v17 = vpack.c.bf16 %v4309_v57, %v15391_v6  ;;  %v4609_v36 = vpack.c.bf16 %v4593_v30, %v4309_v57 }
 0x3ca   :  { %4460 = vmatmul.bf16.gmra.mxu1 %v4324_v14  ;;  %6097 = vmatpush.bf16.msrb.mxu3 %v13112_v24  ;;  %v4875_v24 = vld [vmem:[#allocation3 + $0xe1] sm:$0xff] }
 0x3cb   :  { %4744 = vmatmul.bf16.gmra.mxu2 %v4608_v45  ;;  %5532 = vmatpush.bf16.msra.mxu1 %v13093_v2 }
 0x3cc   :  { %v4974_v28 = vpop.f32.mrf.mxu3 }
 0x3cd   :  { %v15417_v29 = vadd.f32 %v4974_v28, %v15321_v21  ;;  %v13100_v21 = vld [vmem:[%s17271_s3 + $0x390] sm:$0xff] }
 0x3ce   :  { %v4705_v32 = vpop.f32.mrf.mxu2  ;;  %v4154_v40 = vpop.f32.mrf.mxu0  ;;  %5817 = vmatpush.bf16.msra.mxu2 %v13100_v21  ;;  %v4873_v28 = vld [vmem:[#allocation3 + $0xd1] sm:$0xff]  ;;  %v5138_v21 = vld [vmem:[#allocation3 + $0x3a] sm:$0xff] }
 0x3cf   :  { %v15419_v60 = vadd.f32 %v4705_v32, %v4484_v9  ;;  %v15423_v22 = vadd.f32 %v4154_v40, %v15216_v35  ;;  %v4423_v15 = vpop.f32.mrf.mxu1  ;;  %5533 = vmatpush.bf16.msra.mxu1 %v13092_v61  ;;  %v13091_v35 = vld [vmem:[%s17271_s3 + $0x348] sm:$0xff]  ;;  %v13090_v9 = vld [vmem:[%s17271_s3 + $0x340] sm:$0xff] }
 0x3d0   :  { %v4485_v31 = vadd.f32 %v4423_v15, %v15325_v20  ;;  %v13099_v20 = vld [vmem:[%s17271_s3 + $0x388] sm:$0xff]  ;;  %v4595_v15 = vld [vmem:[#allocation3 + $0x100] sm:$0xf] }
 0x3d1   :  { %v5139_v32 = vld [vmem:[#allocation3 + $0x42] sm:$0xff] }
 0x3d2   :  { %5818 = vmatpush.bf16.msra.mxu2 %v13099_v20  ;;  %v4872_v61 = vld [vmem:[#allocation3 + $0xc9] sm:$0xff]  ;;  %v5166_v20 = vpack.c.bf16 %v5139_v32, %v5138_v21 }
 0x3d3   :  { %5534 = vmatpush.bf16.msra.mxu1 %v13091_v35  ;;  %v4891_v35 = vpack.c.bf16 %v4873_v28, %v4872_v61  ;;  %v13110_v28 = vld [vmem:[%s17271_s3 + $0x3e0] sm:$0xff] }
 0x3d4   :  { %v4976_v47 = vpop.f32.mrf.mxu3 }
 0x3d5   :  { %v5047_v4 = vadd.f32 %v4976_v47, %v4763_v43  ;;  %v4594_v43 = vld [vmem:[#allocation3 + $0xf8] sm:$0xff]  ;;  %v4326_v47 = vpack.c.bf16 %v4311_v1, %v4593_v30  ;;  %v13111_v30 = vld [vmem:[%s17271_s3 + $0x3e8] sm:$0xff] }
 0x3d6   :  { %v4707_v50 = vpop.f32.mrf.mxu2  ;;  %v4157_v54 = vpop.f32.mrf.mxu0  ;;  %v4610_v8 = vpack.c.bf16 %v4595_v15, %v4594_v43  ;;  %6098 = vmatpush.bf16.msrb.mxu3 %v13111_v30  ;;  %v4877_v43 = vld [vmem:[#allocation3 + $0xf1] sm:$0xff] }
 0x3d7   :  { %v15440_v3 = vadd.f32 %v4707_v50, %v4485_v31  ;;  %5077 = vst [vmem:[#allocation4 + $0x18] sm:$0xff] %v5047_v4  ;;  %v15446_v34 = vadd.f32 %v4157_v54, %v15224_v48  ;;  %v4426_v39 = vpop.f32.mrf.mxu1  ;;  %v13098_v48 = vld [vmem:[%s17271_s3 + $0x380] sm:$0xff]  ;;  %5535 = vmatpush.bf16.msra.mxu1 %v13090_v9 }
 0x3d8   :  { %v4486_v38 = vadd.f32 %v4426_v39, %v15335_v19  ;;  %5819 = vmatpush.bf16.msra.mxu2 %v13098_v48  ;;  %v5141_v39 = vld [vmem:[#allocation3 + $0x52] sm:$0xff] }
 0x3d9   :  { %5018 = vmatmul.bf16.gmra.mxu3 %v4890_v0  ;;  %5257 = vmatmul.bf16.gmra.mxu0 %v5165_v16  ;;  %v5419_v16 = vld [vmem:[#allocation3 + $0x23] sm:$0xff] }
 0x3da   :  { %4465 = vmatmul.bf16.gmra.mxu1 %v4325_v17  ;;  %6099 = vmatpush.bf16.msrb.mxu3 %v13110_v28 }
 0x3db   :  { %4749 = vmatmul.bf16.gmra.mxu2 %v4609_v36  ;;  %v4874_v36 = vld [vmem:[#allocation3 + $0xd9] sm:$0xff] }
 0x3dc   :  { %v4979_v14 = vpop.f32.mrf.mxu3 }
 0x3dd   :  { %v15457_v6 = vadd.f32 %v4979_v14, %v15346_v10  ;;  %v4892_v14 = vpack.c.bf16 %v4875_v24, %v4874_v36  ;;  %v5420_v24 = vld [vmem:[#allocation3 + $0x2b] sm:$0xff] }
 0x3de   :  { %v4710_v19 = vpop.f32.mrf.mxu2  ;;  %v4159_v41 = vpop.f32.mrf.mxu0 }
 0x3df   :  { %v15459_v45 = vadd.f32 %v4710_v19, %v4486_v38  ;;  %v15462_v63 = vadd.f32 %v4159_v41, %v15233_v49  ;;  %v4428_v44 = vpop.f32.mrf.mxu1  ;;  %v13120_v49 = vld [vmem:[%s17271_s3 + $0x430] sm:$0xff]  ;;  %v15492_v38 = vld [vmem:[#allocation3 + $0x24] sm:$0xff]  ;;  %v5418_v41 = vld [vmem:[#allocation3 + $0x1b] sm:$0xff] }
 0x3e0   :  { %v4487_v2 = vadd.f32 %v4428_v44, %v15352_v13  ;;  %6381 = vmatpush.bf16.msrb.mxu0 %v13120_v49  ;;  %v5702_v44 = vld [vmem:[#allocation3 + $0x1c] sm:$0xff]  ;;  %v13108_v49 = vld [vmem:[%s17271_s3 + $0x3d0] sm:$0xff] }
 0x3e4   :  { %v4981_v12 = vpop.f32.mrf.mxu3 }
 0x3e5   :  { %v15466_v40 = vadd.f32 %v4981_v12, %v15357_v33  ;;  %v5732_v12 = vpack.c.bf16 %v15492_v38, %v5702_v44 }
 0x3e6   :  { %v4712_v25 = vpop.f32.mrf.mxu2  ;;  %v4162_v31 = vpop.f32.mrf.mxu0 }
 0x3e7   :  { %v15468_v10 = vadd.f32 %v4712_v25, %v4487_v2  ;;  %v15474_v13 = vadd.f32 %v4162_v31, %v15241_v53  ;;  %v4431_v59 = vpop.f32.mrf.mxu1 }
 0x3e8   :  { %v4488_v33 = vadd.f32 %v4431_v59, %v15361_v55  ;;  %v13119_v59 = vld [vmem:[%s17271_s3 + $0x428] sm:$0xff] }
 0x3e9   :  { %5023 = vmatmul.bf16.gmra.mxu3 %v4891_v35  ;;  %5262 = vmatmul.bf16.gmra.mxu0 %v5166_v20  ;;  %v5143_v35 = vld [vmem:[#allocation3 + $0x62] sm:$0xff] }
 0x3ea   :  { %4470 = vmatmul.bf16.gmra.mxu1 %v4326_v47  ;;  %6382 = vmatpush.bf16.msrb.mxu0 %v13119_v59  ;;  %v15528_v47 = vld [vmem:[#allocation3 + $0x34] sm:$0xff] }
 0x3eb   :  { %4754 = vmatmul.bf16.gmra.mxu2 %v4610_v8  ;;  %v5422_v59 = vld [vmem:[#allocation3 + $0x3b] sm:$0xff] }
 0x3ec   :  { %v4984_v27 = vpop.f32.mrf.mxu3 }
 0x3ed   :  { %v15478_v4 = vadd.f32 %v4984_v27, %v15370_v56 }
 0x3ee   :  { %v4715_v50 = vpop.f32.mrf.mxu2  ;;  %v4164_v57 = vpop.f32.mrf.mxu0 }
 0x3ef   :  { %v15480_v53 = vadd.f32 %v4715_v50, %v4488_v33  ;;  %v15483_v54 = vadd.f32 %v4164_v57, %v15252_v7  ;;  %v4433_v5 = vpop.f32.mrf.mxu1  ;;  %v5421_v33 = vld [vmem:[#allocation3 + $0x33] sm:$0xff]  ;;  %v4876_v50 = vld [vmem:[#allocation3 + $0xe9] sm:$0xff] }
 0x3f0   :  { %v4489_v55 = vadd.f32 %v4433_v5, %v15374_v52  ;;  %v5140_v52 = vld [vmem:[#allocation3 + $0x4a] sm:$0xff]  ;;  %v5142_v57 = vld [vmem:[#allocation3 + $0x5a] sm:$0xff]  ;;  %v4893_v30 = vpack.c.bf16 %v4877_v43, %v4876_v50 }
 0x3f1   :  { %v5167_v19 = vpack.c.bf16 %v5141_v39, %v5140_v52  ;;  %v15535_v39 = vld [vmem:[#allocation3 + $0x2c] sm:$0xff] }
 0x3f4   :  { %v4986_v58 = vpop.f32.mrf.mxu3 }
 0x3f5   :  { %v15490_v56 = vadd.f32 %v4986_v58, %v15393_v37  ;;  %v5448_v37 = vpack.c.bf16 %v5419_v16, %v5418_v41  ;;  %v5168_v58 = vpack.c.bf16 %v5143_v35, %v5142_v57  ;;  %v5733_v16 = vpack.c.bf16 %v15528_v47, %v15535_v39  ;;  %v13118_v57 = vld [vmem:[%s17271_s3 + $0x420] sm:$0xff] }
 0x3f6   :  { %v4717_v0 = vpop.f32.mrf.mxu2  ;;  %v4167_v17 = vpop.f32.mrf.mxu0  ;;  %6383 = vmatpush.bf16.msrb.mxu0 %v13118_v57 }
 0x3f7   :  { %v15494_v7 = vadd.f32 %v4717_v0, %v4489_v55  ;;  %v15497_v9 = vadd.f32 %v4167_v17, %v15261_v18  ;;  %v4436_v48 = vpop.f32.mrf.mxu1  ;;  %v13109_v18 = vld [vmem:[%s17271_s3 + $0x3d8] sm:$0xff]  ;;  %v5449_v0 = vpack.c.bf16 %v5421_v33, %v5420_v24  ;;  %v13106_v17 = vld [vmem:[%s17271_s3 + $0x3c0] sm:$0xff] }
 0x3f8   :  { %v4490_v2 = vadd.f32 %v4436_v48, %v15396_v11  ;;  %6100 = vmatpush.bf16.msrb.mxu3 %v13109_v18 }
 0x3f9   :  { %5028 = vmatmul.bf16.gmra.mxu3 %v4892_v14  ;;  %5267 = vmatmul.bf16.gmra.mxu0 %v5167_v19 }
 0x3fa   :  { %5536 = vmatmul.bf16.vlgmr.msra.gmra.mxu1 %v5448_v37  ;;  %v4879_v37 = vld [vmem:[#allocation3 + $0x101] sm:$0xf] }
 0x3fb   :  { %5820 = vmatmul.bf16.vlgmr.msra.gmra.mxu2 %v5732_v12  ;;  %v5145_v12 = vld [vmem:[#allocation3 + $0x72] sm:$0xff] }
 0x3fc   :  { %v4989_v32 = vpop.f32.mrf.mxu3  ;;  %6101 = vmatpush.bf16.msrb.mxu3 %v13108_v49 }
 0x3fd   :  { %v15508_v11 = vadd.f32 %v4989_v32, %v15419_v60  ;;  %v13107_v60 = vld [vmem:[%s17271_s3 + $0x3c8] sm:$0xff] }
 0x3fe   :  { %v4720_v25 = vpop.f32.mrf.mxu2  ;;  %v4169_v15 = vpop.f32.mrf.mxu0  ;;  %v5423_v32 = vld [vmem:[#allocation3 + $0x43] sm:$0xff] }
 0x3ff   :  { %v15510_v1 = vadd.f32 %v4720_v25, %v4490_v2  ;;  %v15513_v31 = vadd.f32 %v4169_v15, %v15273_v62  ;;  %v4438_v61 = vpop.f32.mrf.mxu1  ;;  %v4878_v2 = vld [vmem:[#allocation3 + $0xf9] sm:$0xff] }
 0x400   :  { %v4491_v21 = vadd.f32 %v4438_v61, %v15423_v22  ;;  %6102 = vmatpush.bf16.msrb.mxu3 %v13107_v60  ;;  %v5144_v61 = vld [vmem:[#allocation3 + $0x6a] sm:$0xff]  ;;  %v15562_v60 = vld [vmem:[#allocation3 + $0x3c] sm:$0xff] }
 0x401   :  { %v5169_v49 = vpack.c.bf16 %v5145_v12, %v5144_v61 }
 0x404   :  { %v4991_v62 = vpop.f32.mrf.mxu3  ;;  %6103 = vmatpush.bf16.msrb.mxu3 %v13106_v17  ;;  %v5146_v17 = vld [vmem:[#allocation3 + $0x7a] sm:$0xff] }
 0x405   :  { %v15526_v22 = vadd.f32 %v4991_v62, %v15440_v3 }
 0x406   :  { %v4722_v20 = vpop.f32.mrf.mxu2  ;;  %v4172_v27 = vpop.f32.mrf.mxu0 }
 0x407   :  { %v15530_v8 = vadd.f32 %v4722_v20, %v4491_v21  ;;  %v15533_v5 = vadd.f32 %v4172_v27, %v15283_v26  ;;  %v4441_v55 = vpop.f32.mrf.mxu1 }
 0x408   :  { %v4492_v3 = vadd.f32 %v4441_v55, %v15446_v34 }
 0x409   :  { %5033 = vmatmul.bf16.gmra.mxu3 %v4893_v30  ;;  %5272 = vmatmul.bf16.gmra.mxu0 %v5168_v58  ;;  %v5147_v30 = vld [vmem:[#allocation3 + $0x82] sm:$0xff] }
 0x40a   :  { %5541 = vmatmul.bf16.gmra.mxu1 %v5449_v0 }
 0x40b   :  { %5825 = vmatmul.bf16.gmra.mxu2 %v5733_v16 }
 0x40c   :  { %v4994_v26 = vpop.f32.mrf.mxu3 }
 0x40d   :  { %v15544_v52 = vadd.f32 %v4994_v26, %v15459_v45  ;;  %v15555_v45 = vld [vmem:[#allocation3 + $0x44] sm:$0xff]  ;;  %v5170_v26 = vpack.c.bf16 %v5147_v30, %v5146_v17 }
 0x40e   :  { %v4725_v36 = vpop.f32.mrf.mxu2  ;;  %v4174_v34 = vpop.f32.mrf.mxu0  ;;  %v5734_v43 = vpack.c.bf16 %v15555_v45, %v15562_v60 }
 0x40f   :  { %v15546_v48 = vadd.f32 %v4725_v36, %v4492_v3  ;;  %v15549_v14 = vadd.f32 %v4174_v34, %v15289_v23  ;;  %v4443_v19 = vpop.f32.mrf.mxu1  ;;  %v15581_v3 = vld [vmem:[#allocation3 + $0x54] sm:$0xff]  ;;  %v5424_v36 = vld [vmem:[#allocation3 + $0x4b] sm:$0xff] }
 0x410   :  { %v4493_v41 = vadd.f32 %v4443_v19, %v15462_v63  ;;  %v4894_v63 = vpack.c.bf16 %v4879_v37, %v4878_v2  ;;  %v15587_v34 = vld [vmem:[#allocation3 + $0x4c] sm:$0xff]  ;;  %v6016_v19 = vpack.c.bf16 %v15535_v39, %v15492_v38 }
 0x414   :  { %v4996_v44 = vpop.f32.mrf.mxu3 }
 0x415   :  { %v15553_v18 = vadd.f32 %v4996_v44, %v15468_v10  ;;  %v5450_v10 = vpack.c.bf16 %v5423_v32, %v5422_v59  ;;  %v5735_v44 = vpack.c.bf16 %v15581_v3, %v15587_v34 }
 0x416   :  { %v4727_v28 = vpop.f32.mrf.mxu2  ;;  %v4177_v15 = vpop.f32.mrf.mxu0 }
 0x417   :  { %v15557_v25 = vadd.f32 %v4727_v28, %v4493_v41  ;;  %v15560_v23 = vadd.f32 %v4177_v15, %v15300_v51  ;;  %v4446_v21 = vpop.f32.mrf.mxu1  ;;  %v5149_v15 = vld [vmem:[#allocation3 + $0x92] sm:$0xff] }
 0x418   :  { %v4494_v62 = vadd.f32 %v4446_v21, %v15474_v13 }
 0x419   :  { %5038 = vmatmul.bf16.gmra.mxu3 %v4894_v63  ;;  %5277 = vmatmul.bf16.gmra.mxu0 %v5169_v49  ;;  %v5427_v63 = vld [vmem:[#allocation3 + $0x63] sm:$0xff] }
 0x41a   :  { %5546 = vmatmul.bf16.gmra.mxu1 %v5450_v10  ;;  %v15605_v49 = vld [vmem:[#allocation3 + $0x64] sm:$0xff] }
 0x41b   :  { %5830 = vmatmul.bf16.gmra.mxu2 %v5734_v43 }
 0x41c   :  { %v4999_v35 = vpop.f32.mrf.mxu3 }
 0x41d   :  { %v15568_v51 = vadd.f32 %v4999_v35, %v15480_v53  ;;  %v5425_v53 = vld [vmem:[#allocation3 + $0x53] sm:$0xff]  ;;  %v5426_v35 = vld [vmem:[#allocation3 + $0x5b] sm:$0xff] }
 0x41e   :  { %v4730_v20 = vpop.f32.mrf.mxu2  ;;  %v15572_v27 = vpop.f32.mrf.mxu0 }
 0x41f   :  { %v15570_v33 = vadd.f32 %v4730_v20, %v4494_v62  ;;  %v4448_v50 = vpop.f32.mrf.mxu1  ;;  %v5148_v62 = vld [vmem:[#allocation3 + $0x8a] sm:$0xff]  ;;  %v15611_v20 = vld [vmem:[#allocation3 + $0x5c] sm:$0xff] }
 0x420   :  { %v4495_v13 = vadd.f32 %v4448_v50, %v15483_v54  ;;  %v5171_v43 = vpack.c.bf16 %v5149_v15, %v5148_v62  ;;  %v6018_v15 = vpack.c.bf16 %v15587_v34, %v15555_v45 }
 0x424   :  { %v5001_v55 = vpop.f32.mrf.mxu3 }
 0x425   :  { %v15579_v24 = vadd.f32 %v5001_v55, %v15494_v7  ;;  %v5451_v7 = vpack.c.bf16 %v5425_v53, %v5424_v36  ;;  %v5151_v36 = vld [vmem:[#allocation3 + $0xa2] sm:$0xff] }
 0x426   :  { %v4732_v58 = vpop.f32.mrf.mxu2  ;;  %v15585_v16 = vpop.f32.mrf.mxu0 }
 0x427   :  { %v15583_v0 = vadd.f32 %v4732_v58, %v4495_v13  ;;  %v4451_v54 = vpop.f32.mrf.mxu1  ;;  %v5736_v13 = vpack.c.bf16 %v15605_v49, %v15611_v20  ;;  %v3997_v58 = vld [vmem:[#allocation4 + $0xe8] sm:$0xf] }
 0x428   :  { %v4496_v41 = vadd.f32 %v4451_v54, %v15497_v9  ;;  %v13117_v54 = vld [vmem:[%s17271_s3 + $0x418] sm:$0xff] }
 0x429   :  { %5282 = vmatmul.bf16.gmra.mxu0 %v5170_v26  ;;  %6104 = vmatmul.bf16.vlgmr.msrb.gmra.mxu3 %v6016_v19 }
 0x42a   :  { %5551 = vmatmul.bf16.gmra.mxu1 %v5451_v7  ;;  %6384 = vmatpush.bf16.msrb.mxu0 %v13117_v54  ;;  %v15630_v7 = vld [vmem:[#allocation3 + $0x74] sm:$0xff]  ;;  %v6019_v54 = vpack.c.bf16 %v15611_v20, %v15581_v3 }
 0x42b   :  { %5835 = vmatmul.bf16.gmra.mxu2 %v5735_v44 }
 0x42c   :  { %v5004_v2 = vpop.f32.mrf.mxu3 }
 0x42d   :  { %v15595_v12 = vadd.f32 %v5004_v2, %v15510_v1 }
 0x42e   :  { %v4735_v37 = vpop.f32.mrf.mxu2  ;;  %v15599_v32 = vpop.f32.mrf.mxu0 }
 0x42f   :  { %v15597_v28 = vadd.f32 %v4735_v37, %v4496_v41  ;;  %v4453_v38 = vpop.f32.mrf.mxu1  ;;  %v5429_v41 = vld [vmem:[#allocation3 + $0x73] sm:$0xff] }
 0x430   :  { %v4497_v9 = vadd.f32 %v4453_v38, %v15513_v31  ;;  %v6017_v31 = vpack.c.bf16 %v15562_v60, %v15528_v47 }
 0x434   :  { %v5006_v39 = vpop.f32.mrf.mxu3 }
 0x435   :  { %v15603_v21 = vadd.f32 %v5006_v39, %v15530_v8  ;;  %v5452_v8 = vpack.c.bf16 %v5427_v63, %v5426_v35  ;;  %v5712_v39 = vld [vmem:[#allocation3 + $0x6c] sm:$0xff] }
 0x436   :  { %v4737_v61 = vpop.f32.mrf.mxu2  ;;  %v15609_v1 = vpop.f32.mrf.mxu0 }
 0x437   :  { %v15607_v59 = vadd.f32 %v4737_v61, %v4497_v9  ;;  %v4456_v10 = vpop.f32.mrf.mxu1  ;;  %v5428_v9 = vld [vmem:[#allocation3 + $0x6b] sm:$0xff] }
 0x438   :  { %v4498_v50 = vadd.f32 %v4456_v10, %v15533_v5  ;;  %v5453_v63 = vpack.c.bf16 %v5429_v41, %v5428_v9 }
 0x439   :  { %5287 = vmatmul.bf16.gmra.mxu0 %v5171_v43  ;;  %6109 = vmatmul.bf16.gmra.mxu3 %v6017_v31 }
 0x43a   :  { %5556 = vmatmul.bf16.gmra.mxu1 %v5452_v8 }
 0x43b   :  { %5840 = vmatmul.bf16.gmra.mxu2 %v5736_v13  ;;  %v5431_v13 = vld [vmem:[#allocation3 + $0x83] sm:$0xff] }
 0x43c   :  { %v5009_v57 = vpop.f32.mrf.mxu3 }
 0x43d   :  { %v15619_v30 = vadd.f32 %v5009_v57, %v15546_v48  ;;  %v15654_v57 = vld [vmem:[#allocation3 + $0x84] sm:$0xff] }
 0x43e   :  { %v4740_v55 = vpop.f32.mrf.mxu2  ;;  %v4189_v17 = vpop.f32.mrf.mxu0 }
 0x43f   :  { %v15621_v53 = vadd.f32 %v4740_v55, %v4498_v50  ;;  %v4221_v47 = vadd.f32 %v4189_v17, %v3997_v58  ;;  %v4458_v60 = vpop.f32.mrf.mxu1  ;;  %v5152_v58 = vld [vmem:[#allocation3 + $0xaa] sm:$0xff] }
 0x440   :  { %v4499_v5 = vadd.f32 %v4458_v60, %v15549_v14  ;;  %v5150_v14 = vld [vmem:[#allocation3 + $0x9a] sm:$0xff] }
 0x441   :  { %4251 = vst [vmem:[#allocation4 + $0xe8] sm:$0xf] %v4221_v47  ;;  %v5172_v38 = vpack.c.bf16 %v5151_v36, %v5150_v14  ;;  %v5430_v60 = vld [vmem:[#allocation3 + $0x7b] sm:$0xff]  ;;  %v13116_v14 = vld [vmem:[%s17271_s3 + $0x410] sm:$0xff] }
 0x442   :  { %6385 = vmatpush.bf16.msrb.mxu0 %v13116_v14 }
 0x444   :  { %v5011_v26 = vpop.f32.mrf.mxu3 }
 0x445   :  { %v15628_v48 = vadd.f32 %v5011_v26, %v15557_v25  ;;  %v5737_v25 = vpack.c.bf16 %v15630_v7, %v5712_v39  ;;  %v5454_v26 = vpack.c.bf16 %v5431_v13, %v5430_v60  ;;  %v6020_v13 = vpack.c.bf16 %v5712_v39, %v15605_v49 }
 0x446   :  { %v4742_v19 = vpop.f32.mrf.mxu2  ;;  %v15634_v2 = vpop.f32.mrf.mxu0 }
 0x447   :  { %v15632_v44 = vadd.f32 %v4742_v19, %v4499_v5  ;;  %v4461_v37 = vpop.f32.mrf.mxu1  ;;  %v5714_v5 = vld [vmem:[#allocation3 + $0x7c] sm:$0xff] }
 0x448   :  { %v4500_v61 = vadd.f32 %v4461_v37, %v15560_v23  ;;  %v5153_v23 = vld [vmem:[#allocation3 + $0xb2] sm:$0xff]  ;;  %v5155_v37 = vld [vmem:[#allocation3 + $0xc2] sm:$0xff] }
 0x449   :  { %5292 = vmatmul.bf16.gmra.mxu0 %v5172_v38  ;;  %6114 = vmatmul.bf16.gmra.mxu3 %v6018_v15  ;;  %v5173_v47 = vpack.c.bf16 %v5153_v23, %v5152_v58  ;;  %v5433_v15 = vld [vmem:[#allocation3 + $0x93] sm:$0xff] }
 0x44a   :  { %5561 = vmatmul.bf16.gmra.mxu1 %v5453_v63  ;;  %v5154_v63 = vld [vmem:[#allocation3 + $0xba] sm:$0xff]  ;;  %v15688_v23 = vld [vmem:[#allocation3 + $0x8c] sm:$0xff] }
 0x44b   :  { %5845 = vmatmul.bf16.gmra.mxu2 %v5737_v25 }
 0x44c   :  { %v5014_v62 = vpop.f32.mrf.mxu3 }
 0x44d   :  { %v15641_v43 = vadd.f32 %v5014_v62, %v15570_v33 }
 0x44e   :  { %v4745_v10 = vpop.f32.mrf.mxu2  ;;  %v15645_v31 = vpop.f32.mrf.mxu0 }
 0x44f   :  { %v15643_v35 = vadd.f32 %v4745_v10, %v4500_v61  ;;  %v15647_v50 = vpop.f32.mrf.mxu1  ;;  %v15681_v61 = vld [vmem:[#allocation3 + $0x94] sm:$0xff]  ;;  %v5174_v10 = vpack.c.bf16 %v5155_v37, %v5154_v63  ;;  %v5435_v37 = vld [vmem:[#allocation3 + $0xa3] sm:$0xff] }
 0x454   :  { %v5016_v45 = vpop.f32.mrf.mxu3 }
 0x455   :  { %v15652_v8 = vadd.f32 %v5016_v45, %v15583_v0  ;;  %v5738_v0 = vpack.c.bf16 %v15654_v57, %v5714_v5  ;;  %v5432_v45 = vld [vmem:[#allocation3 + $0x8b] sm:$0xff] }
 0x456   :  { %v15649_v34 = vpop.f32.mrf.mxu2  ;;  %v5258_v55 = vpop.f32.mrf.mxu0 }
 0x457   :  { %v15656_v33 = vpop.f32.mrf.mxu1  ;;  %v15659_v17 = vadd.f32 %v5258_v55, %v15417_v29  ;;  %v5455_v55 = vpack.c.bf16 %v5433_v15, %v5432_v45  ;;  %v15704_v15 = vld [vmem:[#allocation3 + $0xa4] sm:$0xff]  ;;  %v5434_v45 = vld [vmem:[#allocation3 + $0x9b] sm:$0xff] }
 0x459   :  { %5297 = vmatmul.bf16.gmra.mxu0 %v5173_v47  ;;  %6119 = vmatmul.bf16.gmra.mxu3 %v6019_v54  ;;  %v4281_v54 = vld [vmem:[#allocation4 + $0xe8] sm:$0xf] }
 0x45a   :  { %5566 = vmatmul.bf16.gmra.mxu1 %v5454_v26 }
 0x45b   :  { %5850 = vmatmul.bf16.gmra.mxu2 %v5738_v0 }
 0x45c   :  { %v5019_v36 = vpop.f32.mrf.mxu3 }
 0x45d   :  { %v15667_v41 = vadd.f32 %v5019_v36, %v15597_v28  ;;  %v5157_v36 = vld [vmem:[#allocation3 + $0xd2] sm:$0xff] }
 0x45e   :  { %v15664_v19 = vpop.f32.mrf.mxu2  ;;  %v15669_v29 = vpop.f32.mrf.mxu0 }
 0x45f   :  { %v15674_v3 = vpop.f32.mrf.mxu1 }
 0x464   :  { %v5021_v20 = vpop.f32.mrf.mxu3 }
 0x465   :  { %v15679_v9 = vadd.f32 %v5021_v20, %v15607_v59  ;;  %v5739_v59 = vpack.c.bf16 %v15681_v61, %v15688_v23 }
 0x466   :  { %v15676_v38 = vpop.f32.mrf.mxu2  ;;  %v5263_v28 = vpop.f32.mrf.mxu0 }
 0x467   :  { %v15683_v25 = vpop.f32.mrf.mxu1  ;;  %v15686_v62 = vadd.f32 %v5263_v28, %v15457_v6 }
 0x469   :  { %5302 = vmatmul.bf16.gmra.mxu0 %v5174_v10  ;;  %6124 = vmatmul.bf16.gmra.mxu3 %v6020_v13  ;;  %v15711_v13 = vld [vmem:[#allocation3 + $0x9c] sm:$0xff] }
 0x46a   :  { %5571 = vmatmul.bf16.gmra.mxu1 %v5455_v55  ;;  %v6021_v55 = vpack.c.bf16 %v5714_v5, %v15630_v7  ;;  %v3993_v5 = vld [vmem:[#allocation4 + $0xc8] sm:$0xff] }
 0x46b   :  { %5855 = vmatmul.bf16.gmra.mxu2 %v5739_v59  ;;  %v5456_v59 = vpack.c.bf16 %v5435_v37, %v5434_v45 }
 0x46c   :  { %v5024_v58 = vpop.f32.mrf.mxu3 }
 0x46d   :  { %v15696_v6 = vadd.f32 %v5024_v58, %v15621_v53  ;;  %v5156_v53 = vld [vmem:[#allocation3 + $0xca] sm:$0xff] }
 0x46e   :  { %v15693_v47 = vpop.f32.mrf.mxu2  ;;  %v5265_v60 = vpop.f32.mrf.mxu0 }
 0x46f   :  { %v4473_v26 = vpop.f32.mrf.mxu1  ;;  %v15699_v0 = vadd.f32 %v5265_v60, %v15466_v40  ;;  %v5175_v40 = vpack.c.bf16 %v5157_v36, %v5156_v53 }
 0x470   :  { %v4505_v49 = vadd.f32 %v4473_v26, %v4281_v54 }
 0x472   :  { %4535 = vst [vmem:[#allocation4 + $0xe8] sm:$0xf] %v4505_v49 }
 0x474   :  { %v5026_v39 = vpop.f32.mrf.mxu3 }
 0x475   :  { %v15702_v20 = vadd.f32 %v5026_v39, %v15632_v44  ;;  %v5740_v44 = vpack.c.bf16 %v15704_v15, %v15711_v13  ;;  %v4217_v39 = vadd.f32 %v15572_v27, %v3993_v5  ;;  %v5158_v27 = vld [vmem:[#allocation3 + $0xda] sm:$0xff]  ;;  %v6022_v5 = vpack.c.bf16 %v15688_v23, %v15654_v57 }
 0x476   :  { %v4757_v14 = vpop.f32.mrf.mxu2  ;;  %v5268_v28 = vpop.f32.mrf.mxu0 }
 0x477   :  { %v15707_v63 = vadd.f32 %v5268_v28, %v15478_v4  ;;  %v15709_v10 = vpop.f32.mrf.mxu1  ;;  %v13115_v4 = vld [vmem:[%s17271_s3 + $0x408] sm:$0xff]  ;;  %v4501_v37 = vadd.f32 %v15647_v50, %v4217_v39 }
 0x478   :  { %6386 = vmatpush.bf16.msrb.mxu0 %v13115_v4  ;;  %v5436_v4 = vld [vmem:[#allocation3 + $0xab] sm:$0xff] }
 0x479   :  { %v4565_v58 = vld [vmem:[#allocation4 + $0xe8] sm:$0xf]  ;;  %5307 = vmatmul.bf16.gmra.mxu0 %v5175_v40  ;;  %6129 = vmatmul.bf16.gmra.mxu3 %v6021_v55  ;;  %v4785_v28 = vadd.f32 %v15649_v34, %v4501_v37  ;;  %v5437_v55 = vld [vmem:[#allocation3 + $0xb3] sm:$0xff] }
 0x47a   :  { %v4789_v60 = vadd.f32 %v4757_v14, %v4565_v58  ;;  %5576 = vmatmul.bf16.gmra.mxu1 %v5456_v59  ;;  %v5159_v40 = vld [vmem:[#allocation3 + $0xe2] sm:$0xff]  ;;  %v15734_v59 = vld [vmem:[#allocation3 + $0xb4] sm:$0xff] }
 0x47b   :  { %5860 = vmatmul.bf16.gmra.mxu2 %v5740_v44  ;;  %v3994_v44 = vld [vmem:[#allocation4 + $0xd0] sm:$0xff]  ;;  %v5176_v34 = vpack.c.bf16 %v5159_v40, %v5158_v27  ;;  %v3995_v40 = vld [vmem:[#allocation4 + $0xd8] sm:$0xff] }
 0x47c   :  { %4819 = vst [vmem:[#allocation4 + $0xe8] sm:$0xf] %v4789_v60  ;;  %v5029_v54 = vpop.f32.mrf.mxu3  ;;  %v4219_v57 = vadd.f32 %v15599_v32, %v3995_v40 }
 0x47d   :  { %v15720_v26 = vadd.f32 %v5029_v54, %v15643_v35  ;;  %v15742_v54 = vld [vmem:[#allocation3 + $0xac] sm:$0xff] }
 0x47e   :  { %v15722_v7 = vpop.f32.mrf.mxu2  ;;  %v5270_v49 = vpop.f32.mrf.mxu0  ;;  %v5741_v39 = vpack.c.bf16 %v15734_v59, %v15742_v54 }
 0x47f   :  { %v15726_v36 = vadd.f32 %v5270_v49, %v15490_v56  ;;  %v15728_v14 = vpop.f32.mrf.mxu1  ;;  %v4218_v56 = vadd.f32 %v15585_v16, %v3994_v44  ;;  %v5457_v49 = vpack.c.bf16 %v5437_v55, %v5436_v4  ;;  %v15762_v4 = vld [vmem:[#allocation3 + $0xc4] sm:$0xff] }
 0x481   :  { %v4502_v37 = vadd.f32 %v15656_v33, %v4218_v56  ;;  %v4503_v33 = vadd.f32 %v15674_v3, %v4219_v57 }
 0x483   :  { %v4787_v44 = vadd.f32 %v15676_v38, %v4503_v33  ;;  %v5438_v38 = vld [vmem:[#allocation3 + $0xbb] sm:$0xff] }
 0x484   :  { %v5031_v53 = vpop.f32.mrf.mxu3 }
 0x485   :  { %v5069_v45 = vadd.f32 %v5031_v53, %v4785_v28 }
 0x486   :  { %v15732_v35 = vpop.f32.mrf.mxu2  ;;  %v5273_v58 = vpop.f32.mrf.mxu0 }
 0x487   :  { %5099 = vst [vmem:[#allocation4 + $0xc8] sm:$0xff] %v5069_v45  ;;  %v15738_v60 = vadd.f32 %v5273_v58, %v15508_v11  ;;  %v15740_v50 = vpop.f32.mrf.mxu1  ;;  %v4786_v11 = vadd.f32 %v15664_v19, %v4502_v37  ;;  %v5161_v19 = vld [vmem:[#allocation3 + $0xf2] sm:$0xff] }
 0x489   :  { %5312 = vmatmul.bf16.gmra.mxu0 %v5176_v34  ;;  %6134 = vmatmul.bf16.gmra.mxu3 %v6022_v5  ;;  %v5439_v34 = vld [vmem:[#allocation3 + $0xc3] sm:$0xff] }
 0x48a   :  { %5581 = vmatmul.bf16.gmra.mxu1 %v5457_v49  ;;  %v3996_v5 = vld [vmem:[#allocation4 + $0xe0] sm:$0xff]  ;;  %v5160_v49 = vld [vmem:[#allocation3 + $0xea] sm:$0xff]  ;;  %v5458_v40 = vpack.c.bf16 %v5439_v34, %v5438_v38  ;;  %v15792_v38 = vld [vmem:[#allocation3 + $0xd4] sm:$0xff] }
 0x48b   :  { %5865 = vmatmul.bf16.gmra.mxu2 %v5741_v39  ;;  %v5177_v37 = vpack.c.bf16 %v5161_v19, %v5160_v49  ;;  %v5163_v49 = vld [vmem:[#allocation3 + $0x102] sm:$0xf] }
 0x48c   :  { %v5034_v16 = vpop.f32.mrf.mxu3 }
 0x48d   :  { %v5070_v28 = vadd.f32 %v5034_v16, %v4786_v11  ;;  %v15768_v11 = vld [vmem:[#allocation3 + $0xbc] sm:$0xff]  ;;  %v6023_v16 = vpack.c.bf16 %v15711_v13, %v15681_v61 }
 0x48e   :  { %v15750_v53 = vpop.f32.mrf.mxu2  ;;  %v5275_v45 = vpop.f32.mrf.mxu0  ;;  %v13129_v61 = vld [vmem:[%s17271_s3 + $0x478] sm:$0xff] }
 0x48f   :  { %5100 = vst [vmem:[#allocation4 + $0xd0] sm:$0xff] %v5070_v28  ;;  %v15754_v23 = vadd.f32 %v5275_v45, %v15526_v22  ;;  %v15756_v55 = vpop.f32.mrf.mxu1  ;;  %v4220_v22 = vadd.f32 %v15609_v1, %v3996_v5  ;;  %v5742_v45 = vpack.c.bf16 %v15762_v4, %v15768_v11  ;;  %v13114_v1 = vld [vmem:[%s17271_s3 + $0x400] sm:$0xff]  ;;  %6664 = vmatpush.bf16.msrb.mxu1 %v13129_v61  ;;  %v15800_v61 = vld [vmem:[#allocation3 + $0xcc] sm:$0xff] }
 0x490   :  { %6387 = vmatpush.bf16.msrb.mxu0 %v13114_v1 }
 0x494   :  { %v5036_v58 = vpop.f32.mrf.mxu3 }
 0x495   :  { %v5071_v27 = vadd.f32 %v5036_v58, %v4787_v44 }
 0x496   :  { %v15760_v56 = vpop.f32.mrf.mxu2  ;;  %v5278_v32 = vpop.f32.mrf.mxu0 }
 0x497   :  { %5101 = vst [vmem:[#allocation4 + $0xd8] sm:$0xff] %v5071_v27  ;;  %v15766_v39 = vadd.f32 %v5278_v32, %v15544_v52  ;;  %v5547_v3 = vpop.f32.mrf.mxu1  ;;  %v4504_v52 = vadd.f32 %v15683_v25, %v4220_v22  ;;  %v13137_v27 = vld [vmem:[%s17271_s3 + $0x4b8] sm:$0xff] }
 0x498   :  { %v5616_v28 = vadd.f32 %v5547_v3, %v15686_v62  ;;  %6948 = vmatpush.bf16.msrb.mxu2 %v13137_v27  ;;  %v5162_v32 = vld [vmem:[#allocation3 + $0xfa] sm:$0xff] }
 0x499   :  { %5317 = vmatmul.bf16.gmra.mxu0 %v5177_v37  ;;  %6139 = vmatmul.bf16.gmra.mxu3 %v6023_v16  ;;  %v4788_v62 = vadd.f32 %v15693_v47, %v4504_v52  ;;  %v4849_v47 = vld [vmem:[#allocation4 + $0xe8] sm:$0xf]  ;;  %v5441_v37 = vld [vmem:[#allocation3 + $0xd3] sm:$0xff]  ;;  %v5104_v16 = vld [vmem:[#allocation4] sm:$0xff]  ;;  %v5178_v1 = vpack.c.bf16 %v5163_v49, %v5162_v32 }
 0x49a   :  { %5586 = vmatmul.bf16.gmra.mxu1 %v5458_v40  ;;  %v5328_v40 = vadd.f32 %v15634_v2, %v5104_v16  ;;  %v5440_v52 = vld [vmem:[#allocation3 + $0xcb] sm:$0xff]  ;;  %v13145_v2 = vld [vmem:[%s17271_s3 + $0x4f8] sm:$0xff] }
 0x49b   :  { %5870 = vmatmul.bf16.gmra.mxu2 %v5742_v45  ;;  %7232 = vmatpush.bf16.msra.mxu3 %v13145_v2  ;;  %v13136_v49 = vld [vmem:[%s17271_s3 + $0x4b0] sm:$0xff] }
 0x49c   :  { %v5039_v13 = vpop.f32.mrf.mxu3  ;;  %6949 = vmatpush.bf16.msrb.mxu2 %v13136_v49 }
 0x49d   :  { %v5072_v57 = vadd.f32 %v5039_v13, %v4788_v62  ;;  %v6024_v62 = vpack.c.bf16 %v15742_v54, %v15704_v15 }
 0x49e   :  { %v5831_v33 = vpop.f32.mrf.mxu2  ;;  %v5280_v58 = vpop.f32.mrf.mxu0 }
 0x49f   :  { %v15783_v44 = vadd.f32 %v5831_v33, %v5616_v28  ;;  %5102 = vst [vmem:[#allocation4 + $0xe0] sm:$0xff] %v5072_v57  ;;  %v15786_v25 = vadd.f32 %v5280_v58, %v15553_v18  ;;  %v5549_v19 = vpop.f32.mrf.mxu1  ;;  %v5459_v57 = vpack.c.bf16 %v5441_v37, %v5440_v52  ;;  %v5743_v33 = vpack.c.bf16 %v15792_v38, %v15800_v61  ;;  %v6271_v37 = vld [vmem:[#allocation3 + $0x2d] sm:$0xff]  ;;  %v6270_v52 = vld [vmem:[#allocation3 + $0x25] sm:$0xff] }
 0x4a0   :  { %v5617_v34 = vadd.f32 %v5549_v19, %v15699_v0  ;;  %v5105_v19 = vld [vmem:[#allocation4 + $0x8] sm:$0xff]  ;;  %v6300_v2 = vpack.c.bf16 %v6271_v37, %v6270_v52  ;;  %v6273_v37 = vld [vmem:[#allocation3 + $0x3d] sm:$0xff]  ;;  %v6272_v52 = vld [vmem:[#allocation3 + $0x35] sm:$0xff] }
 0x4a4   :  { %v5041_v5 = vpop.f32.mrf.mxu3 }
 0x4a5   :  { %v5073_v22 = vadd.f32 %v5041_v5, %v4849_v47  ;;  %v5329_v47 = vadd.f32 %v15645_v31, %v5105_v19  ;;  %v13135_v31 = vld [vmem:[%s17271_s3 + $0x4a8] sm:$0xff]  ;;  %v13133_v19 = vld [vmem:[%s17271_s3 + $0x498] sm:$0xff] }
 0x4a6   :  { %v5833_v3 = vpop.f32.mrf.mxu2  ;;  %v5283_v28 = vpop.f32.mrf.mxu0  ;;  %6950 = vmatpush.bf16.msrb.mxu2 %v13135_v31  ;;  %v13132_v31 = vld [vmem:[%s17271_s3 + $0x490] sm:$0xff] }
 0x4a7   :  { %v15794_v18 = vadd.f32 %v5833_v3, %v5617_v34  ;;  %5103 = vst [vmem:[#allocation4 + $0xe8] sm:$0xf] %v5073_v22  ;;  %v15798_v45 = vadd.f32 %v5283_v28, %v15568_v51  ;;  %v5552_v0 = vpop.f32.mrf.mxu1  ;;  %v5612_v51 = vadd.f32 %v15709_v10, %v5328_v40  ;;  %v5613_v22 = vadd.f32 %v15728_v14, %v5329_v47  ;;  %v5443_v40 = vld [vmem:[#allocation3 + $0xe3] sm:$0xff] }
 0x4a8   :  { %v5618_v13 = vadd.f32 %v5552_v0, %v15707_v63  ;;  %v15833_v0 = vld [vmem:[#allocation3 + $0xe4] sm:$0xff] }
 0x4a9   :  { %5322 = vmatmul.bf16.gmra.mxu0 %v5178_v1  ;;  %6144 = vmatmul.bf16.gmra.mxu3 %v6024_v62  ;;  %v5896_v58 = vadd.f32 %v15722_v7, %v5612_v51  ;;  %v13128_v7 = vld [vmem:[%s17271_s3 + $0x470] sm:$0xff] }
 0x4aa   :  { %5591 = vmatmul.bf16.gmra.mxu1 %v5459_v57  ;;  %v5442_v57 = vld [vmem:[#allocation3 + $0xdb] sm:$0xff] }
 0x4ab   :  { %5875 = vmatmul.bf16.gmra.mxu2 %v5743_v33  ;;  %6665 = vmatpush.bf16.msrb.mxu1 %v13128_v7  ;;  %v6025_v33 = vpack.c.bf16 %v15768_v11, %v15734_v59  ;;  %v5614_v59 = vadd.f32 %v15740_v50, %v15659_v17  ;;  %v13125_v11 = vld [vmem:[%s17271_s3 + $0x458] sm:$0xff] }
 0x4ac   :  { %v6105_v15 = vpop.f32.mrf.mxu3  ;;  %v5107_v50 = vld [vmem:[#allocation4 + $0x18] sm:$0xff] }
 0x4ad   :  { %v6180_v63 = vadd.f32 %v6105_v15, %v5896_v58  ;;  %v5460_v58 = vpack.c.bf16 %v5443_v40, %v5442_v57  ;;  %v5445_v40 = vld [vmem:[#allocation3 + $0xf3] sm:$0xff] }
 0x4ae   :  { %v5836_v54 = vpop.f32.mrf.mxu2  ;;  %v5285_v34 = vpop.f32.mrf.mxu0 }
 0x4af   :  { %v15812_v27 = vadd.f32 %v5836_v54, %v5618_v13  ;;  %6210 = vst [vmem:[#allocation4] sm:$0xff] %v6180_v63  ;;  %v15816_v5 = vadd.f32 %v5285_v34, %v15579_v24  ;;  %v5554_v10 = vpop.f32.mrf.mxu1  ;;  %v13127_v24 = vld [vmem:[%s17271_s3 + $0x468] sm:$0xff]  ;;  %v13126_v54 = vld [vmem:[%s17271_s3 + $0x460] sm:$0xff]  ;;  %v13153_v63 = vld [vmem:[%s17271_s3 + $0x538] sm:$0xff] }
 0x4b0   :  { %v5619_v32 = vadd.f32 %v5554_v10, %v15726_v36  ;;  %v5897_v36 = vadd.f32 %v15732_v35, %v5613_v22  ;;  %6666 = vmatpush.bf16.msrb.mxu1 %v13127_v24  ;;  %v15840_v35 = vld [vmem:[#allocation3 + $0xdc] sm:$0xff]  ;;  %7516 = vmatpush.bf16.msra.mxu0 %v13153_v63  ;;  %v13124_v24 = vld [vmem:[%s17271_s3 + $0x450] sm:$0xff] }
 0x4b1   :  { %v5744_v15 = vpack.c.bf16 %v15833_v0, %v15840_v35 }
 0x4b4   :  { %v6107_v3 = vpop.f32.mrf.mxu3  ;;  %6667 = vmatpush.bf16.msrb.mxu1 %v13126_v54 }
 0x4b5   :  { %v6181_v28 = vadd.f32 %v6107_v3, %v5897_v36 }
 0x4b6   :  { %v5838_v16 = vpop.f32.mrf.mxu2  ;;  %v5288_v1 = vpop.f32.mrf.mxu0 }
 0x4b7   :  { %v15835_v14 = vadd.f32 %v5838_v16, %v5619_v32  ;;  %6211 = vst [vmem:[#allocation4 + $0x8] sm:$0xff] %v6181_v28  ;;  %v15838_v62 = vadd.f32 %v5288_v1, %v15595_v12  ;;  %v5557_v13 = vpop.f32.mrf.mxu1  ;;  %v13134_v12 = vld [vmem:[%s17271_s3 + $0x4a0] sm:$0xff]  ;;  %v15886_v1 = vld [vmem:[#allocation3 + $0xf4] sm:$0xff] }
 0x4b8   :  { %v5620_v51 = vadd.f32 %v5557_v13, %v15738_v60  ;;  %v5898_v60 = vadd.f32 %v15750_v53, %v5614_v59  ;;  %6951 = vmatpush.bf16.msrb.mxu2 %v13134_v12  ;;  %v5331_v53 = vadd.f32 %v15669_v29, %v5107_v50  ;;  %6668 = vmatpush.bf16.msrb.mxu1 %v13125_v11  ;;  %v13144_v13 = vld [vmem:[%s17271_s3 + $0x4f0] sm:$0xff]  ;;  %v13130_v59 = vld [vmem:[%s17271_s3 + $0x480] sm:$0xff] }
 0x4b9   :  { %6149 = vmatmul.bf16.gmra.mxu3 %v6025_v33  ;;  %6388 = vmatmul.bf16.vlgmr.msrb.gmra.mxu0 %v6300_v2  ;;  %v5444_v2 = vld [vmem:[#allocation3 + $0xeb] sm:$0xff]  ;;  %v5446_v50 = vld [vmem:[#allocation3 + $0xfb] sm:$0xff] }
 0x4ba   :  { %5596 = vmatmul.bf16.gmra.mxu1 %v5460_v58  ;;  %v5615_v36 = vadd.f32 %v15756_v55, %v5331_v53  ;;  %v6026_v58 = vpack.c.bf16 %v15800_v61, %v15762_v4  ;;  %v5461_v12 = vpack.c.bf16 %v5445_v40, %v5444_v2  ;;  %7233 = vmatpush.bf16.msra.mxu3 %v13144_v13  ;;  %v13143_v13 = vld [vmem:[%s17271_s3 + $0x4e8] sm:$0xff]  ;;  %v6277_v2 = vld [vmem:[#allocation3 + $0x5d] sm:$0xff] }
 0x4bb   :  { %5880 = vmatmul.bf16.gmra.mxu2 %v5744_v15  ;;  %v6301_v15 = vpack.c.bf16 %v6273_v37, %v6272_v52 }
 0x4bc   :  { %v6110_v34 = vpop.f32.mrf.mxu3  ;;  %6952 = vmatpush.bf16.msrb.mxu2 %v13133_v19  ;;  %v5899_v29 = vadd.f32 %v15760_v56, %v5615_v36  ;;  %6669 = vmatpush.bf16.msrb.mxu1 %v13124_v24  ;;  %v15921_v24 = vld [vmem:[#allocation3 + $0xfc] sm:$0xff] }
 0x4bd   :  { %v6182_v17 = vadd.f32 %v6110_v34, %v5898_v60 }
 0x4be   :  { %v5841_v47 = vpop.f32.mrf.mxu2  ;;  %v5290_v32 = vpop.f32.mrf.mxu0  ;;  %7234 = vmatpush.bf16.msra.mxu3 %v13143_v13  ;;  %v6840_v13 = vld [vmem:[#allocation3 + $0x37] sm:$0xff] }
 0x4bf   :  { %v15865_v10 = vadd.f32 %v5841_v47, %v5620_v51  ;;  %6212 = vst [vmem:[#allocation4 + $0x10] sm:$0xff] %v6182_v17  ;;  %v15869_v7 = vadd.f32 %v5290_v32, %v15603_v21  ;;  %v5559_v49 = vpop.f32.mrf.mxu1  ;;  %v13123_v21 = vld [vmem:[%s17271_s3 + $0x448] sm:$0xff] }
 0x4c0   :  { %v5621_v22 = vadd.f32 %v5559_v49, %v15754_v23  ;;  %6953 = vmatpush.bf16.msrb.mxu2 %v13132_v31  ;;  %v13131_v23 = vld [vmem:[%s17271_s3 + $0x488] sm:$0xff]  ;;  %6670 = vmatpush.bf16.msrb.mxu1 %v13123_v21 }
 0x4c1   :  { %v15896_v51 = vld [vmem:[#allocation3 + $0xec] sm:$0xff] }
 0x4c2   :  { %v5745_v63 = vpack.c.bf16 %v15886_v1, %v15896_v51  ;;  %v6275_v32 = vld [vmem:[#allocation3 + $0x4d] sm:$0xff] }
 0x4c4   :  { %v6112_v3 = vpop.f32.mrf.mxu3  ;;  %6954 = vmatpush.bf16.msrb.mxu2 %v13131_v23 }
 0x4c5   :  { %v6183_v28 = vadd.f32 %v6112_v3, %v5899_v29  ;;  %v6274_v29 = vld [vmem:[#allocation3 + $0x45] sm:$0xff] }
 0x4c6   :  { %v5843_v16 = vpop.f32.mrf.mxu2  ;;  %v5293_v56 = vpop.f32.mrf.mxu0  ;;  %v6302_v23 = vpack.c.bf16 %v6275_v32, %v6274_v29  ;;  %v13151_v29 = vld [vmem:[%s17271_s3 + $0x528] sm:$0xff] }
 0x4c7   :  { %v15888_v55 = vadd.f32 %v5843_v16, %v5621_v22  ;;  %6213 = vst [vmem:[#allocation4 + $0x18] sm:$0xff] %v6183_v28  ;;  %v15894_v57 = vadd.f32 %v5293_v56, %v15619_v30  ;;  %v5562_v33 = vpop.f32.mrf.mxu1  ;;  %v13122_v30 = vld [vmem:[%s17271_s3 + $0x440] sm:$0xff] }
 0x4c8   :  { %v5622_v54 = vadd.f32 %v5562_v33, %v15766_v39  ;;  %6671 = vmatpush.bf16.msrb.mxu1 %v13122_v30  ;;  %6955 = vmatpush.bf16.msrb.mxu2 %v13130_v59  ;;  %v5447_v22 = vld [vmem:[#allocation3 + $0x103] sm:$0xf]  ;;  %v6028_v59 = vpack.c.bf16 %v15896_v51, %v15833_v0 }
 0x4c9   :  { %6154 = vmatmul.bf16.gmra.mxu3 %v6026_v58  ;;  %6393 = vmatmul.bf16.gmra.mxu0 %v6301_v15  ;;  %v5462_v37 = vpack.c.bf16 %v5447_v22, %v5446_v50  ;;  %v6555_v15 = vld [vmem:[#allocation3 + $0x2e] sm:$0xff] }
 0x4ca   :  { %5601 = vmatmul.bf16.gmra.mxu1 %v5461_v12 }
 0x4cb   :  { %5885 = vmatmul.bf16.gmra.mxu2 %v5745_v63  ;;  %v6276_v63 = vld [vmem:[#allocation3 + $0x55] sm:$0xff] }
 0x4cc   :  { %v6115_v4 = vpop.f32.mrf.mxu3 }
 0x4cd   :  { %v15910_v61 = vadd.f32 %v6115_v4, %v15783_v44  ;;  %v5731_v44 = vld [vmem:[#allocation3 + $0x104] sm:$0xf]  ;;  %v6303_v4 = vpack.c.bf16 %v6277_v2, %v6276_v63 }
 0x4ce   :  { %v5846_v39 = vpop.f32.mrf.mxu2  ;;  %v5295_v11 = vpop.f32.mrf.mxu0  ;;  %v5746_v16 = vpack.c.bf16 %v5731_v44, %v15921_v24 }
 0x4cf   :  { %v15912_v60 = vadd.f32 %v5846_v39, %v5622_v54  ;;  %v15915_v19 = vadd.f32 %v5295_v11, %v15628_v48  ;;  %v5564_v34 = vpop.f32.mrf.mxu1  ;;  %v13152_v48 = vld [vmem:[%s17271_s3 + $0x530] sm:$0xff]  ;;  %v6554_v39 = vld [vmem:[#allocation3 + $0x26] sm:$0xff] }
 0x4d0   :  { %v5623_v47 = vadd.f32 %v5564_v34, %v15786_v25  ;;  %7517 = vmatpush.bf16.msra.mxu0 %v13152_v48  ;;  %v6839_v54 = vld [vmem:[#allocation3 + $0x2f] sm:$0xff]  ;;  %v6838_v11 = vld [vmem:[#allocation3 + $0x27] sm:$0xff] }
 0x4d1   :  { %v6279_v48 = vld [vmem:[#allocation3 + $0x6d] sm:$0xff] }
 0x4d4   :  { %v6117_v17 = vpop.f32.mrf.mxu3  ;;  %7518 = vmatpush.bf16.msra.mxu0 %v13151_v29 }
 0x4d5   :  { %v15919_v49 = vadd.f32 %v6117_v17, %v15794_v18  ;;  %v6027_v18 = vpack.c.bf16 %v15840_v35, %v15792_v38  ;;  %v13142_v17 = vld [vmem:[%s17271_s3 + $0x4e0] sm:$0xff] }
 0x4d6   :  { %v5848_v53 = vpop.f32.mrf.mxu2  ;;  %v5298_v36 = vpop.f32.mrf.mxu0  ;;  %7235 = vmatpush.bf16.msra.mxu3 %v13142_v17 }
 0x4d7   :  { %v15923_v31 = vadd.f32 %v5848_v53, %v5623_v47  ;;  %v15929_v25 = vadd.f32 %v5298_v36, %v15641_v43  ;;  %v5567_v21 = vpop.f32.mrf.mxu1  ;;  %v6868_v47 = vpack.c.bf16 %v6839_v54, %v6838_v11  ;;  %v13140_v36 = vld [vmem:[%s17271_s3 + $0x4d0] sm:$0xff] }
 0x4d8   :  { %v5624_v3 = vadd.f32 %v5567_v21, %v15798_v45 }
 0x4d9   :  { %6159 = vmatmul.bf16.gmra.mxu3 %v6027_v18  ;;  %6398 = vmatmul.bf16.gmra.mxu0 %v6302_v23  ;;  %v6841_v23 = vld [vmem:[#allocation3 + $0x3f] sm:$0xff] }
 0x4da   :  { %5606 = vmatmul.bf16.gmra.mxu1 %v5462_v37  ;;  %v6869_v2 = vpack.c.bf16 %v6841_v23, %v6840_v13  ;;  %v6282_v13 = vld [vmem:[#allocation3 + $0x85] sm:$0xff] }
 0x4db   :  { %5890 = vmatmul.bf16.gmra.mxu2 %v5746_v16  ;;  %v6278_v16 = vld [vmem:[#allocation3 + $0x65] sm:$0xff] }
 0x4dc   :  { %v6120_v28 = vpop.f32.mrf.mxu3 }
 0x4dd   :  { %v15936_v43 = vadd.f32 %v6120_v28, %v15812_v27 }
 0x4de   :  { %v5851_v40 = vpop.f32.mrf.mxu2  ;;  %v5300_v52 = vpop.f32.mrf.mxu0 }
 0x4df   :  { %v15938_v56 = vadd.f32 %v5851_v40, %v5624_v3  ;;  %v15941_v38 = vadd.f32 %v5300_v52, %v15652_v8  ;;  %v5569_v45 = vpop.f32.mrf.mxu1  ;;  %v6029_v52 = vpack.c.bf16 %v15921_v24, %v15886_v1 }
 0x4e0   :  { %v5625_v35 = vadd.f32 %v5569_v45, %v15816_v5  ;;  %v6304_v45 = vpack.c.bf16 %v6279_v48, %v6278_v16 }
 0x4e4   :  { %v6122_v33 = vpop.f32.mrf.mxu3 }
 0x4e5   :  { %v15948_v27 = vadd.f32 %v6122_v33, %v15835_v14  ;;  %v6584_v14 = vpack.c.bf16 %v6555_v15, %v6554_v39  ;;  %v6281_v39 = vld [vmem:[#allocation3 + $0x7d] sm:$0xff] }
 0x4e6   :  { %v5853_v58 = vpop.f32.mrf.mxu2  ;;  %v5303_v8 = vpop.f32.mrf.mxu0 }
 0x4e7   :  { %v15950_v12 = vadd.f32 %v5853_v58, %v5625_v35  ;;  %v15953_v30 = vadd.f32 %v5303_v8, %v15667_v41  ;;  %v5572_v5 = vpop.f32.mrf.mxu1  ;;  %v13141_v41 = vld [vmem:[%s17271_s3 + $0x4d8] sm:$0xff]  ;;  %v13138_v58 = vld [vmem:[%s17271_s3 + $0x4c0] sm:$0xff] }
 0x4e8   :  { %v5626_v34 = vadd.f32 %v5572_v5, %v15838_v62  ;;  %7236 = vmatpush.bf16.msra.mxu3 %v13141_v41  ;;  %v6556_v35 = vld [vmem:[#allocation3 + $0x36] sm:$0xff] }
 0x4e9   :  { %6164 = vmatmul.bf16.gmra.mxu3 %v6028_v59  ;;  %6403 = vmatmul.bf16.gmra.mxu0 %v6303_v4  ;;  %v6014_v59 = vld [vmem:[#allocation3 + $0x104] sm:$0xff]  ;;  %v6015_v4 = vld [vmem:[#allocation3 + $0x10c] sm:$0xf]  ;;  %v6280_v41 = vld [vmem:[#allocation3 + $0x75] sm:$0xff] }
 0x4ea   :  { %6672 = vmatmul.bf16.vlgmr.msrb.gmra.mxu1 %v6584_v14  ;;  %v6559_v14 = vld [vmem:[#allocation3 + $0x4e] sm:$0xff] }
 0x4eb   :  { %6956 = vmatmul.bf16.vlgmr.msrb.gmra.mxu2 %v6868_v47 }
 0x4ec   :  { %v6125_v0 = vpop.f32.mrf.mxu3  ;;  %7237 = vmatpush.bf16.msra.mxu3 %v13140_v36 }
 0x4ed   :  { %v15965_v50 = vadd.f32 %v6125_v0, %v15865_v10  ;;  %v13139_v10 = vld [vmem:[%s17271_s3 + $0x4c8] sm:$0xff] }
 0x4ee   :  { %v5856_v51 = vpop.f32.mrf.mxu2  ;;  %v5305_v32 = vpop.f32.mrf.mxu0 }
 0x4ef   :  { %v15967_v62 = vadd.f32 %v5856_v51, %v5626_v34  ;;  %v15970_v53 = vadd.f32 %v5305_v32, %v15679_v9  ;;  %v5574_v22 = vpop.f32.mrf.mxu1  ;;  %v6030_v51 = vpack.c.bf16 %v6015_v4, %v6014_v59  ;;  %v6558_v32 = vld [vmem:[#allocation3 + $0x46] sm:$0xff] }
 0x4f0   :  { %v5627_v44 = vadd.f32 %v5574_v22, %v15869_v7  ;;  %v6557_v7 = vld [vmem:[#allocation3 + $0x3e] sm:$0xff]  ;;  %7238 = vmatpush.bf16.msra.mxu3 %v13139_v10  ;;  %v6842_v22 = vld [vmem:[#allocation3 + $0x47] sm:$0xff]  ;;  %v6586_v36 = vpack.c.bf16 %v6559_v14, %v6558_v32 }
 0x4f1   :  { %v6585_v33 = vpack.c.bf16 %v6557_v7, %v6556_v35 }
 0x4f4   :  { %v6127_v9 = vpop.f32.mrf.mxu3  ;;  %7239 = vmatpush.bf16.msra.mxu3 %v13138_v58  ;;  %v6844_v58 = vld [vmem:[#allocation3 + $0x57] sm:$0xff] }
 0x4f5   :  { %v15983_v18 = vadd.f32 %v6127_v9, %v15888_v55 }
 0x4f6   :  { %v5858_v21 = vpop.f32.mrf.mxu2  ;;  %v5308_v37 = vpop.f32.mrf.mxu0 }
 0x4f7   :  { %v15985_v3 = vadd.f32 %v5858_v21, %v5627_v44  ;;  %v15988_v28 = vadd.f32 %v5308_v37, %v15696_v6  ;;  %v5577_v40 = vpop.f32.mrf.mxu1  ;;  %v6283_v37 = vld [vmem:[#allocation3 + $0x8d] sm:$0xff] }
 0x4f8   :  { %v5628_v55 = vadd.f32 %v5577_v40, %v15894_v57 }
 0x4f9   :  { %6169 = vmatmul.bf16.gmra.mxu3 %v6029_v52  ;;  %6408 = vmatmul.bf16.gmra.mxu0 %v6304_v45  ;;  %v6845_v52 = vld [vmem:[#allocation3 + $0x5f] sm:$0xff] }
 0x4fa   :  { %6677 = vmatmul.bf16.gmra.mxu1 %v6585_v33  ;;  %v6306_v33 = vpack.c.bf16 %v6283_v37, %v6282_v13 }
 0x4fb   :  { %6961 = vmatmul.bf16.gmra.mxu2 %v6869_v2  ;;  %v6560_v2 = vld [vmem:[#allocation3 + $0x56] sm:$0xff] }
 0x4fc   :  { %v6130_v6 = vpop.f32.mrf.mxu3 }
 0x4fd   :  { %v15997_v1 = vadd.f32 %v6130_v6, %v15912_v60  ;;  %v6843_v60 = vld [vmem:[#allocation3 + $0x4f] sm:$0xff] }
 0x4fe   :  { %v5861_v15 = vpop.f32.mrf.mxu2  ;;  %v5310_v54 = vpop.f32.mrf.mxu0  ;;  %v6870_v29 = vpack.c.bf16 %v6843_v60, %v6842_v22  ;;  %v13335_v6 = vld [vmem:[#allocation3 + $0x30] sm:$0xff] }
 0x4ff   :  { %v15999_v24 = vadd.f32 %v5861_v15, %v5628_v55  ;;  %v16002_v57 = vadd.f32 %v5310_v54, %v15702_v20  ;;  %v5579_v8 = vpop.f32.mrf.mxu1  ;;  %v7122_v55 = vld [vmem:[#allocation3 + $0x28] sm:$0xff] }
 0x500   :  { %v5629_v63 = vadd.f32 %v5579_v8, %v15915_v19  ;;  %v6305_v19 = vpack.c.bf16 %v6281_v39, %v6280_v41  ;;  %v7152_v15 = vpack.c.bf16 %v13335_v6, %v7122_v55  ;;  %v6565_v6 = vld [vmem:[#allocation3 + $0x7e] sm:$0xff] }
 0x504   :  { %v6132_v5 = vpop.f32.mrf.mxu3 }
 0x505   :  { %v16006_v34 = vadd.f32 %v6132_v5, %v15923_v31 }
 0x506   :  { %v5863_v11 = vpop.f32.mrf.mxu2  ;;  %v5313_v17 = vpop.f32.mrf.mxu0 }
 0x507   :  { %v16008_v47 = vadd.f32 %v5863_v11, %v5629_v63  ;;  %v16011_v20 = vadd.f32 %v5313_v17, %v15720_v26  ;;  %v5582_v0 = vpop.f32.mrf.mxu1  ;;  %v6871_v63 = vpack.c.bf16 %v6845_v52, %v6844_v58 }
 0x508   :  { %v5630_v44 = vadd.f32 %v5582_v0, %v15929_v25  ;;  %v13150_v25 = vld [vmem:[%s17271_s3 + $0x520] sm:$0xff]  ;;  %v6563_v0 = vld [vmem:[#allocation3 + $0x6e] sm:$0xff] }
 0x509   :  { %6174 = vmatmul.bf16.gmra.mxu3 %v6030_v51  ;;  %6413 = vmatmul.bf16.gmra.mxu0 %v6305_v19  ;;  %v6847_v51 = vld [vmem:[#allocation3 + $0x6f] sm:$0xff] }
 0x50a   :  { %6682 = vmatmul.bf16.gmra.mxu1 %v6586_v36  ;;  %7519 = vmatpush.bf16.msra.mxu0 %v13150_v25  ;;  %v6562_v36 = vld [vmem:[#allocation3 + $0x66] sm:$0xff] }
 0x50b   :  { %6966 = vmatmul.bf16.gmra.mxu2 %v6870_v29  ;;  %v6846_v29 = vld [vmem:[#allocation3 + $0x67] sm:$0xff] }
 0x50c   :  { %v6135_v31 = vpop.f32.mrf.mxu3  ;;  %v6872_v25 = vpack.c.bf16 %v6847_v51, %v6846_v29 }
 0x50d   :  { %v16015_v9 = vadd.f32 %v6135_v31, %v15938_v56  ;;  %v6561_v56 = vld [vmem:[#allocation3 + $0x5e] sm:$0xff] }
 0x50e   :  { %v5866_v10 = vpop.f32.mrf.mxu2  ;;  %v16019_v48 = vpop.f32.mrf.mxu0  ;;  %v6587_v8 = vpack.c.bf16 %v6561_v56, %v6560_v2  ;;  %v13336_v31 = vld [vmem:[#allocation3 + $0x38] sm:$0xff]  ;;  %v5133_v56 = vld [vmem:[#allocation4 + $0xe8] sm:$0xf]  ;;  %v6287_v2 = vld [vmem:[#allocation3 + $0xad] sm:$0xff] }
 0x50f   :  { %v16017_v26 = vadd.f32 %v5866_v10, %v5630_v44  ;;  %v5584_v21 = vpop.f32.mrf.mxu1  ;;  %v13337_v10 = vld [vmem:[#allocation3 + $0x40] sm:$0xff] }
 0x510   :  { %v5631_v7 = vadd.f32 %v5584_v21, %v15941_v38 }
 0x514   :  { %v6137_v23 = vpop.f32.mrf.mxu3 }
 0x515   :  { %v16026_v40 = vadd.f32 %v6137_v23, %v15950_v12 }
 0x516   :  { %v5868_v16 = vpop.f32.mrf.mxu2  ;;  %v16030_v35 = vpop.f32.mrf.mxu0 }
 0x517   :  { %v16028_v45 = vadd.f32 %v5868_v16, %v5631_v7  ;;  %v5587_v38 = vpop.f32.mrf.mxu1  ;;  %v6588_v7 = vpack.c.bf16 %v6563_v0, %v6562_v36 }
 0x518   :  { %v5632_v54 = vadd.f32 %v5587_v38, %v15953_v30  ;;  %v6285_v30 = vld [vmem:[#allocation3 + $0x9d] sm:$0xff] }
 0x519   :  { %6418 = vmatmul.bf16.gmra.mxu0 %v6306_v33  ;;  %7240 = vmatmul.bf16.vlgmr.msra.gmra.mxu3 %v7152_v15  ;;  %v6849_v15 = vld [vmem:[#allocation3 + $0x7f] sm:$0xff] }
 0x51a   :  { %6687 = vmatmul.bf16.gmra.mxu1 %v6587_v8 }
 0x51b   :  { %6971 = vmatmul.bf16.gmra.mxu2 %v6871_v63  ;;  %v6286_v63 = vld [vmem:[#allocation3 + $0xa5] sm:$0xff] }
 0x51c   :  { %v6140_v12 = vpop.f32.mrf.mxu3 }
 0x51d   :  { %v16034_v59 = vadd.f32 %v6140_v12, %v15967_v62  ;;  %v6284_v62 = vld [vmem:[#allocation3 + $0x95] sm:$0xff]  ;;  %v6308_v12 = vpack.c.bf16 %v6287_v2, %v6286_v63 }
 0x51e   :  { %v5871_v5 = vpop.f32.mrf.mxu2  ;;  %v16038_v39 = vpop.f32.mrf.mxu0  ;;  %v6307_v44 = vpack.c.bf16 %v6285_v30, %v6284_v62 }
 0x51f   :  { %v16036_v4 = vadd.f32 %v5871_v5, %v5632_v54  ;;  %v5589_v11 = vpop.f32.mrf.mxu1  ;;  %v6564_v5 = vld [vmem:[#allocation3 + $0x76] sm:$0xff] }
 0x520   :  { %v5633_v14 = vadd.f32 %v5589_v11, %v15970_v53  ;;  %v7153_v53 = vpack.c.bf16 %v13337_v10, %v13336_v31  ;;  %v6848_v11 = vld [vmem:[#allocation3 + $0x77] sm:$0xff]  ;;  %v6589_v0 = vpack.c.bf16 %v6565_v6, %v6564_v5 }
 0x521   :  { %v6873_v51 = vpack.c.bf16 %v6849_v15, %v6848_v11  ;;  %v6289_v10 = vld [vmem:[#allocation3 + $0xbd] sm:$0xff]  ;;  %v13148_v15 = vld [vmem:[%s17271_s3 + $0x510] sm:$0xff] }
 0x522   :  { %v7131_v5 = vld [vmem:[#allocation3 + $0x70] sm:$0xff] }
 0x524   :  { %v6142_v60 = vpop.f32.mrf.mxu3 }
 0x525   :  { %v16042_v41 = vadd.f32 %v6142_v60, %v15985_v3  ;;  %v13339_v60 = vld [vmem:[#allocation3 + $0x50] sm:$0xff] }
 0x526   :  { %v5873_v17 = vpop.f32.mrf.mxu2  ;;  %v16046_v32 = vpop.f32.mrf.mxu0 }
 0x527   :  { %v16044_v19 = vadd.f32 %v5873_v17, %v5633_v14  ;;  %v5592_v22 = vpop.f32.mrf.mxu1  ;;  %v13338_v14 = vld [vmem:[#allocation3 + $0x48] sm:$0xff] }
 0x528   :  { %v5634_v21 = vadd.f32 %v5592_v22, %v15988_v28  ;;  %v13149_v28 = vld [vmem:[%s17271_s3 + $0x518] sm:$0xff]  ;;  %v7154_v30 = vpack.c.bf16 %v13339_v60, %v13338_v14 }
 0x529   :  { %6423 = vmatmul.bf16.gmra.mxu0 %v6307_v44  ;;  %7245 = vmatmul.bf16.gmra.mxu3 %v7153_v53  ;;  %v6569_v60 = vld [vmem:[#allocation3 + $0x9e] sm:$0xff] }
 0x52a   :  { %6692 = vmatmul.bf16.gmra.mxu1 %v6588_v7  ;;  %7520 = vmatpush.bf16.msra.mxu0 %v13149_v28  ;;  %v6567_v7 = vld [vmem:[#allocation3 + $0x8e] sm:$0xff] }
 0x52b   :  { %6976 = vmatmul.bf16.gmra.mxu2 %v6872_v25  ;;  %v6851_v25 = vld [vmem:[#allocation3 + $0x8f] sm:$0xff] }
 0x52c   :  { %v6145_v3 = vpop.f32.mrf.mxu3 }
 0x52d   :  { %v16050_v37 = vadd.f32 %v6145_v3, %v15999_v24 }
 0x52e   :  { %v5876_v23 = vpop.f32.mrf.mxu2  ;;  %v5325_v52 = vpop.f32.mrf.mxu0  ;;  %7521 = vmatpush.bf16.msra.mxu0 %v13148_v15 }
 0x52f   :  { %v16052_v16 = vadd.f32 %v5876_v23, %v5634_v21  ;;  %v5357_v13 = vadd.f32 %v5325_v52, %v5133_v56  ;;  %v5594_v55 = vpop.f32.mrf.mxu1  ;;  %v6566_v52 = vld [vmem:[#allocation3 + $0x86] sm:$0xff] }
 0x530   :  { %v5635_v38 = vadd.f32 %v5594_v55, %v16002_v57  ;;  %v13340_v55 = vld [vmem:[#allocation3 + $0x58] sm:$0xff]  ;;  %v6590_v28 = vpack.c.bf16 %v6567_v7, %v6566_v52 }
 0x531   :  { %5387 = vst [vmem:[#allocation4 + $0xe8] sm:$0xf] %v5357_v13  ;;  %v6850_v13 = vld [vmem:[#allocation3 + $0x87] sm:$0xff] }
 0x534   :  { %v6147_v33 = vpop.f32.mrf.mxu3 }
 0x535   :  { %v16059_v24 = vadd.f32 %v6147_v33, %v16008_v47  ;;  %v6874_v33 = vpack.c.bf16 %v6851_v25, %v6850_v13 }
 0x536   :  { %v5878_v58 = vpop.f32.mrf.mxu2  ;;  %v16063_v8 = vpop.f32.mrf.mxu0 }
 0x537   :  { %v16061_v54 = vadd.f32 %v5878_v58, %v5635_v38  ;;  %v5597_v57 = vpop.f32.mrf.mxu1 }
 0x538   :  { %v5636_v17 = vadd.f32 %v5597_v57, %v16011_v20  ;;  %v7129_v20 = vld [vmem:[#allocation3 + $0x60] sm:$0xff] }
 0x539   :  { %6428 = vmatmul.bf16.gmra.mxu0 %v6308_v12  ;;  %7250 = vmatmul.bf16.gmra.mxu3 %v7154_v30  ;;  %v7155_v38 = vpack.c.bf16 %v7129_v20, %v13340_v55  ;;  %v6291_v12 = vld [vmem:[#allocation3 + $0xcd] sm:$0xff] }
 0x53a   :  { %6697 = vmatmul.bf16.gmra.mxu1 %v6589_v0  ;;  %v16101_v0 = vld [vmem:[#allocation3 + $0x68] sm:$0xff] }
 0x53b   :  { %6981 = vmatmul.bf16.gmra.mxu2 %v6873_v51  ;;  %v7156_v20 = vpack.c.bf16 %v7131_v5, %v16101_v0  ;;  %v6855_v5 = vld [vmem:[#allocation3 + $0xaf] sm:$0xff] }
 0x53c   :  { %v6150_v47 = vpop.f32.mrf.mxu3 }
 0x53d   :  { %v16067_v22 = vadd.f32 %v6150_v47, %v16017_v26  ;;  %v6288_v26 = vld [vmem:[#allocation3 + $0xb5] sm:$0xff] }
 0x53e   :  { %v5881_v62 = vpop.f32.mrf.mxu2  ;;  %v16071_v36 = vpop.f32.mrf.mxu0  ;;  %v6309_v56 = vpack.c.bf16 %v6289_v10, %v6288_v26  ;;  %v6852_v10 = vld [vmem:[#allocation3 + $0x97] sm:$0xff] }
 0x53f   :  { %v16069_v44 = vadd.f32 %v5881_v62, %v5636_v17  ;;  %v16073_v29 = vpop.f32.mrf.mxu1  ;;  %v6290_v17 = vld [vmem:[#allocation3 + $0xc5] sm:$0xff] }
 0x540   :  { %v6310_v62 = vpack.c.bf16 %v6291_v12, %v6290_v17  ;;  %v6571_v12 = vld [vmem:[#allocation3 + $0xae] sm:$0xff] }
 0x544   :  { %v6152_v31 = vpop.f32.mrf.mxu3 }
 0x545   :  { %v16078_v21 = vadd.f32 %v6152_v31, %v16028_v45  ;;  %v6568_v31 = vld [vmem:[#allocation3 + $0x96] sm:$0xff] }
 0x546   :  { %v16075_v53 = vpop.f32.mrf.mxu2  ;;  %v16080_v3 = vpop.f32.mrf.mxu0  ;;  %v6591_v7 = vpack.c.bf16 %v6569_v60, %v6568_v31  ;;  %v6854_v31 = vld [vmem:[#allocation3 + $0xa7] sm:$0xff] }
 0x547   :  { %v16082_v23 = vpop.f32.mrf.mxu1 }
 0x549   :  { %6433 = vmatmul.bf16.gmra.mxu0 %v6309_v56  ;;  %7255 = vmatmul.bf16.gmra.mxu3 %v7155_v38 }
 0x54a   :  { %6702 = vmatmul.bf16.gmra.mxu1 %v6590_v28 }
 0x54b   :  { %6986 = vmatmul.bf16.gmra.mxu2 %v6874_v33  ;;  %v6293_v33 = vld [vmem:[#allocation3 + $0xdd] sm:$0xff] }
 0x54c   :  { %v6155_v45 = vpop.f32.mrf.mxu3 }
 0x54d   :  { %v16087_v58 = vadd.f32 %v6155_v45, %v16036_v4  ;;  %v6853_v4 = vld [vmem:[#allocation3 + $0x9f] sm:$0xff] }
 0x54e   :  { %v16084_v2 = vpop.f32.mrf.mxu2  ;;  %v16089_v6 = vpop.f32.mrf.mxu0  ;;  %v6875_v25 = vpack.c.bf16 %v6853_v4, %v6852_v10  ;;  %v7133_v45 = vld [vmem:[#allocation3 + $0x80] sm:$0xff]  ;;  %v16120_v4 = vld [vmem:[#allocation3 + $0x78] sm:$0xff] }
 0x54f   :  { %v16094_v63 = vpop.f32.mrf.mxu1  ;;  %v7157_v10 = vpack.c.bf16 %v7133_v45, %v16120_v4 }
 0x554   :  { %v6157_v57 = vpop.f32.mrf.mxu3 }
 0x555   :  { %v16099_v14 = vadd.f32 %v6157_v57, %v16044_v19 }
 0x556   :  { %v16096_v11 = vpop.f32.mrf.mxu2  ;;  %v6399_v30 = vpop.f32.mrf.mxu0 }
 0x557   :  { %v16103_v51 = vpop.f32.mrf.mxu1  ;;  %v16106_v47 = vadd.f32 %v6399_v30, %v15910_v61  ;;  %v5417_v61 = vld [vmem:[#allocation4 + $0xe8] sm:$0xf] }
 0x559   :  { %6438 = vmatmul.bf16.gmra.mxu0 %v6310_v62  ;;  %7260 = vmatmul.bf16.gmra.mxu3 %v7156_v20  ;;  %v6570_v62 = vld [vmem:[#allocation3 + $0xa6] sm:$0xff] }
 0x55a   :  { %6707 = vmatmul.bf16.gmra.mxu1 %v6591_v7  ;;  %v6592_v20 = vpack.c.bf16 %v6571_v12, %v6570_v62  ;;  %v6876_v7 = vpack.c.bf16 %v6855_v5, %v6854_v31  ;;  %v6573_v62 = vld [vmem:[#allocation3 + $0xbe] sm:$0xff] }
 0x55b   :  { %6991 = vmatmul.bf16.gmra.mxu2 %v6875_v25  ;;  %v6857_v31 = vld [vmem:[#allocation3 + $0xbf] sm:$0xff] }
 0x55c   :  { %v6160_v19 = vpop.f32.mrf.mxu3 }
 0x55d   :  { %v16112_v56 = vadd.f32 %v6160_v19, %v16052_v16  ;;  %v6292_v16 = vld [vmem:[#allocation3 + $0xd5] sm:$0xff] }
 0x55e   :  { %v16109_v26 = vpop.f32.mrf.mxu2  ;;  %v6401_v52 = vpop.f32.mrf.mxu0  ;;  %v6311_v17 = vpack.c.bf16 %v6293_v33, %v6292_v16  ;;  %v7135_v16 = vld [vmem:[#allocation3 + $0x90] sm:$0xff] }
 0x55f   :  { %v5609_v13 = vpop.f32.mrf.mxu1  ;;  %v16115_v55 = vadd.f32 %v6401_v52, %v15919_v49 }
 0x560   :  { %v5641_v38 = vadd.f32 %v5609_v13, %v5417_v61  ;;  %v5129_v13 = vld [vmem:[#allocation4 + $0xc8] sm:$0xff] }
 0x562   :  { %5671 = vst [vmem:[#allocation4 + $0xe8] sm:$0xf] %v5641_v38 }
 0x564   :  { %v6162_v28 = vpop.f32.mrf.mxu3 }
 0x565   :  { %v16118_v57 = vadd.f32 %v6162_v28, %v16061_v54  ;;  %v5353_v28 = vadd.f32 %v16019_v48, %v5129_v13  ;;  %v6294_v48 = vld [vmem:[#allocation3 + $0xe5] sm:$0xff] }
 0x566   :  { %v5893_v15 = vpop.f32.mrf.mxu2  ;;  %v6404_v60 = vpop.f32.mrf.mxu0 }
 0x567   :  { %v16123_v30 = vadd.f32 %v6404_v60, %v15936_v43  ;;  %v16125_v49 = vpop.f32.mrf.mxu1  ;;  %v13147_v43 = vld [vmem:[%s17271_s3 + $0x508] sm:$0xff] }
 0x568   :  { %7522 = vmatpush.bf16.msra.mxu0 %v13147_v43  ;;  %v6295_v60 = vld [vmem:[#allocation3 + $0xed] sm:$0xff]  ;;  %v6856_v43 = vld [vmem:[#allocation3 + $0xb7] sm:$0xff] }
 0x569   :  { %v5701_v54 = vld [vmem:[#allocation4 + $0xe8] sm:$0xf]  ;;  %6443 = vmatmul.bf16.gmra.mxu0 %v6311_v17  ;;  %7265 = vmatmul.bf16.gmra.mxu3 %v7157_v10  ;;  %v5130_v10 = vld [vmem:[#allocation4 + $0xd0] sm:$0xff] }
 0x56a   :  { %v5925_v25 = vadd.f32 %v5893_v15, %v5701_v54  ;;  %6712 = vmatmul.bf16.gmra.mxu1 %v6592_v20  ;;  %v5637_v15 = vadd.f32 %v16073_v29, %v5353_v28  ;;  %v6312_v54 = vpack.c.bf16 %v6295_v60, %v6294_v48 }
 0x56b   :  { %6996 = vmatmul.bf16.gmra.mxu2 %v6876_v7  ;;  %v16146_v7 = vld [vmem:[#allocation3 + $0x88] sm:$0xff] }
 0x56c   :  { %5955 = vst [vmem:[#allocation4 + $0xe8] sm:$0xf] %v5925_v25  ;;  %v6165_v19 = vpop.f32.mrf.mxu3  ;;  %v5921_v12 = vadd.f32 %v16075_v53, %v5637_v15  ;;  %v6572_v25 = vld [vmem:[#allocation3 + $0xb6] sm:$0xff] }
 0x56d   :  { %v16132_v52 = vadd.f32 %v6165_v19, %v16069_v44  ;;  %v7158_v19 = vpack.c.bf16 %v7135_v16, %v16146_v7  ;;  %v6593_v13 = vpack.c.bf16 %v6573_v62, %v6572_v25  ;;  %v6859_v25 = vld [vmem:[#allocation3 + $0xcf] sm:$0xff] }
 0x56e   :  { %v16134_v61 = vpop.f32.mrf.mxu2  ;;  %v6406_v38 = vpop.f32.mrf.mxu0 }
 0x56f   :  { %v16138_v33 = vadd.f32 %v6406_v38, %v15948_v27  ;;  %v16140_v45 = vpop.f32.mrf.mxu1  ;;  %v5354_v27 = vadd.f32 %v16030_v35, %v5130_v10  ;;  %v6877_v38 = vpack.c.bf16 %v6857_v31, %v6856_v43  ;;  %v5132_v43 = vld [vmem:[#allocation4 + $0xe0] sm:$0xff] }
 0x571   :  { %v5638_v28 = vadd.f32 %v16082_v23, %v5354_v27 }
 0x573   :  { %v5922_v35 = vadd.f32 %v16084_v2, %v5638_v28  ;;  %v6297_v2 = vld [vmem:[#allocation3 + $0xfd] sm:$0xff]  ;;  %v6574_v28 = vld [vmem:[#allocation3 + $0xc6] sm:$0xff] }
 0x574   :  { %v6167_v5 = vpop.f32.mrf.mxu3 }
 0x575   :  { %v6205_v44 = vadd.f32 %v6167_v5, %v5921_v12  ;;  %v5131_v5 = vld [vmem:[#allocation4 + $0xd8] sm:$0xff] }
 0x576   :  { %v16144_v17 = vpop.f32.mrf.mxu2  ;;  %v6409_v20 = vpop.f32.mrf.mxu0 }
 0x577   :  { %6235 = vst [vmem:[#allocation4 + $0xc8] sm:$0xff] %v6205_v44  ;;  %v16150_v29 = vadd.f32 %v6409_v20, %v15965_v50  ;;  %v16152_v53 = vpop.f32.mrf.mxu1  ;;  %v5355_v44 = vadd.f32 %v16038_v39, %v5131_v5  ;;  %v7137_v20 = vld [vmem:[#allocation3 + $0xa0] sm:$0xff] }
 0x579   :  { %6448 = vmatmul.bf16.gmra.mxu0 %v6312_v54  ;;  %7270 = vmatmul.bf16.gmra.mxu3 %v7158_v19  ;;  %v5639_v23 = vadd.f32 %v16094_v63, %v5355_v44  ;;  %v6575_v54 = vld [vmem:[#allocation3 + $0xce] sm:$0xff]  ;;  %v13146_v44 = vld [vmem:[%s17271_s3 + $0x500] sm:$0xff] }
 0x57a   :  { %6717 = vmatmul.bf16.gmra.mxu1 %v6593_v13  ;;  %v6296_v19 = vld [vmem:[#allocation3 + $0xf5] sm:$0xff]  ;;  %v6594_v5 = vpack.c.bf16 %v6575_v54, %v6574_v28  ;;  %7523 = vmatpush.bf16.msra.mxu0 %v13146_v44  ;;  %v6861_v28 = vld [vmem:[#allocation3 + $0xdf] sm:$0xff] }
 0x57b   :  { %7001 = vmatmul.bf16.gmra.mxu2 %v6877_v38  ;;  %v5923_v31 = vadd.f32 %v16096_v11, %v5639_v23  ;;  %v16169_v13 = vld [vmem:[#allocation3 + $0x98] sm:$0xff]  ;;  %v6313_v38 = vpack.c.bf16 %v6297_v2, %v6296_v19  ;;  %v7139_v19 = vld [vmem:[#allocation3 + $0xb0] sm:$0xff] }
 0x57c   :  { %v6170_v15 = vpop.f32.mrf.mxu3  ;;  %v13169_v54 = vld [vmem:[%s17271_s3 + $0x5b8] sm:$0xff] }
 0x57d   :  { %v6206_v50 = vadd.f32 %v6170_v15, %v5922_v35  ;;  %v6858_v35 = vld [vmem:[#allocation3 + $0xc7] sm:$0xff]  ;;  %v7159_v15 = vpack.c.bf16 %v7137_v20, %v16169_v13  ;;  %8084 = vmatpush.bf16.msra.mxu2 %v13169_v54 }
 0x57e   :  { %v16157_v12 = vpop.f32.mrf.mxu2  ;;  %v6411_v60 = vpop.f32.mrf.mxu0 }
 0x57f   :  { %6236 = vst [vmem:[#allocation4 + $0xd0] sm:$0xff] %v6206_v50  ;;  %v16161_v16 = vadd.f32 %v6411_v60, %v15983_v18  ;;  %v16163_v62 = vpop.f32.mrf.mxu1  ;;  %v5356_v18 = vadd.f32 %v16046_v32, %v5132_v43  ;;  %v6878_v60 = vpack.c.bf16 %v6859_v25, %v6858_v35  ;;  %v6240_v35 = vld [vmem:[#allocation4] sm:$0xff] }
 0x581   :  { %v5640_v32 = vadd.f32 %v16103_v51, %v5356_v18 }
 0x583   :  { %v5924_v23 = vadd.f32 %v16109_v26, %v5640_v32  ;;  %v5985_v26 = vld [vmem:[#allocation4 + $0xe8] sm:$0xf] }
 0x584   :  { %v6172_v10 = vpop.f32.mrf.mxu3 }
 0x585   :  { %v6207_v48 = vadd.f32 %v6172_v10, %v5923_v31 }
 0x586   :  { %v16167_v27 = vpop.f32.mrf.mxu2  ;;  %v6414_v39 = vpop.f32.mrf.mxu0 }
 0x587   :  { %6237 = vst [vmem:[#allocation4 + $0xd8] sm:$0xff] %v6207_v48  ;;  %v16173_v63 = vadd.f32 %v6414_v39, %v15997_v1  ;;  %v6683_v11 = vpop.f32.mrf.mxu1  ;;  %v13161_v1 = vld [vmem:[%s17271_s3 + $0x578] sm:$0xff]  ;;  %v6299_v39 = vld [vmem:[#allocation3 + $0x10d] sm:$0xf] }
 0x588   :  { %v6752_v50 = vadd.f32 %v6683_v11, %v16106_v47  ;;  %7800 = vmatpush.bf16.msra.mxu1 %v13161_v1  ;;  %v6576_v1 = vld [vmem:[#allocation3 + $0xd6] sm:$0xff] }
 0x589   :  { %6453 = vmatmul.bf16.gmra.mxu0 %v6313_v38  ;;  %7275 = vmatmul.bf16.gmra.mxu3 %v7159_v15  ;;  %v6577_v38 = vld [vmem:[#allocation3 + $0xde] sm:$0xff] }
 0x58a   :  { %6722 = vmatmul.bf16.gmra.mxu1 %v6594_v5  ;;  %v16196_v5 = vld [vmem:[#allocation3 + $0xa8] sm:$0xff] }
 0x58b   :  { %7006 = vmatmul.bf16.gmra.mxu2 %v6878_v60  ;;  %v6464_v60 = vadd.f32 %v16063_v8, %v6240_v35 }
 0x58c   :  { %v6175_v47 = vpop.f32.mrf.mxu3 }
 0x58d   :  { %v6208_v31 = vadd.f32 %v6175_v47, %v5924_v23  ;;  %v6860_v23 = vld [vmem:[#allocation3 + $0xd7] sm:$0xff]  ;;  %v7160_v47 = vpack.c.bf16 %v7139_v19, %v16196_v5  ;;  %v6748_v8 = vadd.f32 %v16125_v49, %v6464_v60 }
 0x58e   :  { %v6967_v10 = vpop.f32.mrf.mxu2  ;;  %v6416_v20 = vpop.f32.mrf.mxu0 }
 0x58f   :  { %v16185_v2 = vadd.f32 %v6967_v10, %v6752_v50  ;;  %6238 = vst [vmem:[#allocation4 + $0xe0] sm:$0xff] %v6208_v31  ;;  %v16188_v51 = vadd.f32 %v6416_v20, %v16006_v34  ;;  %v6685_v48 = vpop.f32.mrf.mxu1  ;;  %v6298_v50 = vld [vmem:[#allocation3 + $0x105] sm:$0xff]  ;;  %v6595_v10 = vpack.c.bf16 %v6577_v38, %v6576_v1  ;;  %v6879_v20 = vpack.c.bf16 %v6861_v28, %v6860_v23  ;;  %v13168_v38 = vld [vmem:[%s17271_s3 + $0x5b0] sm:$0xff] }
 0x590   :  { %v6753_v25 = vadd.f32 %v6685_v48, %v16115_v55  ;;  %v6314_v32 = vpack.c.bf16 %v6299_v39, %v6298_v50  ;;  %v13177_v48 = vld [vmem:[%s17271_s3 + $0x5f8] sm:$0xff]  ;;  %8085 = vmatpush.bf16.msra.mxu2 %v13168_v38  ;;  %v6242_v1 = vld [vmem:[#allocation4 + $0x10] sm:$0xff] }
 0x591   :  { %8368 = vmatpush.bf16.msrb.mxu3 %v13177_v48  ;;  %v6862_v48 = vld [vmem:[#allocation3 + $0xe7] sm:$0xff] }
 0x594   :  { %v6177_v43 = vpop.f32.mrf.mxu3 }
 0x595   :  { %v6209_v18 = vadd.f32 %v6177_v43, %v5985_v26  ;;  %v6241_v43 = vld [vmem:[#allocation4 + $0x8] sm:$0xff] }
 0x596   :  { %v6969_v11 = vpop.f32.mrf.mxu2  ;;  %v6419_v34 = vpop.f32.mrf.mxu0  ;;  %v6465_v19 = vadd.f32 %v16071_v36, %v6241_v43  ;;  %v13167_v36 = vld [vmem:[%s17271_s3 + $0x5a8] sm:$0xff] }
 0x597   :  { %v16194_v15 = vadd.f32 %v6969_v11, %v6753_v25  ;;  %6239 = vst [vmem:[#allocation4 + $0xe8] sm:$0xf] %v6209_v18  ;;  %v16200_v55 = vadd.f32 %v6419_v34, %v16015_v9  ;;  %v6688_v44 = vpop.f32.mrf.mxu1  ;;  %v7032_v9 = vadd.f32 %v16134_v61, %v6748_v8  ;;  %v13160_v61 = vld [vmem:[%s17271_s3 + $0x570] sm:$0xff]  ;;  %v7141_v34 = vld [vmem:[#allocation3 + $0xc0] sm:$0xff]  ;;  %8086 = vmatpush.bf16.msra.mxu2 %v13167_v36 }
 0x598   :  { %v6754_v31 = vadd.f32 %v6688_v44, %v16123_v30  ;;  %v6749_v28 = vadd.f32 %v16140_v45, %v6465_v19  ;;  %7801 = vmatpush.bf16.msra.mxu1 %v13160_v61  ;;  %v6579_v44 = vld [vmem:[#allocation3 + $0xee] sm:$0xff]  ;;  %v13157_v19 = vld [vmem:[%s17271_s3 + $0x558] sm:$0xff] }
 0x599   :  { %6458 = vmatmul.bf16.gmra.mxu0 %v6314_v32  ;;  %7280 = vmatmul.bf16.gmra.mxu3 %v7160_v47  ;;  %v6863_v32 = vld [vmem:[#allocation3 + $0xef] sm:$0xff]  ;;  %v16232_v47 = vld [vmem:[#allocation3 + $0xb8] sm:$0xff] }
 0x59a   :  { %6727 = vmatmul.bf16.gmra.mxu1 %v6595_v10  ;;  %v7161_v8 = vpack.c.bf16 %v7141_v34, %v16232_v47 }
 0x59b   :  { %7011 = vmatmul.bf16.gmra.mxu2 %v6879_v20  ;;  %v6578_v20 = vld [vmem:[#allocation3 + $0xe6] sm:$0xff] }
 0x59c   :  { %v7241_v54 = vpop.f32.mrf.mxu3 }
 0x59d   :  { %v7316_v26 = vadd.f32 %v7241_v54, %v7032_v9  ;;  %v6596_v54 = vpack.c.bf16 %v6579_v44, %v6578_v20 }
 0x59e   :  { %v6972_v25 = vpop.f32.mrf.mxu2  ;;  %v6421_v39 = vpop.f32.mrf.mxu0 }
 0x59f   :  { %v16209_v30 = vadd.f32 %v6972_v25, %v6754_v31  ;;  %7346 = vst [vmem:[#allocation4] sm:$0xff] %v7316_v26  ;;  %v16213_v18 = vadd.f32 %v6421_v39, %v16026_v40  ;;  %v6690_v49 = vpop.f32.mrf.mxu1  ;;  %v13159_v40 = vld [vmem:[%s17271_s3 + $0x568] sm:$0xff]  ;;  %v6466_v31 = vadd.f32 %v16080_v3, %v6242_v1  ;;  %v6880_v25 = vpack.c.bf16 %v6863_v32, %v6862_v48  ;;  %v13158_v26 = vld [vmem:[%s17271_s3 + $0x560] sm:$0xff] }
 0x5a0   :  { %v6755_v11 = vadd.f32 %v6690_v49, %v16138_v33  ;;  %v7033_v33 = vadd.f32 %v16144_v17, %v6749_v28  ;;  %7802 = vmatpush.bf16.msra.mxu1 %v13159_v40  ;;  %v13166_v3 = vld [vmem:[%s17271_s3 + $0x5a0] sm:$0xff]  ;;  %v13165_v49 = vld [vmem:[%s17271_s3 + $0x598] sm:$0xff] }
 0x5a1   :  { %v6750_v43 = vadd.f32 %v16152_v53, %v6466_v31  ;;  %8087 = vmatpush.bf16.msra.mxu2 %v13166_v3  ;;  %v6581_v1 = vld [vmem:[#allocation3 + $0xfe] sm:$0xff] }
 0x5a3   :  { %v7034_v39 = vadd.f32 %v16157_v12, %v6750_v43  ;;  %v17299_v43 = vld [vmem:[#allocation10_spill] sm:$0xff] }
 0x5a4   :  { %v7243_v35 = vpop.f32.mrf.mxu3  ;;  %7803 = vmatpush.bf16.msra.mxu1 %v13158_v26 }
 0x5a5   :  { %v7317_v60 = vadd.f32 %v7243_v35, %v7033_v33  ;;  %8088 = vmatpush.bf16.msra.mxu2 %v13165_v49  ;;  %v13156_v33 = vld [vmem:[%s17271_s3 + $0x550] sm:$0xff] }
 0x5a6   :  { %v6974_v50 = vpop.f32.mrf.mxu2  ;;  %v6424_v23 = vpop.f32.mrf.mxu0  ;;  %v13164_v35 = vld [vmem:[%s17271_s3 + $0x590] sm:$0xff] }
 0x5a7   :  { %v16230_v45 = vadd.f32 %v6974_v50, %v6755_v11  ;;  %7347 = vst [vmem:[#allocation4 + $0x8] sm:$0xff] %v7317_v60  ;;  %v16236_v10 = vadd.f32 %v6424_v23, %v16034_v59  ;;  %v6693_v17 = vpop.f32.mrf.mxu1  ;;  %v13185_v59 = vld [vmem:[%s17271_s3 + $0x638] sm:$0xff]  ;;  %v7143_v60 = vld [vmem:[#allocation3 + $0xd0] sm:$0xff] }
 0x5a8   :  { %v6756_v9 = vadd.f32 %v6693_v17, %v16150_v29  ;;  %v17298_v29 = vpack.c.bf16 %v14001_v46, %v13999_v42  ;;  %8652 = vmatpush.bf16.msrb.mxu0 %v13185_v59  ;;  %v6243_v42 = vld [vmem:[#allocation4 + $0x18] sm:$0xff]  ;;  %7804 = vmatpush.bf16.msra.mxu1 %v13157_v19  ;;  %v13176_v17 = vld [vmem:[%s17271_s3 + $0x5f0] sm:$0xff]  ;;  %v13154_v59 = vld [vmem:[%s17271_s3 + $0x540] sm:$0xff] }
 0x5a9   :  { %7285 = vmatmul.bf16.gmra.mxu3 %v7161_v8  ;;  %v6467_v12 = vadd.f32 %v16089_v6, %v6243_v42  ;;  %8089 = vmatpush.bf16.msra.mxu2 %v13164_v35  ;;  %v6865_v23 = vld [vmem:[#allocation3 + $0xff] sm:$0xff]  ;;  %v6580_v8 = vld [vmem:[#allocation3 + $0xf6] sm:$0xff]  ;;  %v6867_v35 = vld [vmem:[#allocation3 + $0x10f] sm:$0xf] }
 0x5aa   :  { %7524 = vmatmul.bf16.vlgmr.msra.gmra.mxu0 %v17298_v29  ;;  %6732 = vmatmul.bf16.gmra.mxu1 %v6596_v54  ;;  %v6597_v26 = vpack.c.bf16 %v6581_v1, %v6580_v8  ;;  %v17300_v29 = vld [vmem:[#allocation9_spill] sm:$0xff] }
 0x5ab   :  { %7016 = vmatmul.bf16.gmra.mxu2 %v6880_v25  ;;  %v6751_v34 = vadd.f32 %v16163_v62, %v6467_v12  ;;  %8369 = vmatpush.bf16.msrb.mxu3 %v13176_v17 }
 0x5ac   :  { %v7246_v53 = vpop.f32.mrf.mxu3  ;;  %7805 = vmatpush.bf16.msra.mxu1 %v13156_v33  ;;  %v6583_v33 = vld [vmem:[#allocation3 + $0x10e] sm:$0xf] }
 0x5ad   :  { %v7318_v61 = vadd.f32 %v7246_v53, %v7034_v39  ;;  %v7035_v6 = vadd.f32 %v16167_v27, %v6751_v34  ;;  %v16283_v27 = vld [vmem:[#allocation3 + $0xc8] sm:$0xff]  ;;  %v17301_v39 = vpack.c.bf16 %v17299_v43, %v17300_v29  ;;  %v7975_v29 = vld [vmem:[#allocation3 + $0x3a] sm:$0xff] }
 0x5ae   :  { %v6977_v11 = vpop.f32.mrf.mxu2  ;;  %v6426_v38 = vpop.f32.mrf.mxu0  ;;  %v7162_v54 = vpack.c.bf16 %v7143_v60, %v16283_v27  ;;  %v13341_v60 = vld [vmem:[#allocation3 + $0xe0] sm:$0xff] }
 0x5af   :  { %v16260_v46 = vadd.f32 %v6977_v11, %v6756_v9  ;;  %7348 = vst [vmem:[#allocation4 + $0x10] sm:$0xff] %v7318_v61  ;;  %v16264_v28 = vadd.f32 %v6426_v38, %v16042_v41  ;;  %v6695_v40 = vpop.f32.mrf.mxu1  ;;  %v13155_v41 = vld [vmem:[%s17271_s3 + $0x548] sm:$0xff]  ;;  %v6864_v9 = vld [vmem:[#allocation3 + $0xf7] sm:$0xff] }
 0x5b0   :  { %v6757_v36 = vadd.f32 %v6695_v40, %v16161_v16  ;;  %v13163_v16 = vld [vmem:[%s17271_s3 + $0x588] sm:$0xff]  ;;  %7806 = vmatpush.bf16.msra.mxu1 %v13155_v41  ;;  %v6881_v3 = vpack.c.bf16 %v6865_v23, %v6864_v9 }
 0x5b1   :  { %8090 = vmatpush.bf16.msra.mxu2 %v13163_v16  ;;  %v6582_v16 = vld [vmem:[#allocation3 + $0x106] sm:$0xff] }
 0x5b2   :  { %v17302_v23 = vld [vmem:[#allocation12_spill] sm:$0xff] }
 0x5b4   :  { %v7248_v50 = vpop.f32.mrf.mxu3  ;;  %7807 = vmatpush.bf16.msra.mxu1 %v13154_v59 }
 0x5b5   :  { %v7319_v32 = vadd.f32 %v7248_v50, %v7035_v6  ;;  %v16316_v6 = vld [vmem:[#allocation3 + $0xd8] sm:$0xff]  ;;  %v6866_v50 = vld [vmem:[#allocation3 + $0x107] sm:$0xff] }
 0x5b6   :  { %v6979_v44 = vpop.f32.mrf.mxu2  ;;  %v6429_v62 = vpop.f32.mrf.mxu0  ;;  %v6882_v1 = vpack.c.bf16 %v6867_v35, %v6866_v50 }
 0x5b7   :  { %v16281_v31 = vadd.f32 %v6979_v44, %v6757_v36  ;;  %7349 = vst [vmem:[#allocation4 + $0x18] sm:$0xff] %v7319_v32  ;;  %v16289_v20 = vadd.f32 %v6429_v62, %v16050_v37  ;;  %v6698_v48 = vpop.f32.mrf.mxu1  ;;  %v13162_v37 = vld [vmem:[%s17271_s3 + $0x580] sm:$0xff]  ;;  %v6598_v32 = vpack.c.bf16 %v6583_v33, %v6582_v16  ;;  %v7974_v33 = vld [vmem:[#allocation3 + $0x32] sm:$0xff] }
 0x5b8   :  { %v6758_v25 = vadd.f32 %v6698_v48, %v16173_v63  ;;  %8091 = vmatpush.bf16.msra.mxu2 %v13162_v37  ;;  %v17303_v62 = vld [vmem:[#allocation11_spill] sm:$0xff] }
 0x5b9   :  { %7290 = vmatmul.bf16.gmra.mxu3 %v7162_v54  ;;  %v17304_v17 = vpack.c.bf16 %v17302_v23, %v17303_v62 }
 0x5ba   :  { %7529 = vmatmul.bf16.gmra.mxu0 %v17301_v39  ;;  %6737 = vmatmul.bf16.gmra.mxu1 %v6597_v26 }
 0x5bb   :  { %7021 = vmatmul.bf16.gmra.mxu2 %v6881_v3  ;;  %v13175_v3 = vld [vmem:[%s17271_s3 + $0x5e8] sm:$0xff] }
 0x5bc   :  { %v7251_v63 = vpop.f32.mrf.mxu3  ;;  %8370 = vmatpush.bf16.msrb.mxu3 %v13175_v3  ;;  %v13344_v3 = vld [vmem:[#allocation3 + $0xf8] sm:$0xff] }
 0x5bd   :  { %v16303_v49 = vadd.f32 %v7251_v63, %v16185_v2 }
 0x5be   :  { %v6982_v19 = vpop.f32.mrf.mxu2  ;;  %v6431_v11 = vpop.f32.mrf.mxu0 }
 0x5bf   :  { %v16305_v53 = vadd.f32 %v6982_v19, %v6758_v25  ;;  %v16308_v61 = vadd.f32 %v6431_v11, %v16059_v24  ;;  %v6700_v42 = vpop.f32.mrf.mxu1  ;;  %v13184_v24 = vld [vmem:[%s17271_s3 + $0x630] sm:$0xff]  ;;  %v13342_v11 = vld [vmem:[#allocation3 + $0xe8] sm:$0xff] }
 0x5c0   :  { %v6759_v38 = vadd.f32 %v6700_v42, %v16188_v51  ;;  %8653 = vmatpush.bf16.msrb.mxu0 %v13184_v24  ;;  %v13343_v42 = vld [vmem:[#allocation3 + $0xf0] sm:$0xff]  ;;  %v13174_v24 = vld [vmem:[%s17271_s3 + $0x5e0] sm:$0xff] }
 0x5c1   :  { %8371 = vmatpush.bf16.msrb.mxu3 %v13174_v24 }
 0x5c4   :  { %v7253_v12 = vpop.f32.mrf.mxu3 }
 0x5c5   :  { %v16312_v36 = vadd.f32 %v7253_v12, %v16194_v15  ;;  %v7163_v15 = vpack.c.bf16 %v13341_v60, %v16316_v6 }
 0x5c6   :  { %v6984_v40 = vpop.f32.mrf.mxu2  ;;  %v6434_v2 = vpop.f32.mrf.mxu0 }
 0x5c7   :  { %v16314_v34 = vadd.f32 %v6984_v40, %v6759_v38  ;;  %v16322_v41 = vadd.f32 %v6434_v2, %v16067_v22  ;;  %v6703_v51 = vpop.f32.mrf.mxu1  ;;  %v7164_v38 = vpack.c.bf16 %v13343_v42, %v13342_v11  ;;  %v7690_v40 = vld [vmem:[#allocation3 + $0x31] sm:$0xff]  ;;  %v8004_v2 = vpack.c.bf16 %v7975_v29, %v7974_v33  ;;  %v7692_v29 = vld [vmem:[#allocation3 + $0x41] sm:$0xff] }
 0x5c8   :  { %v6760_v44 = vadd.f32 %v6703_v51, %v16200_v55  ;;  %v13170_v11 = vld [vmem:[%s17271_s3 + $0x5c0] sm:$0xff] }
 0x5c9   :  { %7295 = vmatmul.bf16.gmra.mxu3 %v7163_v15 }
 0x5ca   :  { %7534 = vmatmul.bf16.gmra.mxu0 %v17304_v17  ;;  %6742 = vmatmul.bf16.gmra.mxu1 %v6598_v32  ;;  %v13172_v32 = vld [vmem:[%s17271_s3 + $0x5d0] sm:$0xff] }
 0x5cb   :  { %7026 = vmatmul.bf16.gmra.mxu2 %v6882_v1  ;;  %v13183_v1 = vld [vmem:[%s17271_s3 + $0x628] sm:$0xff] }
 0x5cc   :  { %v7256_v22 = vpop.f32.mrf.mxu3  ;;  %8654 = vmatpush.bf16.msrb.mxu0 %v13183_v1  ;;  %v7977_v17 = vld [vmem:[#allocation3 + $0x4a] sm:$0xff] }
 0x5cd   :  { %v16330_v8 = vadd.f32 %v7256_v22, %v16209_v30  ;;  %v7691_v30 = vld [vmem:[#allocation3 + $0x39] sm:$0xff]  ;;  %v7694_v1 = vld [vmem:[#allocation3 + $0x51] sm:$0xff] }
 0x5ce   :  { %v6987_v48 = vpop.f32.mrf.mxu2  ;;  %v6436_v54 = vpop.f32.mrf.mxu0  ;;  %v7720_v35 = vpack.c.bf16 %v7691_v30, %v7690_v40 }
 0x5cf   :  { %v16332_v9 = vadd.f32 %v6987_v48, %v6760_v44  ;;  %v16335_v55 = vadd.f32 %v6436_v54, %v16078_v21  ;;  %v6705_v25 = vpop.f32.mrf.mxu1  ;;  %v7412_v21 = vld [vmem:[#allocation3 + $0x60] sm:$0xff]  ;;  %v7414_v54 = vld [vmem:[#allocation3 + $0x70] sm:$0xff] }
 0x5d0   :  { %v6761_v26 = vadd.f32 %v6705_v25, %v16213_v18  ;;  %v7439_v12 = vpack.c.bf16 %v16101_v0, %v7412_v21  ;;  %v7440_v30 = vpack.c.bf16 %v16120_v4, %v7414_v54 }
 0x5d4   :  { %v7258_v59 = vpop.f32.mrf.mxu3 }
 0x5d5   :  { %v16342_v43 = vadd.f32 %v7258_v59, %v16230_v45  ;;  %v13345_v59 = vld [vmem:[#allocation3 + $0x100] sm:$0xff] }
 0x5d6   :  { %v6989_v37 = vpop.f32.mrf.mxu2  ;;  %v6439_v63 = vpop.f32.mrf.mxu0 }
 0x5d7   :  { %v16344_v39 = vadd.f32 %v6989_v37, %v6761_v26  ;;  %v16347_v19 = vadd.f32 %v6439_v63, %v16087_v58  ;;  %v6708_v18 = vpop.f32.mrf.mxu1  ;;  %v13173_v58 = vld [vmem:[%s17271_s3 + $0x5d8] sm:$0xff]  ;;  %v7165_v37 = vpack.c.bf16 %v13345_v59, %v13344_v3  ;;  %v7976_v63 = vld [vmem:[#allocation3 + $0x42] sm:$0xff] }
 0x5d8   :  { %v6762_v45 = vadd.f32 %v6708_v18, %v16236_v10  ;;  %8372 = vmatpush.bf16.msrb.mxu3 %v13173_v58  ;;  %v8005_v18 = vpack.c.bf16 %v7977_v17, %v7976_v63  ;;  %v7695_v58 = vld [vmem:[#allocation3 + $0x59] sm:$0xff] }
 0x5d9   :  { %7300 = vmatmul.bf16.gmra.mxu3 %v7164_v38  ;;  %v8259_v59 = vld [vmem:[#allocation3 + $0x3b] sm:$0xff] }
 0x5da   :  { %7539 = vmatmul.bf16.gmra.mxu0 %v7439_v12  ;;  %7808 = vmatmul.bf16.vlgmr.msra.gmra.mxu1 %v7720_v35  ;;  %v7151_v35 = vld [vmem:[#allocation3 + $0x110] sm:$0xf] }
 0x5db   :  { %8092 = vmatmul.bf16.vlgmr.msra.gmra.mxu2 %v8004_v2 }
 0x5dc   :  { %v7261_v0 = vpop.f32.mrf.mxu3  ;;  %8373 = vmatpush.bf16.msrb.mxu3 %v13172_v32 }
 0x5dd   :  { %v16358_v16 = vadd.f32 %v7261_v0, %v16260_v46  ;;  %v13171_v46 = vld [vmem:[%s17271_s3 + $0x5c8] sm:$0xff]  ;;  %v7979_v0 = vld [vmem:[#allocation3 + $0x5a] sm:$0xff] }
 0x5de   :  { %v6992_v51 = vpop.f32.mrf.mxu2  ;;  %v6441_v50 = vpop.f32.mrf.mxu0 }
 0x5df   :  { %v16360_v10 = vadd.f32 %v6992_v51, %v6762_v45  ;;  %v16363_v60 = vadd.f32 %v6441_v50, %v16099_v14  ;;  %v6710_v15 = vpop.f32.mrf.mxu1  ;;  %v7416_v50 = vld [vmem:[#allocation3 + $0x80] sm:$0xff] }
 0x5e0   :  { %v6763_v44 = vadd.f32 %v6710_v15, %v16264_v28  ;;  %v7693_v28 = vld [vmem:[#allocation3 + $0x49] sm:$0xff]  ;;  %8374 = vmatpush.bf16.msrb.mxu3 %v13171_v46  ;;  %v7978_v46 = vld [vmem:[#allocation3 + $0x52] sm:$0xff] }
 0x5e1   :  { %v7721_v21 = vpack.c.bf16 %v7693_v28, %v7692_v29  ;;  %v7981_v29 = vld [vmem:[#allocation3 + $0x6a] sm:$0xff] }
 0x5e4   :  { %v7263_v14 = vpop.f32.mrf.mxu3  ;;  %8375 = vmatpush.bf16.msrb.mxu3 %v13170_v11 }
 0x5e5   :  { %v16376_v62 = vadd.f32 %v7263_v14, %v16281_v31 }
 0x5e6   :  { %v6994_v23 = vpop.f32.mrf.mxu2  ;;  %v6444_v48 = vpop.f32.mrf.mxu0 }
 0x5e7   :  { %v16378_v22 = vadd.f32 %v6994_v23, %v6763_v44  ;;  %v16381_v25 = vadd.f32 %v6444_v48, %v16112_v56  ;;  %v6713_v26 = vpop.f32.mrf.mxu1  ;;  %v13346_v44 = vld [vmem:[#allocation3 + $0x108] sm:$0xff]  ;;  %v8006_v23 = vpack.c.bf16 %v7979_v0, %v7978_v46 }
 0x5e8   :  { %v6764_v31 = vadd.f32 %v6713_v26, %v16289_v20  ;;  %v7166_v32 = vpack.c.bf16 %v7151_v35, %v13346_v44 }
 0x5e9   :  { %7305 = vmatmul.bf16.gmra.mxu3 %v7165_v37 }
 0x5ea   :  { %7544 = vmatmul.bf16.gmra.mxu0 %v7440_v30  ;;  %7813 = vmatmul.bf16.gmra.mxu1 %v7721_v21  ;;  %v7418_v21 = vld [vmem:[#allocation3 + $0x90] sm:$0xff] }
 0x5eb   :  { %8097 = vmatmul.bf16.gmra.mxu2 %v8005_v18  ;;  %v8258_v18 = vld [vmem:[#allocation3 + $0x33] sm:$0xff]  ;;  %v7442_v11 = vpack.c.bf16 %v16169_v13, %v7418_v21 }
 0x5ec   :  { %v7266_v56 = vpop.f32.mrf.mxu3 }
 0x5ed   :  { %v16389_v4 = vadd.f32 %v7266_v56, %v16305_v53  ;;  %v7696_v56 = vld [vmem:[#allocation3 + $0x61] sm:$0xff] }
 0x5ee   :  { %v6997_v42 = vpop.f32.mrf.mxu2  ;;  %v6446_v12 = vpop.f32.mrf.mxu0 }
 0x5ef   :  { %v16391_v38 = vadd.f32 %v6997_v42, %v6764_v31  ;;  %v16394_v20 = vadd.f32 %v6446_v12, %v16118_v57  ;;  %v6715_v40 = vpop.f32.mrf.mxu1  ;;  %v7980_v42 = vld [vmem:[#allocation3 + $0x62] sm:$0xff]  ;;  %v8288_v12 = vpack.c.bf16 %v8259_v59, %v8258_v18 }
 0x5f0   :  { %v6765_v33 = vadd.f32 %v6715_v40, %v16308_v61  ;;  %v7441_v61 = vpack.c.bf16 %v16146_v7, %v7416_v50 }
 0x5f4   :  { %v7268_v45 = vpop.f32.mrf.mxu3 }
 0x5f5   :  { %v16398_v24 = vadd.f32 %v7268_v45, %v16314_v34  ;;  %v7722_v34 = vpack.c.bf16 %v7695_v58, %v7694_v1  ;;  %v8007_v45 = vpack.c.bf16 %v7981_v29, %v7980_v42  ;;  %v7701_v42 = vld [vmem:[#allocation3 + $0x89] sm:$0xff] }
 0x5f6   :  { %v6999_v2 = vpop.f32.mrf.mxu2  ;;  %v6449_v53 = vpop.f32.mrf.mxu0 }
 0x5f7   :  { %v16400_v51 = vadd.f32 %v6999_v2, %v6765_v33  ;;  %v16403_v15 = vadd.f32 %v6449_v53, %v16132_v52  ;;  %v6718_v57 = vpop.f32.mrf.mxu1 }
 0x5f8   :  { %v6766_v14 = vadd.f32 %v6718_v57, %v16322_v41  ;;  %v13182_v41 = vld [vmem:[%s17271_s3 + $0x620] sm:$0xff] }
 0x5f9   :  { %7310 = vmatmul.bf16.gmra.mxu3 %v7166_v32  ;;  %8655 = vmatpush.bf16.msrb.mxu0 %v13182_v41  ;;  %v7699_v32 = vld [vmem:[#allocation3 + $0x79] sm:$0xff] }
 0x5fa   :  { %7549 = vmatmul.bf16.gmra.mxu0 %v7441_v61  ;;  %7818 = vmatmul.bf16.gmra.mxu1 %v7722_v34  ;;  %v7983_v61 = vld [vmem:[#allocation3 + $0x7a] sm:$0xff] }
 0x5fb   :  { %8102 = vmatmul.bf16.gmra.mxu2 %v8006_v23 }
 0x5fc   :  { %v7271_v28 = vpop.f32.mrf.mxu3 }
 0x5fd   :  { %v16408_v52 = vadd.f32 %v7271_v28, %v16332_v9  ;;  %v7697_v9 = vld [vmem:[#allocation3 + $0x69] sm:$0xff]  ;;  %v7698_v28 = vld [vmem:[#allocation3 + $0x71] sm:$0xff] }
 0x5fe   :  { %v7002_v17 = vpop.f32.mrf.mxu2  ;;  %v16412_v54 = vpop.f32.mrf.mxu0  ;;  %v7723_v33 = vpack.c.bf16 %v7697_v9, %v7696_v56  ;;  %v6269_v9 = vld [vmem:[#allocation4 + $0xe8] sm:$0xf] }
 0x5ff   :  { %v16410_v48 = vadd.f32 %v7002_v17, %v6766_v14  ;;  %v6720_v7 = vpop.f32.mrf.mxu1  ;;  %v8260_v14 = vld [vmem:[#allocation3 + $0x43] sm:$0xff]  ;;  %v7982_v17 = vld [vmem:[#allocation3 + $0x72] sm:$0xff] }
 0x600   :  { %v6767_v26 = vadd.f32 %v6720_v7, %v16335_v55  ;;  %v8008_v41 = vpack.c.bf16 %v7983_v61, %v7982_v17  ;;  %v6265_v61 = vld [vmem:[#allocation4 + $0xc8] sm:$0xff] }
 0x604   :  { %v7273_v3 = vpop.f32.mrf.mxu3 }
 0x605   :  { %v16419_v30 = vadd.f32 %v7273_v3, %v16344_v39 }
 0x606   :  { %v7004_v37 = vpop.f32.mrf.mxu2  ;;  %v16423_v31 = vpop.f32.mrf.mxu0 }
 0x607   :  { %v16421_v63 = vadd.f32 %v7004_v37, %v6767_v26  ;;  %v6723_v55 = vpop.f32.mrf.mxu1  ;;  %v7724_v26 = vpack.c.bf16 %v7699_v32, %v7698_v28 }
 0x608   :  { %v6768_v40 = vadd.f32 %v6723_v55, %v16347_v19  ;;  %v8261_v19 = vld [vmem:[#allocation3 + $0x4b] sm:$0xff] }
 0x609   :  { %8376 = vmatmul.bf16.vlgmr.msrb.gmra.mxu3 %v8288_v12  ;;  %v7985_v12 = vld [vmem:[#allocation3 + $0x8a] sm:$0xff] }
 0x60a   :  { %7554 = vmatmul.bf16.gmra.mxu0 %v7442_v11  ;;  %7823 = vmatmul.bf16.gmra.mxu1 %v7723_v33  ;;  %v8263_v11 = vld [vmem:[#allocation3 + $0x5b] sm:$0xff] }
 0x60b   :  { %8107 = vmatmul.bf16.gmra.mxu2 %v8007_v45  ;;  %v7422_v45 = vld [vmem:[#allocation3 + $0xb0] sm:$0xff] }
 0x60c   :  { %v7276_v39 = vpop.f32.mrf.mxu3 }
 0x60d   :  { %v16428_v2 = vadd.f32 %v7276_v39, %v16360_v10  ;;  %v7420_v10 = vld [vmem:[#allocation3 + $0xa0] sm:$0xff] }
 0x60e   :  { %v7007_v35 = vpop.f32.mrf.mxu2  ;;  %v16432_v0 = vpop.f32.mrf.mxu0  ;;  %v7443_v23 = vpack.c.bf16 %v16196_v5, %v7420_v10 }
 0x60f   :  { %v16430_v58 = vadd.f32 %v7007_v35, %v6768_v40  ;;  %v6725_v13 = vpop.f32.mrf.mxu1  ;;  %v7444_v35 = vpack.c.bf16 %v16232_v47, %v7422_v45 }
 0x610   :  { %v6769_v53 = vadd.f32 %v6725_v13, %v16363_v60  ;;  %v8289_v60 = vpack.c.bf16 %v8261_v19, %v8260_v14  ;;  %v7700_v13 = vld [vmem:[#allocation3 + $0x81] sm:$0xff] }
 0x614   :  { %v7278_v50 = vpop.f32.mrf.mxu3 }
 0x615   :  { %v16436_v44 = vadd.f32 %v7278_v50, %v16378_v22 }
 0x616   :  { %v7009_v57 = vpop.f32.mrf.mxu2  ;;  %v16440_v46 = vpop.f32.mrf.mxu0 }
 0x617   :  { %v16438_v1 = vadd.f32 %v7009_v57, %v6769_v53  ;;  %v6728_v34 = vpop.f32.mrf.mxu1  ;;  %v7984_v53 = vld [vmem:[#allocation3 + $0x82] sm:$0xff]  ;;  %v7725_v57 = vpack.c.bf16 %v7701_v42, %v7700_v13  ;;  %v13180_v13 = vld [vmem:[%s17271_s3 + $0x610] sm:$0xff] }
 0x618   :  { %v6770_v7 = vadd.f32 %v6728_v34, %v16381_v25  ;;  %v13181_v25 = vld [vmem:[%s17271_s3 + $0x618] sm:$0xff]  ;;  %v8009_v32 = vpack.c.bf16 %v7985_v12, %v7984_v53  ;;  %v6489_v34 = vadd.f32 %v16412_v54, %v6265_v61  ;;  %v7705_v61 = vld [vmem:[#allocation3 + $0xa9] sm:$0xff] }
 0x619   :  { %8381 = vmatmul.bf16.gmra.mxu3 %v8289_v60  ;;  %8656 = vmatpush.bf16.msrb.mxu0 %v13181_v25  ;;  %v8265_v60 = vld [vmem:[#allocation3 + $0x6b] sm:$0xff]  ;;  %v6267_v12 = vld [vmem:[#allocation4 + $0xd8] sm:$0xff] }
 0x61a   :  { %7559 = vmatmul.bf16.gmra.mxu0 %v7443_v23  ;;  %7828 = vmatmul.bf16.gmra.mxu1 %v7724_v26  ;;  %v7702_v25 = vld [vmem:[#allocation3 + $0x91] sm:$0xff] }
 0x61b   :  { %8112 = vmatmul.bf16.gmra.mxu2 %v8008_v41 }
 0x61c   :  { %v7281_v22 = vpop.f32.mrf.mxu3 }
 0x61d   :  { %v16445_v59 = vadd.f32 %v7281_v22, %v16391_v38  ;;  %v7703_v22 = vld [vmem:[#allocation3 + $0x99] sm:$0xff]  ;;  %8657 = vmatpush.bf16.msrb.mxu0 %v13180_v13 }
 0x61e   :  { %v7012_v3 = vpop.f32.mrf.mxu2  ;;  %v6461_v5 = vpop.f32.mrf.mxu0  ;;  %v7726_v42 = vpack.c.bf16 %v7703_v22, %v7702_v25  ;;  %v7704_v22 = vld [vmem:[#allocation3 + $0xa1] sm:$0xff] }
 0x61f   :  { %v16447_v37 = vadd.f32 %v7012_v3, %v6770_v7  ;;  %v6493_v29 = vadd.f32 %v6461_v5, %v6269_v9  ;;  %v6730_v21 = vpop.f32.mrf.mxu1  ;;  %v6266_v7 = vld [vmem:[#allocation4 + $0xd0] sm:$0xff]  ;;  %v7987_v3 = vld [vmem:[#allocation3 + $0x9a] sm:$0xff] }
 0x620   :  { %v6771_v18 = vadd.f32 %v6730_v21, %v16394_v20  ;;  %v8262_v20 = vld [vmem:[#allocation3 + $0x53] sm:$0xff]  ;;  %v7424_v5 = vld [vmem:[#allocation3 + $0xc0] sm:$0xff] }
 0x621   :  { %6523 = vst [vmem:[#allocation4 + $0xe8] sm:$0xf] %v6493_v29  ;;  %v8290_v50 = vpack.c.bf16 %v8263_v11, %v8262_v20  ;;  %v8264_v29 = vld [vmem:[#allocation3 + $0x63] sm:$0xff] }
 0x622   :  { %v8291_v11 = vpack.c.bf16 %v8265_v60, %v8264_v29 }
 0x624   :  { %v7283_v55 = vpop.f32.mrf.mxu3 }
 0x625   :  { %v16454_v38 = vadd.f32 %v7283_v55, %v16400_v51  ;;  %v7986_v55 = vld [vmem:[#allocation3 + $0x92] sm:$0xff] }
 0x626   :  { %v7014_v56 = vpop.f32.mrf.mxu2 }
 0x627   :  { %v16456_v40 = vadd.f32 %v7014_v56, %v6771_v18  ;;  %v16458_v33 = vpop.f32.mrf.mxu0  ;;  %v6733_v39 = vpop.f32.mrf.mxu1  ;;  %v7445_v18 = vpack.c.bf16 %v16283_v27, %v7424_v5  ;;  %v7727_v5 = vpack.c.bf16 %v7705_v61, %v7704_v22 }
 0x628   :  { %v6772_v19 = vadd.f32 %v6733_v39, %v16403_v15  ;;  %v6491_v39 = vadd.f32 %v16432_v0, %v6267_v12  ;;  %v7989_v0 = vld [vmem:[#allocation3 + $0xaa] sm:$0xff] }
 0x629   :  { %8386 = vmatmul.bf16.gmra.mxu3 %v8290_v50 }
 0x62a   :  { %7564 = vmatmul.bf16.gmra.mxu0 %v7444_v35  ;;  %7833 = vmatmul.bf16.gmra.mxu1 %v7725_v57  ;;  %v8267_v57 = vld [vmem:[#allocation3 + $0x7b] sm:$0xff] }
 0x62b   :  { %8117 = vmatmul.bf16.gmra.mxu2 %v8009_v32  ;;  %v6268_v32 = vld [vmem:[#allocation4 + $0xe0] sm:$0xff] }
 0x62c   :  { %v7286_v51 = vpop.f32.mrf.mxu3 }
 0x62d   :  { %v16463_v14 = vadd.f32 %v7286_v51, %v16410_v48  ;;  %v6490_v48 = vadd.f32 %v16423_v31, %v6266_v7 }
 0x62e   :  { %v7017_v10 = vpop.f32.mrf.mxu2 }
 0x62f   :  { %v16466_v47 = vadd.f32 %v7017_v10, %v6772_v19  ;;  %v16468_v23 = vpop.f32.mrf.mxu0  ;;  %v6735_v28 = vpop.f32.mrf.mxu1  ;;  %v6492_v10 = vadd.f32 %v16440_v46, %v6268_v32  ;;  %v7990_v32 = vld [vmem:[#allocation3 + $0xb2] sm:$0xff] }
 0x630   :  { %v6773_v15 = vadd.f32 %v6735_v28, %v6489_v34 }
 0x634   :  { %v7288_v17 = vpop.f32.mrf.mxu3 }
 0x635   :  { %v16471_v41 = vadd.f32 %v7288_v17, %v16421_v63  ;;  %v8010_v63 = vpack.c.bf16 %v7987_v3, %v7986_v55  ;;  %v8266_v17 = vld [vmem:[#allocation3 + $0x73] sm:$0xff]  ;;  %v7988_v3 = vld [vmem:[#allocation3 + $0xa2] sm:$0xff] }
 0x636   :  { %v7019_v26 = vpop.f32.mrf.mxu2  ;;  %v8011_v29 = vpack.c.bf16 %v7989_v0, %v7988_v3  ;;  %v6553_v55 = vld [vmem:[#allocation4 + $0xe8] sm:$0xf] }
 0x637   :  { %v16474_v9 = vadd.f32 %v7019_v26, %v6773_v15  ;;  %v16476_v54 = vpop.f32.mrf.mxu0  ;;  %v6738_v21 = vpop.f32.mrf.mxu1  ;;  %v7426_v15 = vld [vmem:[#allocation3 + $0xd0] sm:$0xff] }
 0x638   :  { %v6774_v56 = vadd.f32 %v6738_v21, %v6490_v48  ;;  %v7446_v26 = vpack.c.bf16 %v16316_v6, %v7426_v15  ;;  %v8292_v48 = vpack.c.bf16 %v8267_v57, %v8266_v17  ;;  %v7706_v57 = vld [vmem:[#allocation3 + $0xb1] sm:$0xff]  ;;  %v17305_v15 = vld [vmem:[#allocation14_spill] sm:$0xff] }
 0x639   :  { %8391 = vmatmul.bf16.gmra.mxu3 %v8291_v11 }
 0x63a   :  { %7569 = vmatmul.bf16.gmra.mxu0 %v7445_v18  ;;  %7838 = vmatmul.bf16.gmra.mxu1 %v7726_v42 }
 0x63b   :  { %8122 = vmatmul.bf16.gmra.mxu2 %v8010_v63  ;;  %v8269_v63 = vld [vmem:[#allocation3 + $0x8b] sm:$0xff] }
 0x63c   :  { %v7291_v31 = vpop.f32.mrf.mxu3 }
 0x63d   :  { %v16480_v20 = vadd.f32 %v7291_v31, %v16430_v58  ;;  %v7376_v31 = vld [vmem:[#allocation4] sm:$0xff] }
 0x63e   :  { %v7022_v45 = vpop.f32.mrf.mxu2  ;;  %v7600_v13 = vadd.f32 %v16458_v33, %v7376_v31 }
 0x63f   :  { %v16483_v35 = vadd.f32 %v7022_v45, %v6774_v56  ;;  %v16485_v27 = vpop.f32.mrf.mxu0  ;;  %v6740_v53 = vpop.f32.mrf.mxu1 }
 0x640   :  { %v6775_v50 = vadd.f32 %v6740_v53, %v6491_v39  ;;  %v7707_v39 = vld [vmem:[#allocation3 + $0xb9] sm:$0xff] }
 0x641   :  { %v7728_v0 = vpack.c.bf16 %v7707_v39, %v7706_v57  ;;  %v8270_v39 = vld [vmem:[#allocation3 + $0x93] sm:$0xff] }
 0x644   :  { %v7293_v19 = vpop.f32.mrf.mxu3 }
 0x645   :  { %v16491_v58 = vadd.f32 %v7293_v19, %v16438_v1 }
 0x646   :  { %v7024_v51 = vpop.f32.mrf.mxu2 }
 0x647   :  { %v16494_v34 = vadd.f32 %v7024_v51, %v6775_v50  ;;  %v7535_v28 = vpop.f32.mrf.mxu0  ;;  %v6743_v60 = vpop.f32.mrf.mxu1  ;;  %v8268_v50 = vld [vmem:[#allocation3 + $0x83] sm:$0xff] }
 0x648   :  { %v16497_v7 = vadd.f32 %v7535_v28, %v16303_v49  ;;  %v6776_v1 = vadd.f32 %v6743_v60, %v6492_v10  ;;  %v8293_v51 = vpack.c.bf16 %v8269_v63, %v8268_v50  ;;  %v7993_v63 = vld [vmem:[#allocation3 + $0xca] sm:$0xff] }
 0x649   :  { %8396 = vmatmul.bf16.gmra.mxu3 %v8292_v48 }
 0x64a   :  { %7574 = vmatmul.bf16.gmra.mxu0 %v7446_v26  ;;  %7843 = vmatmul.bf16.gmra.mxu1 %v7727_v5  ;;  %v7377_v26 = vld [vmem:[#allocation4 + $0x8] sm:$0xff] }
 0x64b   :  { %8127 = vmatmul.bf16.gmra.mxu2 %v8011_v29  ;;  %v7601_v48 = vadd.f32 %v16468_v23, %v7377_v26  ;;  %v8273_v26 = vld [vmem:[#allocation3 + $0xab] sm:$0xff] }
 0x64c   :  { %v7296_v46 = vpop.f32.mrf.mxu3 }
 0x64d   :  { %v16501_v18 = vadd.f32 %v7296_v46, %v16447_v37  ;;  %v7991_v37 = vld [vmem:[#allocation3 + $0xba] sm:$0xff] }
 0x64e   :  { %v7027_v21 = vpop.f32.mrf.mxu2  ;;  %v8012_v10 = vpack.c.bf16 %v7991_v37, %v7990_v32  ;;  %v17308_v32 = vld [vmem:[#allocation16_spill] sm:$0xff] }
 0x64f   :  { %v16503_v25 = vadd.f32 %v7027_v21, %v6776_v1  ;;  %v7537_v49 = vpop.f32.mrf.mxu0  ;;  %v6745_v6 = vpop.f32.mrf.mxu1 }
 0x650   :  { %v16506_v11 = vadd.f32 %v7537_v49, %v16312_v36  ;;  %v6777_v56 = vadd.f32 %v6745_v6, %v6553_v55  ;;  %v8271_v55 = vld [vmem:[#allocation3 + $0x9b] sm:$0xff]  ;;  %v7378_v6 = vld [vmem:[#allocation4 + $0x10] sm:$0xff] }
 0x651   :  { %v7602_v31 = vadd.f32 %v16476_v54, %v7378_v6  ;;  %v8294_v50 = vpack.c.bf16 %v8271_v55, %v8270_v39  ;;  %v7994_v6 = vld [vmem:[#allocation3 + $0xd2] sm:$0xff] }
 0x652   :  { %6807 = vst [vmem:[#allocation4 + $0xe8] sm:$0xf] %v6777_v56  ;;  %v17312_v39 = vld [vmem:[#allocation17_spill] sm:$0xff] }
 0x654   :  { %v7298_v42 = vpop.f32.mrf.mxu3 }
 0x655   :  { %v16509_v45 = vadd.f32 %v7298_v42, %v16456_v40  ;;  %v17306_v40 = vld [vmem:[#allocation13_spill] sm:$0xff] }
 0x656   :  { %v7029_v12 = vpop.f32.mrf.mxu2  ;;  %v17307_v17 = vpack.c.bf16 %v17305_v15, %v17306_v40 }
 0x657   :  { %v7540_v53 = vpop.f32.mrf.mxu0  ;;  %v7809_v36 = vpop.f32.mrf.mxu1 }
 0x658   :  { %v16513_v19 = vadd.f32 %v7540_v53, %v16330_v8  ;;  %v7884_v61 = vadd.f32 %v7809_v36, %v7600_v13  ;;  %v13179_v8 = vld [vmem:[%s17271_s3 + $0x608] sm:$0xff] }
 0x659   :  { %v6837_v28 = vld [vmem:[#allocation4 + $0xe8] sm:$0xf]  ;;  %8401 = vmatmul.bf16.gmra.mxu3 %v8293_v51  ;;  %8658 = vmatpush.bf16.msrb.mxu0 %v13179_v8 }
 0x65a   :  { %7579 = vmatmul.bf16.gmra.mxu0 %v17307_v17  ;;  %v7061_v60 = vadd.f32 %v7029_v12, %v6837_v28  ;;  %7848 = vmatmul.bf16.gmra.mxu1 %v7728_v0  ;;  %v7708_v13 = vld [vmem:[#allocation3 + $0xc1] sm:$0xff]  ;;  %v7379_v0 = vld [vmem:[#allocation4 + $0x18] sm:$0xff] }
 0x65b   :  { %8132 = vmatmul.bf16.gmra.mxu2 %v8012_v10  ;;  %v7992_v53 = vld [vmem:[#allocation3 + $0xc2] sm:$0xff]  ;;  %v7603_v28 = vadd.f32 %v16485_v27, %v7379_v0 }
 0x65c   :  { %7091 = vst [vmem:[#allocation4 + $0xe8] sm:$0xf] %v7061_v60  ;;  %v7301_v33 = vpop.f32.mrf.mxu3  ;;  %v17309_v51 = vld [vmem:[#allocation15_spill] sm:$0xff] }
 0x65d   :  { %v16522_v22 = vadd.f32 %v7301_v33, %v16466_v47  ;;  %v7709_v47 = vld [vmem:[#allocation3 + $0xc9] sm:$0xff] }
 0x65e   :  { %v8093_v3 = vpop.f32.mrf.mxu2  ;;  %v7729_v57 = vpack.c.bf16 %v7709_v47, %v7708_v13  ;;  %v8272_v27 = vld [vmem:[#allocation3 + $0xa3] sm:$0xff] }
 0x65f   :  { %v16525_v1 = vadd.f32 %v8093_v3, %v7884_v61  ;;  %v7542_v5 = vpop.f32.mrf.mxu0  ;;  %v7811_v46 = vpop.f32.mrf.mxu1  ;;  %v17310_v61 = vpack.c.bf16 %v17308_v32, %v17309_v51 }
 0x660   :  { %v16528_v29 = vadd.f32 %v7542_v5, %v16342_v43  ;;  %v7885_v21 = vadd.f32 %v7811_v46, %v7601_v48  ;;  %v7711_v5 = vld [vmem:[#allocation3 + $0xd9] sm:$0xff] }
 0x663   :  { %v7121_v32 = vld [vmem:[#allocation4 + $0xe8] sm:$0xf] }
 0x664   :  { %v7303_v49 = vpop.f32.mrf.mxu3 }
 0x665   :  { %v16531_v56 = vadd.f32 %v7303_v49, %v16474_v9  ;;  %v8013_v9 = vpack.c.bf16 %v7993_v63, %v7992_v53 }
 0x666   :  { %v8095_v42 = vpop.f32.mrf.mxu2 }
 0x667   :  { %v16534_v23 = vadd.f32 %v8095_v42, %v7885_v21  ;;  %v7545_v12 = vpop.f32.mrf.mxu0  ;;  %v7814_v37 = vpop.f32.mrf.mxu1  ;;  %v8295_v42 = vpack.c.bf16 %v8273_v26, %v8272_v27 }
 0x668   :  { %v16537_v43 = vadd.f32 %v7545_v12, %v16358_v16  ;;  %v7886_v36 = vadd.f32 %v7814_v37, %v7602_v31  ;;  %v17311_v12 = vld [vmem:[#allocation18_spill] sm:$0xff] }
 0x669   :  { %8406 = vmatmul.bf16.gmra.mxu3 %v8294_v50  ;;  %v17313_v37 = vpack.c.bf16 %v17311_v12, %v17312_v39  ;;  %v8543_v12 = vld [vmem:[#allocation3 + $0x3c] sm:$0xff] }
 0x66a   :  { %7584 = vmatmul.bf16.gmra.mxu0 %v17310_v61  ;;  %7853 = vmatmul.bf16.gmra.mxu1 %v7729_v57  ;;  %v7435_v61 = vld [vmem:[#allocation3 + $0x118] sm:$0xf] }
 0x66b   :  { %8137 = vmatmul.bf16.gmra.mxu2 %v8013_v9 }
 0x66c   :  { %v7306_v54 = vpop.f32.mrf.mxu3 }
 0x66d   :  { %v16543_v10 = vadd.f32 %v7306_v54, %v16483_v35  ;;  %v7995_v35 = vld [vmem:[#allocation3 + $0xda] sm:$0xff] }
 0x66e   :  { %v8098_v16 = vpop.f32.mrf.mxu2  ;;  %v8014_v31 = vpack.c.bf16 %v7995_v35, %v7994_v6  ;;  %v8275_v54 = vld [vmem:[#allocation3 + $0xbb] sm:$0xff] }
 0x66f   :  { %v16546_v15 = vadd.f32 %v8098_v16, %v7886_v36  ;;  %v7547_v40 = vpop.f32.mrf.mxu0  ;;  %v7816_v60 = vpop.f32.mrf.mxu1 }
 0x670   :  { %v16549_v17 = vadd.f32 %v7547_v40, %v16376_v62  ;;  %v7887_v8 = vadd.f32 %v7816_v60, %v7603_v28  ;;  %v7710_v62 = vld [vmem:[#allocation3 + $0xd1] sm:$0xff]  ;;  %v7713_v28 = vld [vmem:[#allocation3 + $0xe9] sm:$0xff] }
 0x671   :  { %v7730_v63 = vpack.c.bf16 %v7711_v5, %v7710_v62  ;;  %v7997_v40 = vld [vmem:[#allocation3 + $0xea] sm:$0xff]  ;;  %v7996_v5 = vld [vmem:[#allocation3 + $0xe2] sm:$0xff] }
 0x674   :  { %v7308_v33 = vpop.f32.mrf.mxu3 }
 0x675   :  { %v16552_v3 = vadd.f32 %v7308_v33, %v16494_v34  ;;  %v13178_v34 = vld [vmem:[%s17271_s3 + $0x600] sm:$0xff]  ;;  %v8274_v33 = vld [vmem:[#allocation3 + $0xb3] sm:$0xff] }
 0x676   :  { %v8100_v48 = vpop.f32.mrf.mxu2  ;;  %8659 = vmatpush.bf16.msrb.mxu0 %v13178_v34  ;;  %v8296_v35 = vpack.c.bf16 %v8275_v54, %v8274_v33  ;;  %v8277_v34 = vld [vmem:[#allocation3 + $0xcb] sm:$0xff] }
 0x677   :  { %v16554_v46 = vadd.f32 %v8100_v48, %v7887_v8  ;;  %v7550_v21 = vpop.f32.mrf.mxu0  ;;  %v7819_v55 = vpop.f32.mrf.mxu1  ;;  %v7434_v8 = vld [vmem:[#allocation3 + $0x110] sm:$0xff] }
 0x678   :  { %v16557_v49 = vadd.f32 %v7550_v21, %v16389_v4  ;;  %v7888_v47 = vadd.f32 %v7819_v55, %v16497_v7  ;;  %v7450_v48 = vpack.c.bf16 %v7435_v61, %v7434_v8  ;;  %v8015_v55 = vpack.c.bf16 %v7997_v40, %v7996_v5 }
 0x679   :  { %8411 = vmatmul.bf16.gmra.mxu3 %v8295_v42 }
 0x67a   :  { %7589 = vmatmul.bf16.gmra.mxu0 %v17313_v37  ;;  %7858 = vmatmul.bf16.gmra.mxu1 %v7730_v63 }
 0x67b   :  { %8142 = vmatmul.bf16.gmra.mxu2 %v8014_v31 }
 0x67c   :  { %v7311_v4 = vpop.f32.mrf.mxu3 }
 0x67d   :  { %v16567_v13 = vadd.f32 %v7311_v4, %v16503_v25  ;;  %v7715_v4 = vld [vmem:[#allocation3 + $0xf9] sm:$0xff] }
 0x67e   :  { %v8103_v53 = vpop.f32.mrf.mxu2 }
 0x67f   :  { %v16569_v7 = vadd.f32 %v8103_v53, %v7888_v47  ;;  %v7552_v50 = vpop.f32.mrf.mxu0  ;;  %v7821_v57 = vpop.f32.mrf.mxu1  ;;  %v7999_v53 = vld [vmem:[#allocation3 + $0xfa] sm:$0xff] }
 0x680   :  { %v16572_v36 = vadd.f32 %v7552_v50, %v16398_v24  ;;  %v7889_v9 = vadd.f32 %v7821_v57, %v16506_v11  ;;  %v7712_v11 = vld [vmem:[#allocation3 + $0xe1] sm:$0xff]  ;;  %v8542_v57 = vld [vmem:[#allocation3 + $0x34] sm:$0xff] }
 0x681   :  { %v7731_v27 = vpack.c.bf16 %v7713_v28, %v7712_v11  ;;  %v8276_v50 = vld [vmem:[#allocation3 + $0xc3] sm:$0xff]  ;;  %v8572_v54 = vpack.c.bf16 %v8543_v12, %v8542_v57  ;;  %v8545_v11 = vld [vmem:[#allocation3 + $0x4c] sm:$0xff] }
 0x682   :  { %v8297_v61 = vpack.c.bf16 %v8277_v34, %v8276_v50 }
 0x684   :  { %v7313_v51 = vpop.f32.mrf.mxu3 }
 0x685   :  { %v7345_v0 = vadd.f32 %v7313_v51, %v7121_v32  ;;  %v7714_v32 = vld [vmem:[#allocation3 + $0xf1] sm:$0xff] }
 0x686   :  { %v8105_v16 = vpop.f32.mrf.mxu2  ;;  %v7998_v51 = vld [vmem:[#allocation3 + $0xf2] sm:$0xff] }
 0x687   :  { %v16575_v25 = vadd.f32 %v8105_v16, %v7889_v9  ;;  %v7555_v60 = vpop.f32.mrf.mxu0  ;;  %7375 = vst [vmem:[#allocation4 + $0xe8] sm:$0xf] %v7345_v0  ;;  %v7824_v26 = vpop.f32.mrf.mxu1  ;;  %v7732_v16 = vpack.c.bf16 %v7715_v4, %v7714_v32  ;;  %v8016_v28 = vpack.c.bf16 %v7999_v53, %v7998_v51 }
 0x688   :  { %v16578_v24 = vadd.f32 %v7555_v60, %v16408_v52  ;;  %v7890_v21 = vadd.f32 %v7824_v26, %v16513_v19 }
 0x689   :  { %8416 = vmatmul.bf16.gmra.mxu3 %v8296_v35 }
 0x68a   :  { %7594 = vmatmul.bf16.gmra.mxu0 %v7450_v48  ;;  %7863 = vmatmul.bf16.gmra.mxu1 %v7731_v27  ;;  %v8279_v48 = vld [vmem:[#allocation3 + $0xdb] sm:$0xff]  ;;  %v8001_v27 = vld [vmem:[#allocation3 + $0x10a] sm:$0xff] }
 0x68b   :  { %8147 = vmatmul.bf16.gmra.mxu2 %v8015_v55  ;;  %v8278_v55 = vld [vmem:[#allocation3 + $0xd3] sm:$0xff] }
 0x68c   :  { %v8377_v62 = vpop.f32.mrf.mxu3  ;;  %v8298_v34 = vpack.c.bf16 %v8279_v48, %v8278_v55  ;;  %v8546_v48 = vld [vmem:[#allocation3 + $0x54] sm:$0xff] }
 0x68d   :  { %v16582_v42 = vadd.f32 %v8377_v62, %v16525_v1  ;;  %v8544_v62 = vld [vmem:[#allocation3 + $0x44] sm:$0xff] }
 0x68e   :  { %v8108_v6 = vpop.f32.mrf.mxu2  ;;  %v8573_v12 = vpack.c.bf16 %v8545_v11, %v8544_v62 }
 0x68f   :  { %v16584_v52 = vadd.f32 %v8108_v6, %v7890_v21  ;;  %v7557_v47 = vpop.f32.mrf.mxu0  ;;  %v16589_v31 = vpop.f32.mrf.mxu1  ;;  %v7717_v21 = vld [vmem:[#allocation3 + $0x109] sm:$0xff] }
 0x690   :  { %v16587_v63 = vadd.f32 %v7557_v47, %v16419_v30  ;;  %v7716_v47 = vld [vmem:[#allocation3 + $0x101] sm:$0xff] }
 0x691   :  { %v7733_v53 = vpack.c.bf16 %v7717_v21, %v7716_v47 }
 0x694   :  { %v8379_v19 = vpop.f32.mrf.mxu3 }
 0x695   :  { %v16594_v37 = vadd.f32 %v8379_v19, %v16534_v23  ;;  %v8000_v19 = vld [vmem:[#allocation3 + $0x102] sm:$0xff] }
 0x696   :  { %v16591_v39 = vpop.f32.mrf.mxu2 }
 0x697   :  { %v7560_v1 = vpop.f32.mrf.mxu0  ;;  %v7829_v30 = vpop.f32.mrf.mxu1 }
 0x698   :  { %v16597_v9 = vadd.f32 %v7560_v1, %v16428_v2  ;;  %v7892_v0 = vadd.f32 %v7829_v30, %v16537_v43  ;;  %v8017_v1 = vpack.c.bf16 %v8001_v27, %v8000_v19 }
 0x699   :  { %8421 = vmatmul.bf16.gmra.mxu3 %v8297_v61  ;;  %v7718_v61 = vld [vmem:[#allocation3 + $0x111] sm:$0xff] }
 0x69a   :  { %8660 = vmatmul.bf16.vlgmr.msrb.gmra.mxu0 %v8572_v54  ;;  %7868 = vmatmul.bf16.gmra.mxu1 %v7732_v16  ;;  %v8281_v54 = vld [vmem:[#allocation3 + $0xeb] sm:$0xff] }
 0x69b   :  { %8152 = vmatmul.bf16.gmra.mxu2 %v8016_v28 }
 0x69c   :  { %v8382_v23 = vpop.f32.mrf.mxu3 }
 0x69d   :  { %v16601_v60 = vadd.f32 %v8382_v23, %v16546_v15  ;;  %v7719_v23 = vld [vmem:[#allocation3 + $0x119] sm:$0xf] }
 0x69e   :  { %v8113_v40 = vpop.f32.mrf.mxu2  ;;  %v7734_v55 = vpack.c.bf16 %v7719_v23, %v7718_v61 }
 0x69f   :  { %v16603_v2 = vadd.f32 %v8113_v40, %v7892_v0  ;;  %v7562_v8 = vpop.f32.mrf.mxu0  ;;  %v16608_v26 = vpop.f32.mrf.mxu1  ;;  %v8547_v0 = vld [vmem:[#allocation3 + $0x5c] sm:$0xff] }
 0x6a0   :  { %v16606_v33 = vadd.f32 %v7562_v8, %v16436_v44  ;;  %v8003_v40 = vld [vmem:[#allocation3 + $0x11a] sm:$0xf]  ;;  %v8574_v27 = vpack.c.bf16 %v8547_v0, %v8546_v48 }
 0x6a4   :  { %v8384_v43 = vpop.f32.mrf.mxu3 }
 0x6a5   :  { %v16613_v35 = vadd.f32 %v8384_v43, %v16554_v46  ;;  %v8280_v43 = vld [vmem:[#allocation3 + $0xe3] sm:$0xff] }
 0x6a6   :  { %v16610_v5 = vpop.f32.mrf.mxu2  ;;  %v8299_v21 = vpack.c.bf16 %v8281_v54, %v8280_v43 }
 0x6a7   :  { %v7565_v15 = vpop.f32.mrf.mxu0  ;;  %v7834_v44 = vpop.f32.mrf.mxu1 }
 0x6a8   :  { %v16616_v6 = vadd.f32 %v7565_v15, %v16445_v59  ;;  %v7894_v4 = vadd.f32 %v7834_v44, %v16557_v49 }
 0x6a9   :  { %8426 = vmatmul.bf16.gmra.mxu3 %v8298_v34 }
 0x6aa   :  { %8665 = vmatmul.bf16.gmra.mxu0 %v8573_v12  ;;  %7873 = vmatmul.bf16.gmra.mxu1 %v7733_v53  ;;  %v8549_v53 = vld [vmem:[#allocation3 + $0x6c] sm:$0xff] }
 0x6ab   :  { %8157 = vmatmul.bf16.gmra.mxu2 %v8017_v1 }
 0x6ac   :  { %v8387_v46 = vpop.f32.mrf.mxu3 }
 0x6ad   :  { %v16620_v57 = vadd.f32 %v8387_v46, %v16569_v7  ;;  %v8002_v7 = vld [vmem:[#allocation3 + $0x112] sm:$0xff] }
 0x6ae   :  { %v8118_v50 = vpop.f32.mrf.mxu2  ;;  %v8018_v62 = vpack.c.bf16 %v8003_v40, %v8002_v7 }
 0x6af   :  { %v16622_v59 = vadd.f32 %v8118_v50, %v7894_v4  ;;  %v7567_v30 = vpop.f32.mrf.mxu0  ;;  %v16627_v51 = vpop.f32.mrf.mxu1  ;;  %v8283_v4 = vld [vmem:[#allocation3 + $0xfb] sm:$0xff]  ;;  %v8282_v50 = vld [vmem:[#allocation3 + $0xf3] sm:$0xff] }
 0x6b0   :  { %v16625_v32 = vadd.f32 %v7567_v30, %v16454_v38  ;;  %v8548_v30 = vld [vmem:[#allocation3 + $0x64] sm:$0xff]  ;;  %v8300_v61 = vpack.c.bf16 %v8283_v4, %v8282_v50 }
 0x6b1   :  { %v8575_v54 = vpack.c.bf16 %v8549_v53, %v8548_v30 }
 0x6b4   :  { %v8389_v49 = vpop.f32.mrf.mxu3 }
 0x6b5   :  { %v16632_v28 = vadd.f32 %v8389_v49, %v16575_v25 }
 0x6b6   :  { %v16629_v16 = vpop.f32.mrf.mxu2 }
 0x6b7   :  { %v7570_v8 = vpop.f32.mrf.mxu0  ;;  %v7839_v11 = vpop.f32.mrf.mxu1 }
 0x6b8   :  { %v16635_v38 = vadd.f32 %v7570_v8, %v16463_v14  ;;  %v7896_v15 = vadd.f32 %v7839_v11, %v16578_v24  ;;  %v8285_v11 = vld [vmem:[#allocation3 + $0x10b] sm:$0xff] }
 0x6b9   :  { %8431 = vmatmul.bf16.gmra.mxu3 %v8299_v21  ;;  %v8551_v21 = vld [vmem:[#allocation3 + $0x7c] sm:$0xff] }
 0x6ba   :  { %8670 = vmatmul.bf16.gmra.mxu0 %v8574_v27  ;;  %7878 = vmatmul.bf16.gmra.mxu1 %v7734_v55  ;;  %v8550_v55 = vld [vmem:[#allocation3 + $0x74] sm:$0xff] }
 0x6bb   :  { %8162 = vmatmul.bf16.gmra.mxu2 %v8018_v62 }
 0x6bc   :  { %v8392_v25 = vpop.f32.mrf.mxu3 }
 0x6bd   :  { %v16639_v47 = vadd.f32 %v8392_v25, %v16584_v52 }
 0x6be   :  { %v8123_v44 = vpop.f32.mrf.mxu2 }
 0x6bf   :  { %v16641_v19 = vadd.f32 %v8123_v44, %v7896_v15  ;;  %v7572_v14 = vpop.f32.mrf.mxu0  ;;  %v16646_v12 = vpop.f32.mrf.mxu1  ;;  %v8284_v15 = vld [vmem:[#allocation3 + $0x103] sm:$0xff]  ;;  %v8576_v44 = vpack.c.bf16 %v8551_v21, %v8550_v55 }
 0x6c0   :  { %v16644_v34 = vadd.f32 %v7572_v14, %v16471_v41  ;;  %v8301_v25 = vpack.c.bf16 %v8285_v11, %v8284_v15 }
 0x6c4   :  { %v16648_v24 = vpop.f32.mrf.mxu3 }
 0x6c6   :  { %v16650_v1 = vpop.f32.mrf.mxu2 }
 0x6c7   :  { %v7575_v46 = vpop.f32.mrf.mxu0  ;;  %v7844_v49 = vpop.f32.mrf.mxu1 }
 0x6c8   :  { %v16653_v52 = vadd.f32 %v7575_v46, %v16480_v20  ;;  %v7898_v41 = vadd.f32 %v7844_v49, %v16597_v9 }
 0x6c9   :  { %8436 = vmatmul.bf16.gmra.mxu3 %v8300_v61  ;;  %v8286_v61 = vld [vmem:[#allocation3 + $0x113] sm:$0xff] }
 0x6ca   :  { %8675 = vmatmul.bf16.gmra.mxu0 %v8575_v54  ;;  %v8287_v54 = vld [vmem:[#allocation3 + $0x11b] sm:$0xf] }
 0x6cb   :  { %v8302_v11 = vpack.c.bf16 %v8287_v54, %v8286_v61 }
 0x6cc   :  { %v8397_v0 = vpop.f32.mrf.mxu3 }
 0x6cd   :  { %v16657_v7 = vadd.f32 %v8397_v0, %v16603_v2 }
 0x6ce   :  { %v8128_v23 = vpop.f32.mrf.mxu2 }
 0x6cf   :  { %v16659_v40 = vadd.f32 %v8128_v23, %v7898_v41  ;;  %v7577_v8 = vpop.f32.mrf.mxu0  ;;  %v16664_v20 = vpop.f32.mrf.mxu1  ;;  %v8552_v23 = vld [vmem:[#allocation3 + $0x84] sm:$0xff] }
 0x6d0   :  { %v16662_v43 = vadd.f32 %v7577_v8, %v16491_v58 }
 0x6d4   :  { %v16666_v48 = vpop.f32.mrf.mxu3 }
 0x6d6   :  { %v16668_v9 = vpop.f32.mrf.mxu2 }
 0x6d7   :  { %v7580_v27 = vpop.f32.mrf.mxu0  ;;  %v7849_v62 = vpop.f32.mrf.mxu1 }
 0x6d8   :  { %v16671_v2 = vadd.f32 %v7580_v27, %v16501_v18  ;;  %v7900_v58 = vadd.f32 %v7849_v62, %v16616_v6  ;;  %v8553_v6 = vld [vmem:[#allocation3 + $0x8c] sm:$0xff]  ;;  %v13193_v27 = vld [vmem:[%s17273_s5 + $0x38] sm:$0xff] }
 0x6d9   :  { %8441 = vmatmul.bf16.gmra.mxu3 %v8301_v25  ;;  %v8577_v21 = vpack.c.bf16 %v8553_v6, %v8552_v23  ;;  %9124 = vmatpush.bf16.msrb.mxu1 %v13193_v27  ;;  %v8554_v6 = vld [vmem:[#allocation3 + $0x94] sm:$0xff] }
 0x6da   :  { %8680 = vmatmul.bf16.gmra.mxu0 %v8576_v44 }
 0x6dc   :  { %v8402_v14 = vpop.f32.mrf.mxu3 }
 0x6dd   :  { %v16675_v53 = vadd.f32 %v8402_v14, %v16622_v59  ;;  %v13201_v14 = vld [vmem:[%s17273_s5 + $0x78] sm:$0xff] }
 0x6de   :  { %v8133_v4 = vpop.f32.mrf.mxu2  ;;  %9210 = vmatpush.bf16.msrb.mxu2 %v13201_v14 }
 0x6df   :  { %v16677_v46 = vadd.f32 %v8133_v4, %v7900_v58  ;;  %v7582_v50 = vpop.f32.mrf.mxu0  ;;  %v16682_v18 = vpop.f32.mrf.mxu1  ;;  %v13209_v4 = vld [vmem:[%s17273_s5 + $0xb8] sm:$0xff] }
 0x6e0   :  { %v16680_v30 = vadd.f32 %v7582_v50, %v16509_v45  ;;  %9296 = vmatpush.bf16.msra.mxu3 %v13209_v4  ;;  %v8555_v50 = vld [vmem:[#allocation3 + $0x9c] sm:$0xff] }
 0x6e1   :  { %v8578_v23 = vpack.c.bf16 %v8555_v50, %v8554_v6  ;;  %v8556_v50 = vld [vmem:[#allocation3 + $0xa4] sm:$0xff] }
 0x6e4   :  { %v16684_v49 = vpop.f32.mrf.mxu3 }
 0x6e6   :  { %v16686_v41 = vpop.f32.mrf.mxu2 }
 0x6e7   :  { %v7585_v0 = vpop.f32.mrf.mxu0  ;;  %v7854_v8 = vpop.f32.mrf.mxu1 }
 0x6e8   :  { %v16689_v59 = vadd.f32 %v7585_v0, %v16522_v22  ;;  %v7902_v45 = vadd.f32 %v7854_v8, %v16635_v38 }
 0x6e9   :  { %8446 = vmatmul.bf16.gmra.mxu3 %v8302_v11 }
 0x6ea   :  { %8685 = vmatmul.bf16.gmra.mxu0 %v8577_v21 }
 0x6ec   :  { %v8407_v15 = vpop.f32.mrf.mxu3 }
 0x6ed   :  { %v16696_v62 = vadd.f32 %v8407_v15, %v16641_v19 }
 0x6ee   :  { %v8138_v55 = vpop.f32.mrf.mxu2 }
 0x6ef   :  { %v16698_v25 = vadd.f32 %v8138_v55, %v7902_v45  ;;  %v7587_v22 = vpop.f32.mrf.mxu0  ;;  %v7856_v58 = vpop.f32.mrf.mxu1 }
 0x6f0   :  { %v16701_v44 = vadd.f32 %v7587_v22, %v16531_v56  ;;  %v7903_v38 = vadd.f32 %v7856_v58, %v16644_v34 }
 0x6f4   :  { %v16710_v19 = vpop.f32.mrf.mxu3 }
 0x6f6   :  { %v8140_v61 = vpop.f32.mrf.mxu2 }
 0x6f7   :  { %v16712_v54 = vadd.f32 %v8140_v61, %v7903_v38  ;;  %v7590_v56 = vpop.f32.mrf.mxu0  ;;  %v7859_v0 = vpop.f32.mrf.mxu1  ;;  %v8557_v38 = vld [vmem:[#allocation3 + $0xac] sm:$0xff] }
 0x6f8   :  { %v16715_v34 = vadd.f32 %v7590_v56, %v16543_v10  ;;  %v7904_v8 = vadd.f32 %v7859_v0, %v16653_v52  ;;  %v8579_v56 = vpack.c.bf16 %v8557_v38, %v8556_v50  ;;  %v8559_v38 = vld [vmem:[#allocation3 + $0xbc] sm:$0xff] }
 0x6fa   :  { %8690 = vmatmul.bf16.gmra.mxu0 %v8578_v23 }
 0x6fc   :  { %v8412_v11 = vpop.f32.mrf.mxu3 }
 0x6fd   :  { %v16719_v45 = vadd.f32 %v8412_v11, %v16659_v40 }
 0x6fe   :  { %v8143_v21 = vpop.f32.mrf.mxu2 }
 0x6ff   :  { %v16721_v27 = vadd.f32 %v8143_v21, %v7904_v8  ;;  %v7592_v15 = vpop.f32.mrf.mxu0  ;;  %v7861_v22 = vpop.f32.mrf.mxu1  ;;  %v7405_v8 = vld [vmem:[#allocation4 + $0xe8] sm:$0xf] }
 0x700   :  { %v16724_v55 = vadd.f32 %v7592_v15, %v16552_v3  ;;  %v7905_v10 = vadd.f32 %v7861_v22, %v16662_v43 }
 0x704   :  { %v16727_v58 = vpop.f32.mrf.mxu3 }
 0x706   :  { %v8145_v14 = vpop.f32.mrf.mxu2 }
 0x707   :  { %v16729_v52 = vadd.f32 %v8145_v14, %v7905_v10  ;;  %v7595_v4 = vpop.f32.mrf.mxu0  ;;  %v7864_v61 = vpop.f32.mrf.mxu1 }
 0x708   :  { %v16732_v40 = vadd.f32 %v7595_v4, %v16567_v13  ;;  %v7906_v6 = vadd.f32 %v7864_v61, %v16671_v2  ;;  %v7901_v13 = vadd.f32 %v16682_v18, %v16625_v32  ;;  %v8558_v61 = vld [vmem:[#allocation3 + $0xb4] sm:$0xff] }
 0x709   :  { %v13192_v32 = vld [vmem:[%s17273_s5 + $0x30] sm:$0xff] }
 0x70a   :  { %8695 = vmatmul.bf16.gmra.mxu0 %v8579_v56  ;;  %v8185_v2 = vadd.f32 %v16686_v41, %v7901_v13  ;;  %9125 = vmatpush.bf16.msrb.mxu1 %v13192_v32  ;;  %v8561_v13 = vld [vmem:[#allocation3 + $0xcc] sm:$0xff] }
 0x70c   :  { %v8417_v3 = vpop.f32.mrf.mxu3 }
 0x70d   :  { %v16736_v43 = vadd.f32 %v8417_v3, %v16677_v46  ;;  %v8580_v3 = vpack.c.bf16 %v8559_v38, %v8558_v61 }
 0x70e   :  { %v8148_v0 = vpop.f32.mrf.mxu2 }
 0x70f   :  { %v16738_v23 = vadd.f32 %v8148_v0, %v7906_v6  ;;  %v7597_v11 = vpop.f32.mrf.mxu0  ;;  %v7866_v15 = vpop.f32.mrf.mxu1 }
 0x710   :  { %v7629_v21 = vadd.f32 %v7597_v11, %v7405_v8  ;;  %v7907_v22 = vadd.f32 %v7866_v15, %v16680_v30  ;;  %v13200_v15 = vld [vmem:[%s17273_s5 + $0x70] sm:$0xff] }
 0x711   :  { %9211 = vmatpush.bf16.msrb.mxu2 %v13200_v15 }
 0x712   :  { %7659 = vst [vmem:[#allocation4 + $0xe8] sm:$0xf] %v7629_v21 }
 0x714   :  { %v8419_v10 = vpop.f32.mrf.mxu3 }
 0x715   :  { %v16744_v4 = vadd.f32 %v8419_v10, %v8185_v2 }
 0x716   :  { %v8150_v14 = vpop.f32.mrf.mxu2 }
 0x717   :  { %v16746_v46 = vadd.f32 %v8150_v14, %v7907_v22  ;;  %v8661_v50 = vpop.f32.mrf.mxu0  ;;  %v7869_v56 = vpop.f32.mrf.mxu1  ;;  %v8560_v14 = vld [vmem:[#allocation3 + $0xc4] sm:$0xff] }
 0x718   :  { %v8736_v6 = vadd.f32 %v8661_v50, %v16582_v42  ;;  %v7908_v30 = vadd.f32 %v7869_v56, %v16689_v59  ;;  %v13208_v59 = vld [vmem:[%s17273_s5 + $0xb0] sm:$0xff]  ;;  %v8581_v56 = vpack.c.bf16 %v8561_v13, %v8560_v14 }
 0x719   :  { %9297 = vmatpush.bf16.msra.mxu3 %v13208_v59  ;;  %v8562_v14 = vld [vmem:[#allocation3 + $0xd4] sm:$0xff] }
 0x71a   :  { %8766 = vst [vmem:[#allocation4] sm:$0xff] %v8736_v6  ;;  %8700 = vmatmul.bf16.gmra.mxu0 %v8580_v3 }
 0x71c   :  { %v8422_v18 = vpop.f32.mrf.mxu3 }
 0x71d   :  { %v16754_v0 = vadd.f32 %v8422_v18, %v16698_v25 }
 0x71e   :  { %v8153_v41 = vpop.f32.mrf.mxu2 }
 0x71f   :  { %v16756_v8 = vadd.f32 %v8153_v41, %v7908_v30  ;;  %v8663_v11 = vpop.f32.mrf.mxu0  ;;  %v7871_v21 = vpop.f32.mrf.mxu1 }
 0x720   :  { %v8737_v42 = vadd.f32 %v8663_v11, %v16594_v37  ;;  %v7909_v22 = vadd.f32 %v7871_v21, %v16701_v44 }
 0x722   :  { %8767 = vst [vmem:[#allocation4 + $0x8] sm:$0xff] %v8737_v42 }
 0x724   :  { %v8424_v25 = vpop.f32.mrf.mxu3 }
 0x725   :  { %v16767_v10 = vadd.f32 %v8424_v25, %v16712_v54  ;;  %v8563_v25 = vld [vmem:[#allocation3 + $0xdc] sm:$0xff] }
 0x726   :  { %v8155_v2 = vpop.f32.mrf.mxu2 }
 0x727   :  { %v16769_v37 = vadd.f32 %v8155_v2, %v7909_v22  ;;  %v8666_v38 = vpop.f32.mrf.mxu0  ;;  %v7874_v50 = vpop.f32.mrf.mxu1 }
 0x728   :  { %v8738_v61 = vadd.f32 %v8666_v38, %v16601_v60  ;;  %v7910_v3 = vadd.f32 %v7874_v50, %v16715_v34 }
 0x729   :  { %v8824_v18 = vld [vmem:[#allocation4 + $0x1] sm:$0xff] }
 0x72a   :  { %8768 = vst [vmem:[#allocation4 + $0x10] sm:$0xff] %v8738_v61  ;;  %8705 = vmatmul.bf16.gmra.mxu0 %v8581_v56  ;;  %v8852_v15 = vmax.f32 %v8736_v6, %v8824_v18  ;;  %v8582_v61 = vpack.c.bf16 %v8563_v25, %v8562_v14  ;;  %v13191_v6 = vld [vmem:[%s17273_s5 + $0x28] sm:$0xff] }
 0x72b   :  { %v13199_v56 = vld [vmem:[%s17273_s5 + $0x68] sm:$0xff]  ;;  %9126 = vmatpush.bf16.msrb.mxu1 %v13191_v6 }
 0x72c   :  { %v8427_v44 = vpop.f32.mrf.mxu3  ;;  %9212 = vmatpush.bf16.msrb.mxu2 %v13199_v56  ;;  %v8564_v25 = vld [vmem:[#allocation3 + $0xe4] sm:$0xff] }
 0x72d   :  { %v16774_v30 = vadd.f32 %v8427_v44, %v16721_v27 }
 0x72e   :  { %v8158_v32 = vpop.f32.mrf.mxu2 }
 0x72f   :  { %v16776_v54 = vadd.f32 %v8158_v32, %v7910_v3  ;;  %v8668_v41 = vpop.f32.mrf.mxu0  ;;  %v16778_v11 = vpop.f32.mrf.mxu1 }
 0x730   :  { %v8739_v21 = vadd.f32 %v8668_v41, %v16613_v35 }
 0x731   :  { %v8880_v42 = vld [vmem:[#allocation4 + $0xc] sm:$0xff] }
 0x732   :  { %v8908_v60 = vld [vmem:[#allocation4 + $0xd] sm:$0xff]  ;;  %8769 = vst [vmem:[#allocation4 + $0x18] sm:$0xff] %v8739_v21 }
 0x733   :  { %v8936_v59 = vmax.f32 %v8880_v42, %v8908_v60  ;;  %v13207_v42 = vld [vmem:[%s17273_s5 + $0xa8] sm:$0xff] }
 0x734   :  { %v8429_v22 = vpop.f32.mrf.mxu3  ;;  %9298 = vmatpush.bf16.msra.mxu3 %v13207_v42 }
 0x735   :  { %v8964_v34 = vmax.f32 %v8852_v15, %v8936_v59  ;;  %v16784_v27 = vadd.f32 %v8429_v22, %v16729_v52  ;;  %v8565_v59 = vld [vmem:[#allocation3 + $0xec] sm:$0xff] }
 0x736   :  { %v16781_v2 = vpop.f32.mrf.mxu2 }
 0x737   :  { %v8992_v13 = vmax.f32 %v8964_v34, 0.0  ;;  %v8671_v38 = vpop.f32.mrf.mxu0  ;;  %v16786_v50 = vpop.f32.mrf.mxu1 }
 0x738   :  { %v8740_v35 = vadd.f32 %v8671_v38, %v16620_v57  ;;  %v7689_v57 = vld [vmem:[#allocation4 + $0xe8] sm:$0xf]  ;;  %v8583_v38 = vpack.c.bf16 %v8565_v59, %v8564_v25  ;;  %v13206_v25 = vld [vmem:[%s17273_s5 + $0xa0] sm:$0xff] }
 0x739   :  { %9020 = vst [vmem:[#allocation5] sm:$0xff] %v8992_v13  ;;  %9299 = vmatpush.bf16.msra.mxu3 %v13206_v25  ;;  %v13205_v25 = vld [vmem:[%s17273_s5 + $0x98] sm:$0xff] }
 0x73a   :  { %8770 = vst [vmem:[#allocation4 + $0x20] sm:$0xff] %v8740_v35  ;;  %8710 = vmatmul.bf16.gmra.mxu0 %v8582_v61  ;;  %v7891_v35 = vadd.f32 %v16589_v31, %v16528_v29  ;;  %v13190_v31 = vld [vmem:[%s17273_s5 + $0x20] sm:$0xff] }
 0x73b   :  { %9127 = vmatpush.bf16.msrb.mxu1 %v13190_v31  ;;  %v7895_v31 = vadd.f32 %v16627_v51, %v16572_v36  ;;  %v13189_v36 = vld [vmem:[%s17273_s5 + $0x18] sm:$0xff] }
 0x73c   :  { %v8432_v52 = vpop.f32.mrf.mxu3 }
 0x73d   :  { %v16796_v3 = vadd.f32 %v8432_v52, %v16738_v23  ;;  %9300 = vmatpush.bf16.msra.mxu3 %v13205_v25  ;;  %v13219_v25 = vld [vmem:[%s17273_s5 + $0x108] sm:$0xff] }
 0x73e   :  { %v16798_v32 = vpop.f32.mrf.mxu2 }
 0x73f   :  { %v8673_v44 = vpop.f32.mrf.mxu0  ;;  %v7881_v18 = vpop.f32.mrf.mxu1  ;;  %9128 = vmatpush.bf16.msrb.mxu1 %v13189_v36  ;;  %v13222_v36 = vld [vmem:[%s17273_s5 + $0x120] sm:$0xff] }
 0x740   :  { %v8741_v41 = vadd.f32 %v8673_v44, %v16632_v28  ;;  %v7913_v60 = vadd.f32 %v7881_v18, %v7689_v57 }
 0x741   :  { %v8827_v34 = vld [vmem:[#allocation4 + $0x19] sm:$0xff] }
 0x742   :  { %8771 = vst [vmem:[#allocation4 + $0x28] sm:$0xff] %v8741_v41  ;;  %v8855_v61 = vmax.f32 %v8739_v21, %v8827_v34 }
 0x743   :  { %7943 = vst [vmem:[#allocation4 + $0xe8] sm:$0xf] %v7913_v60 }
 0x744   :  { %v8434_v15 = vpop.f32.mrf.mxu3 }
 0x745   :  { %v16805_v23 = vadd.f32 %v8434_v15, %v16746_v46  ;;  %v8175_v46 = vadd.f32 %v16591_v39, %v7891_v35  ;;  %v8567_v39 = vld [vmem:[#allocation3 + $0xfc] sm:$0xff] }
 0x746   :  { %v8165_v52 = vpop.f32.mrf.mxu2 }
 0x747   :  { %v8676_v22 = vpop.f32.mrf.mxu0 }
 0x748   :  { %v8742_v13 = vadd.f32 %v8676_v22, %v16639_v47  ;;  %v8459_v47 = vadd.f32 %v16648_v24, %v8175_v46  ;;  %v8566_v24 = vld [vmem:[#allocation3 + $0xf4] sm:$0xff]  ;;  %v13198_v22 = vld [vmem:[%s17273_s5 + $0x60] sm:$0xff] }
 0x749   :  { %v8883_v28 = vld [vmem:[#allocation4 + $0x24] sm:$0xff]  ;;  %9213 = vmatpush.bf16.msrb.mxu2 %v13198_v22  ;;  %v13197_v22 = vld [vmem:[%s17273_s5 + $0x58] sm:$0xff] }
 0x74a   :  { %v8911_v14 = vld [vmem:[#allocation4 + $0x25] sm:$0xff]  ;;  %8772 = vst [vmem:[#allocation4 + $0x30] sm:$0xff] %v8742_v13  ;;  %8715 = vmatmul.bf16.gmra.mxu0 %v8583_v38  ;;  %v7893_v38 = vadd.f32 %v16608_v26, %v16549_v17  ;;  %v7911_v17 = vadd.f32 %v16778_v11, %v16724_v55  ;;  %v7912_v55 = vadd.f32 %v16786_v50, %v16732_v40  ;;  %v8570_v50 = vld [vmem:[#allocation3 + $0x114] sm:$0xff] }
 0x74b   :  { %v8939_v6 = vmax.f32 %v8883_v28, %v8911_v14  ;;  %v7973_v56 = vld [vmem:[#allocation4 + $0xe8] sm:$0xf]  ;;  %v8179_v11 = vadd.f32 %v16629_v16, %v7895_v31 }
 0x74c   :  { %v8197_v44 = vadd.f32 %v8165_v52, %v7973_v56  ;;  %v8437_v18 = vpop.f32.mrf.mxu3  ;;  %v8195_v46 = vadd.f32 %v16781_v2, %v7911_v17  ;;  %v8196_v2 = vadd.f32 %v16798_v32, %v7912_v55  ;;  %v13216_v55 = vld [vmem:[%s17273_s5 + $0xf0] sm:$0xff] }
 0x74d   :  { %v8967_v57 = vmax.f32 %v8855_v61, %v8939_v6  ;;  %v16813_v42 = vadd.f32 %v8437_v18, %v16756_v8  ;;  %v8584_v8 = vpack.c.bf16 %v8567_v39, %v8566_v24  ;;  %v8569_v18 = vld [vmem:[#allocation3 + $0x10c] sm:$0xff]  ;;  %v8571_v24 = vld [vmem:[#allocation3 + $0x11c] sm:$0xf]  ;;  %9214 = vmatpush.bf16.msrb.mxu2 %v13197_v22 }
 0x74e   :  { %8227 = vst [vmem:[#allocation4 + $0xe8] sm:$0xf] %v8197_v44  ;;  %v13211_v22 = vld [vmem:[%s17273_s5 + $0xc8] sm:$0xff] }
 0x74f   :  { %v8995_v41 = vmax.f32 %v8967_v57, 0.0  ;;  %v8678_v60 = vpop.f32.mrf.mxu0 }
 0x750   :  { %v8743_v29 = vadd.f32 %v8678_v60, %v8459_v47 }
 0x751   :  { %9023 = vst [vmem:[#allocation5 + $0x18] sm:$0xff] %v8995_v41  ;;  %v8568_v41 = vld [vmem:[#allocation3 + $0x104] sm:$0xff] }
 0x752   :  { %8773 = vst [vmem:[#allocation4 + $0x38] sm:$0xff] %v8743_v29  ;;  %v8585_v29 = vpack.c.bf16 %v8569_v18, %v8568_v41  ;;  %v13202_v41 = vld [vmem:[%s17273_s5 + $0x80] sm:$0xff] }
 0x754   :  { %v8439_v21 = vpop.f32.mrf.mxu3 }
 0x755   :  { %v16819_v15 = vadd.f32 %v8439_v21, %v16769_v37  ;;  %v8177_v37 = vadd.f32 %v16610_v5, %v7893_v38  ;;  %v8463_v21 = vadd.f32 %v16684_v49, %v8179_v11  ;;  %v8257_v51 = vld [vmem:[#allocation4 + $0xe8] sm:$0xf]  ;;  %v8586_v49 = vpack.c.bf16 %v8571_v24, %v8570_v50  ;;  %v13224_v11 = vld [vmem:[%s17273_s5 + $0x130] sm:$0xff]  ;;  %v13213_v50 = vld [vmem:[%s17273_s5 + $0xd8] sm:$0xff] }
 0x756   :  { %v13221_v24 = vld [vmem:[%s17273_s5 + $0x118] sm:$0xff] }
 0x757   :  { %v8681_v59 = vpop.f32.mrf.mxu0 }
 0x758   :  { %v8744_v34 = vadd.f32 %v8681_v59, %v16657_v7  ;;  %v8461_v7 = vadd.f32 %v16666_v48, %v8177_v37 }
 0x759   :  { %v8830_v35 = vld [vmem:[#allocation4 + $0x31] sm:$0xff] }
 0x75a   :  { %8774 = vst [vmem:[#allocation4 + $0x40] sm:$0xff] %v8744_v34  ;;  %8720 = vmatmul.bf16.gmra.mxu0 %v8584_v8  ;;  %v8858_v26 = vmax.f32 %v8742_v13, %v8830_v35 }
 0x75c   :  { %v8442_v28 = vpop.f32.mrf.mxu3 }
 0x75d   :  { %v16833_v14 = vadd.f32 %v8442_v28, %v16776_v54  ;;  %v7897_v28 = vadd.f32 %v16646_v12, %v16587_v63  ;;  %v7899_v63 = vadd.f32 %v16664_v20, %v16606_v33  ;;  %v13196_v33 = vld [vmem:[%s17273_s5 + $0x50] sm:$0xff] }
 0x75e   :  { %v13204_v20 = vld [vmem:[%s17273_s5 + $0x90] sm:$0xff]  ;;  %9215 = vmatpush.bf16.msrb.mxu2 %v13196_v33 }
 0x75f   :  { %v8683_v61 = vpop.f32.mrf.mxu0  ;;  %v8183_v12 = vadd.f32 %v16668_v9, %v7899_v63  ;;  %9301 = vmatpush.bf16.msra.mxu3 %v13204_v20  ;;  %v13187_v9 = vld [vmem:[%s17273_s5 + $0x8] sm:$0xff]  ;;  %v9138_v20 = vld [vmem:[#allocation5 + $0x2] sm:$0x1] }
 0x760   :  { %v8745_v6 = vadd.f32 %v8683_v61, %v8461_v7 }
 0x761   :  { %v8886_v56 = vld [vmem:[#allocation4 + $0x3c] sm:$0xff] }
 0x762   :  { %v8914_v52 = vld [vmem:[#allocation4 + $0x3d] sm:$0xff]  ;;  %8775 = vst [vmem:[#allocation4 + $0x48] sm:$0xff] %v8745_v6 }
 0x763   :  { %v8942_v44 = vmax.f32 %v8886_v56, %v8914_v52 }
 0x764   :  { %v8444_v57 = vpop.f32.mrf.mxu3 }
 0x765   :  { %v8970_v5 = vmax.f32 %v8858_v26, %v8942_v44  ;;  %v8479_v47 = vadd.f32 %v8444_v57, %v8195_v46 }
 0x767   :  { %v8998_v48 = vmax.f32 %v8970_v5, 0.0  ;;  %v8686_v54 = vpop.f32.mrf.mxu0  ;;  %8509 = vst [vmem:[#allocation4 + $0xd8] sm:$0xff] %v8479_v47  ;;  %v13186_v47 = vld [vmem:[%s17273_s5] sm:$0xff] }
 0x768   :  { %v8746_v60 = vadd.f32 %v8686_v54, %v16675_v53  ;;  %v13194_v54 = vld [vmem:[%s17273_s5 + $0x40] sm:$0xff] }
 0x769   :  { %9026 = vst [vmem:[#allocation5 + $0x30] sm:$0xff] %v8998_v48 }
 0x76a   :  { %8776 = vst [vmem:[#allocation4 + $0x50] sm:$0xff] %v8746_v60  ;;  %8725 = vmatmul.bf16.gmra.mxu0 %v8585_v29  ;;  %v13225_v60 = vld [vmem:[%s17273_s5 + $0x138] sm:$0xff] }
 0x76b   :  { %v13233_v29 = vld [vmem:[%s17273_s5 + $0x178] sm:$0xff] }
 0x76c   :  { %v8447_v13 = vpop.f32.mrf.mxu3 }
 0x76d   :  { %v8480_v39 = vadd.f32 %v8447_v13, %v8196_v2  ;;  %v13232_v2 = vld [vmem:[%s17273_s5 + $0x170] sm:$0xff] }
 0x76f   :  { %v8688_v59 = vpop.f32.mrf.mxu0  ;;  %8510 = vst [vmem:[#allocation4 + $0xe0] sm:$0xff] %v8480_v39  ;;  %v13223_v39 = vld [vmem:[%s17273_s5 + $0x128] sm:$0xff] }
 0x770   :  { %v8747_v53 = vadd.f32 %v8688_v59, %v8463_v21  ;;  %v13215_v21 = vld [vmem:[%s17273_s5 + $0xe8] sm:$0xff] }
 0x771   :  { %v8833_v34 = vld [vmem:[#allocation4 + $0x49] sm:$0xff] }
 0x772   :  { %8777 = vst [vmem:[#allocation4 + $0x58] sm:$0xff] %v8747_v53  ;;  %v8861_v7 = vmax.f32 %v8745_v6, %v8833_v34  ;;  %v8467_v6 = vadd.f32 %v16727_v58, %v8183_v12  ;;  %v13203_v58 = vld [vmem:[%s17273_s5 + $0x88] sm:$0xff]  ;;  %v13214_v53 = vld [vmem:[%s17273_s5 + $0xe0] sm:$0xff]  ;;  %v13212_v34 = vld [vmem:[%s17273_s5 + $0xd0] sm:$0xff] }
 0x773   :  { %9302 = vmatpush.bf16.msra.mxu3 %v13203_v58  ;;  %v13231_v59 = vld [vmem:[%s17273_s5 + $0x168] sm:$0xff]  ;;  %v9224_v58 = vld [vmem:[#allocation5 + $0x4] sm:$0x1] }
 0x774   :  { %v8449_v40 = vpop.f32.mrf.mxu3 }
 0x775   :  { %v8481_v16 = vadd.f32 %v8449_v40, %v8257_v51  ;;  %v13230_v51 = vld [vmem:[%s17273_s5 + $0x160] sm:$0xff] }
 0x777   :  { %v8691_v32 = vpop.f32.mrf.mxu0  ;;  %8511 = vst [vmem:[#allocation4 + $0xe8] sm:$0xf] %v8481_v16  ;;  %9303 = vmatpush.bf16.msra.mxu3 %v13202_v41  ;;  %v13229_v16 = vld [vmem:[%s17273_s5 + $0x158] sm:$0xff] }
 0x778   :  { %v8748_v8 = vadd.f32 %v8691_v32, %v16696_v62  ;;  %v8181_v62 = vadd.f32 %v16650_v1, %v7897_v28  ;;  %v13220_v32 = vld [vmem:[%s17273_s5 + $0x110] sm:$0xff]  ;;  %v13210_v28 = vld [vmem:[%s17273_s5 + $0xc0] sm:$0xff] }
 0x779   :  { %v8889_v38 = vld [vmem:[#allocation4 + $0x54] sm:$0xff] }
 0x77a   :  { %v8917_v37 = vld [vmem:[#allocation4 + $0x55] sm:$0xff]  ;;  %8778 = vst [vmem:[#allocation4 + $0x60] sm:$0xff] %v8748_v8  ;;  %8730 = vmatmul.bf16.gmra.mxu0 %v8586_v49  ;;  %v8465_v56 = vadd.f32 %v16710_v19, %v8181_v62 }
 0x77b   :  { %v8945_v35 = vmax.f32 %v8889_v38, %v8917_v37  ;;  %v13188_v19 = vld [vmem:[%s17273_s5 + $0x10] sm:$0xff]  ;;  %9554 = vmatpush.bf16.msrb.mxu3 %v13233_v29  ;;  %v13227_v38 = vld [vmem:[%s17273_s5 + $0x148] sm:$0xff] }
 0x77c   :  { %9129 = vmatpush.bf16.msrb.mxu1 %v13188_v19  ;;  %v13228_v8 = vld [vmem:[%s17273_s5 + $0x150] sm:$0xff] }
 0x77d   :  { %v8973_v61 = vmax.f32 %v8861_v7, %v8945_v35  ;;  %v13218_v7 = vld [vmem:[%s17273_s5 + $0x100] sm:$0xff]  ;;  %v9052_v19 = vld [vmem:[#allocation5] sm:$0x1] }
 0x77e   :  { %v13226_v35 = vld [vmem:[%s17273_s5 + $0x140] sm:$0xff] }
 0x77f   :  { %v9001_v52 = vmax.f32 %v8973_v61, 0.0  ;;  %v8693_v17 = vpop.f32.mrf.mxu0  ;;  %9555 = vmatpush.bf16.msrb.mxu3 %v13232_v2 }
 0x780   :  { %v8749_v26 = vadd.f32 %v8693_v17, %v8465_v56  ;;  %9130 = vmatpush.bf16.msrb.mxu1 %v13187_v9 }
 0x781   :  { %9029 = vst [vmem:[#allocation5 + $0x48] sm:$0xff] %v9001_v52 }
 0x782   :  { %8779 = vst [vmem:[#allocation4 + $0x68] sm:$0xff] %v8749_v26 }
 0x783   :  { %9556 = vmatpush.bf16.msrb.mxu3 %v13231_v59 }
 0x784   :  { %9131 = vmatpush.bf16.msrb.mxu1 %v13186_v47 }
 0x787   :  { %v8696_v44 = vpop.f32.mrf.mxu0  ;;  %9557 = vmatpush.bf16.msrb.mxu3 %v13230_v51 }
 0x788   :  { %v8750_v46 = vadd.f32 %v8696_v44, %v16719_v45  ;;  %v13195_v45 = vld [vmem:[%s17273_s5 + $0x48] sm:$0xff] }
 0x789   :  { %9216 = vmatpush.bf16.msrb.mxu2 %v13195_v45 }
 0x78a   :  { %8780 = vst [vmem:[#allocation4 + $0x70] sm:$0xff] %v8750_v46 }
 0x78b   :  { %9558 = vmatpush.bf16.msrb.mxu3 %v13229_v16 }
 0x78d   :  { %9217 = vmatpush.bf16.msrb.mxu2 %v13194_v54  ;;  %v13257_v54 = vld [vmem:[%s17273_s5 + $0x238] sm:$0xff] }
 0x78f   :  { %v8698_v1 = vpop.f32.mrf.mxu0  ;;  %9559 = vmatpush.bf16.msrb.mxu3 %v13228_v8 }
 0x790   :  { %v8751_v5 = vadd.f32 %v8698_v1, %v8467_v6 }
 0x791   :  { %9468 = vmatpush.bf16.msra.mxu2 %v13225_v60 }
 0x792   :  { %8781 = vst [vmem:[#allocation4 + $0x78] sm:$0xff] %v8751_v5 }
 0x793   :  { %9560 = vmatpush.bf16.msrb.mxu3 %v13227_v38  ;;  %v13253_v38 = vld [vmem:[%s17273_s5 + $0x218] sm:$0xff] }
 0x795   :  { %9469 = vmatpush.bf16.msra.mxu2 %v13224_v11 }
 0x797   :  { %v8701_v57 = vpop.f32.mrf.mxu0  ;;  %9561 = vmatpush.bf16.msrb.mxu3 %v13226_v35 }
 0x798   :  { %v8752_v18 = vadd.f32 %v8701_v57, %v16736_v43 }
 0x799   :  { %9470 = vmatpush.bf16.msra.mxu2 %v13223_v39 }
 0x79a   :  { %8782 = vst [vmem:[#allocation4 + $0x80] sm:$0xff] %v8752_v18 }
 0x79d   :  { %9471 = vmatpush.bf16.msra.mxu2 %v13222_v36 }
 0x79f   :  { %v8703_v43 = vpop.f32.mrf.mxu0 }
 0x7a0   :  { %v8753_v48 = vadd.f32 %v8703_v43, %v16744_v4  ;;  %v13217_v4 = vld [vmem:[%s17273_s5 + $0xf8] sm:$0xff] }
 0x7a1   :  { %9382 = vmatpush.bf16.msra.mxu1 %v13217_v4  ;;  %9472 = vmatpush.bf16.msra.mxu2 %v13221_v24  ;;  %v13240_v4 = vld [vmem:[%s17273_s5 + $0x1b0] sm:$0xff] }
 0x7a2   :  { %8783 = vst [vmem:[#allocation4 + $0x88] sm:$0xff] %v8753_v48  ;;  %v9310_v24 = vld [vmem:[#allocation5 + $0x6] sm:$0x1] }
 0x7a5   :  { %9383 = vmatpush.bf16.msra.mxu1 %v13216_v55  ;;  %9473 = vmatpush.bf16.msra.mxu2 %v13220_v32  ;;  %v13256_v55 = vld [vmem:[%s17273_s5 + $0x230] sm:$0xff] }
 0x7a7   :  { %v8706_v31 = vpop.f32.mrf.mxu0 }
 0x7a8   :  { %v8754_v13 = vadd.f32 %v8706_v31, %v16754_v0  ;;  %v13248_v31 = vld [vmem:[%s17273_s5 + $0x1f0] sm:$0xff] }
 0x7a9   :  { %9384 = vmatpush.bf16.msra.mxu1 %v13215_v21  ;;  %9474 = vmatpush.bf16.msra.mxu2 %v13219_v25  ;;  %v13245_v25 = vld [vmem:[%s17273_s5 + $0x1d8] sm:$0xff] }
 0x7aa   :  { %8784 = vst [vmem:[#allocation4 + $0x90] sm:$0xff] %v8754_v13 }
 0x7ad   :  { %9385 = vmatpush.bf16.msra.mxu1 %v13214_v53  ;;  %9475 = vmatpush.bf16.msra.mxu2 %v13218_v7  ;;  %v13247_v53 = vld [vmem:[%s17273_s5 + $0x1e8] sm:$0xff] }
 0x7af   :  { %v8708_v0 = vpop.f32.mrf.mxu0 }
 0x7b0   :  { %v8755_v40 = vadd.f32 %v8708_v0, %v16767_v10  ;;  %v13239_v0 = vld [vmem:[%s17273_s5 + $0x1a8] sm:$0xff] }
 0x7b1   :  { %9386 = vmatpush.bf16.msra.mxu1 %v13213_v50  ;;  %v13238_v50 = vld [vmem:[%s17273_s5 + $0x1a0] sm:$0xff] }
 0x7b2   :  { %8785 = vst [vmem:[#allocation4 + $0x98] sm:$0xff] %v8755_v40 }
 0x7b5   :  { %9387 = vmatpush.bf16.msra.mxu1 %v13212_v34  ;;  %v13254_v34 = vld [vmem:[%s17273_s5 + $0x220] sm:$0xff] }
 0x7b7   :  { %v8711_v10 = vpop.f32.mrf.mxu0 }
 0x7b8   :  { %v8756_v49 = vadd.f32 %v8711_v10, %v16774_v30  ;;  %v13246_v10 = vld [vmem:[%s17273_s5 + $0x1e0] sm:$0xff] }
 0x7b9   :  { %9388 = vmatpush.bf16.msra.mxu1 %v13211_v22  ;;  %v8842_v37 = vld [vmem:[#allocation4 + $0x91] sm:$0xff] }
 0x7ba   :  { %8786 = vst [vmem:[#allocation4 + $0xa0] sm:$0xff] %v8756_v49  ;;  %v8870_v52 = vmax.f32 %v8754_v13, %v8842_v37  ;;  %v13237_v49 = vld [vmem:[%s17273_s5 + $0x198] sm:$0xff]  ;;  %v13244_v37 = vld [vmem:[%s17273_s5 + $0x1d0] sm:$0xff] }
 0x7bd   :  { %9389 = vmatpush.bf16.msra.mxu1 %v13210_v28 }
 0x7bf   :  { %v8713_v30 = vpop.f32.mrf.mxu0 }
 0x7c0   :  { %v8757_v62 = vadd.f32 %v8713_v30, %v16784_v27  ;;  %v13252_v30 = vld [vmem:[%s17273_s5 + $0x210] sm:$0xff] }
 0x7c1   :  { %v8898_v61 = vld [vmem:[#allocation4 + $0x9c] sm:$0xff] }
 0x7c2   :  { %v8926_v56 = vld [vmem:[#allocation4 + $0x9d] sm:$0xff]  ;;  %8787 = vst [vmem:[#allocation4 + $0xa8] sm:$0xff] %v8757_v62 }
 0x7c3   :  { %v8954_v17 = vmax.f32 %v8898_v61, %v8926_v56  ;;  %v9396_v61 = vld [vmem:[#allocation5 + $0x18] sm:$0x1] }
 0x7c5   :  { %v8982_v26 = vmax.f32 %v8870_v52, %v8954_v17 }
 0x7c7   :  { %v9010_v44 = vmax.f32 %v8982_v26, 0.0  ;;  %v8716_v46 = vpop.f32.mrf.mxu0 }
 0x7c8   :  { %v8758_v63 = vadd.f32 %v8716_v46, %v16796_v3  ;;  %v13241_v3 = vld [vmem:[%s17273_s5 + $0x1b8] sm:$0xff]  ;;  %v13235_v46 = vld [vmem:[%s17273_s5 + $0x188] sm:$0xff] }
 0x7c9   :  { %9038 = vst [vmem:[#allocation5 + $0x90] sm:$0xff] %v9010_v44  ;;  %v9482_v44 = vld [vmem:[#allocation5 + $0x1a] sm:$0x1] }
 0x7ca   :  { %8788 = vst [vmem:[#allocation4 + $0xb0] sm:$0xff] %v8758_v63 }
 0x7cf   :  { %v8718_v12 = vpop.f32.mrf.mxu0 }
 0x7d0   :  { %v9053_v6 = vld [vmem:[#allocation5 + $0x90] sm:$0x1]  ;;  %v9139_v1 = vld [vmem:[#allocation5 + $0x92] sm:$0x1]  ;;  %v9225_v27 = vld [vmem:[#allocation5 + $0x94] sm:$0x1]  ;;  %v8759_v5 = vadd.f32 %v8718_v12, %v16805_v23 }
 0x7d1   :  { %v9055_v57 = vrot.slane %v9053_v6, 7  ;;  %v9141_v18 = vrot.slane %v9139_v1, 7  ;;  %v9227_v33 = vrot.slane %v9225_v27, 7  ;;  %v13249_v23 = vld [vmem:[%s17273_s5 + $0x1f8] sm:$0xff]  ;;  %v8845_v60 = vld [vmem:[#allocation4 + $0xa9] sm:$0xff] }
 0x7d2   :  { %8789 = vst [vmem:[#allocation4 + $0xb8] sm:$0xff] %v8759_v5  ;;  %v9311_v21 = vld [vmem:[#allocation5 + $0x96] sm:$0x1]  ;;  %v8873_v39 = vmax.f32 %v8757_v62, %v8845_v60  ;;  %v13251_v6 = vld [vmem:[%s17273_s5 + $0x208] sm:$0xff]  ;;  %v8539_v5 = vld [vmem:[#allocation4 + $0xd8] sm:$0xff] }
 0x7d3   :  { %v9058_v9 = vsel %vm9057_vm1, %v9052_v19, %v9055_v57  ;;  %v9143_v45 = vsel %vm9057_vm1, %v9138_v20, %v9141_v18  ;;  %v9229_v47 = vsel %vm9057_vm1, %v9224_v58, %v9227_v33  ;;  %v9313_v51 = vrot.slane %v9311_v21, 7  ;;  %v13234_v19 = vld [vmem:[%s17273_s5 + $0x180] sm:$0xff]  ;;  %v9568_v57 = vld [vmem:[#allocation5 + $0x1c] sm:$0x1]  ;;  %v13265_v58 = vld [vmem:[%s17273_s5 + $0x278] sm:$0xff] }
 0x7d4   :  { %v9059_v43 = vpack.c.bf16 %v9058_v9, %v9058_v9  ;;  %v9144_v48 = vpack.c.bf16 %v9143_v45, %v9143_v45  ;;  %v9230_v41 = vpack.c.bf16 %v9229_v47, %v9229_v47  ;;  %v13242_v20 = vld [vmem:[%s17273_s5 + $0x1c0] sm:$0xff] }
 0x7d5   :  { %v9315_v8 = vsel %vm9057_vm1, %v9310_v24, %v9313_v51  ;;  %v13250_v9 = vld [vmem:[%s17273_s5 + $0x200] sm:$0xff]  ;;  %v13279_v51 = vld [vmem:[%s17273_s5 + $0x2e8] sm:$0xff] }
 0x7d6   :  { %9132 = vmatmul.bf16.vlgmr.msrb.gmra.mxu1 %v9059_v43  ;;  %9218 = vmatmul.bf16.vlgmr.msrb.gmra.mxu2 %v9144_v48  ;;  %v9316_v22 = vpack.c.bf16 %v9315_v8, %v9315_v8  ;;  %v13281_v43 = vld [vmem:[%s17273_s5 + $0x2f8] sm:$0xff]  ;;  %v8540_v21 = vld [vmem:[#allocation4 + $0xe0] sm:$0xff] }
 0x7d7   :  { %9304 = vmatmul.bf16.vlgmr.msra.gmra.mxu3 %v9230_v41  ;;  %9640 = vmatpush.bf16.msrb.mxu1 %v13241_v3  ;;  %v8721_v29 = vpop.f32.mrf.mxu0  ;;  %v13273_v3 = vld [vmem:[%s17273_s5 + $0x2b8] sm:$0xff]  ;;  %v13270_v24 = vld [vmem:[%s17273_s5 + $0x2a0] sm:$0xff] }
 0x7d8   :  { %9726 = vmatpush.bf16.msrb.mxu2 %v13249_v23  ;;  %9812 = vmatpush.bf16.msra.mxu3 %v13257_v54  ;;  %v16994_v11 = vadd.f32 %v8721_v29, %v16813_v42  ;;  %v13255_v42 = vld [vmem:[%s17273_s5 + $0x228] sm:$0xff] }
 0x7d9   :  { %v8901_v2 = vld [vmem:[#allocation4 + $0xb4] sm:$0xff] }
 0x7da   :  { %v8929_v13 = vld [vmem:[#allocation4 + $0xb5] sm:$0xff]  ;;  %8790 = vst [vmem:[#allocation4 + $0xc0] sm:$0xff] %v16994_v11 }
 0x7db   :  { %v8957_v59 = vmax.f32 %v8901_v2, %v8929_v13  ;;  %9641 = vmatpush.bf16.msrb.mxu1 %v13240_v4 }
 0x7dc   :  { %9727 = vmatpush.bf16.msrb.mxu2 %v13248_v31  ;;  %9813 = vmatpush.bf16.msra.mxu3 %v13256_v55  ;;  %v13264_v31 = vld [vmem:[%s17273_s5 + $0x270] sm:$0xff] }
 0x7dd   :  { %v8985_v36 = vmax.f32 %v8873_v39, %v8957_v59  ;;  %v13272_v55 = vld [vmem:[%s17273_s5 + $0x2b0] sm:$0xff]  ;;  %v9654_v59 = vld [vmem:[#allocation5 + $0x1e] sm:$0x1] }
 0x7df   :  { %v9013_v40 = vmax.f32 %v8985_v36, 0.0  ;;  %9642 = vmatpush.bf16.msrb.mxu1 %v13239_v0  ;;  %v8723_v16 = vpop.f32.mrf.mxu0 }
 0x7e0   :  { %9728 = vmatpush.bf16.msrb.mxu2 %v13247_v53  ;;  %9814 = vmatpush.bf16.msra.mxu3 %v13255_v42  ;;  %v8761_v32 = vadd.f32 %v8723_v16, %v16819_v15  ;;  %v13236_v15 = vld [vmem:[%s17273_s5 + $0x190] sm:$0xff]  ;;  %v13263_v53 = vld [vmem:[%s17273_s5 + $0x268] sm:$0xff]  ;;  %v13278_v16 = vld [vmem:[%s17273_s5 + $0x2e0] sm:$0xff] }
 0x7e1   :  { %9041 = vst [vmem:[#allocation5 + $0xa8] sm:$0xff] %v9013_v40  ;;  %v13271_v42 = vld [vmem:[%s17273_s5 + $0x2a8] sm:$0xff] }
 0x7e2   :  { %8791 = vst [vmem:[#allocation4 + $0xc8] sm:$0xff] %v8761_v32 }
 0x7e3   :  { %9643 = vmatpush.bf16.msrb.mxu1 %v13238_v50  ;;  %v13262_v50 = vld [vmem:[%s17273_s5 + $0x260] sm:$0xff] }
 0x7e4   :  { %9729 = vmatpush.bf16.msrb.mxu2 %v13246_v10  ;;  %9815 = vmatpush.bf16.msra.mxu3 %v13254_v34  ;;  %v8541_v10 = vld [vmem:[#allocation4 + $0xe8] sm:$0xf] }
 0x7e6   :  { %9390 = vmatmul.bf16.vlgmr.msra.gmra.mxu1 %v9316_v22  ;;  %v13269_v22 = vld [vmem:[%s17273_s5 + $0x298] sm:$0xff] }
 0x7e7   :  { %9644 = vmatpush.bf16.msrb.mxu1 %v13237_v49  ;;  %v8726_v28 = vpop.f32.mrf.mxu0  ;;  %v13261_v49 = vld [vmem:[%s17273_s5 + $0x258] sm:$0xff] }
 0x7e8   :  { %9730 = vmatpush.bf16.msrb.mxu2 %v13245_v25  ;;  %9816 = vmatpush.bf16.msra.mxu3 %v13253_v38  ;;  %v9397_v7 = vld [vmem:[#allocation5 + $0xa8] sm:$0x1]  ;;  %v9483_v35 = vld [vmem:[#allocation5 + $0xaa] sm:$0x1]  ;;  %v8762_v62 = vadd.f32 %v8726_v28, %v16833_v14  ;;  %v9569_v17 = vld [vmem:[#allocation5 + $0xac] sm:$0x1] }
 0x7e9   :  { %v9399_v56 = vrot.slane %v9397_v7, 7  ;;  %v9485_v52 = vrot.slane %v9483_v35, 7  ;;  %v13243_v14 = vld [vmem:[%s17273_s5 + $0x1c8] sm:$0xff]  ;;  %v9571_v27 = vrot.slane %v9569_v17, 7  ;;  %v9655_v54 = vld [vmem:[#allocation5 + $0xae] sm:$0x1] }
 0x7ea   :  { %8792 = vst [vmem:[#allocation4 + $0xd0] sm:$0xff] %v8762_v62  ;;  %v8848_v18 = vld [vmem:[#allocation4 + $0xc1] sm:$0xff]  ;;  %v9657_v2 = vrot.slane %v9655_v54, 7  ;;  %v9740_v25 = vld [vmem:[#allocation5 + $0x30] sm:$0x1]  ;;  %v13260_v28 = vld [vmem:[%s17273_s5 + $0x250] sm:$0xff] }
 0x7eb   :  { %9645 = vmatpush.bf16.msrb.mxu1 %v13236_v15  ;;  %v9401_v26 = vsel %vm9057_vm1, %v9396_v61, %v9399_v56  ;;  %v9487_v12 = vsel %vm9057_vm1, %v9482_v44, %v9485_v52  ;;  %v9573_v48 = vsel %vm9057_vm1, %v9568_v57, %v9571_v27  ;;  %v8876_v41 = vmax.f32 %v16994_v11, %v8848_v18  ;;  %v13280_v11 = vld [vmem:[%s17273_s5 + $0x2f0] sm:$0xff]  ;;  %v13277_v15 = vld [vmem:[%s17273_s5 + $0x2d8] sm:$0xff]  ;;  %v13259_v17 = vld [vmem:[%s17273_s5 + $0x248] sm:$0xff] }
 0x7ec   :  { %9731 = vmatpush.bf16.msrb.mxu2 %v13244_v37  ;;  %9817 = vmatpush.bf16.msra.mxu3 %v13252_v30  ;;  %v9402_v63 = vpack.c.bf16 %v9401_v26, %v9401_v26  ;;  %v9488_v1 = vpack.c.bf16 %v9487_v12, %v9487_v12  ;;  %v9574_v60 = vpack.c.bf16 %v9573_v48, %v9573_v48  ;;  %v13268_v7 = vld [vmem:[%s17273_s5 + $0x290] sm:$0xff]  ;;  %v13267_v26 = vld [vmem:[%s17273_s5 + $0x288] sm:$0xff]  ;;  %v9826_v57 = vld [vmem:[#allocation5 + $0x32] sm:$0x1] }
 0x7ed   :  { %v9659_v36 = vsel %vm9057_vm1, %v9654_v59, %v9657_v2  ;;  %v13276_v35 = vld [vmem:[%s17273_s5 + $0x2d0] sm:$0xff]  ;;  %v13275_v44 = vld [vmem:[%s17273_s5 + $0x2c8] sm:$0xff]  ;;  %v13302_v59 = vld [vmem:[%s17273_s5 + $0x3a0] sm:$0xff] }
 0x7ee   :  { %9476 = vmatmul.bf16.vlgmr.msra.gmra.mxu2 %v9402_v63  ;;  %9562 = vmatmul.bf16.vlgmr.msrb.gmra.mxu3 %v9488_v1  ;;  %v9660_v40 = vpack.c.bf16 %v9659_v36, %v9659_v36  ;;  %v13287_v2 = vld [vmem:[%s17273_s5 + $0x328] sm:$0xff]  ;;  %v13284_v36 = vld [vmem:[%s17273_s5 + $0x310] sm:$0xff] }
 0x7ef   :  { %9646 = vmatpush.bf16.msrb.mxu1 %v13235_v46  ;;  %v8728_v33 = vpop.f32.mrf.mxu0 }
 0x7f0   :  { %9732 = vmatpush.bf16.msrb.mxu2 %v13243_v14  ;;  %9818 = vmatpush.bf16.msra.mxu3 %v13251_v6  ;;  %v8763_v45 = vadd.f32 %v8728_v33, %v8539_v5  ;;  %v13258_v5 = vld [vmem:[%s17273_s5 + $0x240] sm:$0xff] }
 0x7f1   :  { %v8904_v47 = vld [vmem:[#allocation4 + $0xcc] sm:$0xff]  ;;  %v13274_v33 = vld [vmem:[%s17273_s5 + $0x2c0] sm:$0xff] }
 0x7f2   :  { %v8932_v23 = vld [vmem:[#allocation4 + $0xcd] sm:$0xff]  ;;  %8793 = vst [vmem:[#allocation4 + $0xd8] sm:$0xff] %v8763_v45  ;;  %v13297_v45 = vld [vmem:[%s17273_s5 + $0x378] sm:$0xff] }
 0x7f3   :  { %v8960_v4 = vmax.f32 %v8904_v47, %v8932_v23  ;;  %9647 = vmatpush.bf16.msrb.mxu1 %v13234_v19  ;;  %v13266_v19 = vld [vmem:[%s17273_s5 + $0x280] sm:$0xff] }
 0x7f4   :  { %9733 = vmatpush.bf16.msrb.mxu2 %v13242_v20  ;;  %9819 = vmatpush.bf16.msra.mxu3 %v13250_v9  ;;  %v13289_v20 = vld [vmem:[%s17273_s5 + $0x338] sm:$0xff]  ;;  %v9912_v9 = vld [vmem:[#allocation5 + $0x34] sm:$0x1] }
 0x7f5   :  { %v8988_v29 = vmax.f32 %v8876_v41, %v8960_v4  ;;  %v13288_v41 = vld [vmem:[%s17273_s5 + $0x330] sm:$0xff]  ;;  %v9998_v4 = vld [vmem:[#allocation5 + $0x36] sm:$0x1] }
 0x7f6   :  { %9648 = vmatmul.bf16.vlgmr.msrb.gmra.mxu1 %v9574_v60  ;;  %v13296_v60 = vld [vmem:[%s17273_s5 + $0x370] sm:$0xff] }
 0x7f7   :  { %9898 = vmatpush.bf16.msra.mxu1 %v13265_v58  ;;  %v9016_v13 = vmax.f32 %v8988_v29, 0.0  ;;  %v8731_v39 = vpop.f32.mrf.mxu0  ;;  %v13305_v58 = vld [vmem:[%s17273_s5 + $0x3b8] sm:$0xff]  ;;  %v13304_v29 = vld [vmem:[%s17273_s5 + $0x3b0] sm:$0xff] }
 0x7f8   :  { %9984 = vmatpush.bf16.msra.mxu2 %v13273_v3  ;;  %10070 = vmatpush.bf16.msrb.mxu3 %v13281_v43  ;;  %v8764_v0 = vadd.f32 %v8731_v39, %v8540_v21  ;;  %v13286_v21 = vld [vmem:[%s17273_s5 + $0x320] sm:$0xff] }
 0x7f9   :  { %9044 = vst [vmem:[#allocation5 + $0xc0] sm:$0xff] %v9016_v13  ;;  %v8823_v62 = vld [vmem:[#allocation4 + $0xd8] sm:$0x7f]  ;;  %v13303_v13 = vld [vmem:[%s17273_s5 + $0x3a8] sm:$0xff]  ;;  %v13294_v39 = vld [vmem:[%s17273_s5 + $0x360] sm:$0xff] }
 0x7fa   :  { %8794 = vst [vmem:[#allocation4 + $0xe0] sm:$0xff] %v8764_v0  ;;  %v8851_v61 = vld [vmem:[#allocation4 + $0xd9] sm:$0x7f] }
 0x7fb   :  { %9899 = vmatpush.bf16.msra.mxu1 %v13264_v31  ;;  %v8879_v12 = vmax.f32 %v8823_v62, %v8851_v61  ;;  %v13285_v0 = vld [vmem:[%s17273_s5 + $0x318] sm:$0xff] }
 0x7fc   :  { %9985 = vmatpush.bf16.msra.mxu2 %v13272_v55  ;;  %10071 = vmatpush.bf16.msrb.mxu3 %v13280_v11  ;;  %v13295_v11 = vld [vmem:[%s17273_s5 + $0x368] sm:$0xff] }
 0x7fe   :  { %9734 = vmatmul.bf16.vlgmr.msrb.gmra.mxu2 %v9660_v40  ;;  %v13300_v40 = vld [vmem:[%s17273_s5 + $0x390] sm:$0xff] }
 0x7ff   :  { %9900 = vmatpush.bf16.msra.mxu1 %v13263_v53  ;;  %v8733_v34 = vpop.f32.mrf.mxu0  ;;  %v13293_v53 = vld [vmem:[%s17273_s5 + $0x358] sm:$0xff] }
 0x800   :  { %9986 = vmatpush.bf16.msra.mxu2 %v13271_v42  ;;  %10072 = vmatpush.bf16.msrb.mxu3 %v13279_v51  ;;  %v9741_v32 = vld [vmem:[#allocation5 + $0xc0] sm:$0x1]  ;;  %v8765_v8 = vadd.f32 %v8733_v34, %v8541_v10  ;;  %v9827_v56 = vld [vmem:[#allocation5 + $0xc2] sm:$0x1]  ;;  %v9913_v52 = vld [vmem:[#allocation5 + $0xc4] sm:$0x1] }
 0x801   :  { %v9743_v38 = vrot.slane %v9741_v32, 7  ;;  %v9829_v14 = vrot.slane %v9827_v56, 7  ;;  %v9915_v6 = vrot.slane %v9913_v52, 7  ;;  %v9999_v27 = vld [vmem:[#allocation5 + $0xc6] sm:$0x1]  ;;  %v13301_v42 = vld [vmem:[%s17273_s5 + $0x398] sm:$0xff] }
 0x802   :  { %8795 = vst [vmem:[#allocation4 + $0xe8] sm:$0xf] %v8765_v8  ;;  %v10001_v48 = vrot.slane %v9999_v27, 7  ;;  %v13292_v51 = vld [vmem:[%s17273_s5 + $0x350] sm:$0xff]  ;;  %v13291_v34 = vld [vmem:[%s17273_s5 + $0x348] sm:$0xff]  ;;  %v13306_v27 = vld [vmem:[%s17273_s5 + $0x3c0] sm:$0xff] }
 0x803   :  { %9901 = vmatpush.bf16.msra.mxu1 %v13262_v50  ;;  %v9745_v37 = vsel %vm9057_vm1, %v9740_v25, %v9743_v38  ;;  %v9831_v3 = vsel %vm9057_vm1, %v9826_v57, %v9829_v14  ;;  %v9917_v43 = vsel %vm9057_vm1, %v9912_v9, %v9915_v6  ;;  %v13299_v32 = vld [vmem:[%s17273_s5 + $0x388] sm:$0xff]  ;;  %v13282_v25 = vld [vmem:[%s17273_s5 + $0x300] sm:$0xff] }
 0x804   :  { %9987 = vmatpush.bf16.msra.mxu2 %v13270_v24  ;;  %10073 = vmatpush.bf16.msrb.mxu3 %v13278_v16  ;;  %v9746_v30 = vpack.c.bf16 %v9745_v37, %v9745_v37  ;;  %v9832_v23 = vpack.c.bf16 %v9831_v3, %v9831_v3  ;;  %v9918_v54 = vpack.c.bf16 %v9917_v43, %v9917_v43  ;;  %v13283_v24 = vld [vmem:[%s17273_s5 + $0x308] sm:$0xff]  ;;  %v13290_v38 = vld [vmem:[%s17273_s5 + $0x340] sm:$0xff]  ;;  %v10084_v37 = vld [vmem:[#allocation5 + $0x48] sm:$0x1] }
 0x805   :  { %v10003_v31 = vsel %vm9057_vm1, %v9998_v4, %v10001_v48  ;;  %v13307_v6 = vld [vmem:[%s17273_s5 + $0x3c8] sm:$0xff] }
 0x806   :  { %9820 = vmatmul.bf16.vlgmr.msra.gmra.mxu3 %v9746_v30  ;;  %v10004_v55 = vpack.c.bf16 %v10003_v31, %v10003_v31  ;;  %v13313_v30 = vld [vmem:[%s17273_s5 + $0x3f8] sm:$0xff] }
 0x807   :  { %9902 = vmatpush.bf16.msra.mxu1 %v13261_v49 }
 0x808   :  { %9988 = vmatpush.bf16.msra.mxu2 %v13269_v22  ;;  %10074 = vmatpush.bf16.msrb.mxu3 %v13277_v15  ;;  %v13298_v15 = vld [vmem:[%s17273_s5 + $0x380] sm:$0xff] }
 0x809   :  { %v8907_v46 = vld [vmem:[#allocation4 + $0xe4] sm:$0x7f] }
 0x80a   :  { %v8935_v63 = vld [vmem:[#allocation4 + $0xe5] sm:$0x7f] }
 0x80b   :  { %9903 = vmatpush.bf16.msra.mxu1 %v13260_v28  ;;  %v8963_v1 = vmax.f32 %v8907_v46, %v8935_v63  ;;  %v13310_v46 = vld [vmem:[%s17273_s5 + $0x3e0] sm:$0xff]  ;;  %v13309_v63 = vld [vmem:[%s17273_s5 + $0x3d8] sm:$0xff] }
 0x80c   :  { %9989 = vmatpush.bf16.msra.mxu2 %v13268_v7  ;;  %10075 = vmatpush.bf16.msrb.mxu3 %v13276_v35  ;;  %v10170_v7 = vld [vmem:[#allocation5 + $0x4a] sm:$0x1]  ;;  %v10256_v35 = vld [vmem:[#allocation5 + $0x4c] sm:$0x1] }
 0x80d   :  { %v8991_v18 = vmax.f32 %v8879_v12, %v8963_v1  ;;  %v13308_v12 = vld [vmem:[%s17273_s5 + $0x3d0] sm:$0xff] }
 0x80f   :  { %9904 = vmatpush.bf16.msra.mxu1 %v13259_v17  ;;  %v9019_v47 = vmax.f32 %v8991_v18, 0.0 }
 0x810   :  { %9990 = vmatpush.bf16.msra.mxu2 %v13267_v26  ;;  %10076 = vmatpush.bf16.msrb.mxu3 %v13275_v44  ;;  %v13312_v26 = vld [vmem:[%s17273_s5 + $0x3f0] sm:$0xff]  ;;  %v13311_v44 = vld [vmem:[%s17273_s5 + $0x3e8] sm:$0xff] }
 0x811   :  { %9047 = vst [vmem:[#allocation5 + $0xd8] sm:$0x7f] %v9019_v47 }
 0x813   :  { %9905 = vmatpush.bf16.msra.mxu1 %v13258_v5  ;;  %v10342_v5 = vld [vmem:[#allocation5 + $0x4e] sm:$0x1] }
 0x814   :  { %9991 = vmatpush.bf16.msra.mxu2 %v13266_v19  ;;  %10077 = vmatpush.bf16.msrb.mxu3 %v13274_v33  ;;  %v13327_v33 = vld [vmem:[%s17274_s6] ss:$0 sm:$0xff] }
 0x816   :  { %9906 = vmatmul.bf16.vlgmr.msra.gmra.mxu1 %v9832_v23 }
 0x817   :  { %10156 = vmatpush.bf16.msrb.mxu1 %v13289_v20  ;;  %9992 = vmatmul.bf16.vlgmr.msra.gmra.mxu2 %v9918_v54 }
 0x818   :  { %10242 = vmatpush.bf16.msrb.mxu2 %v13297_v45  ;;  %10328 = vmatpush.bf16.msra.mxu3 %v13305_v58  ;;  %v10085_v50 = vld [vmem:[#allocation5 + $0xd8] sm:$0x1]  ;;  %v10171_v16 = vld [vmem:[#allocation5 + $0xda] sm:$0x1]  ;;  %v10257_v10 = vld [vmem:[#allocation5 + $0xdc] sm:$0x1] }
 0x819   :  { %10078 = vmatmul.bf16.vlgmr.msrb.gmra.mxu3 %v10004_v55  ;;  %v10087_v8 = vrot.slane %v10085_v50, 7  ;;  %v10173_v49 = vrot.slane %v10171_v16, 7  ;;  %v10259_v22 = vrot.slane %v10257_v10, 7  ;;  %v10343_v14 = vld [vmem:[#allocation5 + $0xde] sm:$0x1]  ;;  %v13318_v10 = vld [vmem:[%s17275_s7 + $0x20] sm:$0xff] }
 0x81a   :  { %v10345_v1 = vrot.slane %v10343_v14, 7 }
 0x81b   :  { %10157 = vmatpush.bf16.msrb.mxu1 %v13288_v41  ;;  %v10089_v28 = vsel %vm9057_vm1, %v10084_v37, %v10087_v8  ;;  %v10175_v62 = vsel %vm9057_vm1, %v10170_v7, %v10173_v49  ;;  %v10261_v61 = vsel %vm9057_vm1, %v10256_v35, %v10259_v22  ;;  %v13316_v49 = vld [vmem:[%s17275_s7 + $0x10] sm:$0xff] }
 0x81c   :  { %10243 = vmatpush.bf16.msrb.mxu2 %v13296_v60  ;;  %10329 = vmatpush.bf16.msra.mxu3 %v13304_v29  ;;  %v10090_v56 = vpack.c.bf16 %v10089_v28, %v10089_v28  ;;  %v10176_v52 = vpack.c.bf16 %v10175_v62, %v10175_v62  ;;  %v10262_v17 = vpack.c.bf16 %v10261_v61, %v10261_v61 }
 0x81d   :  { %v10347_v19 = vsel %vm9057_vm1, %v10342_v5, %v10345_v1  ;;  %v10511_v1 = vlaneseq  ;;  %v13328_v5 = vld [vmem:[%s17276_s8] ss:$0 sm:$0xff]  ;;  %s13373_s8 = smov [#allocation6]  }
 0x81e   :  { %v10348_v57 = vpack.c.bf16 %v10347_v19, %v10347_v19  ;;  %s10535_s1 = sshll.u32 %s13373_s8, 4  ;;  %s10536_s1 = int_to_ptr.vmem [resolvable:$true] %s10535_s1 }
 0x81f   :  { %10158 = vmatpush.bf16.msrb.mxu1 %v13287_v2 }
 0x820   :  { %10244 = vmatpush.bf16.msrb.mxu2 %v13295_v11  ;;  %10330 = vmatpush.bf16.msra.mxu3 %v13303_v13 }
 0x823   :  { %10159 = vmatpush.bf16.msrb.mxu1 %v13286_v21 }
 0x824   :  { %10245 = vmatpush.bf16.msrb.mxu2 %v13294_v39  ;;  %10331 = vmatpush.bf16.msra.mxu3 %v13302_v59 }
 0x827   :  { %10160 = vmatpush.bf16.msrb.mxu1 %v13285_v0 }
 0x828   :  { %10246 = vmatpush.bf16.msrb.mxu2 %v13293_v53  ;;  %10332 = vmatpush.bf16.msra.mxu3 %v13301_v42  ;;  %v13321_v53 = vld [vmem:[%s17275_s7 + $0x38] sm:$0xff] }
 0x82b   :  { %10161 = vmatpush.bf16.msrb.mxu1 %v13284_v36 }
 0x82c   :  { %10247 = vmatpush.bf16.msrb.mxu2 %v13292_v51  ;;  %10333 = vmatpush.bf16.msra.mxu3 %v13300_v40  ;;  %v13320_v40 = vld [vmem:[%s17275_s7 + $0x30] sm:$0xff] }
 0x82f   :  { %10162 = vmatpush.bf16.msrb.mxu1 %v13283_v24  ;;  %v13319_v24 = vld [vmem:[%s17275_s7 + $0x28] sm:$0xff] }
 0x830   :  { %10248 = vmatpush.bf16.msrb.mxu2 %v13291_v34  ;;  %10334 = vmatpush.bf16.msra.mxu3 %v13299_v32  ;;  %v13317_v32 = vld [vmem:[%s17275_s7 + $0x18] sm:$0xff] }
 0x833   :  { %10163 = vmatpush.bf16.msrb.mxu1 %v13282_v25  ;;  %v13315_v25 = vld [vmem:[%s17275_s7 + $0x8] sm:$0xff] }
 0x834   :  { %10249 = vmatpush.bf16.msrb.mxu2 %v13290_v38  ;;  %10335 = vmatpush.bf16.msra.mxu3 %v13298_v15  ;;  %v13314_v38 = vld [vmem:[%s17275_s7] sm:$0xff] }
 0x836   :  { %10164 = vmatmul.bf16.vlgmr.msrb.gmra.mxu1 %v10090_v56 }
 0x837   :  { %10414 = vmatpush.bf16.msra.mxu1 %v13313_v30  ;;  %10250 = vmatmul.bf16.vlgmr.msrb.gmra.mxu2 %v10176_v52 }
 0x838   :  { %10336 = vmatmul.bf16.vlgmr.msra.gmra.mxu3 %v10262_v17  ;;  %10498 = vmatpush.bf16.msra.mxu2 %v13321_v53 }
 0x83b   :  { %10415 = vmatpush.bf16.msra.mxu1 %v13312_v26 }
 0x83c   :  { %10499 = vmatpush.bf16.msra.mxu2 %v13320_v40 }
 0x83f   :  { %10416 = vmatpush.bf16.msra.mxu1 %v13311_v44 }
 0x840   :  { %10500 = vmatpush.bf16.msra.mxu2 %v13319_v24 }
 0x843   :  { %10417 = vmatpush.bf16.msra.mxu1 %v13310_v46 }
 0x844   :  { %10501 = vmatpush.bf16.msra.mxu2 %v13318_v10 }
 0x847   :  { %10418 = vmatpush.bf16.msra.mxu1 %v13309_v63 }
 0x848   :  { %10502 = vmatpush.bf16.msra.mxu2 %v13317_v32 }
 0x84b   :  { %10419 = vmatpush.bf16.msra.mxu1 %v13308_v12 }
 0x84c   :  { %10503 = vmatpush.bf16.msra.mxu2 %v13316_v49 }
 0x84f   :  { %10420 = vmatpush.bf16.msra.mxu1 %v13307_v6 }
 0x850   :  { %10504 = vmatpush.bf16.msra.mxu2 %v13315_v25 }
 0x853   :  { %10421 = vmatpush.bf16.msra.mxu1 %v13306_v27  ;;  %v9133_v18 = vpop.f32.mrf.mxu1  ;;  %v10512_v27 = vand.u32 127, %v10511_v1 }
 0x854   :  { %v9137_v20 = vadd.f32 %v13327_v33, %v9133_v18  ;;  %10505 = vmatpush.bf16.msra.mxu2 %v13314_v38 }
 0x855   :  { %vm10513_vm2 = vcmp.lt.s32.totalorder %v10512_v27, 10 }
 0x856   :  { %10422 = vmatmul.bf16.vlgmr.msra.gmra.mxu1 %v10348_v57 }
 0x859   :  { %v9219_v9 = vpop.f32.mrf.mxu2 }
 0x85a   :  { %v9223_v45 = vadd.f32 %v9219_v9, %v9137_v20  ;;  %v9305_v58 = vpop.f32.mrf.mxu3 }
 0x85b   :  { %v9135_v3 = vpop.f32.mrf.mxu1 }
 0x85c   :  { %v9309_v43 = vadd.f32 %v9305_v58, %v9223_v45 }
 0x861   :  { %v9221_v48 = vpop.f32.mrf.mxu2 }
 0x862   :  { %v9307_v47 = vpop.f32.mrf.mxu3 }
 0x863   :  { %v9391_v23 = vpop.f32.mrf.mxu1 }
 0x864   :  { %v9395_v54 = vadd.f32 %v9391_v23, %v9309_v43 }
 0x86b   :  { %v9393_v41 = vpop.f32.mrf.mxu1 }
 0x871   :  { %v9477_v4 = vpop.f32.mrf.mxu2  ;;  %v9563_v29 = vpop.f32.mrf.mxu3 }
 0x872   :  { %v9481_v60 = vadd.f32 %v9477_v4, %v9395_v54 }
 0x873   :  { %v9649_v31 = vpop.f32.mrf.mxu1 }
 0x874   :  { %v9567_v55 = vadd.f32 %v9563_v29, %v9481_v60 }
 0x876   :  { %v9653_v2 = vadd.f32 %v9649_v31, %v9567_v55 }
 0x879   :  { %v9479_v11 = vpop.f32.mrf.mxu2  ;;  %v9565_v13 = vpop.f32.mrf.mxu3 }
 0x87b   :  { %v9651_v21 = vpop.f32.mrf.mxu1 }
 0x881   :  { %v9735_v39 = vpop.f32.mrf.mxu2 }
 0x882   :  { %v9739_v28 = vadd.f32 %v9735_v39, %v9653_v2 }
 0x889   :  { %v9737_v59 = vpop.f32.mrf.mxu2  ;;  %v9821_v0 = vpop.f32.mrf.mxu3 }
 0x88a   :  { %v9825_v7 = vadd.f32 %v9821_v0, %v9739_v28 }
 0x891   :  { %v9823_v36 = vpop.f32.mrf.mxu3 }
 0x893   :  { %v9907_v42 = vpop.f32.mrf.mxu1 }
 0x894   :  { %v9911_v61 = vadd.f32 %v9907_v42, %v9825_v7 }
 0x89a   :  { %v9993_v51 = vpop.f32.mrf.mxu2 }
 0x89b   :  { %v9909_v50 = vpop.f32.mrf.mxu1  ;;  %v9997_v56 = vadd.f32 %v9993_v51, %v9911_v61 }
 0x89c   :  { %v10079_v16 = vpop.f32.mrf.mxu3 }
 0x89d   :  { %v10083_v52 = vadd.f32 %v10079_v16, %v9997_v56 }
 0x8a2   :  { %v9995_v34 = vpop.f32.mrf.mxu2 }
 0x8a4   :  { %v10081_v8 = vpop.f32.mrf.mxu3 }
 0x8b3   :  { %v10165_v22 = vpop.f32.mrf.mxu1 }
 0x8b4   :  { %v10169_v17 = vadd.f32 %v10165_v22, %v10083_v52 }
 0x8ba   :  { %v10251_v15 = vpop.f32.mrf.mxu2 }
 0x8bb   :  { %v10337_v37 = vpop.f32.mrf.mxu3  ;;  %v10167_v30 = vpop.f32.mrf.mxu1  ;;  %v10255_v26 = vadd.f32 %v10251_v15, %v10169_v17 }
 0x8bd   :  { %v10341_v44 = vadd.f32 %v10337_v37, %v10255_v26 }
 0x8c2   :  { %v10253_v35 = vpop.f32.mrf.mxu2 }
 0x8c3   :  { %v10339_v62 = vpop.f32.mrf.mxu3 }
 0x8d3   :  { %v10423_v46 = vpop.f32.mrf.mxu1 }
 0x8d4   :  { %v10427_v63 = vadd.f32 %v10423_v46, %v10341_v44 }
 0x8d6   :  { %v10428_v12 = vmax.f32 %v10427_v63, 0.0 }
 0x8d8   :  { %v10429_v14 = vpack.c.bf16 %v10428_v12, %v10428_v12 }
 0x8da   :  { %10506 = vmatmul.bf16.vlgmr.msra.gmra.mxu2 %v10429_v14 }
 0x8db   :  { %v10425_v6 = vpop.f32.mrf.mxu1 }
 0x95d   :  { %v10507_v19 = vpop.f32.mrf.mxu2 }
 0x95e   :  { %v10508_v57 = vadd.f32 %v13328_v5, %v10507_v19 }
 0x960   :  { %v10514_v18 = vsel %vm10513_vm2, %v10508_v57, -1e+30 }
 0x961   :  { %v10516_v33 = vsel %vm10515_vm3, %v10514_v18, -inf }
 0x962   :  { %10517 = vmax.xlane.f32.xlu0 %v10516_v33 }
 0x965   :  { %v10509_v20 = vpop.f32.mrf.mxu2 }
 0x9d5   :  { %v10518_v9 = vpop.xlane.xlu0 %10517 }
 0x9d6   :  { %v10519_v45 = vsub.f32 %v10514_v18, %v10518_v9 }
 0x9d8   :  { %v10520_v58 = vmul.f32 1.442695, %v10519_v45 }
 0x9da   :  { %13329 = vpow2.f32 %v10520_v58 }
 0x9e0   :  { %v13330_v3 = vpop.eup %13329 }
 0x9e1   :  { %v10522_v43 = vsel %vm10515_vm3, %v13330_v3, 0.0 }
 0x9e2   :  { %10523 = vadd.xlane.f32.xlu0 %v10522_v43 }
 0xa55   :  { %v10524_v48 = vpop.xlane.xlu0 %10523 }
 0xa56   :  { %13331 = vlog2.f32 %v10524_v48 }
 0xa5c   :  { %v13332_v47 = vpop.eup %13331 }
 0xa5d   :  { %v10526_v23 = vmul.f32 0.6931472, %v13332_v47 }
 0xa5f   :  { %v10527_v54 = vadd.f32 %v10526_v23, %v10518_v9 }
 0xa61   :  { %v10528_v41 = vsub.f32 %v10508_v57, %v10527_v54 }
 0xa63   :  { %10529 = vst [vmem:[#allocation6] sm:$0x3] %v10528_v41 }
 0xa64   :  { %10540 = dma.vmem_to_hbm [thread:$0]  %s10536_s1, 32, %s10538_s24, [#allocation7]  }
 0xa65   :  { %13371 = dma.done.wait [#allocation7], 32  }
 0xa66   :  { %13372 = vsyncadd [#allocation7], 4294967264 }
 0xa67   :  { %10545 = vsyncpa [#allocation7], 1 }

</bundles_post_ra>
